<compile_context>
chip_gen: v6e
topology: v6e:2x2x1
jax: 0.10.0
libtpu: 0.0.40
codegen_flags: <defaults>
</compile_context>

<pallas_src>
import functools

import jax
import jax.numpy as jnp
from jax import lax
from jax.experimental import pallas as pl
from jax.experimental.pallas import tpu as pltpu


# ----------------------------------------------------------------------------
# Fused conv (+BN+ReLU) kernel: grid = (output_row, tap_row)
# ----------------------------------------------------------------------------
def _conv_row_kernel(x_ref, w_ref, s_ref, b_ref, o_ref, acc_ref,
                     *, kw, relu, row_stride, row_phase):
    i = pl.program_id(1)                      # tap row index (reduction axis)

    @pl.when(i == 0)
    def _init():
        acc_ref[...] = jnp.zeros_like(acc_ref)

    B = x_ref.shape[0]
    Wo = o_ref.shape[2]
    Cout = o_ref.shape[3]

    def _accumulate():
        for b in range(B):
            partial = jnp.zeros((Wo, Cout), jnp.float32)
            for j in range(kw):               # kw taps unrolled
                xs = x_ref[b, 0, j:j + Wo, :]             # (Wo, Cin) bf16
                wij = w_ref[i, j]                          # (Cin, Cout) bf16
                partial = partial + jnp.dot(
                    xs, wij, preferred_element_type=jnp.float32)
            acc_ref[b, :, :] = acc_ref[b, :, :] + partial

    if row_stride == 1:
        _accumulate()
    else:
        # ConvTranspose path: skip tap rows that hit all-zero dilated rows.
        @pl.when(((pl.program_id(0) + i) % row_stride) == row_phase)
        def _():
            _accumulate()

    @pl.when(i == pl.num_programs(1) - 1)
    def _finalize():
        y = acc_ref[...] * s_ref[...] + b_ref[...]         # (B, Wo, Cout) f32
        if relu:
            y = jnp.maximum(y, 0.0)
        o_ref[:, 0, :, :] = y.astype(o_ref.dtype)


def _conv_core(xpad, w_k, scale, bias, *, relu, out_dtype,
               row_stride=1, row_phase=0):
    """xpad: (B, Hp, Wp, Cin) pre-padded NHWC; w_k: (kh, kw, Cin, Cout)."""
    B, Hp, Wp, Cin = xpad.shape
    kh, kw, Cin2, Cout = w_k.shape
    assert Cin == Cin2
    Ho = Hp - kh + 1
    Wo = Wp - kw + 1
    kernel = functools.partial(_conv_row_kernel, kw=kw, relu=relu,
                               row_stride=row_stride, row_phase=row_phase)
    return pl.pallas_call(
        kernel,
        out_shape=jax.ShapeDtypeStruct((B, Ho, Wo, Cout), out_dtype),
        grid=(Ho, kh),
        in_specs=[
            # shifted single-row window of the padded input (no im2col)
            pl.BlockSpec((B, 1, Wp, Cin), lambda h, i: (0, h + i, 0, 0)),
            # full weight stays VMEM-resident (constant index_map)
            pl.BlockSpec((kh, kw, Cin, Cout), lambda h, i: (0, 0, 0, 0)),
            pl.BlockSpec((1, Cout), lambda h, i: (0, 0)),
            pl.BlockSpec((1, Cout), lambda h, i: (0, 0)),
        ],
        out_specs=pl.BlockSpec((B, 1, Wo, Cout), lambda h, i: (0, h, 0, 0)),
        scratch_shapes=[pltpu.VMEM((B, Wo, Cout), jnp.float32)],
        compiler_params=pltpu.CompilerParams(
            dimension_semantics=("parallel", "arbitrary")),
    )(xpad.astype(jnp.bfloat16), w_k.astype(jnp.bfloat16),
      scale.reshape(1, Cout).astype(jnp.float32),
      bias.reshape(1, Cout).astype(jnp.float32))


def conv2d(x, w, scale, bias, *, relu, padding, out_dtype=jnp.bfloat16):
    """x: (B,H,W,Cin) NHWC; w: PyTorch Conv2d weight (Cout, Cin, kh, kw)."""
    xpad = jnp.pad(x, ((0, 0), (padding, padding), (padding, padding), (0, 0)))
    w_k = jnp.transpose(w, (2, 3, 1, 0))                  # (kh, kw, Cin, Cout)
    return _conv_core(xpad, w_k, scale, bias, relu=relu, out_dtype=out_dtype)


def conv_transpose2d(x, wt, scale, bias, *, relu, stride, padding,
                     output_padding, out_dtype=jnp.bfloat16):
    """x: (B,H,W,Cin); wt: PyTorch ConvTranspose2d weight (Cin, Cout, kh, kw)."""
    Cin, Cout, kh, kw = wt.shape
    pt = kh - 1 - padding
    pb = kh - 1 - padding + output_padding
    pw0 = kw - 1 - padding
    pw1 = kw - 1 - padding + output_padding
    # zero-insertion (interior dilation) + edge padding in one lax.pad
    xd = lax.pad(x, jnp.array(0, x.dtype),
                 ((0, 0, 0), (pt, pb, stride - 1),
                  (pw0, pw1, stride - 1), (0, 0, 0)))
    # equivalent direct conv weight: flip spatially, swap in/out channel axes
    w_k = jnp.transpose(jnp.flip(wt, axis=(2, 3)), (2, 3, 0, 1))
    return _conv_core(xd, w_k, scale, bias, relu=relu, out_dtype=out_dtype,
                      row_stride=stride, row_phase=pt % stride)


# ----------------------------------------------------------------------------
# MaxPool2d(2) — tiled, no strided-slice HBM materialization
# ----------------------------------------------------------------------------
def _maxpool_kernel(x_ref, o_ref):
    C = o_ref.shape[-1]
    r = jnp.maximum(x_ref[:, 0, :, :], x_ref[:, 1, :, :])   # (B, W/2, 2C)
    o_ref[:, 0, :, :] = jnp.maximum(r[:, :, :C], r[:, :, C:])


def maxpool2x2(x):
    B, H, W, C = x.shape
    Hh, Wh = H // 2, W // 2
    xr = x.reshape(B, H, Wh, 2 * C)     # free reshape: W pairs move into lanes
    return pl.pallas_call(
        _maxpool_kernel,
        out_shape=jax.ShapeDtypeStruct((B, Hh, Wh, C), x.dtype),
        grid=(Hh,),
        in_specs=[pl.BlockSpec((B, 2, Wh, 2 * C), lambda hp: (0, hp, 0, 0))],
        out_specs=pl.BlockSpec((B, 1, Wh, C), lambda hp: (0, hp, 0, 0)),
        compiler_params=pltpu.CompilerParams(dimension_semantics=("parallel",)),
    )(xr)


# ----------------------------------------------------------------------------
# Input BatchNorm (folded affine) — row-tiled, also casts f32 -> bf16
# ----------------------------------------------------------------------------
def _affine_kernel(x_ref, s_ref, b_ref, o_ref):
    o_ref[...] = (x_ref[...] * s_ref[...] + b_ref[...]).astype(o_ref.dtype)


def _pick_row_tile(m, cap=1024):
    t = cap
    while t >= 8:
        if m % t == 0:
            return t
        t //= 2
    return m


def channel_affine(x, scale, bias, out_dtype=jnp.bfloat16):
    B, H, W, C = x.shape
    M = B * H * W
    TM = _pick_row_tile(M)
    out = pl.pallas_call(
        _affine_kernel,
        out_shape=jax.ShapeDtypeStruct((M, C), out_dtype),
        grid=(M // TM,),
        in_specs=[pl.BlockSpec((TM, C), lambda i: (i, 0)),
                  pl.BlockSpec((1, C), lambda i: (0, 0)),
                  pl.BlockSpec((1, C), lambda i: (0, 0))],
        out_specs=pl.BlockSpec((TM, C), lambda i: (i, 0)),
        compiler_params=pltpu.CompilerParams(dimension_semantics=("parallel",)),
    )(x.reshape(M, C).astype(jnp.float32),
      scale.reshape(1, C).astype(jnp.float32),
      bias.reshape(1, C).astype(jnp.float32))
    return out.reshape(B, H, W, C)


# ----------------------------------------------------------------------------
# Parameters (deterministic, synthetic) and forward pass
# ----------------------------------------------------------------------------
_BN_EPS = 1e-5


def _bn_fold(gamma, beta):
    # Inference-mode BN with running_mean=0, running_var=1.
    scale = gamma / jnp.sqrt(1.0 + _BN_EPS)
    return scale, beta


def init_params(key, in_channels):
    ks = jax.random.split(key, 20)
    n = lambda k, s, sc=0.05: sc * jax.random.normal(k, s, jnp.float32)
    g = lambda k, c: jax.random.uniform(k, (c,), jnp.float32, 0.8, 1.2)
    return {
        "bn_in_g": g(ks[0], in_channels), "bn_in_b": n(ks[1], (in_channels,)),
        "w_cp1": n(ks[2], (32, in_channels, 9, 9)),
        "bn1_g": g(ks[3], 32), "bn1_b": n(ks[3], (32,)),
        "w_cp2": n(ks[4], (64, 32, 7, 7)),
        "bn2_g": g(ks[5], 64), "bn2_b": n(ks[5], (64,)),
        "w_c1": n(ks[6], (32, 64, 9, 9)),
        "bnc1_g": g(ks[7], 32), "bnc1_b": n(ks[7], (32,)),
        "w_c2": n(ks[8], (32, 32, 7, 7)),
        "bnc2_g": g(ks[9], 32), "bnc2_b": n(ks[9], (32,)),
        "w_d1": n(ks[10], (32, 16, 9, 9)),            # ConvTranspose (Cin,Cout,kh,kw)
        "bnd1_g": g(ks[11], 16), "bnd1_b": n(ks[11], (16,)),
        "w_c3": n(ks[12], (16, 48, 5, 5)),
        "bnc3_g": g(ks[13], 16), "bnc3_b": n(ks[13], (16,)),
        "w_d2": n(ks[14], (16, 4, 5, 5)),             # ConvTranspose (Cin,Cout,kh,kw)
        "bnd2_g": g(ks[15], 4), "bnd2_b": n(ks[15], (4,)),
        "w_c4": n(ks[16], (1, 4, 3, 3)),
        "b_c4": n(ks[17], (1,)),
    }


def routenet_fcn_forward(x_nchw, p):
    """Mirrors RouteNetFCN.forward.  Input NCHW, output (B, H, W) f32."""
    x = jnp.transpose(x_nchw, (0, 2, 3, 1)).astype(jnp.float32)   # -> NHWC

    # layer_input_bn (also casts to bf16)
    x = channel_affine(x, *_bn_fold(p["bn_in_g"], p["bn_in_b"]))

    # layer_cp1: conv9 -> BN -> ReLU -> maxpool2
    out = conv2d(x, p["w_cp1"], *_bn_fold(p["bn1_g"], p["bn1_b"]),
                 relu=True, padding=4)
    save = maxpool2x2(out)                                        # (B, H/2, W/2, 32)

    # layer_cp2: conv7 -> BN -> ReLU -> maxpool2
    out = conv2d(save, p["w_cp2"], *_bn_fold(p["bn2_g"], p["bn2_b"]),
                 relu=True, padding=3)
    out = maxpool2x2(out)                                         # (B, H/4, W/4, 64)

    # layer_c1, layer_c2
    out = conv2d(out, p["w_c1"], *_bn_fold(p["bnc1_g"], p["bnc1_b"]),
                 relu=True, padding=4)
    out = conv2d(out, p["w_c2"], *_bn_fold(p["bnc2_g"], p["bnc2_b"]),
                 relu=True, padding=3)

    # layer_d1: ConvTranspose2d(32->16, k=9, s=2, p=4, op=1) -> BN -> ReLU
    out = conv_transpose2d(out, p["w_d1"], *_bn_fold(p["bnd1_g"], p["bnd1_b"]),
                           relu=True, stride=2, padding=4, output_padding=1)

    # cat([out, save], dim=channel)  -> 16 + 32 = 48 channels
    out = jnp.concatenate([out, save], axis=-1)

    # layer_c3
    out = conv2d(out, p["w_c3"], *_bn_fold(p["bnc3_g"], p["bnc3_b"]),
                 relu=True, padding=2)

    # layer_d2: ConvTranspose2d(16->4, k=5, s=2, p=2, op=1) -> BN -> ReLU
    out = conv_transpose2d(out, p["w_d2"], *_bn_fold(p["bnd2_g"], p["bnd2_b"]),
                           relu=True, stride=2, padding=2, output_padding=1)

    # layer_c4: Conv2d(4->1, k=3, p=1) with bias, no BN / ReLU, f32 output
    out = conv2d(out, p["w_c4"], jnp.ones((1,), jnp.float32), p["b_c4"],
                 relu=False, padding=1, out_dtype=jnp.float32)    # (B, H, W, 1)

    return out[..., 0]                                            # squeeze channel


if __name__ == "__main__":
    key = jax.random.PRNGKey(0)
    k_x, k_p = jax.random.split(key)

    B, C_IN, H, W = 2, 4, 16, 16
    x = jax.random.normal(k_x, (B, C_IN, H, W), jnp.float32)      # NCHW input
    params = init_params(k_p, C_IN)

    fwd = jax.jit(routenet_fcn_forward)
    y = fwd(x, params)
    jax.block_until_ready(y)

    assert y.shape == (B, H, W), y.shape
    assert jnp.all(jnp.isfinite(y))
    print("KERNEL_OK")
</pallas_src>

<mosaic_0001>
module attributes {stable_mosaic.version = 11 : i64} {
  func.func @_affine_kernel(%arg0: i32, %arg1: memref<512x4xf32, #tpu.memory_space<vmem>>, %arg2: memref<1x4xf32, #tpu.memory_space<vmem>>, %arg3: memref<1x4xf32, #tpu.memory_space<vmem>>, %arg4: memref<512x4xbf16, #tpu.memory_space<vmem>>) attributes {dimension_semantics = [#tpu.dimension_semantics<parallel>], iteration_bounds = array<i64: 1>, scalar_prefetch = 0 : i64, scratch_operands = 0 : i64, tpu.core_type = #tpu.core_type<tc>, window_params = [{transform_indices = @transform_0, window_bounds = array<i64: 512, 4>}, {pipeline_mode = #tpu.pipeline_mode<synchronous>, transform_indices = @transform_1, window_bounds = array<i64: 1, 4>}, {pipeline_mode = #tpu.pipeline_mode<synchronous>, transform_indices = @transform_2, window_bounds = array<i64: 1, 4>}, {transform_indices = @transform_3, window_bounds = array<i64: 512, 4>}]} {
    %c0 = arith.constant 0 : index
    %c0_0 = arith.constant 0 : index
    %0 = vector.load %arg1[%c0, %c0_0] : memref<512x4xf32, #tpu.memory_space<vmem>>, vector<512x4xf32>
    %c0_1 = arith.constant 0 : index
    %c0_2 = arith.constant 0 : index
    %1 = vector.load %arg2[%c0_1, %c0_2] : memref<1x4xf32, #tpu.memory_space<vmem>>, vector<1x4xf32>
    %2 = vector.broadcast %1 : vector<1x4xf32> to vector<512x4xf32>
    %3 = arith.mulf %0, %2 : vector<512x4xf32>
    %c0_3 = arith.constant 0 : index
    %c0_4 = arith.constant 0 : index
    %4 = vector.load %arg3[%c0_3, %c0_4] : memref<1x4xf32, #tpu.memory_space<vmem>>, vector<1x4xf32>
    %5 = vector.broadcast %4 : vector<1x4xf32> to vector<512x4xf32>
    %6 = arith.addf %3, %5 : vector<512x4xf32>
    %7 = arith.truncf %6 : vector<512x4xf32> to vector<512x4xbf16>
    %c0_5 = arith.constant 0 : index
    %c0_6 = arith.constant 0 : index
    %8 = vector.load %arg4[%c0_5, %c0_6] : memref<512x4xbf16, #tpu.memory_space<vmem>>, vector<512x4xbf16>
    tpu.vector_store %arg4[%c0_5, %c0_6], %7 {strides = array<i32>} : memref<512x4xbf16, #tpu.memory_space<vmem>>, vector<512x4xbf16>,
    return
  }
  func.func @transform_0(%arg0: i32) -> (i32, i32) {
    %c0_i32 = arith.constant 0 : i32
    %c0_i32_0 = arith.constant 0 : i32
    return %arg0, %c0_i32 : i32, i32
  }
  func.func @transform_1(%arg0: i32) -> (i32, i32) {
    %c0_i32 = arith.constant 0 : i32
    %c0_i32_0 = arith.constant 0 : i32
    %c0_i32_1 = arith.constant 0 : i32
    return %c0_i32, %c0_i32_0 : i32, i32
  }
  func.func @transform_2(%arg0: i32) -> (i32, i32) {
    %c0_i32 = arith.constant 0 : i32
    %c0_i32_0 = arith.constant 0 : i32
    %c0_i32_1 = arith.constant 0 : i32
    return %c0_i32, %c0_i32_0 : i32, i32
  }
  func.func @transform_3(%arg0: i32) -> (i32, i32) {
    %c0_i32 = arith.constant 0 : i32
    %c0_i32_0 = arith.constant 0 : i32
    return %arg0, %c0_i32 : i32, i32
  }
}

module attributes {stable_mosaic.version = 11 : i64} {
  func.func @_conv_row_kernel(%arg0: i32, %arg1: i32, %arg2: memref<2x1x24x4xbf16, #tpu.memory_space<vmem>>, %arg3: memref<9x9x4x32xbf16, #tpu.memory_space<vmem>>, %arg4: memref<1x32xf32, #tpu.memory_space<vmem>>, %arg5: memref<1x32xf32, #tpu.memory_space<vmem>>, %arg6: memref<2x1x16x32xbf16, #tpu.memory_space<vmem>>, %arg7: memref<2x16x32xf32, #tpu.memory_space<vmem>>) attributes {dimension_semantics = [#tpu.dimension_semantics<parallel>, #tpu.dimension_semantics<arbitrary>], iteration_bounds = array<i64: 16, 9>, scalar_prefetch = 0 : i64, scratch_operands = 1 : i64, tpu.core_type = #tpu.core_type<tc>, window_params = [{transform_indices = @transform_0, window_bounds = array<i64: 2, 1, 24, 4>}, {pipeline_mode = #tpu.pipeline_mode<synchronous>, transform_indices = @transform_1, window_bounds = array<i64: 9, 9, 4, 32>}, {pipeline_mode = #tpu.pipeline_mode<synchronous>, transform_indices = @transform_2, window_bounds = array<i64: 1, 32>}, {pipeline_mode = #tpu.pipeline_mode<synchronous>, transform_indices = @transform_3, window_bounds = array<i64: 1, 32>}, {transform_indices = @transform_4, window_bounds = array<i64: 2, 1, 16, 32>}]} {
    %c0_i32 = arith.constant 0 : i32
    %0 = arith.cmpi eq, %arg1, %c0_i32 : i32
    %1 = arith.extui %0 : i1 to i32
    %c0_i32_0 = arith.constant 0 : i32
    %2 = arith.cmpi ne, %1, %c0_i32_0 : i32
    scf.if %2 {
      %cst_150 = arith.constant 0.000000e+00 : f32
      %146 = vector.broadcast %cst_150 : f32 to vector<2x16x32xf32>
      %c0_151 = arith.constant 0 : index
      %c0_152 = arith.constant 0 : index
      %c0_153 = arith.constant 0 : index
      %147 = vector.load %arg7[%c0_151, %c0_152, %c0_153] : memref<2x16x32xf32, #tpu.memory_space<vmem>>, vector<2x16x32xf32>
      tpu.vector_store %arg7[%c0_151, %c0_152, %c0_153], %146 {strides = array<i32>} : memref<2x16x32xf32, #tpu.memory_space<vmem>>, vector<2x16x32xf32>,
    } else {
    }
    %cst = arith.constant 0.000000e+00 : f32
    %3 = vector.broadcast %cst : f32 to vector<16x32xf32>
    %c0 = arith.constant 0 : index
    %c0_1 = arith.constant 0 : index
    %c0_2 = arith.constant 0 : index
    %c0_3 = arith.constant 0 : index
    %4 = vector.load %arg2[%c0, %c0_1, %c0_2, %c0_3] : memref<2x1x24x4xbf16, #tpu.memory_space<vmem>>, vector<1x1x16x4xbf16>
    %5 = vector.shape_cast %4 : vector<1x1x16x4xbf16> to vector<16x4xbf16>
    %6 = arith.index_cast %arg1 : i32 to index
    %c0_4 = arith.constant 0 : index
    %c0_5 = arith.constant 0 : index
    %c0_6 = arith.constant 0 : index
    %7 = vector.load %arg3[%6, %c0_4, %c0_5, %c0_6] : memref<9x9x4x32xbf16, #tpu.memory_space<vmem>>, vector<1x1x4x32xbf16>
    %8 = vector.shape_cast %7 : vector<1x1x4x32xbf16> to vector<4x32xbf16>
    %cst_7 = arith.constant dense<0.000000e+00> : vector<16x32xf32>
    %9 = tpu.matmul %5, %8, %cst_7 {dimension_numbers = #tpu.dot_dimension_numbers<[1], [0], [0], [1], [0, 0, 1, 1], [], []>} : vector<16x4xbf16>, vector<4x32xbf16>, vector<16x32xf32> -> vector<16x32xf32>
    %10 = arith.addf %3, %9 : vector<16x32xf32>
    %c0_8 = arith.constant 0 : index
    %c0_9 = arith.constant 0 : index
    %c1 = arith.constant 1 : index
    %c0_10 = arith.constant 0 : index
    %11 = vector.load %arg2[%c0_8, %c0_9, %c1, %c0_10] : memref<2x1x24x4xbf16, #tpu.memory_space<vmem>>, vector<1x1x16x4xbf16>
    %12 = vector.shape_cast %11 : vector<1x1x16x4xbf16> to vector<16x4xbf16>
    %13 = arith.index_cast %arg1 : i32 to index
    %c1_11 = arith.constant 1 : index
    %c0_12 = arith.constant 0 : index
    %c0_13 = arith.constant 0 : index
    %14 = vector.load %arg3[%13, %c1_11, %c0_12, %c0_13] : memref<9x9x4x32xbf16, #tpu.memory_space<vmem>>, vector<1x1x4x32xbf16>
    %15 = vector.shape_cast %14 : vector<1x1x4x32xbf16> to vector<4x32xbf16>
    %cst_14 = arith.constant dense<0.000000e+00> : vector<16x32xf32>
    %16 = tpu.matmul %12, %15, %cst_14 {dimension_numbers = #tpu.dot_dimension_numbers<[1], [0], [0], [1], [0, 0, 1, 1], [], []>} : vector<16x4xbf16>, vector<4x32xbf16>, vector<16x32xf32> -> vector<16x32xf32>
    %17 = arith.addf %10, %16 : vector<16x32xf32>
    %c0_15 = arith.constant 0 : index
    %c0_16 = arith.constant 0 : index
    %c2 = arith.constant 2 : index
    %c0_17 = arith.constant 0 : index
    %18 = vector.load %arg2[%c0_15, %c0_16, %c2, %c0_17] : memref<2x1x24x4xbf16, #tpu.memory_space<vmem>>, vector<1x1x16x4xbf16>
    %19 = vector.shape_cast %18 : vector<1x1x16x4xbf16> to vector<16x4xbf16>
    %20 = arith.index_cast %arg1 : i32 to index
    %c2_18 = arith.constant 2 : index
    %c0_19 = arith.constant 0 : index
    %c0_20 = arith.constant 0 : index
    %21 = vector.load %arg3[%20, %c2_18, %c0_19, %c0_20] : memref<9x9x4x32xbf16, #tpu.memory_space<vmem>>, vector<1x1x4x32xbf16>
    %22 = vector.shape_cast %21 : vector<1x1x4x32xbf16> to vector<4x32xbf16>
    %cst_21 = arith.constant dense<0.000000e+00> : vector<16x32xf32>
    %23 = tpu.matmul %19, %22, %cst_21 {dimension_numbers = #tpu.dot_dimension_numbers<[1], [0], [0], [1], [0, 0, 1, 1], [], []>} : vector<16x4xbf16>, vector<4x32xbf16>, vector<16x32xf32> -> vector<16x32xf32>
    %24 = arith.addf %17, %23 : vector<16x32xf32>
    %c0_22 = arith.constant 0 : index
    %c0_23 = arith.constant 0 : index
    %c3 = arith.constant 3 : index
    %c0_24 = arith.constant 0 : index
    %25 = vector.load %arg2[%c0_22, %c0_23, %c3, %c0_24] : memref<2x1x24x4xbf16, #tpu.memory_space<vmem>>, vector<1x1x16x4xbf16>
    %26 = vector.shape_cast %25 : vector<1x1x16x4xbf16> to vector<16x4xbf16>
    %27 = arith.index_cast %arg1 : i32 to index
    %c3_25 = arith.constant 3 : index
    %c0_26 = arith.constant 0 : index
    %c0_27 = arith.constant 0 : index
    %28 = vector.load %arg3[%27, %c3_25, %c0_26, %c0_27] : memref<9x9x4x32xbf16, #tpu.memory_space<vmem>>, vector<1x1x4x32xbf16>
    %29 = vector.shape_cast %28 : vector<1x1x4x32xbf16> to vector<4x32xbf16>
    %cst_28 = arith.constant dense<0.000000e+00> : vector<16x32xf32>
    %30 = tpu.matmul %26, %29, %cst_28 {dimension_numbers = #tpu.dot_dimension_numbers<[1], [0], [0], [1], [0, 0, 1, 1], [], []>} : vector<16x4xbf16>, vector<4x32xbf16>, vector<16x32xf32> -> vector<16x32xf32>
    %31 = arith.addf %24, %30 : vector<16x32xf32>
    %c0_29 = arith.constant 0 : index
    %c0_30 = arith.constant 0 : index
    %c4 = arith.constant 4 : index
    %c0_31 = arith.constant 0 : index
    %32 = vector.load %arg2[%c0_29, %c0_30, %c4, %c0_31] : memref<2x1x24x4xbf16, #tpu.memory_space<vmem>>, vector<1x1x16x4xbf16>
    %33 = vector.shape_cast %32 : vector<1x1x16x4xbf16> to vector<16x4xbf16>
    %34 = arith.index_cast %arg1 : i32 to index
    %c4_32 = arith.constant 4 : index
    %c0_33 = arith.constant 0 : index
    %c0_34 = arith.constant 0 : index
    %35 = vector.load %arg3[%34, %c4_32, %c0_33, %c0_34] : memref<9x9x4x32xbf16, #tpu.memory_space<vmem>>, vector<1x1x4x32xbf16>
    %36 = vector.shape_cast %35 : vector<1x1x4x32xbf16> to vector<4x32xbf16>
    %cst_35 = arith.constant dense<0.000000e+00> : vector<16x32xf32>
    %37 = tpu.matmul %33, %36, %cst_35 {dimension_numbers = #tpu.dot_dimension_numbers<[1], [0], [0], [1], [0, 0, 1, 1], [], []>} : vector<16x4xbf16>, vector<4x32xbf16>, vector<16x32xf32> -> vector<16x32xf32>
    %38 = arith.addf %31, %37 : vector<16x32xf32>
    %c0_36 = arith.constant 0 : index
    %c0_37 = arith.constant 0 : index
    %c5 = arith.constant 5 : index
    %c0_38 = arith.constant 0 : index
    %39 = vector.load %arg2[%c0_36, %c0_37, %c5, %c0_38] : memref<2x1x24x4xbf16, #tpu.memory_space<vmem>>, vector<1x1x16x4xbf16>
    %40 = vector.shape_cast %39 : vector<1x1x16x4xbf16> to vector<16x4xbf16>
    %41 = arith.index_cast %arg1 : i32 to index
    %c5_39 = arith.constant 5 : index
    %c0_40 = arith.constant 0 : index
    %c0_41 = arith.constant 0 : index
    %42 = vector.load %arg3[%41, %c5_39, %c0_40, %c0_41] : memref<9x9x4x32xbf16, #tpu.memory_space<vmem>>, vector<1x1x4x32xbf16>
    %43 = vector.shape_cast %42 : vector<1x1x4x32xbf16> to vector<4x32xbf16>
    %cst_42 = arith.constant dense<0.000000e+00> : vector<16x32xf32>
    %44 = tpu.matmul %40, %43, %cst_42 {dimension_numbers = #tpu.dot_dimension_numbers<[1], [0], [0], [1], [0, 0, 1, 1], [], []>} : vector<16x4xbf16>, vector<4x32xbf16>, vector<16x32xf32> -> vector<16x32xf32>
    %45 = arith.addf %38, %44 : vector<16x32xf32>
    %c0_43 = arith.constant 0 : index
    %c0_44 = arith.constant 0 : index
    %c6 = arith.constant 6 : index
    %c0_45 = arith.constant 0 : index
    %46 = vector.load %arg2[%c0_43, %c0_44, %c6, %c0_45] : memref<2x1x24x4xbf16, #tpu.memory_space<vmem>>, vector<1x1x16x4xbf16>
    %47 = vector.shape_cast %46 : vector<1x1x16x4xbf16> to vector<16x4xbf16>
    %48 = arith.index_cast %arg1 : i32 to index
    %c6_46 = arith.constant 6 : index
    %c0_47 = arith.constant 0 : index
    %c0_48 = arith.constant 0 : index
    %49 = vector.load %arg3[%48, %c6_46, %c0_47, %c0_48] : memref<9x9x4x32xbf16, #tpu.memory_space<vmem>>, vector<1x1x4x32xbf16>
    %50 = vector.shape_cast %49 : vector<1x1x4x32xbf16> to vector<4x32xbf16>
    %cst_49 = arith.constant dense<0.000000e+00> : vector<16x32xf32>
    %51 = tpu.matmul %47, %50, %cst_49 {dimension_numbers = #tpu.dot_dimension_numbers<[1], [0], [0], [1], [0, 0, 1, 1], [], []>} : vector<16x4xbf16>, vector<4x32xbf16>, vector<16x32xf32> -> vector<16x32xf32>
    %52 = arith.addf %45, %51 : vector<16x32xf32>
    %c0_50 = arith.constant 0 : index
    %c0_51 = arith.constant 0 : index
    %c7 = arith.constant 7 : index
    %c0_52 = arith.constant 0 : index
    %53 = vector.load %arg2[%c0_50, %c0_51, %c7, %c0_52] : memref<2x1x24x4xbf16, #tpu.memory_space<vmem>>, vector<1x1x16x4xbf16>
    %54 = vector.shape_cast %53 : vector<1x1x16x4xbf16> to vector<16x4xbf16>
    %55 = arith.index_cast %arg1 : i32 to index
    %c7_53 = arith.constant 7 : index
    %c0_54 = arith.constant 0 : index
    %c0_55 = arith.constant 0 : index
    %56 = vector.load %arg3[%55, %c7_53, %c0_54, %c0_55] : memref<9x9x4x32xbf16, #tpu.memory_space<vmem>>, vector<1x1x4x32xbf16>
    %57 = vector.shape_cast %56 : vector<1x1x4x32xbf16> to vector<4x32xbf16>
    %cst_56 = arith.constant dense<0.000000e+00> : vector<16x32xf32>
    %58 = tpu.matmul %54, %57, %cst_56 {dimension_numbers = #tpu.dot_dimension_numbers<[1], [0], [0], [1], [0, 0, 1, 1], [], []>} : vector<16x4xbf16>, vector<4x32xbf16>, vector<16x32xf32> -> vector<16x32xf32>
    %59 = arith.addf %52, %58 : vector<16x32xf32>
    %c0_57 = arith.constant 0 : index
    %c0_58 = arith.constant 0 : index
    %c8 = arith.constant 8 : index
    %c0_59 = arith.constant 0 : index
    %60 = vector.load %arg2[%c0_57, %c0_58, %c8, %c0_59] : memref<2x1x24x4xbf16, #tpu.memory_space<vmem>>, vector<1x1x16x4xbf16>
    %61 = vector.shape_cast %60 : vector<1x1x16x4xbf16> to vector<16x4xbf16>
    %62 = arith.index_cast %arg1 : i32 to index
    %c8_60 = arith.constant 8 : index
    %c0_61 = arith.constant 0 : index
    %c0_62 = arith.constant 0 : index
    %63 = vector.load %arg3[%62, %c8_60, %c0_61, %c0_62] : memref<9x9x4x32xbf16, #tpu.memory_space<vmem>>, vector<1x1x4x32xbf16>
    %64 = vector.shape_cast %63 : vector<1x1x4x32xbf16> to vector<4x32xbf16>
    %cst_63 = arith.constant dense<0.000000e+00> : vector<16x32xf32>
    %65 = tpu.matmul %61, %64, %cst_63 {dimension_numbers = #tpu.dot_dimension_numbers<[1], [0], [0], [1], [0, 0, 1, 1], [], []>} : vector<16x4xbf16>, vector<4x32xbf16>, vector<16x32xf32> -> vector<16x32xf32>
    %66 = arith.addf %59, %65 : vector<16x32xf32>
    %c0_64 = arith.constant 0 : index
    %c0_65 = arith.constant 0 : index
    %c0_66 = arith.constant 0 : index
    %67 = vector.load %arg7[%c0_64, %c0_65, %c0_66] : memref<2x16x32xf32, #tpu.memory_space<vmem>>, vector<1x16x32xf32>
    %68 = vector.shape_cast %67 : vector<1x16x32xf32> to vector<16x32xf32>
    %69 = arith.addf %68, %66 : vector<16x32xf32>
    %c0_67 = arith.constant 0 : index
    %c0_68 = arith.constant 0 : index
    %c0_69 = arith.constant 0 : index
    %70 = vector.load %arg7[%c0_67, %c0_68, %c0_69] : memref<2x16x32xf32, #tpu.memory_space<vmem>>, vector<1x16x32xf32>
    %71 = vector.shape_cast %70 : vector<1x16x32xf32> to vector<16x32xf32>
    %72 = vector.shape_cast %69 : vector<16x32xf32> to vector<1x16x32xf32>
    tpu.vector_store %arg7[%c0_67, %c0_68, %c0_69], %72 {strides = array<i32>} : memref<2x16x32xf32, #tpu.memory_space<vmem>>, vector<1x16x32xf32>,
    %cst_70 = arith.constant 0.000000e+00 : f32
    %73 = vector.broadcast %cst_70 : f32 to vector<16x32xf32>
    %c1_71 = arith.constant 1 : index
    %c0_72 = arith.constant 0 : index
    %c0_73 = arith.constant 0 : index
    %c0_74 = arith.constant 0 : index
    %74 = vector.load %arg2[%c1_71, %c0_72, %c0_73, %c0_74] : memref<2x1x24x4xbf16, #tpu.memory_space<vmem>>, vector<1x1x16x4xbf16>
    %75 = vector.shape_cast %74 : vector<1x1x16x4xbf16> to vector<16x4xbf16>
    %76 = arith.index_cast %arg1 : i32 to index
    %c0_75 = arith.constant 0 : index
    %c0_76 = arith.constant 0 : index
    %c0_77 = arith.constant 0 : index
    %77 = vector.load %arg3[%76, %c0_75, %c0_76, %c0_77] : memref<9x9x4x32xbf16, #tpu.memory_space<vmem>>, vector<1x1x4x32xbf16>
    %78 = vector.shape_cast %77 : vector<1x1x4x32xbf16> to vector<4x32xbf16>
    %cst_78 = arith.constant dense<0.000000e+00> : vector<16x32xf32>
    %79 = tpu.matmul %75, %78, %cst_78 {dimension_numbers = #tpu.dot_dimension_numbers<[1], [0], [0], [1], [0, 0, 1, 1], [], []>} : vector<16x4xbf16>, vector<4x32xbf16>, vector<16x32xf32> -> vector<16x32xf32>
    %80 = arith.addf %73, %79 : vector<16x32xf32>
    %c1_79 = arith.constant 1 : index
    %c0_80 = arith.constant 0 : index
    %c1_81 = arith.constant 1 : index
    %c0_82 = arith.constant 0 : index
    %81 = vector.load %arg2[%c1_79, %c0_80, %c1_81, %c0_82] : memref<2x1x24x4xbf16, #tpu.memory_space<vmem>>, vector<1x1x16x4xbf16>
    %82 = vector.shape_cast %81 : vector<1x1x16x4xbf16> to vector<16x4xbf16>
    %83 = arith.index_cast %arg1 : i32 to index
    %c1_83 = arith.constant 1 : index
    %c0_84 = arith.constant 0 : index
    %c0_85 = arith.constant 0 : index
    %84 = vector.load %arg3[%83, %c1_83, %c0_84, %c0_85] : memref<9x9x4x32xbf16, #tpu.memory_space<vmem>>, vector<1x1x4x32xbf16>
    %85 = vector.shape_cast %84 : vector<1x1x4x32xbf16> to vector<4x32xbf16>
    %cst_86 = arith.constant dense<0.000000e+00> : vector<16x32xf32>
    %86 = tpu.matmul %82, %85, %cst_86 {dimension_numbers = #tpu.dot_dimension_numbers<[1], [0], [0], [1], [0, 0, 1, 1], [], []>} : vector<16x4xbf16>, vector<4x32xbf16>, vector<16x32xf32> -> vector<16x32xf32>
    %87 = arith.addf %80, %86 : vector<16x32xf32>
    %c1_87 = arith.constant 1 : index
    %c0_88 = arith.constant 0 : index
    %c2_89 = arith.constant 2 : index
    %c0_90 = arith.constant 0 : index
    %88 = vector.load %arg2[%c1_87, %c0_88, %c2_89, %c0_90] : memref<2x1x24x4xbf16, #tpu.memory_space<vmem>>, vector<1x1x16x4xbf16>
    %89 = vector.shape_cast %88 : vector<1x1x16x4xbf16> to vector<16x4xbf16>
    %90 = arith.index_cast %arg1 : i32 to index
    %c2_91 = arith.constant 2 : index
    %c0_92 = arith.constant 0 : index
    %c0_93 = arith.constant 0 : index
    %91 = vector.load %arg3[%90, %c2_91, %c0_92, %c0_93] : memref<9x9x4x32xbf16, #tpu.memory_space<vmem>>, vector<1x1x4x32xbf16>
    %92 = vector.shape_cast %91 : vector<1x1x4x32xbf16> to vector<4x32xbf16>
    %cst_94 = arith.constant dense<0.000000e+00> : vector<16x32xf32>
    %93 = tpu.matmul %89, %92, %cst_94 {dimension_numbers = #tpu.dot_dimension_numbers<[1], [0], [0], [1], [0, 0, 1, 1], [], []>} : vector<16x4xbf16>, vector<4x32xbf16>, vector<16x32xf32> -> vector<16x32xf32>
    %94 = arith.addf %87, %93 : vector<16x32xf32>
    %c1_95 = arith.constant 1 : index
    %c0_96 = arith.constant 0 : index
    %c3_97 = arith.constant 3 : index
    %c0_98 = arith.constant 0 : index
    %95 = vector.load %arg2[%c1_95, %c0_96, %c3_97, %c0_98] : memref<2x1x24x4xbf16, #tpu.memory_space<vmem>>, vector<1x1x16x4xbf16>
    %96 = vector.shape_cast %95 : vector<1x1x16x4xbf16> to vector<16x4xbf16>
    %97 = arith.index_cast %arg1 : i32 to index
    %c3_99 = arith.constant 3 : index
    %c0_100 = arith.constant 0 : index
    %c0_101 = arith.constant 0 : index
    %98 = vector.load %arg3[%97, %c3_99, %c0_100, %c0_101] : memref<9x9x4x32xbf16, #tpu.memory_space<vmem>>, vector<1x1x4x32xbf16>
    %99 = vector.shape_cast %98 : vector<1x1x4x32xbf16> to vector<4x32xbf16>
    %cst_102 = arith.constant dense<0.000000e+00> : vector<16x32xf32>
    %100 = tpu.matmul %96, %99, %cst_102 {dimension_numbers = #tpu.dot_dimension_numbers<[1], [0], [0], [1], [0, 0, 1, 1], [], []>} : vector<16x4xbf16>, vector<4x32xbf16>, vector<16x32xf32> -> vector<16x32xf32>
    %101 = arith.addf %94, %100 : vector<16x32xf32>
    %c1_103 = arith.constant 1 : index
    %c0_104 = arith.constant 0 : index
    %c4_105 = arith.constant 4 : index
    %c0_106 = arith.constant 0 : index
    %102 = vector.load %arg2[%c1_103, %c0_104, %c4_105, %c0_106] : memref<2x1x24x4xbf16, #tpu.memory_space<vmem>>, vector<1x1x16x4xbf16>
    %103 = vector.shape_cast %102 : vector<1x1x16x4xbf16> to vector<16x4xbf16>
    %104 = arith.index_cast %arg1 : i32 to index
    %c4_107 = arith.constant 4 : index
    %c0_108 = arith.constant 0 : index
    %c0_109 = arith.constant 0 : index
    %105 = vector.load %arg3[%104, %c4_107, %c0_108, %c0_109] : memref<9x9x4x32xbf16, #tpu.memory_space<vmem>>, vector<1x1x4x32xbf16>
    %106 = vector.shape_cast %105 : vector<1x1x4x32xbf16> to vector<4x32xbf16>
    %cst_110 = arith.constant dense<0.000000e+00> : vector<16x32xf32>
    %107 = tpu.matmul %103, %106, %cst_110 {dimension_numbers = #tpu.dot_dimension_numbers<[1], [0], [0], [1], [0, 0, 1, 1], [], []>} : vector<16x4xbf16>, vector<4x32xbf16>, vector<16x32xf32> -> vector<16x32xf32>
    %108 = arith.addf %101, %107 : vector<16x32xf32>
    %c1_111 = arith.constant 1 : index
    %c0_112 = arith.constant 0 : index
    %c5_113 = arith.constant 5 : index
    %c0_114 = arith.constant 0 : index
    %109 = vector.load %arg2[%c1_111, %c0_112, %c5_113, %c0_114] : memref<2x1x24x4xbf16, #tpu.memory_space<vmem>>, vector<1x1x16x4xbf16>
    %110 = vector.shape_cast %109 : vector<1x1x16x4xbf16> to vector<16x4xbf16>
    %111 = arith.index_cast %arg1 : i32 to index
    %c5_115 = arith.constant 5 : index
    %c0_116 = arith.constant 0 : index
    %c0_117 = arith.constant 0 : index
    %112 = vector.load %arg3[%111, %c5_115, %c0_116, %c0_117] : memref<9x9x4x32xbf16, #tpu.memory_space<vmem>>, vector<1x1x4x32xbf16>
    %113 = vector.shape_cast %112 : vector<1x1x4x32xbf16> to vector<4x32xbf16>
    %cst_118 = arith.constant dense<0.000000e+00> : vector<16x32xf32>
    %114 = tpu.matmul %110, %113, %cst_118 {dimension_numbers = #tpu.dot_dimension_numbers<[1], [0], [0], [1], [0, 0, 1, 1], [], []>} : vector<16x4xbf16>, vector<4x32xbf16>, vector<16x32xf32> -> vector<16x32xf32>
    %115 = arith.addf %108, %114 : vector<16x32xf32>
    %c1_119 = arith.constant 1 : index
    %c0_120 = arith.constant 0 : index
    %c6_121 = arith.constant 6 : index
    %c0_122 = arith.constant 0 : index
    %116 = vector.load %arg2[%c1_119, %c0_120, %c6_121, %c0_122] : memref<2x1x24x4xbf16, #tpu.memory_space<vmem>>, vector<1x1x16x4xbf16>
    %117 = vector.shape_cast %116 : vector<1x1x16x4xbf16> to vector<16x4xbf16>
    %118 = arith.index_cast %arg1 : i32 to index
    %c6_123 = arith.constant 6 : index
    %c0_124 = arith.constant 0 : index
    %c0_125 = arith.constant 0 : index
    %119 = vector.load %arg3[%118, %c6_123, %c0_124, %c0_125] : memref<9x9x4x32xbf16, #tpu.memory_space<vmem>>, vector<1x1x4x32xbf16>
    %120 = vector.shape_cast %119 : vector<1x1x4x32xbf16> to vector<4x32xbf16>
    %cst_126 = arith.constant dense<0.000000e+00> : vector<16x32xf32>
    %121 = tpu.matmul %117, %120, %cst_126 {dimension_numbers = #tpu.dot_dimension_numbers<[1], [0], [0], [1], [0, 0, 1, 1], [], []>} : vector<16x4xbf16>, vector<4x32xbf16>, vector<16x32xf32> -> vector<16x32xf32>
    %122 = arith.addf %115, %121 : vector<16x32xf32>
    %c1_127 = arith.constant 1 : index
    %c0_128 = arith.constant 0 : index
    %c7_129 = arith.constant 7 : index
    %c0_130 = arith.constant 0 : index
    %123 = vector.load %arg2[%c1_127, %c0_128, %c7_129, %c0_130] : memref<2x1x24x4xbf16, #tpu.memory_space<vmem>>, vector<1x1x16x4xbf16>
    %124 = vector.shape_cast %123 : vector<1x1x16x4xbf16> to vector<16x4xbf16>
    %125 = arith.index_cast %arg1 : i32 to index
    %c7_131 = arith.constant 7 : index
    %c0_132 = arith.constant 0 : index
    %c0_133 = arith.constant 0 : index
    %126 = vector.load %arg3[%125, %c7_131, %c0_132, %c0_133] : memref<9x9x4x32xbf16, #tpu.memory_space<vmem>>, vector<1x1x4x32xbf16>
    %127 = vector.shape_cast %126 : vector<1x1x4x32xbf16> to vector<4x32xbf16>
    %cst_134 = arith.constant dense<0.000000e+00> : vector<16x32xf32>
    %128 = tpu.matmul %124, %127, %cst_134 {dimension_numbers = #tpu.dot_dimension_numbers<[1], [0], [0], [1], [0, 0, 1, 1], [], []>} : vector<16x4xbf16>, vector<4x32xbf16>, vector<16x32xf32> -> vector<16x32xf32>
    %129 = arith.addf %122, %128 : vector<16x32xf32>
    %c1_135 = arith.constant 1 : index
    %c0_136 = arith.constant 0 : index
    %c8_137 = arith.constant 8 : index
    %c0_138 = arith.constant 0 : index
    %130 = vector.load %arg2[%c1_135, %c0_136, %c8_137, %c0_138] : memref<2x1x24x4xbf16, #tpu.memory_space<vmem>>, vector<1x1x16x4xbf16>
    %131 = vector.shape_cast %130 : vector<1x1x16x4xbf16> to vector<16x4xbf16>
    %132 = arith.index_cast %arg1 : i32 to index
    %c8_139 = arith.constant 8 : index
    %c0_140 = arith.constant 0 : index
    %c0_141 = arith.constant 0 : index
    %133 = vector.load %arg3[%132, %c8_139, %c0_140, %c0_141] : memref<9x9x4x32xbf16, #tpu.memory_space<vmem>>, vector<1x1x4x32xbf16>
    %134 = vector.shape_cast %133 : vector<1x1x4x32xbf16> to vector<4x32xbf16>
    %cst_142 = arith.constant dense<0.000000e+00> : vector<16x32xf32>
    %135 = tpu.matmul %131, %134, %cst_142 {dimension_numbers = #tpu.dot_dimension_numbers<[1], [0], [0], [1], [0, 0, 1, 1], [], []>} : vector<16x4xbf16>, vector<4x32xbf16>, vector<16x32xf32> -> vector<16x32xf32>
    %136 = arith.addf %129, %135 : vector<16x32xf32>
    %c1_143 = arith.constant 1 : index
    %c0_144 = arith.constant 0 : index
    %c0_145 = arith.constant 0 : index
    %137 = vector.load %arg7[%c1_143, %c0_144, %c0_145] : memref<2x16x32xf32, #tpu.memory_space<vmem>>, vector<1x16x32xf32>
    %138 = vector.shape_cast %137 : vector<1x16x32xf32> to vector<16x32xf32>
    %139 = arith.addf %138, %136 : vector<16x32xf32>
    %c1_146 = arith.constant 1 : index
    %c0_147 = arith.constant 0 : index
    %c0_148 = arith.constant 0 : index
    %140 = vector.load %arg7[%c1_146, %c0_147, %c0_148] : memref<2x16x32xf32, #tpu.memory_space<vmem>>, vector<1x16x32xf32>
    %141 = vector.shape_cast %140 : vector<1x16x32xf32> to vector<16x32xf32>
    %142 = vector.shape_cast %139 : vector<16x32xf32> to vector<1x16x32xf32>
    tpu.vector_store %arg7[%c1_146, %c0_147, %c0_148], %142 {strides = array<i32>} : memref<2x16x32xf32, #tpu.memory_space<vmem>>, vector<1x16x32xf32>,
    %c8_i32 = arith.constant 8 : i32
    %143 = arith.cmpi eq, %arg1, %c8_i32 : i32
    %144 = arith.extui %143 : i1 to i32
    %c0_i32_149 = arith.constant 0 : i32
    %145 = arith.cmpi ne, %144, %c0_i32_149 : i32
    scf.if %145 {
      %c0_150 = arith.constant 0 : index
      %c0_151 = arith.constant 0 : index
      %c0_152 = arith.constant 0 : index
      %146 = vector.load %arg7[%c0_150, %c0_151, %c0_152] : memref<2x16x32xf32, #tpu.memory_space<vmem>>, vector<2x16x32xf32>
      %c0_153 = arith.constant 0 : index
      %c0_154 = arith.constant 0 : index
      %147 = vector.load %arg4[%c0_153, %c0_154] : memref<1x32xf32, #tpu.memory_space<vmem>>, vector<1x32xf32>
      %148 = vector.shape_cast %147 : vector<1x32xf32> to vector<1x1x32xf32>
      %149 = vector.broadcast %148 : vector<1x1x32xf32> to vector<2x16x32xf32>
      %150 = arith.mulf %146, %149 : vector<2x16x32xf32>
      %c0_155 = arith.constant 0 : index
      %c0_156 = arith.constant 0 : index
      %151 = vector.load %arg5[%c0_155, %c0_156] : memref<1x32xf32, #tpu.memory_space<vmem>>, vector<1x32xf32>
      %152 = vector.shape_cast %151 : vector<1x32xf32> to vector<1x1x32xf32>
      %153 = vector.broadcast %152 : vector<1x1x32xf32> to vector<2x16x32xf32>
      %154 = arith.addf %150, %153 : vector<2x16x32xf32>
      %cst_157 = arith.constant 0.000000e+00 : f32
      %155 = vector.broadcast %cst_157 : f32 to vector<2x16x32xf32>
      %156 = arith.maximumf %154, %155 : vector<2x16x32xf32>
      %157 = arith.truncf %156 : vector<2x16x32xf32> to vector<2x16x32xbf16>
      %c0_158 = arith.constant 0 : index
      %c0_159 = arith.constant 0 : index
      %c0_160 = arith.constant 0 : index
      %c0_161 = arith.constant 0 : index
      %158 = vector.load %arg6[%c0_158, %c0_159, %c0_160, %c0_161] : memref<2x1x16x32xbf16, #tpu.memory_space<vmem>>, vector<2x1x16x32xbf16>
      %159 = vector.shape_cast %158 : vector<2x1x16x32xbf16> to vector<2x16x32xbf16>
      %160 = vector.shape_cast %157 : vector<2x16x32xbf16> to vector<2x1x16x32xbf16>
      tpu.vector_store %arg6[%c0_158, %c0_159, %c0_160, %c0_161], %160 {strides = array<i32>} : memref<2x1x16x32xbf16, #tpu.memory_space<vmem>>, vector<2x1x16x32xbf16>,
    } else {
    }
    return
  }
  func.func @transform_0(%arg0: i32, %arg1: i32) -> (i32, i32, i32, i32) {
    %0 = arith.addi %arg0, %arg1 : i32
    %c0_i32 = arith.constant 0 : i32
    %c0_i32_0 = arith.constant 0 : i32
    %c0_i32_1 = arith.constant 0 : i32
    %c0_i32_2 = arith.constant 0 : i32
    return %c0_i32, %0, %c0_i32_0, %c0_i32_1 : i32, i32, i32, i32
  }
  func.func @transform_1(%arg0: i32, %arg1: i32) -> (i32, i32, i32, i32) {
    %c0_i32 = arith.constant 0 : i32
    %c0_i32_0 = arith.constant 0 : i32
    %c0_i32_1 = arith.constant 0 : i32
    %c0_i32_2 = arith.constant 0 : i32
    %c0_i32_3 = arith.constant 0 : i32
    return %c0_i32, %c0_i32_0, %c0_i32_1, %c0_i32_2 : i32, i32, i32, i32
  }
  func.func @transform_2(%arg0: i32, %arg1: i32) -> (i32, i32) {
    %c0_i32 = arith.constant 0 : i32
    %c0_i32_0 = arith.constant 0 : i32
    %c0_i32_1 = arith.constant 0 : i32
    return %c0_i32, %c0_i32_0 : i32, i32
  }
  func.func @transform_3(%arg0: i32, %arg1: i32) -> (i32, i32) {
    %c0_i32 = arith.constant 0 : i32
    %c0_i32_0 = arith.constant 0 : i32
    %c0_i32_1 = arith.constant 0 : i32
    return %c0_i32, %c0_i32_0 : i32, i32
  }
  func.func @transform_4(%arg0: i32, %arg1: i32) -> (i32, i32, i32, i32) {
    %c0_i32 = arith.constant 0 : i32
    %c0_i32_0 = arith.constant 0 : i32
    %c0_i32_1 = arith.constant 0 : i32
    %c0_i32_2 = arith.constant 0 : i32
    return %c0_i32, %arg0, %c0_i32_0, %c0_i32_1 : i32, i32, i32, i32
  }
}

module attributes {stable_mosaic.version = 11 : i64} {
  func.func @_maxpool_kernel(%arg0: i32, %arg1: memref<2x2x8x64xbf16, #tpu.memory_space<vmem>>, %arg2: memref<2x1x8x32xbf16, #tpu.memory_space<vmem>>) attributes {dimension_semantics = [#tpu.dimension_semantics<parallel>], iteration_bounds = array<i64: 8>, scalar_prefetch = 0 : i64, scratch_operands = 0 : i64, tpu.core_type = #tpu.core_type<tc>, window_params = [{transform_indices = @transform_0, window_bounds = array<i64: 2, 2, 8, 64>}, {transform_indices = @transform_1, window_bounds = array<i64: 2, 1, 8, 32>}]} {
    %c0 = arith.constant 0 : index
    %c0_0 = arith.constant 0 : index
    %c0_1 = arith.constant 0 : index
    %c0_2 = arith.constant 0 : index
    %0 = vector.load %arg1[%c0, %c0_0, %c0_1, %c0_2] : memref<2x2x8x64xbf16, #tpu.memory_space<vmem>>, vector<2x1x8x64xbf16>
    %1 = vector.shape_cast %0 : vector<2x1x8x64xbf16> to vector<2x8x64xbf16>
    %c0_3 = arith.constant 0 : index
    %c1 = arith.constant 1 : index
    %c0_4 = arith.constant 0 : index
    %c0_5 = arith.constant 0 : index
    %2 = vector.load %arg1[%c0_3, %c1, %c0_4, %c0_5] : memref<2x2x8x64xbf16, #tpu.memory_space<vmem>>, vector<2x1x8x64xbf16>
    %3 = vector.shape_cast %2 : vector<2x1x8x64xbf16> to vector<2x8x64xbf16>
    %4 = arith.maximumf %1, %3 : vector<2x8x64xbf16>
    %5 = vector.extract_strided_slice %4 {offsets = [0, 0, 0], sizes = [2, 8, 32], strides = [1, 1, 1]} : vector<2x8x64xbf16> to vector<2x8x32xbf16>
    %6 = vector.extract_strided_slice %4 {offsets = [0, 0, 32], sizes = [2, 8, 32], strides = [1, 1, 1]} : vector<2x8x64xbf16> to vector<2x8x32xbf16>
    %7 = arith.maximumf %5, %6 : vector<2x8x32xbf16>
    %c0_6 = arith.constant 0 : index
    %c0_7 = arith.constant 0 : index
    %c0_8 = arith.constant 0 : index
    %c0_9 = arith.constant 0 : index
    %8 = vector.load %arg2[%c0_6, %c0_7, %c0_8, %c0_9] : memref<2x1x8x32xbf16, #tpu.memory_space<vmem>>, vector<2x1x8x32xbf16>
    %9 = vector.shape_cast %8 : vector<2x1x8x32xbf16> to vector<2x8x32xbf16>
    %10 = vector.shape_cast %7 : vector<2x8x32xbf16> to vector<2x1x8x32xbf16>
    tpu.vector_store %arg2[%c0_6, %c0_7, %c0_8, %c0_9], %10 {strides = array<i32>} : memref<2x1x8x32xbf16, #tpu.memory_space<vmem>>, vector<2x1x8x32xbf16>,
    return
  }
  func.func @transform_0(%arg0: i32) -> (i32, i32, i32, i32) {
    %c0_i32 = arith.constant 0 : i32
    %c0_i32_0 = arith.constant 0 : i32
    %c0_i32_1 = arith.constant 0 : i32
    %c0_i32_2 = arith.constant 0 : i32
    return %c0_i32, %arg0, %c0_i32_0, %c0_i32_1 : i32, i32, i32, i32
  }
  func.func @transform_1(%arg0: i32) -> (i32, i32, i32, i32) {
    %c0_i32 = arith.constant 0 : i32
    %c0_i32_0 = arith.constant 0 : i32
    %c0_i32_1 = arith.constant 0 : i32
    %c0_i32_2 = arith.constant 0 : i32
    return %c0_i32, %arg0, %c0_i32_0, %c0_i32_1 : i32, i32, i32, i32
  }
}

module attributes {stable_mosaic.version = 11 : i64} {
  func.func @_conv_row_kernel(%arg0: i32, %arg1: i32, %arg2: memref<2x1x14x32xbf16, #tpu.memory_space<vmem>>, %arg3: memref<7x7x32x64xbf16, #tpu.memory_space<vmem>>, %arg4: memref<1x64xf32, #tpu.memory_space<vmem>>, %arg5: memref<1x64xf32, #tpu.memory_space<vmem>>, %arg6: memref<2x1x8x64xbf16, #tpu.memory_space<vmem>>, %arg7: memref<2x8x64xf32, #tpu.memory_space<vmem>>) attributes {dimension_semantics = [#tpu.dimension_semantics<parallel>, #tpu.dimension_semantics<arbitrary>], iteration_bounds = array<i64: 8, 7>, scalar_prefetch = 0 : i64, scratch_operands = 1 : i64, tpu.core_type = #tpu.core_type<tc>, window_params = [{transform_indices = @transform_0, window_bounds = array<i64: 2, 1, 14, 32>}, {pipeline_mode = #tpu.pipeline_mode<synchronous>, transform_indices = @transform_1, window_bounds = array<i64: 7, 7, 32, 64>}, {pipeline_mode = #tpu.pipeline_mode<synchronous>, transform_indices = @transform_2, window_bounds = array<i64: 1, 64>}, {pipeline_mode = #tpu.pipeline_mode<synchronous>, transform_indices = @transform_3, window_bounds = array<i64: 1, 64>}, {transform_indices = @transform_4, window_bounds = array<i64: 2, 1, 8, 64>}]} {
    %c0_i32 = arith.constant 0 : i32
    %0 = arith.cmpi eq, %arg1, %c0_i32 : i32
    %1 = arith.extui %0 : i1 to i32
    %c0_i32_0 = arith.constant 0 : i32
    %2 = arith.cmpi ne, %1, %c0_i32_0 : i32
    scf.if %2 {
      %cst_120 = arith.constant 0.000000e+00 : f32
      %118 = vector.broadcast %cst_120 : f32 to vector<2x8x64xf32>
      %c0_121 = arith.constant 0 : index
      %c0_122 = arith.constant 0 : index
      %c0_123 = arith.constant 0 : index
      %119 = vector.load %arg7[%c0_121, %c0_122, %c0_123] : memref<2x8x64xf32, #tpu.memory_space<vmem>>, vector<2x8x64xf32>
      tpu.vector_store %arg7[%c0_121, %c0_122, %c0_123], %118 {strides = array<i32>} : memref<2x8x64xf32, #tpu.memory_space<vmem>>, vector<2x8x64xf32>,
    } else {
    }
    %cst = arith.constant 0.000000e+00 : f32
    %3 = vector.broadcast %cst : f32 to vector<8x64xf32>
    %c0 = arith.constant 0 : index
    %c0_1 = arith.constant 0 : index
    %c0_2 = arith.constant 0 : index
    %c0_3 = arith.constant 0 : index
    %4 = vector.load %arg2[%c0, %c0_1, %c0_2, %c0_3] : memref<2x1x14x32xbf16, #tpu.memory_space<vmem>>, vector<1x1x8x32xbf16>
    %5 = vector.shape_cast %4 : vector<1x1x8x32xbf16> to vector<8x32xbf16>
    %6 = arith.index_cast %arg1 : i32 to index
    %c0_4 = arith.constant 0 : index
    %c0_5 = arith.constant 0 : index
    %c0_6 = arith.constant 0 : index
    %7 = vector.load %arg3[%6, %c0_4, %c0_5, %c0_6] : memref<7x7x32x64xbf16, #tpu.memory_space<vmem>>, vector<1x1x32x64xbf16>
    %8 = vector.shape_cast %7 : vector<1x1x32x64xbf16> to vector<32x64xbf16>
    %cst_7 = arith.constant dense<0.000000e+00> : vector<8x64xf32>
    %9 = tpu.matmul %5, %8, %cst_7 {dimension_numbers = #tpu.dot_dimension_numbers<[1], [0], [0], [1], [0, 0, 1, 1], [], []>} : vector<8x32xbf16>, vector<32x64xbf16>, vector<8x64xf32> -> vector<8x64xf32>
    %10 = arith.addf %3, %9 : vector<8x64xf32>
    %c0_8 = arith.constant 0 : index
    %c0_9 = arith.constant 0 : index
    %c1 = arith.constant 1 : index
    %c0_10 = arith.constant 0 : index
    %11 = vector.load %arg2[%c0_8, %c0_9, %c1, %c0_10] : memref<2x1x14x32xbf16, #tpu.memory_space<vmem>>, vector<1x1x8x32xbf16>
    %12 = vector.shape_cast %11 : vector<1x1x8x32xbf16> to vector<8x32xbf16>
    %13 = arith.index_cast %arg1 : i32 to index
    %c1_11 = arith.constant 1 : index
    %c0_12 = arith.constant 0 : index
    %c0_13 = arith.constant 0 : index
    %14 = vector.load %arg3[%13, %c1_11, %c0_12, %c0_13] : memref<7x7x32x64xbf16, #tpu.memory_space<vmem>>, vector<1x1x32x64xbf16>
    %15 = vector.shape_cast %14 : vector<1x1x32x64xbf16> to vector<32x64xbf16>
    %cst_14 = arith.constant dense<0.000000e+00> : vector<8x64xf32>
    %16 = tpu.matmul %12, %15, %cst_14 {dimension_numbers = #tpu.dot_dimension_numbers<[1], [0], [0], [1], [0, 0, 1, 1], [], []>} : vector<8x32xbf16>, vector<32x64xbf16>, vector<8x64xf32> -> vector<8x64xf32>
    %17 = arith.addf %10, %16 : vector<8x64xf32>
    %c0_15 = arith.constant 0 : index
    %c0_16 = arith.constant 0 : index
    %c2 = arith.constant 2 : index
    %c0_17 = arith.constant 0 : index
    %18 = vector.load %arg2[%c0_15, %c0_16, %c2, %c0_17] : memref<2x1x14x32xbf16, #tpu.memory_space<vmem>>, vector<1x1x8x32xbf16>
    %19 = vector.shape_cast %18 : vector<1x1x8x32xbf16> to vector<8x32xbf16>
    %20 = arith.index_cast %arg1 : i32 to index
    %c2_18 = arith.constant 2 : index
    %c0_19 = arith.constant 0 : index
    %c0_20 = arith.constant 0 : index
    %21 = vector.load %arg3[%20, %c2_18, %c0_19, %c0_20] : memref<7x7x32x64xbf16, #tpu.memory_space<vmem>>, vector<1x1x32x64xbf16>
    %22 = vector.shape_cast %21 : vector<1x1x32x64xbf16> to vector<32x64xbf16>
    %cst_21 = arith.constant dense<0.000000e+00> : vector<8x64xf32>
    %23 = tpu.matmul %19, %22, %cst_21 {dimension_numbers = #tpu.dot_dimension_numbers<[1], [0], [0], [1], [0, 0, 1, 1], [], []>} : vector<8x32xbf16>, vector<32x64xbf16>, vector<8x64xf32> -> vector<8x64xf32>
    %24 = arith.addf %17, %23 : vector<8x64xf32>
    %c0_22 = arith.constant 0 : index
    %c0_23 = arith.constant 0 : index
    %c3 = arith.constant 3 : index
    %c0_24 = arith.constant 0 : index
    %25 = vector.load %arg2[%c0_22, %c0_23, %c3, %c0_24] : memref<2x1x14x32xbf16, #tpu.memory_space<vmem>>, vector<1x1x8x32xbf16>
    %26 = vector.shape_cast %25 : vector<1x1x8x32xbf16> to vector<8x32xbf16>
    %27 = arith.index_cast %arg1 : i32 to index
    %c3_25 = arith.constant 3 : index
    %c0_26 = arith.constant 0 : index
    %c0_27 = arith.constant 0 : index
    %28 = vector.load %arg3[%27, %c3_25, %c0_26, %c0_27] : memref<7x7x32x64xbf16, #tpu.memory_space<vmem>>, vector<1x1x32x64xbf16>
    %29 = vector.shape_cast %28 : vector<1x1x32x64xbf16> to vector<32x64xbf16>
    %cst_28 = arith.constant dense<0.000000e+00> : vector<8x64xf32>
    %30 = tpu.matmul %26, %29, %cst_28 {dimension_numbers = #tpu.dot_dimension_numbers<[1], [0], [0], [1], [0, 0, 1, 1], [], []>} : vector<8x32xbf16>, vector<32x64xbf16>, vector<8x64xf32> -> vector<8x64xf32>
    %31 = arith.addf %24, %30 : vector<8x64xf32>
    %c0_29 = arith.constant 0 : index
    %c0_30 = arith.constant 0 : index
    %c4 = arith.constant 4 : index
    %c0_31 = arith.constant 0 : index
    %32 = vector.load %arg2[%c0_29, %c0_30, %c4, %c0_31] : memref<2x1x14x32xbf16, #tpu.memory_space<vmem>>, vector<1x1x8x32xbf16>
    %33 = vector.shape_cast %32 : vector<1x1x8x32xbf16> to vector<8x32xbf16>
    %34 = arith.index_cast %arg1 : i32 to index
    %c4_32 = arith.constant 4 : index
    %c0_33 = arith.constant 0 : index
    %c0_34 = arith.constant 0 : index
    %35 = vector.load %arg3[%34, %c4_32, %c0_33, %c0_34] : memref<7x7x32x64xbf16, #tpu.memory_space<vmem>>, vector<1x1x32x64xbf16>
    %36 = vector.shape_cast %35 : vector<1x1x32x64xbf16> to vector<32x64xbf16>
    %cst_35 = arith.constant dense<0.000000e+00> : vector<8x64xf32>
    %37 = tpu.matmul %33, %36, %cst_35 {dimension_numbers = #tpu.dot_dimension_numbers<[1], [0], [0], [1], [0, 0, 1, 1], [], []>} : vector<8x32xbf16>, vector<32x64xbf16>, vector<8x64xf32> -> vector<8x64xf32>
    %38 = arith.addf %31, %37 : vector<8x64xf32>
    %c0_36 = arith.constant 0 : index
    %c0_37 = arith.constant 0 : index
    %c5 = arith.constant 5 : index
    %c0_38 = arith.constant 0 : index
    %39 = vector.load %arg2[%c0_36, %c0_37, %c5, %c0_38] : memref<2x1x14x32xbf16, #tpu.memory_space<vmem>>, vector<1x1x8x32xbf16>
    %40 = vector.shape_cast %39 : vector<1x1x8x32xbf16> to vector<8x32xbf16>
    %41 = arith.index_cast %arg1 : i32 to index
    %c5_39 = arith.constant 5 : index
    %c0_40 = arith.constant 0 : index
    %c0_41 = arith.constant 0 : index
    %42 = vector.load %arg3[%41, %c5_39, %c0_40, %c0_41] : memref<7x7x32x64xbf16, #tpu.memory_space<vmem>>, vector<1x1x32x64xbf16>
    %43 = vector.shape_cast %42 : vector<1x1x32x64xbf16> to vector<32x64xbf16>
    %cst_42 = arith.constant dense<0.000000e+00> : vector<8x64xf32>
    %44 = tpu.matmul %40, %43, %cst_42 {dimension_numbers = #tpu.dot_dimension_numbers<[1], [0], [0], [1], [0, 0, 1, 1], [], []>} : vector<8x32xbf16>, vector<32x64xbf16>, vector<8x64xf32> -> vector<8x64xf32>
    %45 = arith.addf %38, %44 : vector<8x64xf32>
    %c0_43 = arith.constant 0 : index
    %c0_44 = arith.constant 0 : index
    %c6 = arith.constant 6 : index
    %c0_45 = arith.constant 0 : index
    %46 = vector.load %arg2[%c0_43, %c0_44, %c6, %c0_45] : memref<2x1x14x32xbf16, #tpu.memory_space<vmem>>, vector<1x1x8x32xbf16>
    %47 = vector.shape_cast %46 : vector<1x1x8x32xbf16> to vector<8x32xbf16>
    %48 = arith.index_cast %arg1 : i32 to index
    %c6_46 = arith.constant 6 : index
    %c0_47 = arith.constant 0 : index
    %c0_48 = arith.constant 0 : index
    %49 = vector.load %arg3[%48, %c6_46, %c0_47, %c0_48] : memref<7x7x32x64xbf16, #tpu.memory_space<vmem>>, vector<1x1x32x64xbf16>
    %50 = vector.shape_cast %49 : vector<1x1x32x64xbf16> to vector<32x64xbf16>
    %cst_49 = arith.constant dense<0.000000e+00> : vector<8x64xf32>
    %51 = tpu.matmul %47, %50, %cst_49 {dimension_numbers = #tpu.dot_dimension_numbers<[1], [0], [0], [1], [0, 0, 1, 1], [], []>} : vector<8x32xbf16>, vector<32x64xbf16>, vector<8x64xf32> -> vector<8x64xf32>
    %52 = arith.addf %45, %51 : vector<8x64xf32>
    %c0_50 = arith.constant 0 : index
    %c0_51 = arith.constant 0 : index
    %c0_52 = arith.constant 0 : index
    %53 = vector.load %arg7[%c0_50, %c0_51, %c0_52] : memref<2x8x64xf32, #tpu.memory_space<vmem>>, vector<1x8x64xf32>
    %54 = vector.shape_cast %53 : vector<1x8x64xf32> to vector<8x64xf32>
    %55 = arith.addf %54, %52 : vector<8x64xf32>
    %c0_53 = arith.constant 0 : index
    %c0_54 = arith.constant 0 : index
    %c0_55 = arith.constant 0 : index
    %56 = vector.load %arg7[%c0_53, %c0_54, %c0_55] : memref<2x8x64xf32, #tpu.memory_space<vmem>>, vector<1x8x64xf32>
    %57 = vector.shape_cast %56 : vector<1x8x64xf32> to vector<8x64xf32>
    %58 = vector.shape_cast %55 : vector<8x64xf32> to vector<1x8x64xf32>
    tpu.vector_store %arg7[%c0_53, %c0_54, %c0_55], %58 {strides = array<i32>} : memref<2x8x64xf32, #tpu.memory_space<vmem>>, vector<1x8x64xf32>,
    %cst_56 = arith.constant 0.000000e+00 : f32
    %59 = vector.broadcast %cst_56 : f32 to vector<8x64xf32>
    %c1_57 = arith.constant 1 : index
    %c0_58 = arith.constant 0 : index
    %c0_59 = arith.constant 0 : index
    %c0_60 = arith.constant 0 : index
    %60 = vector.load %arg2[%c1_57, %c0_58, %c0_59, %c0_60] : memref<2x1x14x32xbf16, #tpu.memory_space<vmem>>, vector<1x1x8x32xbf16>
    %61 = vector.shape_cast %60 : vector<1x1x8x32xbf16> to vector<8x32xbf16>
    %62 = arith.index_cast %arg1 : i32 to index
    %c0_61 = arith.constant 0 : index
    %c0_62 = arith.constant 0 : index
    %c0_63 = arith.constant 0 : index
    %63 = vector.load %arg3[%62, %c0_61, %c0_62, %c0_63] : memref<7x7x32x64xbf16, #tpu.memory_space<vmem>>, vector<1x1x32x64xbf16>
    %64 = vector.shape_cast %63 : vector<1x1x32x64xbf16> to vector<32x64xbf16>
    %cst_64 = arith.constant dense<0.000000e+00> : vector<8x64xf32>
    %65 = tpu.matmul %61, %64, %cst_64 {dimension_numbers = #tpu.dot_dimension_numbers<[1], [0], [0], [1], [0, 0, 1, 1], [], []>} : vector<8x32xbf16>, vector<32x64xbf16>, vector<8x64xf32> -> vector<8x64xf32>
    %66 = arith.addf %59, %65 : vector<8x64xf32>
    %c1_65 = arith.constant 1 : index
    %c0_66 = arith.constant 0 : index
    %c1_67 = arith.constant 1 : index
    %c0_68 = arith.constant 0 : index
    %67 = vector.load %arg2[%c1_65, %c0_66, %c1_67, %c0_68] : memref<2x1x14x32xbf16, #tpu.memory_space<vmem>>, vector<1x1x8x32xbf16>
    %68 = vector.shape_cast %67 : vector<1x1x8x32xbf16> to vector<8x32xbf16>
    %69 = arith.index_cast %arg1 : i32 to index
    %c1_69 = arith.constant 1 : index
    %c0_70 = arith.constant 0 : index
    %c0_71 = arith.constant 0 : index
    %70 = vector.load %arg3[%69, %c1_69, %c0_70, %c0_71] : memref<7x7x32x64xbf16, #tpu.memory_space<vmem>>, vector<1x1x32x64xbf16>
    %71 = vector.shape_cast %70 : vector<1x1x32x64xbf16> to vector<32x64xbf16>
    %cst_72 = arith.constant dense<0.000000e+00> : vector<8x64xf32>
    %72 = tpu.matmul %68, %71, %cst_72 {dimension_numbers = #tpu.dot_dimension_numbers<[1], [0], [0], [1], [0, 0, 1, 1], [], []>} : vector<8x32xbf16>, vector<32x64xbf16>, vector<8x64xf32> -> vector<8x64xf32>
    %73 = arith.addf %66, %72 : vector<8x64xf32>
    %c1_73 = arith.constant 1 : index
    %c0_74 = arith.constant 0 : index
    %c2_75 = arith.constant 2 : index
    %c0_76 = arith.constant 0 : index
    %74 = vector.load %arg2[%c1_73, %c0_74, %c2_75, %c0_76] : memref<2x1x14x32xbf16, #tpu.memory_space<vmem>>, vector<1x1x8x32xbf16>
    %75 = vector.shape_cast %74 : vector<1x1x8x32xbf16> to vector<8x32xbf16>
    %76 = arith.index_cast %arg1 : i32 to index
    %c2_77 = arith.constant 2 : index
    %c0_78 = arith.constant 0 : index
    %c0_79 = arith.constant 0 : index
    %77 = vector.load %arg3[%76, %c2_77, %c0_78, %c0_79] : memref<7x7x32x64xbf16, #tpu.memory_space<vmem>>, vector<1x1x32x64xbf16>
    %78 = vector.shape_cast %77 : vector<1x1x32x64xbf16> to vector<32x64xbf16>
    %cst_80 = arith.constant dense<0.000000e+00> : vector<8x64xf32>
    %79 = tpu.matmul %75, %78, %cst_80 {dimension_numbers = #tpu.dot_dimension_numbers<[1], [0], [0], [1], [0, 0, 1, 1], [], []>} : vector<8x32xbf16>, vector<32x64xbf16>, vector<8x64xf32> -> vector<8x64xf32>
    %80 = arith.addf %73, %79 : vector<8x64xf32>
    %c1_81 = arith.constant 1 : index
    %c0_82 = arith.constant 0 : index
    %c3_83 = arith.constant 3 : index
    %c0_84 = arith.constant 0 : index
    %81 = vector.load %arg2[%c1_81, %c0_82, %c3_83, %c0_84] : memref<2x1x14x32xbf16, #tpu.memory_space<vmem>>, vector<1x1x8x32xbf16>
    %82 = vector.shape_cast %81 : vector<1x1x8x32xbf16> to vector<8x32xbf16>
    %83 = arith.index_cast %arg1 : i32 to index
    %c3_85 = arith.constant 3 : index
    %c0_86 = arith.constant 0 : index
    %c0_87 = arith.constant 0 : index
    %84 = vector.load %arg3[%83, %c3_85, %c0_86, %c0_87] : memref<7x7x32x64xbf16, #tpu.memory_space<vmem>>, vector<1x1x32x64xbf16>
    %85 = vector.shape_cast %84 : vector<1x1x32x64xbf16> to vector<32x64xbf16>
    %cst_88 = arith.constant dense<0.000000e+00> : vector<8x64xf32>
    %86 = tpu.matmul %82, %85, %cst_88 {dimension_numbers = #tpu.dot_dimension_numbers<[1], [0], [0], [1], [0, 0, 1, 1], [], []>} : vector<8x32xbf16>, vector<32x64xbf16>, vector<8x64xf32> -> vector<8x64xf32>
    %87 = arith.addf %80, %86 : vector<8x64xf32>
    %c1_89 = arith.constant 1 : index
    %c0_90 = arith.constant 0 : index
    %c4_91 = arith.constant 4 : index
    %c0_92 = arith.constant 0 : index
    %88 = vector.load %arg2[%c1_89, %c0_90, %c4_91, %c0_92] : memref<2x1x14x32xbf16, #tpu.memory_space<vmem>>, vector<1x1x8x32xbf16>
    %89 = vector.shape_cast %88 : vector<1x1x8x32xbf16> to vector<8x32xbf16>
    %90 = arith.index_cast %arg1 : i32 to index
    %c4_93 = arith.constant 4 : index
    %c0_94 = arith.constant 0 : index
    %c0_95 = arith.constant 0 : index
    %91 = vector.load %arg3[%90, %c4_93, %c0_94, %c0_95] : memref<7x7x32x64xbf16, #tpu.memory_space<vmem>>, vector<1x1x32x64xbf16>
    %92 = vector.shape_cast %91 : vector<1x1x32x64xbf16> to vector<32x64xbf16>
    %cst_96 = arith.constant dense<0.000000e+00> : vector<8x64xf32>
    %93 = tpu.matmul %89, %92, %cst_96 {dimension_numbers = #tpu.dot_dimension_numbers<[1], [0], [0], [1], [0, 0, 1, 1], [], []>} : vector<8x32xbf16>, vector<32x64xbf16>, vector<8x64xf32> -> vector<8x64xf32>
    %94 = arith.addf %87, %93 : vector<8x64xf32>
    %c1_97 = arith.constant 1 : index
    %c0_98 = arith.constant 0 : index
    %c5_99 = arith.constant 5 : index
    %c0_100 = arith.constant 0 : index
    %95 = vector.load %arg2[%c1_97, %c0_98, %c5_99, %c0_100] : memref<2x1x14x32xbf16, #tpu.memory_space<vmem>>, vector<1x1x8x32xbf16>
    %96 = vector.shape_cast %95 : vector<1x1x8x32xbf16> to vector<8x32xbf16>
    %97 = arith.index_cast %arg1 : i32 to index
    %c5_101 = arith.constant 5 : index
    %c0_102 = arith.constant 0 : index
    %c0_103 = arith.constant 0 : index
    %98 = vector.load %arg3[%97, %c5_101, %c0_102, %c0_103] : memref<7x7x32x64xbf16, #tpu.memory_space<vmem>>, vector<1x1x32x64xbf16>
    %99 = vector.shape_cast %98 : vector<1x1x32x64xbf16> to vector<32x64xbf16>
    %cst_104 = arith.constant dense<0.000000e+00> : vector<8x64xf32>
    %100 = tpu.matmul %96, %99, %cst_104 {dimension_numbers = #tpu.dot_dimension_numbers<[1], [0], [0], [1], [0, 0, 1, 1], [], []>} : vector<8x32xbf16>, vector<32x64xbf16>, vector<8x64xf32> -> vector<8x64xf32>
    %101 = arith.addf %94, %100 : vector<8x64xf32>
    %c1_105 = arith.constant 1 : index
    %c0_106 = arith.constant 0 : index
    %c6_107 = arith.constant 6 : index
    %c0_108 = arith.constant 0 : index
    %102 = vector.load %arg2[%c1_105, %c0_106, %c6_107, %c0_108] : memref<2x1x14x32xbf16, #tpu.memory_space<vmem>>, vector<1x1x8x32xbf16>
    %103 = vector.shape_cast %102 : vector<1x1x8x32xbf16> to vector<8x32xbf16>
    %104 = arith.index_cast %arg1 : i32 to index
    %c6_109 = arith.constant 6 : index
    %c0_110 = arith.constant 0 : index
    %c0_111 = arith.constant 0 : index
    %105 = vector.load %arg3[%104, %c6_109, %c0_110, %c0_111] : memref<7x7x32x64xbf16, #tpu.memory_space<vmem>>, vector<1x1x32x64xbf16>
    %106 = vector.shape_cast %105 : vector<1x1x32x64xbf16> to vector<32x64xbf16>
    %cst_112 = arith.constant dense<0.000000e+00> : vector<8x64xf32>
    %107 = tpu.matmul %103, %106, %cst_112 {dimension_numbers = #tpu.dot_dimension_numbers<[1], [0], [0], [1], [0, 0, 1, 1], [], []>} : vector<8x32xbf16>, vector<32x64xbf16>, vector<8x64xf32> -> vector<8x64xf32>
    %108 = arith.addf %101, %107 : vector<8x64xf32>
    %c1_113 = arith.constant 1 : index
    %c0_114 = arith.constant 0 : index
    %c0_115 = arith.constant 0 : index
    %109 = vector.load %arg7[%c1_113, %c0_114, %c0_115] : memref<2x8x64xf32, #tpu.memory_space<vmem>>, vector<1x8x64xf32>
    %110 = vector.shape_cast %109 : vector<1x8x64xf32> to vector<8x64xf32>
    %111 = arith.addf %110, %108 : vector<8x64xf32>
    %c1_116 = arith.constant 1 : index
    %c0_117 = arith.constant 0 : index
    %c0_118 = arith.constant 0 : index
    %112 = vector.load %arg7[%c1_116, %c0_117, %c0_118] : memref<2x8x64xf32, #tpu.memory_space<vmem>>, vector<1x8x64xf32>
    %113 = vector.shape_cast %112 : vector<1x8x64xf32> to vector<8x64xf32>
    %114 = vector.shape_cast %111 : vector<8x64xf32> to vector<1x8x64xf32>
    tpu.vector_store %arg7[%c1_116, %c0_117, %c0_118], %114 {strides = array<i32>} : memref<2x8x64xf32, #tpu.memory_space<vmem>>, vector<1x8x64xf32>,
    %c6_i32 = arith.constant 6 : i32
    %115 = arith.cmpi eq, %arg1, %c6_i32 : i32
    %116 = arith.extui %115 : i1 to i32
    %c0_i32_119 = arith.constant 0 : i32
    %117 = arith.cmpi ne, %116, %c0_i32_119 : i32
    scf.if %117 {
      %c0_120 = arith.constant 0 : index
      %c0_121 = arith.constant 0 : index
      %c0_122 = arith.constant 0 : index
      %118 = vector.load %arg7[%c0_120, %c0_121, %c0_122] : memref<2x8x64xf32, #tpu.memory_space<vmem>>, vector<2x8x64xf32>
      %c0_123 = arith.constant 0 : index
      %c0_124 = arith.constant 0 : index
      %119 = vector.load %arg4[%c0_123, %c0_124] : memref<1x64xf32, #tpu.memory_space<vmem>>, vector<1x64xf32>
      %120 = vector.shape_cast %119 : vector<1x64xf32> to vector<1x1x64xf32>
      %121 = vector.broadcast %120 : vector<1x1x64xf32> to vector<2x8x64xf32>
      %122 = arith.mulf %118, %121 : vector<2x8x64xf32>
      %c0_125 = arith.constant 0 : index
      %c0_126 = arith.constant 0 : index
      %123 = vector.load %arg5[%c0_125, %c0_126] : memref<1x64xf32, #tpu.memory_space<vmem>>, vector<1x64xf32>
      %124 = vector.shape_cast %123 : vector<1x64xf32> to vector<1x1x64xf32>
      %125 = vector.broadcast %124 : vector<1x1x64xf32> to vector<2x8x64xf32>
      %126 = arith.addf %122, %125 : vector<2x8x64xf32>
      %cst_127 = arith.constant 0.000000e+00 : f32
      %127 = vector.broadcast %cst_127 : f32 to vector<2x8x64xf32>
      %128 = arith.maximumf %126, %127 : vector<2x8x64xf32>
      %129 = arith.truncf %128 : vector<2x8x64xf32> to vector<2x8x64xbf16>
      %c0_128 = arith.constant 0 : index
      %c0_129 = arith.constant 0 : index
      %c0_130 = arith.constant 0 : index
      %c0_131 = arith.constant 0 : index
      %130 = vector.load %arg6[%c0_128, %c0_129, %c0_130, %c0_131] : memref<2x1x8x64xbf16, #tpu.memory_space<vmem>>, vector<2x1x8x64xbf16>
      %131 = vector.shape_cast %130 : vector<2x1x8x64xbf16> to vector<2x8x64xbf16>
      %132 = vector.shape_cast %129 : vector<2x8x64xbf16> to vector<2x1x8x64xbf16>
      tpu.vector_store %arg6[%c0_128, %c0_129, %c0_130, %c0_131], %132 {strides = array<i32>} : memref<2x1x8x64xbf16, #tpu.memory_space<vmem>>, vector<2x1x8x64xbf16>,
    } else {
    }
    return
  }
  func.func @transform_0(%arg0: i32, %arg1: i32) -> (i32, i32, i32, i32) {
    %0 = arith.addi %arg0, %arg1 : i32
    %c0_i32 = arith.constant 0 : i32
    %c0_i32_0 = arith.constant 0 : i32
    %c0_i32_1 = arith.constant 0 : i32
    %c0_i32_2 = arith.constant 0 : i32
    return %c0_i32, %0, %c0_i32_0, %c0_i32_1 : i32, i32, i32, i32
  }
  func.func @transform_1(%arg0: i32, %arg1: i32) -> (i32, i32, i32, i32) {
    %c0_i32 = arith.constant 0 : i32
    %c0_i32_0 = arith.constant 0 : i32
    %c0_i32_1 = arith.constant 0 : i32
    %c0_i32_2 = arith.constant 0 : i32
    %c0_i32_3 = arith.constant 0 : i32
    return %c0_i32, %c0_i32_0, %c0_i32_1, %c0_i32_2 : i32, i32, i32, i32
  }
  func.func @transform_2(%arg0: i32, %arg1: i32) -> (i32, i32) {
    %c0_i32 = arith.constant 0 : i32
    %c0_i32_0 = arith.constant 0 : i32
    %c0_i32_1 = arith.constant 0 : i32
    return %c0_i32, %c0_i32_0 : i32, i32
  }
  func.func @transform_3(%arg0: i32, %arg1: i32) -> (i32, i32) {
    %c0_i32 = arith.constant 0 : i32
    %c0_i32_0 = arith.constant 0 : i32
    %c0_i32_1 = arith.constant 0 : i32
    return %c0_i32, %c0_i32_0 : i32, i32
  }
  func.func @transform_4(%arg0: i32, %arg1: i32) -> (i32, i32, i32, i32) {
    %c0_i32 = arith.constant 0 : i32
    %c0_i32_0 = arith.constant 0 : i32
    %c0_i32_1 = arith.constant 0 : i32
    %c0_i32_2 = arith.constant 0 : i32
    return %c0_i32, %arg0, %c0_i32_0, %c0_i32_1 : i32, i32, i32, i32
  }
}

module attributes {stable_mosaic.version = 11 : i64} {
  func.func @_maxpool_kernel(%arg0: i32, %arg1: memref<2x2x4x128xbf16, #tpu.memory_space<vmem>>, %arg2: memref<2x1x4x64xbf16, #tpu.memory_space<vmem>>) attributes {dimension_semantics = [#tpu.dimension_semantics<parallel>], iteration_bounds = array<i64: 4>, scalar_prefetch = 0 : i64, scratch_operands = 0 : i64, tpu.core_type = #tpu.core_type<tc>, window_params = [{transform_indices = @transform_0, window_bounds = array<i64: 2, 2, 4, 128>}, {transform_indices = @transform_1, window_bounds = array<i64: 2, 1, 4, 64>}]} {
    %c0 = arith.constant 0 : index
    %c0_0 = arith.constant 0 : index
    %c0_1 = arith.constant 0 : index
    %c0_2 = arith.constant 0 : index
    %0 = vector.load %arg1[%c0, %c0_0, %c0_1, %c0_2] : memref<2x2x4x128xbf16, #tpu.memory_space<vmem>>, vector<2x1x4x128xbf16>
    %1 = vector.shape_cast %0 : vector<2x1x4x128xbf16> to vector<2x4x128xbf16>
    %c0_3 = arith.constant 0 : index
    %c1 = arith.constant 1 : index
    %c0_4 = arith.constant 0 : index
    %c0_5 = arith.constant 0 : index
    %2 = vector.load %arg1[%c0_3, %c1, %c0_4, %c0_5] : memref<2x2x4x128xbf16, #tpu.memory_space<vmem>>, vector<2x1x4x128xbf16>
    %3 = vector.shape_cast %2 : vector<2x1x4x128xbf16> to vector<2x4x128xbf16>
    %4 = arith.maximumf %1, %3 : vector<2x4x128xbf16>
    %5 = vector.extract_strided_slice %4 {offsets = [0, 0, 0], sizes = [2, 4, 64], strides = [1, 1, 1]} : vector<2x4x128xbf16> to vector<2x4x64xbf16>
    %6 = vector.extract_strided_slice %4 {offsets = [0, 0, 64], sizes = [2, 4, 64], strides = [1, 1, 1]} : vector<2x4x128xbf16> to vector<2x4x64xbf16>
    %7 = arith.maximumf %5, %6 : vector<2x4x64xbf16>
    %c0_6 = arith.constant 0 : index
    %c0_7 = arith.constant 0 : index
    %c0_8 = arith.constant 0 : index
    %c0_9 = arith.constant 0 : index
    %8 = vector.load %arg2[%c0_6, %c0_7, %c0_8, %c0_9] : memref<2x1x4x64xbf16, #tpu.memory_space<vmem>>, vector<2x1x4x64xbf16>
    %9 = vector.shape_cast %8 : vector<2x1x4x64xbf16> to vector<2x4x64xbf16>
    %10 = vector.shape_cast %7 : vector<2x4x64xbf16> to vector<2x1x4x64xbf16>
    tpu.vector_store %arg2[%c0_6, %c0_7, %c0_8, %c0_9], %10 {strides = array<i32>} : memref<2x1x4x64xbf16, #tpu.memory_space<vmem>>, vector<2x1x4x64xbf16>,
    return
  }
  func.func @transform_0(%arg0: i32) -> (i32, i32, i32, i32) {
    %c0_i32 = arith.constant 0 : i32
    %c0_i32_0 = arith.constant 0 : i32
    %c0_i32_1 = arith.constant 0 : i32
    %c0_i32_2 = arith.constant 0 : i32
    return %c0_i32, %arg0, %c0_i32_0, %c0_i32_1 : i32, i32, i32, i32
  }
  func.func @transform_1(%arg0: i32) -> (i32, i32, i32, i32) {
    %c0_i32 = arith.constant 0 : i32
    %c0_i32_0 = arith.constant 0 : i32
    %c0_i32_1 = arith.constant 0 : i32
    %c0_i32_2 = arith.constant 0 : i32
    return %c0_i32, %arg0, %c0_i32_0, %c0_i32_1 : i32, i32, i32, i32
  }
}

module attributes {stable_mosaic.version = 11 : i64} {
  func.func @_conv_row_kernel(%arg0: i32, %arg1: i32, %arg2: memref<2x1x12x64xbf16, #tpu.memory_space<vmem>>, %arg3: memref<9x9x64x32xbf16, #tpu.memory_space<vmem>>, %arg4: memref<1x32xf32, #tpu.memory_space<vmem>>, %arg5: memref<1x32xf32, #tpu.memory_space<vmem>>, %arg6: memref<2x1x4x32xbf16, #tpu.memory_space<vmem>>, %arg7: memref<2x4x32xf32, #tpu.memory_space<vmem>>) attributes {dimension_semantics = [#tpu.dimension_semantics<parallel>, #tpu.dimension_semantics<arbitrary>], iteration_bounds = array<i64: 4, 9>, scalar_prefetch = 0 : i64, scratch_operands = 1 : i64, tpu.core_type = #tpu.core_type<tc>, window_params = [{transform_indices = @transform_0, window_bounds = array<i64: 2, 1, 12, 64>}, {pipeline_mode = #tpu.pipeline_mode<synchronous>, transform_indices = @transform_1, window_bounds = array<i64: 9, 9, 64, 32>}, {pipeline_mode = #tpu.pipeline_mode<synchronous>, transform_indices = @transform_2, window_bounds = array<i64: 1, 32>}, {pipeline_mode = #tpu.pipeline_mode<synchronous>, transform_indices = @transform_3, window_bounds = array<i64: 1, 32>}, {transform_indices = @transform_4, window_bounds = array<i64: 2, 1, 4, 32>}]} {
    %c0_i32 = arith.constant 0 : i32
    %0 = arith.cmpi eq, %arg1, %c0_i32 : i32
    %1 = arith.extui %0 : i1 to i32
    %c0_i32_0 = arith.constant 0 : i32
    %2 = arith.cmpi ne, %1, %c0_i32_0 : i32
    scf.if %2 {
      %cst_150 = arith.constant 0.000000e+00 : f32
      %146 = vector.broadcast %cst_150 : f32 to vector<2x4x32xf32>
      %c0_151 = arith.constant 0 : index
      %c0_152 = arith.constant 0 : index
      %c0_153 = arith.constant 0 : index
      %147 = vector.load %arg7[%c0_151, %c0_152, %c0_153] : memref<2x4x32xf32, #tpu.memory_space<vmem>>, vector<2x4x32xf32>
      tpu.vector_store %arg7[%c0_151, %c0_152, %c0_153], %146 {strides = array<i32>} : memref<2x4x32xf32, #tpu.memory_space<vmem>>, vector<2x4x32xf32>,
    } else {
    }
    %cst = arith.constant 0.000000e+00 : f32
    %3 = vector.broadcast %cst : f32 to vector<4x32xf32>
    %c0 = arith.constant 0 : index
    %c0_1 = arith.constant 0 : index
    %c0_2 = arith.constant 0 : index
    %c0_3 = arith.constant 0 : index
    %4 = vector.load %arg2[%c0, %c0_1, %c0_2, %c0_3] : memref<2x1x12x64xbf16, #tpu.memory_space<vmem>>, vector<1x1x4x64xbf16>
    %5 = vector.shape_cast %4 : vector<1x1x4x64xbf16> to vector<4x64xbf16>
    %6 = arith.index_cast %arg1 : i32 to index
    %c0_4 = arith.constant 0 : index
    %c0_5 = arith.constant 0 : index
    %c0_6 = arith.constant 0 : index
    %7 = vector.load %arg3[%6, %c0_4, %c0_5, %c0_6] : memref<9x9x64x32xbf16, #tpu.memory_space<vmem>>, vector<1x1x64x32xbf16>
    %8 = vector.shape_cast %7 : vector<1x1x64x32xbf16> to vector<64x32xbf16>
    %cst_7 = arith.constant dense<0.000000e+00> : vector<4x32xf32>
    %9 = tpu.matmul %5, %8, %cst_7 {dimension_numbers = #tpu.dot_dimension_numbers<[1], [0], [0], [1], [0, 0, 1, 1], [], []>} : vector<4x64xbf16>, vector<64x32xbf16>, vector<4x32xf32> -> vector<4x32xf32>
    %10 = arith.addf %3, %9 : vector<4x32xf32>
    %c0_8 = arith.constant 0 : index
    %c0_9 = arith.constant 0 : index
    %c1 = arith.constant 1 : index
    %c0_10 = arith.constant 0 : index
    %11 = vector.load %arg2[%c0_8, %c0_9, %c1, %c0_10] : memref<2x1x12x64xbf16, #tpu.memory_space<vmem>>, vector<1x1x4x64xbf16>
    %12 = vector.shape_cast %11 : vector<1x1x4x64xbf16> to vector<4x64xbf16>
    %13 = arith.index_cast %arg1 : i32 to index
    %c1_11 = arith.constant 1 : index
    %c0_12 = arith.constant 0 : index
    %c0_13 = arith.constant 0 : index
    %14 = vector.load %arg3[%13, %c1_11, %c0_12, %c0_13] : memref<9x9x64x32xbf16, #tpu.memory_space<vmem>>, vector<1x1x64x32xbf16>
    %15 = vector.shape_cast %14 : vector<1x1x64x32xbf16> to vector<64x32xbf16>
    %cst_14 = arith.constant dense<0.000000e+00> : vector<4x32xf32>
    %16 = tpu.matmul %12, %15, %cst_14 {dimension_numbers = #tpu.dot_dimension_numbers<[1], [0], [0], [1], [0, 0, 1, 1], [], []>} : vector<4x64xbf16>, vector<64x32xbf16>, vector<4x32xf32> -> vector<4x32xf32>
    %17 = arith.addf %10, %16 : vector<4x32xf32>
    %c0_15 = arith.constant 0 : index
    %c0_16 = arith.constant 0 : index
    %c2 = arith.constant 2 : index
    %c0_17 = arith.constant 0 : index
    %18 = vector.load %arg2[%c0_15, %c0_16, %c2, %c0_17] : memref<2x1x12x64xbf16, #tpu.memory_space<vmem>>, vector<1x1x4x64xbf16>
    %19 = vector.shape_cast %18 : vector<1x1x4x64xbf16> to vector<4x64xbf16>
    %20 = arith.index_cast %arg1 : i32 to index
    %c2_18 = arith.constant 2 : index
    %c0_19 = arith.constant 0 : index
    %c0_20 = arith.constant 0 : index
    %21 = vector.load %arg3[%20, %c2_18, %c0_19, %c0_20] : memref<9x9x64x32xbf16, #tpu.memory_space<vmem>>, vector<1x1x64x32xbf16>
    %22 = vector.shape_cast %21 : vector<1x1x64x32xbf16> to vector<64x32xbf16>
    %cst_21 = arith.constant dense<0.000000e+00> : vector<4x32xf32>
    %23 = tpu.matmul %19, %22, %cst_21 {dimension_numbers = #tpu.dot_dimension_numbers<[1], [0], [0], [1], [0, 0, 1, 1], [], []>} : vector<4x64xbf16>, vector<64x32xbf16>, vector<4x32xf32> -> vector<4x32xf32>
    %24 = arith.addf %17, %23 : vector<4x32xf32>
    %c0_22 = arith.constant 0 : index
    %c0_23 = arith.constant 0 : index
    %c3 = arith.constant 3 : index
    %c0_24 = arith.constant 0 : index
    %25 = vector.load %arg2[%c0_22, %c0_23, %c3, %c0_24] : memref<2x1x12x64xbf16, #tpu.memory_space<vmem>>, vector<1x1x4x64xbf16>
    %26 = vector.shape_cast %25 : vector<1x1x4x64xbf16> to vector<4x64xbf16>
    %27 = arith.index_cast %arg1 : i32 to index
    %c3_25 = arith.constant 3 : index
    %c0_26 = arith.constant 0 : index
    %c0_27 = arith.constant 0 : index
    %28 = vector.load %arg3[%27, %c3_25, %c0_26, %c0_27] : memref<9x9x64x32xbf16, #tpu.memory_space<vmem>>, vector<1x1x64x32xbf16>
    %29 = vector.shape_cast %28 : vector<1x1x64x32xbf16> to vector<64x32xbf16>
    %cst_28 = arith.constant dense<0.000000e+00> : vector<4x32xf32>
    %30 = tpu.matmul %26, %29, %cst_28 {dimension_numbers = #tpu.dot_dimension_numbers<[1], [0], [0], [1], [0, 0, 1, 1], [], []>} : vector<4x64xbf16>, vector<64x32xbf16>, vector<4x32xf32> -> vector<4x32xf32>
    %31 = arith.addf %24, %30 : vector<4x32xf32>
    %c0_29 = arith.constant 0 : index
    %c0_30 = arith.constant 0 : index
    %c4 = arith.constant 4 : index
    %c0_31 = arith.constant 0 : index
    %32 = vector.load %arg2[%c0_29, %c0_30, %c4, %c0_31] : memref<2x1x12x64xbf16, #tpu.memory_space<vmem>>, vector<1x1x4x64xbf16>
    %33 = vector.shape_cast %32 : vector<1x1x4x64xbf16> to vector<4x64xbf16>
    %34 = arith.index_cast %arg1 : i32 to index
    %c4_32 = arith.constant 4 : index
    %c0_33 = arith.constant 0 : index
    %c0_34 = arith.constant 0 : index
    %35 = vector.load %arg3[%34, %c4_32, %c0_33, %c0_34] : memref<9x9x64x32xbf16, #tpu.memory_space<vmem>>, vector<1x1x64x32xbf16>
    %36 = vector.shape_cast %35 : vector<1x1x64x32xbf16> to vector<64x32xbf16>
    %cst_35 = arith.constant dense<0.000000e+00> : vector<4x32xf32>
    %37 = tpu.matmul %33, %36, %cst_35 {dimension_numbers = #tpu.dot_dimension_numbers<[1], [0], [0], [1], [0, 0, 1, 1], [], []>} : vector<4x64xbf16>, vector<64x32xbf16>, vector<4x32xf32> -> vector<4x32xf32>
    %38 = arith.addf %31, %37 : vector<4x32xf32>
    %c0_36 = arith.constant 0 : index
    %c0_37 = arith.constant 0 : index
    %c5 = arith.constant 5 : index
    %c0_38 = arith.constant 0 : index
    %39 = vector.load %arg2[%c0_36, %c0_37, %c5, %c0_38] : memref<2x1x12x64xbf16, #tpu.memory_space<vmem>>, vector<1x1x4x64xbf16>
    %40 = vector.shape_cast %39 : vector<1x1x4x64xbf16> to vector<4x64xbf16>
    %41 = arith.index_cast %arg1 : i32 to index
    %c5_39 = arith.constant 5 : index
    %c0_40 = arith.constant 0 : index
    %c0_41 = arith.constant 0 : index
    %42 = vector.load %arg3[%41, %c5_39, %c0_40, %c0_41] : memref<9x9x64x32xbf16, #tpu.memory_space<vmem>>, vector<1x1x64x32xbf16>
    %43 = vector.shape_cast %42 : vector<1x1x64x32xbf16> to vector<64x32xbf16>
    %cst_42 = arith.constant dense<0.000000e+00> : vector<4x32xf32>
    %44 = tpu.matmul %40, %43, %cst_42 {dimension_numbers = #tpu.dot_dimension_numbers<[1], [0], [0], [1], [0, 0, 1, 1], [], []>} : vector<4x64xbf16>, vector<64x32xbf16>, vector<4x32xf32> -> vector<4x32xf32>
    %45 = arith.addf %38, %44 : vector<4x32xf32>
    %c0_43 = arith.constant 0 : index
    %c0_44 = arith.constant 0 : index
    %c6 = arith.constant 6 : index
    %c0_45 = arith.constant 0 : index
    %46 = vector.load %arg2[%c0_43, %c0_44, %c6, %c0_45] : memref<2x1x12x64xbf16, #tpu.memory_space<vmem>>, vector<1x1x4x64xbf16>
    %47 = vector.shape_cast %46 : vector<1x1x4x64xbf16> to vector<4x64xbf16>
    %48 = arith.index_cast %arg1 : i32 to index
    %c6_46 = arith.constant 6 : index
    %c0_47 = arith.constant 0 : index
    %c0_48 = arith.constant 0 : index
    %49 = vector.load %arg3[%48, %c6_46, %c0_47, %c0_48] : memref<9x9x64x32xbf16, #tpu.memory_space<vmem>>, vector<1x1x64x32xbf16>
    %50 = vector.shape_cast %49 : vector<1x1x64x32xbf16> to vector<64x32xbf16>
    %cst_49 = arith.constant dense<0.000000e+00> : vector<4x32xf32>
    %51 = tpu.matmul %47, %50, %cst_49 {dimension_numbers = #tpu.dot_dimension_numbers<[1], [0], [0], [1], [0, 0, 1, 1], [], []>} : vector<4x64xbf16>, vector<64x32xbf16>, vector<4x32xf32> -> vector<4x32xf32>
    %52 = arith.addf %45, %51 : vector<4x32xf32>
    %c0_50 = arith.constant 0 : index
    %c0_51 = arith.constant 0 : index
    %c7 = arith.constant 7 : index
    %c0_52 = arith.constant 0 : index
    %53 = vector.load %arg2[%c0_50, %c0_51, %c7, %c0_52] : memref<2x1x12x64xbf16, #tpu.memory_space<vmem>>, vector<1x1x4x64xbf16>
    %54 = vector.shape_cast %53 : vector<1x1x4x64xbf16> to vector<4x64xbf16>
    %55 = arith.index_cast %arg1 : i32 to index
    %c7_53 = arith.constant 7 : index
    %c0_54 = arith.constant 0 : index
    %c0_55 = arith.constant 0 : index
    %56 = vector.load %arg3[%55, %c7_53, %c0_54, %c0_55] : memref<9x9x64x32xbf16, #tpu.memory_space<vmem>>, vector<1x1x64x32xbf16>
    %57 = vector.shape_cast %56 : vector<1x1x64x32xbf16> to vector<64x32xbf16>
    %cst_56 = arith.constant dense<0.000000e+00> : vector<4x32xf32>
    %58 = tpu.matmul %54, %57, %cst_56 {dimension_numbers = #tpu.dot_dimension_numbers<[1], [0], [0], [1], [0, 0, 1, 1], [], []>} : vector<4x64xbf16>, vector<64x32xbf16>, vector<4x32xf32> -> vector<4x32xf32>
    %59 = arith.addf %52, %58 : vector<4x32xf32>
    %c0_57 = arith.constant 0 : index
    %c0_58 = arith.constant 0 : index
    %c8 = arith.constant 8 : index
    %c0_59 = arith.constant 0 : index
    %60 = vector.load %arg2[%c0_57, %c0_58, %c8, %c0_59] : memref<2x1x12x64xbf16, #tpu.memory_space<vmem>>, vector<1x1x4x64xbf16>
    %61 = vector.shape_cast %60 : vector<1x1x4x64xbf16> to vector<4x64xbf16>
    %62 = arith.index_cast %arg1 : i32 to index
    %c8_60 = arith.constant 8 : index
    %c0_61 = arith.constant 0 : index
    %c0_62 = arith.constant 0 : index
    %63 = vector.load %arg3[%62, %c8_60, %c0_61, %c0_62] : memref<9x9x64x32xbf16, #tpu.memory_space<vmem>>, vector<1x1x64x32xbf16>
    %64 = vector.shape_cast %63 : vector<1x1x64x32xbf16> to vector<64x32xbf16>
    %cst_63 = arith.constant dense<0.000000e+00> : vector<4x32xf32>
    %65 = tpu.matmul %61, %64, %cst_63 {dimension_numbers = #tpu.dot_dimension_numbers<[1], [0], [0], [1], [0, 0, 1, 1], [], []>} : vector<4x64xbf16>, vector<64x32xbf16>, vector<4x32xf32> -> vector<4x32xf32>
    %66 = arith.addf %59, %65 : vector<4x32xf32>
    %c0_64 = arith.constant 0 : index
    %c0_65 = arith.constant 0 : index
    %c0_66 = arith.constant 0 : index
    %67 = vector.load %arg7[%c0_64, %c0_65, %c0_66] : memref<2x4x32xf32, #tpu.memory_space<vmem>>, vector<1x4x32xf32>
    %68 = vector.shape_cast %67 : vector<1x4x32xf32> to vector<4x32xf32>
    %69 = arith.addf %68, %66 : vector<4x32xf32>
    %c0_67 = arith.constant 0 : index
    %c0_68 = arith.constant 0 : index
    %c0_69 = arith.constant 0 : index
    %70 = vector.load %arg7[%c0_67, %c0_68, %c0_69] : memref<2x4x32xf32, #tpu.memory_space<vmem>>, vector<1x4x32xf32>
    %71 = vector.shape_cast %70 : vector<1x4x32xf32> to vector<4x32xf32>
    %72 = vector.shape_cast %69 : vector<4x32xf32> to vector<1x4x32xf32>
    tpu.vector_store %arg7[%c0_67, %c0_68, %c0_69], %72 {strides = array<i32>} : memref<2x4x32xf32, #tpu.memory_space<vmem>>, vector<1x4x32xf32>,
    %cst_70 = arith.constant 0.000000e+00 : f32
    %73 = vector.broadcast %cst_70 : f32 to vector<4x32xf32>
    %c1_71 = arith.constant 1 : index
    %c0_72 = arith.constant 0 : index
    %c0_73 = arith.constant 0 : index
    %c0_74 = arith.constant 0 : index
    %74 = vector.load %arg2[%c1_71, %c0_72, %c0_73, %c0_74] : memref<2x1x12x64xbf16, #tpu.memory_space<vmem>>, vector<1x1x4x64xbf16>
    %75 = vector.shape_cast %74 : vector<1x1x4x64xbf16> to vector<4x64xbf16>
    %76 = arith.index_cast %arg1 : i32 to index
    %c0_75 = arith.constant 0 : index
    %c0_76 = arith.constant 0 : index
    %c0_77 = arith.constant 0 : index
    %77 = vector.load %arg3[%76, %c0_75, %c0_76, %c0_77] : memref<9x9x64x32xbf16, #tpu.memory_space<vmem>>, vector<1x1x64x32xbf16>
    %78 = vector.shape_cast %77 : vector<1x1x64x32xbf16> to vector<64x32xbf16>
    %cst_78 = arith.constant dense<0.000000e+00> : vector<4x32xf32>
    %79 = tpu.matmul %75, %78, %cst_78 {dimension_numbers = #tpu.dot_dimension_numbers<[1], [0], [0], [1], [0, 0, 1, 1], [], []>} : vector<4x64xbf16>, vector<64x32xbf16>, vector<4x32xf32> -> vector<4x32xf32>
    %80 = arith.addf %73, %79 : vector<4x32xf32>
    %c1_79 = arith.constant 1 : index
    %c0_80 = arith.constant 0 : index
    %c1_81 = arith.constant 1 : index
    %c0_82 = arith.constant 0 : index
    %81 = vector.load %arg2[%c1_79, %c0_80, %c1_81, %c0_82] : memref<2x1x12x64xbf16, #tpu.memory_space<vmem>>, vector<1x1x4x64xbf16>
    %82 = vector.shape_cast %81 : vector<1x1x4x64xbf16> to vector<4x64xbf16>
    %83 = arith.index_cast %arg1 : i32 to index
    %c1_83 = arith.constant 1 : index
    %c0_84 = arith.constant 0 : index
    %c0_85 = arith.constant 0 : index
    %84 = vector.load %arg3[%83, %c1_83, %c0_84, %c0_85] : memref<9x9x64x32xbf16, #tpu.memory_space<vmem>>, vector<1x1x64x32xbf16>
    %85 = vector.shape_cast %84 : vector<1x1x64x32xbf16> to vector<64x32xbf16>
    %cst_86 = arith.constant dense<0.000000e+00> : vector<4x32xf32>
    %86 = tpu.matmul %82, %85, %cst_86 {dimension_numbers = #tpu.dot_dimension_numbers<[1], [0], [0], [1], [0, 0, 1, 1], [], []>} : vector<4x64xbf16>, vector<64x32xbf16>, vector<4x32xf32> -> vector<4x32xf32>
    %87 = arith.addf %80, %86 : vector<4x32xf32>
    %c1_87 = arith.constant 1 : index
    %c0_88 = arith.constant 0 : index
    %c2_89 = arith.constant 2 : index
    %c0_90 = arith.constant 0 : index
    %88 = vector.load %arg2[%c1_87, %c0_88, %c2_89, %c0_90] : memref<2x1x12x64xbf16, #tpu.memory_space<vmem>>, vector<1x1x4x64xbf16>
    %89 = vector.shape_cast %88 : vector<1x1x4x64xbf16> to vector<4x64xbf16>
    %90 = arith.index_cast %arg1 : i32 to index
    %c2_91 = arith.constant 2 : index
    %c0_92 = arith.constant 0 : index
    %c0_93 = arith.constant 0 : index
    %91 = vector.load %arg3[%90, %c2_91, %c0_92, %c0_93] : memref<9x9x64x32xbf16, #tpu.memory_space<vmem>>, vector<1x1x64x32xbf16>
    %92 = vector.shape_cast %91 : vector<1x1x64x32xbf16> to vector<64x32xbf16>
    %cst_94 = arith.constant dense<0.000000e+00> : vector<4x32xf32>
    %93 = tpu.matmul %89, %92, %cst_94 {dimension_numbers = #tpu.dot_dimension_numbers<[1], [0], [0], [1], [0, 0, 1, 1], [], []>} : vector<4x64xbf16>, vector<64x32xbf16>, vector<4x32xf32> -> vector<4x32xf32>
    %94 = arith.addf %87, %93 : vector<4x32xf32>
    %c1_95 = arith.constant 1 : index
    %c0_96 = arith.constant 0 : index
    %c3_97 = arith.constant 3 : index
    %c0_98 = arith.constant 0 : index
    %95 = vector.load %arg2[%c1_95, %c0_96, %c3_97, %c0_98] : memref<2x1x12x64xbf16, #tpu.memory_space<vmem>>, vector<1x1x4x64xbf16>
    %96 = vector.shape_cast %95 : vector<1x1x4x64xbf16> to vector<4x64xbf16>
    %97 = arith.index_cast %arg1 : i32 to index
    %c3_99 = arith.constant 3 : index
    %c0_100 = arith.constant 0 : index
    %c0_101 = arith.constant 0 : index
    %98 = vector.load %arg3[%97, %c3_99, %c0_100, %c0_101] : memref<9x9x64x32xbf16, #tpu.memory_space<vmem>>, vector<1x1x64x32xbf16>
    %99 = vector.shape_cast %98 : vector<1x1x64x32xbf16> to vector<64x32xbf16>
    %cst_102 = arith.constant dense<0.000000e+00> : vector<4x32xf32>
    %100 = tpu.matmul %96, %99, %cst_102 {dimension_numbers = #tpu.dot_dimension_numbers<[1], [0], [0], [1], [0, 0, 1, 1], [], []>} : vector<4x64xbf16>, vector<64x32xbf16>, vector<4x32xf32> -> vector<4x32xf32>
    %101 = arith.addf %94, %100 : vector<4x32xf32>
    %c1_103 = arith.constant 1 : index
    %c0_104 = arith.constant 0 : index
    %c4_105 = arith.constant 4 : index
    %c0_106 = arith.constant 0 : index
    %102 = vector.load %arg2[%c1_103, %c0_104, %c4_105, %c0_106] : memref<2x1x12x64xbf16, #tpu.memory_space<vmem>>, vector<1x1x4x64xbf16>
    %103 = vector.shape_cast %102 : vector<1x1x4x64xbf16> to vector<4x64xbf16>
    %104 = arith.index_cast %arg1 : i32 to index
    %c4_107 = arith.constant 4 : index
    %c0_108 = arith.constant 0 : index
    %c0_109 = arith.constant 0 : index
    %105 = vector.load %arg3[%104, %c4_107, %c0_108, %c0_109] : memref<9x9x64x32xbf16, #tpu.memory_space<vmem>>, vector<1x1x64x32xbf16>
    %106 = vector.shape_cast %105 : vector<1x1x64x32xbf16> to vector<64x32xbf16>
    %cst_110 = arith.constant dense<0.000000e+00> : vector<4x32xf32>
    %107 = tpu.matmul %103, %106, %cst_110 {dimension_numbers = #tpu.dot_dimension_numbers<[1], [0], [0], [1], [0, 0, 1, 1], [], []>} : vector<4x64xbf16>, vector<64x32xbf16>, vector<4x32xf32> -> vector<4x32xf32>
    %108 = arith.addf %101, %107 : vector<4x32xf32>
    %c1_111 = arith.constant 1 : index
    %c0_112 = arith.constant 0 : index
    %c5_113 = arith.constant 5 : index
    %c0_114 = arith.constant 0 : index
    %109 = vector.load %arg2[%c1_111, %c0_112, %c5_113, %c0_114] : memref<2x1x12x64xbf16, #tpu.memory_space<vmem>>, vector<1x1x4x64xbf16>
    %110 = vector.shape_cast %109 : vector<1x1x4x64xbf16> to vector<4x64xbf16>
    %111 = arith.index_cast %arg1 : i32 to index
    %c5_115 = arith.constant 5 : index
    %c0_116 = arith.constant 0 : index
    %c0_117 = arith.constant 0 : index
    %112 = vector.load %arg3[%111, %c5_115, %c0_116, %c0_117] : memref<9x9x64x32xbf16, #tpu.memory_space<vmem>>, vector<1x1x64x32xbf16>
    %113 = vector.shape_cast %112 : vector<1x1x64x32xbf16> to vector<64x32xbf16>
    %cst_118 = arith.constant dense<0.000000e+00> : vector<4x32xf32>
    %114 = tpu.matmul %110, %113, %cst_118 {dimension_numbers = #tpu.dot_dimension_numbers<[1], [0], [0], [1], [0, 0, 1, 1], [], []>} : vector<4x64xbf16>, vector<64x32xbf16>, vector<4x32xf32> -> vector<4x32xf32>
    %115 = arith.addf %108, %114 : vector<4x32xf32>
    %c1_119 = arith.constant 1 : index
    %c0_120 = arith.constant 0 : index
    %c6_121 = arith.constant 6 : index
    %c0_122 = arith.constant 0 : index
    %116 = vector.load %arg2[%c1_119, %c0_120, %c6_121, %c0_122] : memref<2x1x12x64xbf16, #tpu.memory_space<vmem>>, vector<1x1x4x64xbf16>
    %117 = vector.shape_cast %116 : vector<1x1x4x64xbf16> to vector<4x64xbf16>
    %118 = arith.index_cast %arg1 : i32 to index
    %c6_123 = arith.constant 6 : index
    %c0_124 = arith.constant 0 : index
    %c0_125 = arith.constant 0 : index
    %119 = vector.load %arg3[%118, %c6_123, %c0_124, %c0_125] : memref<9x9x64x32xbf16, #tpu.memory_space<vmem>>, vector<1x1x64x32xbf16>
    %120 = vector.shape_cast %119 : vector<1x1x64x32xbf16> to vector<64x32xbf16>
    %cst_126 = arith.constant dense<0.000000e+00> : vector<4x32xf32>
    %121 = tpu.matmul %117, %120, %cst_126 {dimension_numbers = #tpu.dot_dimension_numbers<[1], [0], [0], [1], [0, 0, 1, 1], [], []>} : vector<4x64xbf16>, vector<64x32xbf16>, vector<4x32xf32> -> vector<4x32xf32>
    %122 = arith.addf %115, %121 : vector<4x32xf32>
    %c1_127 = arith.constant 1 : index
    %c0_128 = arith.constant 0 : index
    %c7_129 = arith.constant 7 : index
    %c0_130 = arith.constant 0 : index
    %123 = vector.load %arg2[%c1_127, %c0_128, %c7_129, %c0_130] : memref<2x1x12x64xbf16, #tpu.memory_space<vmem>>, vector<1x1x4x64xbf16>
    %124 = vector.shape_cast %123 : vector<1x1x4x64xbf16> to vector<4x64xbf16>
    %125 = arith.index_cast %arg1 : i32 to index
    %c7_131 = arith.constant 7 : index
    %c0_132 = arith.constant 0 : index
    %c0_133 = arith.constant 0 : index
    %126 = vector.load %arg3[%125, %c7_131, %c0_132, %c0_133] : memref<9x9x64x32xbf16, #tpu.memory_space<vmem>>, vector<1x1x64x32xbf16>
    %127 = vector.shape_cast %126 : vector<1x1x64x32xbf16> to vector<64x32xbf16>
    %cst_134 = arith.constant dense<0.000000e+00> : vector<4x32xf32>
    %128 = tpu.matmul %124, %127, %cst_134 {dimension_numbers = #tpu.dot_dimension_numbers<[1], [0], [0], [1], [0, 0, 1, 1], [], []>} : vector<4x64xbf16>, vector<64x32xbf16>, vector<4x32xf32> -> vector<4x32xf32>
    %129 = arith.addf %122, %128 : vector<4x32xf32>
    %c1_135 = arith.constant 1 : index
    %c0_136 = arith.constant 0 : index
    %c8_137 = arith.constant 8 : index
    %c0_138 = arith.constant 0 : index
    %130 = vector.load %arg2[%c1_135, %c0_136, %c8_137, %c0_138] : memref<2x1x12x64xbf16, #tpu.memory_space<vmem>>, vector<1x1x4x64xbf16>
    %131 = vector.shape_cast %130 : vector<1x1x4x64xbf16> to vector<4x64xbf16>
    %132 = arith.index_cast %arg1 : i32 to index
    %c8_139 = arith.constant 8 : index
    %c0_140 = arith.constant 0 : index
    %c0_141 = arith.constant 0 : index
    %133 = vector.load %arg3[%132, %c8_139, %c0_140, %c0_141] : memref<9x9x64x32xbf16, #tpu.memory_space<vmem>>, vector<1x1x64x32xbf16>
    %134 = vector.shape_cast %133 : vector<1x1x64x32xbf16> to vector<64x32xbf16>
    %cst_142 = arith.constant dense<0.000000e+00> : vector<4x32xf32>
    %135 = tpu.matmul %131, %134, %cst_142 {dimension_numbers = #tpu.dot_dimension_numbers<[1], [0], [0], [1], [0, 0, 1, 1], [], []>} : vector<4x64xbf16>, vector<64x32xbf16>, vector<4x32xf32> -> vector<4x32xf32>
    %136 = arith.addf %129, %135 : vector<4x32xf32>
    %c1_143 = arith.constant 1 : index
    %c0_144 = arith.constant 0 : index
    %c0_145 = arith.constant 0 : index
    %137 = vector.load %arg7[%c1_143, %c0_144, %c0_145] : memref<2x4x32xf32, #tpu.memory_space<vmem>>, vector<1x4x32xf32>
    %138 = vector.shape_cast %137 : vector<1x4x32xf32> to vector<4x32xf32>
    %139 = arith.addf %138, %136 : vector<4x32xf32>
    %c1_146 = arith.constant 1 : index
    %c0_147 = arith.constant 0 : index
    %c0_148 = arith.constant 0 : index
    %140 = vector.load %arg7[%c1_146, %c0_147, %c0_148] : memref<2x4x32xf32, #tpu.memory_space<vmem>>, vector<1x4x32xf32>
    %141 = vector.shape_cast %140 : vector<1x4x32xf32> to vector<4x32xf32>
    %142 = vector.shape_cast %139 : vector<4x32xf32> to vector<1x4x32xf32>
    tpu.vector_store %arg7[%c1_146, %c0_147, %c0_148], %142 {strides = array<i32>} : memref<2x4x32xf32, #tpu.memory_space<vmem>>, vector<1x4x32xf32>,
    %c8_i32 = arith.constant 8 : i32
    %143 = arith.cmpi eq, %arg1, %c8_i32 : i32
    %144 = arith.extui %143 : i1 to i32
    %c0_i32_149 = arith.constant 0 : i32
    %145 = arith.cmpi ne, %144, %c0_i32_149 : i32
    scf.if %145 {
      %c0_150 = arith.constant 0 : index
      %c0_151 = arith.constant 0 : index
      %c0_152 = arith.constant 0 : index
      %146 = vector.load %arg7[%c0_150, %c0_151, %c0_152] : memref<2x4x32xf32, #tpu.memory_space<vmem>>, vector<2x4x32xf32>
      %c0_153 = arith.constant 0 : index
      %c0_154 = arith.constant 0 : index
      %147 = vector.load %arg4[%c0_153, %c0_154] : memref<1x32xf32, #tpu.memory_space<vmem>>, vector<1x32xf32>
      %148 = vector.shape_cast %147 : vector<1x32xf32> to vector<1x1x32xf32>
      %149 = vector.broadcast %148 : vector<1x1x32xf32> to vector<2x4x32xf32>
      %150 = arith.mulf %146, %149 : vector<2x4x32xf32>
      %c0_155 = arith.constant 0 : index
      %c0_156 = arith.constant 0 : index
      %151 = vector.load %arg5[%c0_155, %c0_156] : memref<1x32xf32, #tpu.memory_space<vmem>>, vector<1x32xf32>
      %152 = vector.shape_cast %151 : vector<1x32xf32> to vector<1x1x32xf32>
      %153 = vector.broadcast %152 : vector<1x1x32xf32> to vector<2x4x32xf32>
      %154 = arith.addf %150, %153 : vector<2x4x32xf32>
      %cst_157 = arith.constant 0.000000e+00 : f32
      %155 = vector.broadcast %cst_157 : f32 to vector<2x4x32xf32>
      %156 = arith.maximumf %154, %155 : vector<2x4x32xf32>
      %157 = arith.truncf %156 : vector<2x4x32xf32> to vector<2x4x32xbf16>
      %c0_158 = arith.constant 0 : index
      %c0_159 = arith.constant 0 : index
      %c0_160 = arith.constant 0 : index
      %c0_161 = arith.constant 0 : index
      %158 = vector.load %arg6[%c0_158, %c0_159, %c0_160, %c0_161] : memref<2x1x4x32xbf16, #tpu.memory_space<vmem>>, vector<2x1x4x32xbf16>
      %159 = vector.shape_cast %158 : vector<2x1x4x32xbf16> to vector<2x4x32xbf16>
      %160 = vector.shape_cast %157 : vector<2x4x32xbf16> to vector<2x1x4x32xbf16>
      tpu.vector_store %arg6[%c0_158, %c0_159, %c0_160, %c0_161], %160 {strides = array<i32>} : memref<2x1x4x32xbf16, #tpu.memory_space<vmem>>, vector<2x1x4x32xbf16>,
    } else {
    }
    return
  }
  func.func @transform_0(%arg0: i32, %arg1: i32) -> (i32, i32, i32, i32) {
    %0 = arith.addi %arg0, %arg1 : i32
    %c0_i32 = arith.constant 0 : i32
    %c0_i32_0 = arith.constant 0 : i32
    %c0_i32_1 = arith.constant 0 : i32
    %c0_i32_2 = arith.constant 0 : i32
    return %c0_i32, %0, %c0_i32_0, %c0_i32_1 : i32, i32, i32, i32
  }
  func.func @transform_1(%arg0: i32, %arg1: i32) -> (i32, i32, i32, i32) {
    %c0_i32 = arith.constant 0 : i32
    %c0_i32_0 = arith.constant 0 : i32
    %c0_i32_1 = arith.constant 0 : i32
    %c0_i32_2 = arith.constant 0 : i32
    %c0_i32_3 = arith.constant 0 : i32
    return %c0_i32, %c0_i32_0, %c0_i32_1, %c0_i32_2 : i32, i32, i32, i32
  }
  func.func @transform_2(%arg0: i32, %arg1: i32) -> (i32, i32) {
    %c0_i32 = arith.constant 0 : i32
    %c0_i32_0 = arith.constant 0 : i32
    %c0_i32_1 = arith.constant 0 : i32
    return %c0_i32, %c0_i32_0 : i32, i32
  }
  func.func @transform_3(%arg0: i32, %arg1: i32) -> (i32, i32) {
    %c0_i32 = arith.constant 0 : i32
    %c0_i32_0 = arith.constant 0 : i32
    %c0_i32_1 = arith.constant 0 : i32
    return %c0_i32, %c0_i32_0 : i32, i32
  }
  func.func @transform_4(%arg0: i32, %arg1: i32) -> (i32, i32, i32, i32) {
    %c0_i32 = arith.constant 0 : i32
    %c0_i32_0 = arith.constant 0 : i32
    %c0_i32_1 = arith.constant 0 : i32
    %c0_i32_2 = arith.constant 0 : i32
    return %c0_i32, %arg0, %c0_i32_0, %c0_i32_1 : i32, i32, i32, i32
  }
}

module attributes {stable_mosaic.version = 11 : i64} {
  func.func @_conv_row_kernel(%arg0: i32, %arg1: i32, %arg2: memref<2x1x10x32xbf16, #tpu.memory_space<vmem>>, %arg3: memref<7x7x32x32xbf16, #tpu.memory_space<vmem>>, %arg4: memref<1x32xf32, #tpu.memory_space<vmem>>, %arg5: memref<1x32xf32, #tpu.memory_space<vmem>>, %arg6: memref<2x1x4x32xbf16, #tpu.memory_space<vmem>>, %arg7: memref<2x4x32xf32, #tpu.memory_space<vmem>>) attributes {dimension_semantics = [#tpu.dimension_semantics<parallel>, #tpu.dimension_semantics<arbitrary>], iteration_bounds = array<i64: 4, 7>, scalar_prefetch = 0 : i64, scratch_operands = 1 : i64, tpu.core_type = #tpu.core_type<tc>, window_params = [{transform_indices = @transform_0, window_bounds = array<i64: 2, 1, 10, 32>}, {pipeline_mode = #tpu.pipeline_mode<synchronous>, transform_indices = @transform_1, window_bounds = array<i64: 7, 7, 32, 32>}, {pipeline_mode = #tpu.pipeline_mode<synchronous>, transform_indices = @transform_2, window_bounds = array<i64: 1, 32>}, {pipeline_mode = #tpu.pipeline_mode<synchronous>, transform_indices = @transform_3, window_bounds = array<i64: 1, 32>}, {transform_indices = @transform_4, window_bounds = array<i64: 2, 1, 4, 32>}]} {
    %c0_i32 = arith.constant 0 : i32
    %0 = arith.cmpi eq, %arg1, %c0_i32 : i32
    %1 = arith.extui %0 : i1 to i32
    %c0_i32_0 = arith.constant 0 : i32
    %2 = arith.cmpi ne, %1, %c0_i32_0 : i32
    scf.if %2 {
      %cst_120 = arith.constant 0.000000e+00 : f32
      %118 = vector.broadcast %cst_120 : f32 to vector<2x4x32xf32>
      %c0_121 = arith.constant 0 : index
      %c0_122 = arith.constant 0 : index
      %c0_123 = arith.constant 0 : index
      %119 = vector.load %arg7[%c0_121, %c0_122, %c0_123] : memref<2x4x32xf32, #tpu.memory_space<vmem>>, vector<2x4x32xf32>
      tpu.vector_store %arg7[%c0_121, %c0_122, %c0_123], %118 {strides = array<i32>} : memref<2x4x32xf32, #tpu.memory_space<vmem>>, vector<2x4x32xf32>,
    } else {
    }
    %cst = arith.constant 0.000000e+00 : f32
    %3 = vector.broadcast %cst : f32 to vector<4x32xf32>
    %c0 = arith.constant 0 : index
    %c0_1 = arith.constant 0 : index
    %c0_2 = arith.constant 0 : index
    %c0_3 = arith.constant 0 : index
    %4 = vector.load %arg2[%c0, %c0_1, %c0_2, %c0_3] : memref<2x1x10x32xbf16, #tpu.memory_space<vmem>>, vector<1x1x4x32xbf16>
    %5 = vector.shape_cast %4 : vector<1x1x4x32xbf16> to vector<4x32xbf16>
    %6 = arith.index_cast %arg1 : i32 to index
    %c0_4 = arith.constant 0 : index
    %c0_5 = arith.constant 0 : index
    %c0_6 = arith.constant 0 : index
    %7 = vector.load %arg3[%6, %c0_4, %c0_5, %c0_6] : memref<7x7x32x32xbf16, #tpu.memory_space<vmem>>, vector<1x1x32x32xbf16>
    %8 = vector.shape_cast %7 : vector<1x1x32x32xbf16> to vector<32x32xbf16>
    %cst_7 = arith.constant dense<0.000000e+00> : vector<4x32xf32>
    %9 = tpu.matmul %5, %8, %cst_7 {dimension_numbers = #tpu.dot_dimension_numbers<[1], [0], [0], [1], [0, 0, 1, 1], [], []>} : vector<4x32xbf16>, vector<32x32xbf16>, vector<4x32xf32> -> vector<4x32xf32>
    %10 = arith.addf %3, %9 : vector<4x32xf32>
    %c0_8 = arith.constant 0 : index
    %c0_9 = arith.constant 0 : index
    %c1 = arith.constant 1 : index
    %c0_10 = arith.constant 0 : index
    %11 = vector.load %arg2[%c0_8, %c0_9, %c1, %c0_10] : memref<2x1x10x32xbf16, #tpu.memory_space<vmem>>, vector<1x1x4x32xbf16>
    %12 = vector.shape_cast %11 : vector<1x1x4x32xbf16> to vector<4x32xbf16>
    %13 = arith.index_cast %arg1 : i32 to index
    %c1_11 = arith.constant 1 : index
    %c0_12 = arith.constant 0 : index
    %c0_13 = arith.constant 0 : index
    %14 = vector.load %arg3[%13, %c1_11, %c0_12, %c0_13] : memref<7x7x32x32xbf16, #tpu.memory_space<vmem>>, vector<1x1x32x32xbf16>
    %15 = vector.shape_cast %14 : vector<1x1x32x32xbf16> to vector<32x32xbf16>
    %cst_14 = arith.constant dense<0.000000e+00> : vector<4x32xf32>
    %16 = tpu.matmul %12, %15, %cst_14 {dimension_numbers = #tpu.dot_dimension_numbers<[1], [0], [0], [1], [0, 0, 1, 1], [], []>} : vector<4x32xbf16>, vector<32x32xbf16>, vector<4x32xf32> -> vector<4x32xf32>
    %17 = arith.addf %10, %16 : vector<4x32xf32>
    %c0_15 = arith.constant 0 : index
    %c0_16 = arith.constant 0 : index
    %c2 = arith.constant 2 : index
    %c0_17 = arith.constant 0 : index
    %18 = vector.load %arg2[%c0_15, %c0_16, %c2, %c0_17] : memref<2x1x10x32xbf16, #tpu.memory_space<vmem>>, vector<1x1x4x32xbf16>
    %19 = vector.shape_cast %18 : vector<1x1x4x32xbf16> to vector<4x32xbf16>
    %20 = arith.index_cast %arg1 : i32 to index
    %c2_18 = arith.constant 2 : index
    %c0_19 = arith.constant 0 : index
    %c0_20 = arith.constant 0 : index
    %21 = vector.load %arg3[%20, %c2_18, %c0_19, %c0_20] : memref<7x7x32x32xbf16, #tpu.memory_space<vmem>>, vector<1x1x32x32xbf16>
    %22 = vector.shape_cast %21 : vector<1x1x32x32xbf16> to vector<32x32xbf16>
    %cst_21 = arith.constant dense<0.000000e+00> : vector<4x32xf32>
    %23 = tpu.matmul %19, %22, %cst_21 {dimension_numbers = #tpu.dot_dimension_numbers<[1], [0], [0], [1], [0, 0, 1, 1], [], []>} : vector<4x32xbf16>, vector<32x32xbf16>, vector<4x32xf32> -> vector<4x32xf32>
    %24 = arith.addf %17, %23 : vector<4x32xf32>
    %c0_22 = arith.constant 0 : index
    %c0_23 = arith.constant 0 : index
    %c3 = arith.constant 3 : index
    %c0_24 = arith.constant 0 : index
    %25 = vector.load %arg2[%c0_22, %c0_23, %c3, %c0_24] : memref<2x1x10x32xbf16, #tpu.memory_space<vmem>>, vector<1x1x4x32xbf16>
    %26 = vector.shape_cast %25 : vector<1x1x4x32xbf16> to vector<4x32xbf16>
    %27 = arith.index_cast %arg1 : i32 to index
    %c3_25 = arith.constant 3 : index
    %c0_26 = arith.constant 0 : index
    %c0_27 = arith.constant 0 : index
    %28 = vector.load %arg3[%27, %c3_25, %c0_26, %c0_27] : memref<7x7x32x32xbf16, #tpu.memory_space<vmem>>, vector<1x1x32x32xbf16>
    %29 = vector.shape_cast %28 : vector<1x1x32x32xbf16> to vector<32x32xbf16>
    %cst_28 = arith.constant dense<0.000000e+00> : vector<4x32xf32>
    %30 = tpu.matmul %26, %29, %cst_28 {dimension_numbers = #tpu.dot_dimension_numbers<[1], [0], [0], [1], [0, 0, 1, 1], [], []>} : vector<4x32xbf16>, vector<32x32xbf16>, vector<4x32xf32> -> vector<4x32xf32>
    %31 = arith.addf %24, %30 : vector<4x32xf32>
    %c0_29 = arith.constant 0 : index
    %c0_30 = arith.constant 0 : index
    %c4 = arith.constant 4 : index
    %c0_31 = arith.constant 0 : index
    %32 = vector.load %arg2[%c0_29, %c0_30, %c4, %c0_31] : memref<2x1x10x32xbf16, #tpu.memory_space<vmem>>, vector<1x1x4x32xbf16>
    %33 = vector.shape_cast %32 : vector<1x1x4x32xbf16> to vector<4x32xbf16>
    %34 = arith.index_cast %arg1 : i32 to index
    %c4_32 = arith.constant 4 : index
    %c0_33 = arith.constant 0 : index
    %c0_34 = arith.constant 0 : index
    %35 = vector.load %arg3[%34, %c4_32, %c0_33, %c0_34] : memref<7x7x32x32xbf16, #tpu.memory_space<vmem>>, vector<1x1x32x32xbf16>
    %36 = vector.shape_cast %35 : vector<1x1x32x32xbf16> to vector<32x32xbf16>
    %cst_35 = arith.constant dense<0.000000e+00> : vector<4x32xf32>
    %37 = tpu.matmul %33, %36, %cst_35 {dimension_numbers = #tpu.dot_dimension_numbers<[1], [0], [0], [1], [0, 0, 1, 1], [], []>} : vector<4x32xbf16>, vector<32x32xbf16>, vector<4x32xf32> -> vector<4x32xf32>
    %38 = arith.addf %31, %37 : vector<4x32xf32>
    %c0_36 = arith.constant 0 : index
    %c0_37 = arith.constant 0 : index
    %c5 = arith.constant 5 : index
    %c0_38 = arith.constant 0 : index
    %39 = vector.load %arg2[%c0_36, %c0_37, %c5, %c0_38] : memref<2x1x10x32xbf16, #tpu.memory_space<vmem>>, vector<1x1x4x32xbf16>
    %40 = vector.shape_cast %39 : vector<1x1x4x32xbf16> to vector<4x32xbf16>
    %41 = arith.index_cast %arg1 : i32 to index
    %c5_39 = arith.constant 5 : index
    %c0_40 = arith.constant 0 : index
    %c0_41 = arith.constant 0 : index
    %42 = vector.load %arg3[%41, %c5_39, %c0_40, %c0_41] : memref<7x7x32x32xbf16, #tpu.memory_space<vmem>>, vector<1x1x32x32xbf16>
    %43 = vector.shape_cast %42 : vector<1x1x32x32xbf16> to vector<32x32xbf16>
    %cst_42 = arith.constant dense<0.000000e+00> : vector<4x32xf32>
    %44 = tpu.matmul %40, %43, %cst_42 {dimension_numbers = #tpu.dot_dimension_numbers<[1], [0], [0], [1], [0, 0, 1, 1], [], []>} : vector<4x32xbf16>, vector<32x32xbf16>, vector<4x32xf32> -> vector<4x32xf32>
    %45 = arith.addf %38, %44 : vector<4x32xf32>
    %c0_43 = arith.constant 0 : index
    %c0_44 = arith.constant 0 : index
    %c6 = arith.constant 6 : index
    %c0_45 = arith.constant 0 : index
    %46 = vector.load %arg2[%c0_43, %c0_44, %c6, %c0_45] : memref<2x1x10x32xbf16, #tpu.memory_space<vmem>>, vector<1x1x4x32xbf16>
    %47 = vector.shape_cast %46 : vector<1x1x4x32xbf16> to vector<4x32xbf16>
    %48 = arith.index_cast %arg1 : i32 to index
    %c6_46 = arith.constant 6 : index
    %c0_47 = arith.constant 0 : index
    %c0_48 = arith.constant 0 : index
    %49 = vector.load %arg3[%48, %c6_46, %c0_47, %c0_48] : memref<7x7x32x32xbf16, #tpu.memory_space<vmem>>, vector<1x1x32x32xbf16>
    %50 = vector.shape_cast %49 : vector<1x1x32x32xbf16> to vector<32x32xbf16>
    %cst_49 = arith.constant dense<0.000000e+00> : vector<4x32xf32>
    %51 = tpu.matmul %47, %50, %cst_49 {dimension_numbers = #tpu.dot_dimension_numbers<[1], [0], [0], [1], [0, 0, 1, 1], [], []>} : vector<4x32xbf16>, vector<32x32xbf16>, vector<4x32xf32> -> vector<4x32xf32>
    %52 = arith.addf %45, %51 : vector<4x32xf32>
    %c0_50 = arith.constant 0 : index
    %c0_51 = arith.constant 0 : index
    %c0_52 = arith.constant 0 : index
    %53 = vector.load %arg7[%c0_50, %c0_51, %c0_52] : memref<2x4x32xf32, #tpu.memory_space<vmem>>, vector<1x4x32xf32>
    %54 = vector.shape_cast %53 : vector<1x4x32xf32> to vector<4x32xf32>
    %55 = arith.addf %54, %52 : vector<4x32xf32>
    %c0_53 = arith.constant 0 : index
    %c0_54 = arith.constant 0 : index
    %c0_55 = arith.constant 0 : index
    %56 = vector.load %arg7[%c0_53, %c0_54, %c0_55] : memref<2x4x32xf32, #tpu.memory_space<vmem>>, vector<1x4x32xf32>
    %57 = vector.shape_cast %56 : vector<1x4x32xf32> to vector<4x32xf32>
    %58 = vector.shape_cast %55 : vector<4x32xf32> to vector<1x4x32xf32>
    tpu.vector_store %arg7[%c0_53, %c0_54, %c0_55], %58 {strides = array<i32>} : memref<2x4x32xf32, #tpu.memory_space<vmem>>, vector<1x4x32xf32>,
    %cst_56 = arith.constant 0.000000e+00 : f32
    %59 = vector.broadcast %cst_56 : f32 to vector<4x32xf32>
    %c1_57 = arith.constant 1 : index
    %c0_58 = arith.constant 0 : index
    %c0_59 = arith.constant 0 : index
    %c0_60 = arith.constant 0 : index
    %60 = vector.load %arg2[%c1_57, %c0_58, %c0_59, %c0_60] : memref<2x1x10x32xbf16, #tpu.memory_space<vmem>>, vector<1x1x4x32xbf16>
    %61 = vector.shape_cast %60 : vector<1x1x4x32xbf16> to vector<4x32xbf16>
    %62 = arith.index_cast %arg1 : i32 to index
    %c0_61 = arith.constant 0 : index
    %c0_62 = arith.constant 0 : index
    %c0_63 = arith.constant 0 : index
    %63 = vector.load %arg3[%62, %c0_61, %c0_62, %c0_63] : memref<7x7x32x32xbf16, #tpu.memory_space<vmem>>, vector<1x1x32x32xbf16>
    %64 = vector.shape_cast %63 : vector<1x1x32x32xbf16> to vector<32x32xbf16>
    %cst_64 = arith.constant dense<0.000000e+00> : vector<4x32xf32>
    %65 = tpu.matmul %61, %64, %cst_64 {dimension_numbers = #tpu.dot_dimension_numbers<[1], [0], [0], [1], [0, 0, 1, 1], [], []>} : vector<4x32xbf16>, vector<32x32xbf16>, vector<4x32xf32> -> vector<4x32xf32>
    %66 = arith.addf %59, %65 : vector<4x32xf32>
    %c1_65 = arith.constant 1 : index
    %c0_66 = arith.constant 0 : index
    %c1_67 = arith.constant 1 : index
    %c0_68 = arith.constant 0 : index
    %67 = vector.load %arg2[%c1_65, %c0_66, %c1_67, %c0_68] : memref<2x1x10x32xbf16, #tpu.memory_space<vmem>>, vector<1x1x4x32xbf16>
    %68 = vector.shape_cast %67 : vector<1x1x4x32xbf16> to vector<4x32xbf16>
    %69 = arith.index_cast %arg1 : i32 to index
    %c1_69 = arith.constant 1 : index
    %c0_70 = arith.constant 0 : index
    %c0_71 = arith.constant 0 : index
    %70 = vector.load %arg3[%69, %c1_69, %c0_70, %c0_71] : memref<7x7x32x32xbf16, #tpu.memory_space<vmem>>, vector<1x1x32x32xbf16>
    %71 = vector.shape_cast %70 : vector<1x1x32x32xbf16> to vector<32x32xbf16>
    %cst_72 = arith.constant dense<0.000000e+00> : vector<4x32xf32>
    %72 = tpu.matmul %68, %71, %cst_72 {dimension_numbers = #tpu.dot_dimension_numbers<[1], [0], [0], [1], [0, 0, 1, 1], [], []>} : vector<4x32xbf16>, vector<32x32xbf16>, vector<4x32xf32> -> vector<4x32xf32>
    %73 = arith.addf %66, %72 : vector<4x32xf32>
    %c1_73 = arith.constant 1 : index
    %c0_74 = arith.constant 0 : index
    %c2_75 = arith.constant 2 : index
    %c0_76 = arith.constant 0 : index
    %74 = vector.load %arg2[%c1_73, %c0_74, %c2_75, %c0_76] : memref<2x1x10x32xbf16, #tpu.memory_space<vmem>>, vector<1x1x4x32xbf16>
    %75 = vector.shape_cast %74 : vector<1x1x4x32xbf16> to vector<4x32xbf16>
    %76 = arith.index_cast %arg1 : i32 to index
    %c2_77 = arith.constant 2 : index
    %c0_78 = arith.constant 0 : index
    %c0_79 = arith.constant 0 : index
    %77 = vector.load %arg3[%76, %c2_77, %c0_78, %c0_79] : memref<7x7x32x32xbf16, #tpu.memory_space<vmem>>, vector<1x1x32x32xbf16>
    %78 = vector.shape_cast %77 : vector<1x1x32x32xbf16> to vector<32x32xbf16>
    %cst_80 = arith.constant dense<0.000000e+00> : vector<4x32xf32>
    %79 = tpu.matmul %75, %78, %cst_80 {dimension_numbers = #tpu.dot_dimension_numbers<[1], [0], [0], [1], [0, 0, 1, 1], [], []>} : vector<4x32xbf16>, vector<32x32xbf16>, vector<4x32xf32> -> vector<4x32xf32>
    %80 = arith.addf %73, %79 : vector<4x32xf32>
    %c1_81 = arith.constant 1 : index
    %c0_82 = arith.constant 0 : index
    %c3_83 = arith.constant 3 : index
    %c0_84 = arith.constant 0 : index
    %81 = vector.load %arg2[%c1_81, %c0_82, %c3_83, %c0_84] : memref<2x1x10x32xbf16, #tpu.memory_space<vmem>>, vector<1x1x4x32xbf16>
    %82 = vector.shape_cast %81 : vector<1x1x4x32xbf16> to vector<4x32xbf16>
    %83 = arith.index_cast %arg1 : i32 to index
    %c3_85 = arith.constant 3 : index
    %c0_86 = arith.constant 0 : index
    %c0_87 = arith.constant 0 : index
    %84 = vector.load %arg3[%83, %c3_85, %c0_86, %c0_87] : memref<7x7x32x32xbf16, #tpu.memory_space<vmem>>, vector<1x1x32x32xbf16>
    %85 = vector.shape_cast %84 : vector<1x1x32x32xbf16> to vector<32x32xbf16>
    %cst_88 = arith.constant dense<0.000000e+00> : vector<4x32xf32>
    %86 = tpu.matmul %82, %85, %cst_88 {dimension_numbers = #tpu.dot_dimension_numbers<[1], [0], [0], [1], [0, 0, 1, 1], [], []>} : vector<4x32xbf16>, vector<32x32xbf16>, vector<4x32xf32> -> vector<4x32xf32>
    %87 = arith.addf %80, %86 : vector<4x32xf32>
    %c1_89 = arith.constant 1 : index
    %c0_90 = arith.constant 0 : index
    %c4_91 = arith.constant 4 : index
    %c0_92 = arith.constant 0 : index
    %88 = vector.load %arg2[%c1_89, %c0_90, %c4_91, %c0_92] : memref<2x1x10x32xbf16, #tpu.memory_space<vmem>>, vector<1x1x4x32xbf16>
    %89 = vector.shape_cast %88 : vector<1x1x4x32xbf16> to vector<4x32xbf16>
    %90 = arith.index_cast %arg1 : i32 to index
    %c4_93 = arith.constant 4 : index
    %c0_94 = arith.constant 0 : index
    %c0_95 = arith.constant 0 : index
    %91 = vector.load %arg3[%90, %c4_93, %c0_94, %c0_95] : memref<7x7x32x32xbf16, #tpu.memory_space<vmem>>, vector<1x1x32x32xbf16>
    %92 = vector.shape_cast %91 : vector<1x1x32x32xbf16> to vector<32x32xbf16>
    %cst_96 = arith.constant dense<0.000000e+00> : vector<4x32xf32>
    %93 = tpu.matmul %89, %92, %cst_96 {dimension_numbers = #tpu.dot_dimension_numbers<[1], [0], [0], [1], [0, 0, 1, 1], [], []>} : vector<4x32xbf16>, vector<32x32xbf16>, vector<4x32xf32> -> vector<4x32xf32>
    %94 = arith.addf %87, %93 : vector<4x32xf32>
    %c1_97 = arith.constant 1 : index
    %c0_98 = arith.constant 0 : index
    %c5_99 = arith.constant 5 : index
    %c0_100 = arith.constant 0 : index
    %95 = vector.load %arg2[%c1_97, %c0_98, %c5_99, %c0_100] : memref<2x1x10x32xbf16, #tpu.memory_space<vmem>>, vector<1x1x4x32xbf16>
    %96 = vector.shape_cast %95 : vector<1x1x4x32xbf16> to vector<4x32xbf16>
    %97 = arith.index_cast %arg1 : i32 to index
    %c5_101 = arith.constant 5 : index
    %c0_102 = arith.constant 0 : index
    %c0_103 = arith.constant 0 : index
    %98 = vector.load %arg3[%97, %c5_101, %c0_102, %c0_103] : memref<7x7x32x32xbf16, #tpu.memory_space<vmem>>, vector<1x1x32x32xbf16>
    %99 = vector.shape_cast %98 : vector<1x1x32x32xbf16> to vector<32x32xbf16>
    %cst_104 = arith.constant dense<0.000000e+00> : vector<4x32xf32>
    %100 = tpu.matmul %96, %99, %cst_104 {dimension_numbers = #tpu.dot_dimension_numbers<[1], [0], [0], [1], [0, 0, 1, 1], [], []>} : vector<4x32xbf16>, vector<32x32xbf16>, vector<4x32xf32> -> vector<4x32xf32>
    %101 = arith.addf %94, %100 : vector<4x32xf32>
    %c1_105 = arith.constant 1 : index
    %c0_106 = arith.constant 0 : index
    %c6_107 = arith.constant 6 : index
    %c0_108 = arith.constant 0 : index
    %102 = vector.load %arg2[%c1_105, %c0_106, %c6_107, %c0_108] : memref<2x1x10x32xbf16, #tpu.memory_space<vmem>>, vector<1x1x4x32xbf16>
    %103 = vector.shape_cast %102 : vector<1x1x4x32xbf16> to vector<4x32xbf16>
    %104 = arith.index_cast %arg1 : i32 to index
    %c6_109 = arith.constant 6 : index
    %c0_110 = arith.constant 0 : index
    %c0_111 = arith.constant 0 : index
    %105 = vector.load %arg3[%104, %c6_109, %c0_110, %c0_111] : memref<7x7x32x32xbf16, #tpu.memory_space<vmem>>, vector<1x1x32x32xbf16>
    %106 = vector.shape_cast %105 : vector<1x1x32x32xbf16> to vector<32x32xbf16>
    %cst_112 = arith.constant dense<0.000000e+00> : vector<4x32xf32>
    %107 = tpu.matmul %103, %106, %cst_112 {dimension_numbers = #tpu.dot_dimension_numbers<[1], [0], [0], [1], [0, 0, 1, 1], [], []>} : vector<4x32xbf16>, vector<32x32xbf16>, vector<4x32xf32> -> vector<4x32xf32>
    %108 = arith.addf %101, %107 : vector<4x32xf32>
    %c1_113 = arith.constant 1 : index
    %c0_114 = arith.constant 0 : index
    %c0_115 = arith.constant 0 : index
    %109 = vector.load %arg7[%c1_113, %c0_114, %c0_115] : memref<2x4x32xf32, #tpu.memory_space<vmem>>, vector<1x4x32xf32>
    %110 = vector.shape_cast %109 : vector<1x4x32xf32> to vector<4x32xf32>
    %111 = arith.addf %110, %108 : vector<4x32xf32>
    %c1_116 = arith.constant 1 : index
    %c0_117 = arith.constant 0 : index
    %c0_118 = arith.constant 0 : index
    %112 = vector.load %arg7[%c1_116, %c0_117, %c0_118] : memref<2x4x32xf32, #tpu.memory_space<vmem>>, vector<1x4x32xf32>
    %113 = vector.shape_cast %112 : vector<1x4x32xf32> to vector<4x32xf32>
    %114 = vector.shape_cast %111 : vector<4x32xf32> to vector<1x4x32xf32>
    tpu.vector_store %arg7[%c1_116, %c0_117, %c0_118], %114 {strides = array<i32>} : memref<2x4x32xf32, #tpu.memory_space<vmem>>, vector<1x4x32xf32>,
    %c6_i32 = arith.constant 6 : i32
    %115 = arith.cmpi eq, %arg1, %c6_i32 : i32
    %116 = arith.extui %115 : i1 to i32
    %c0_i32_119 = arith.constant 0 : i32
    %117 = arith.cmpi ne, %116, %c0_i32_119 : i32
    scf.if %117 {
      %c0_120 = arith.constant 0 : index
      %c0_121 = arith.constant 0 : index
      %c0_122 = arith.constant 0 : index
      %118 = vector.load %arg7[%c0_120, %c0_121, %c0_122] : memref<2x4x32xf32, #tpu.memory_space<vmem>>, vector<2x4x32xf32>
      %c0_123 = arith.constant 0 : index
      %c0_124 = arith.constant 0 : index
      %119 = vector.load %arg4[%c0_123, %c0_124] : memref<1x32xf32, #tpu.memory_space<vmem>>, vector<1x32xf32>
      %120 = vector.shape_cast %119 : vector<1x32xf32> to vector<1x1x32xf32>
      %121 = vector.broadcast %120 : vector<1x1x32xf32> to vector<2x4x32xf32>
      %122 = arith.mulf %118, %121 : vector<2x4x32xf32>
      %c0_125 = arith.constant 0 : index
      %c0_126 = arith.constant 0 : index
      %123 = vector.load %arg5[%c0_125, %c0_126] : memref<1x32xf32, #tpu.memory_space<vmem>>, vector<1x32xf32>
      %124 = vector.shape_cast %123 : vector<1x32xf32> to vector<1x1x32xf32>
      %125 = vector.broadcast %124 : vector<1x1x32xf32> to vector<2x4x32xf32>
      %126 = arith.addf %122, %125 : vector<2x4x32xf32>
      %cst_127 = arith.constant 0.000000e+00 : f32
      %127 = vector.broadcast %cst_127 : f32 to vector<2x4x32xf32>
      %128 = arith.maximumf %126, %127 : vector<2x4x32xf32>
      %129 = arith.truncf %128 : vector<2x4x32xf32> to vector<2x4x32xbf16>
      %c0_128 = arith.constant 0 : index
      %c0_129 = arith.constant 0 : index
      %c0_130 = arith.constant 0 : index
      %c0_131 = arith.constant 0 : index
      %130 = vector.load %arg6[%c0_128, %c0_129, %c0_130, %c0_131] : memref<2x1x4x32xbf16, #tpu.memory_space<vmem>>, vector<2x1x4x32xbf16>
      %131 = vector.shape_cast %130 : vector<2x1x4x32xbf16> to vector<2x4x32xbf16>
      %132 = vector.shape_cast %129 : vector<2x4x32xbf16> to vector<2x1x4x32xbf16>
      tpu.vector_store %arg6[%c0_128, %c0_129, %c0_130, %c0_131], %132 {strides = array<i32>} : memref<2x1x4x32xbf16, #tpu.memory_space<vmem>>, vector<2x1x4x32xbf16>,
    } else {
    }
    return
  }
  func.func @transform_0(%arg0: i32, %arg1: i32) -> (i32, i32, i32, i32) {
    %0 = arith.addi %arg0, %arg1 : i32
    %c0_i32 = arith.constant 0 : i32
    %c0_i32_0 = arith.constant 0 : i32
    %c0_i32_1 = arith.constant 0 : i32
    %c0_i32_2 = arith.constant 0 : i32
    return %c0_i32, %0, %c0_i32_0, %c0_i32_1 : i32, i32, i32, i32
  }
  func.func @transform_1(%arg0: i32, %arg1: i32) -> (i32, i32, i32, i32) {
    %c0_i32 = arith.constant 0 : i32
    %c0_i32_0 = arith.constant 0 : i32
    %c0_i32_1 = arith.constant 0 : i32
    %c0_i32_2 = arith.constant 0 : i32
    %c0_i32_3 = arith.constant 0 : i32
    return %c0_i32, %c0_i32_0, %c0_i32_1, %c0_i32_2 : i32, i32, i32, i32
  }
  func.func @transform_2(%arg0: i32, %arg1: i32) -> (i32, i32) {
    %c0_i32 = arith.constant 0 : i32
    %c0_i32_0 = arith.constant 0 : i32
    %c0_i32_1 = arith.constant 0 : i32
    return %c0_i32, %c0_i32_0 : i32, i32
  }
  func.func @transform_3(%arg0: i32, %arg1: i32) -> (i32, i32) {
    %c0_i32 = arith.constant 0 : i32
    %c0_i32_0 = arith.constant 0 : i32
    %c0_i32_1 = arith.constant 0 : i32
    return %c0_i32, %c0_i32_0 : i32, i32
  }
  func.func @transform_4(%arg0: i32, %arg1: i32) -> (i32, i32, i32, i32) {
    %c0_i32 = arith.constant 0 : i32
    %c0_i32_0 = arith.constant 0 : i32
    %c0_i32_1 = arith.constant 0 : i32
    %c0_i32_2 = arith.constant 0 : i32
    return %c0_i32, %arg0, %c0_i32_0, %c0_i32_1 : i32, i32, i32, i32
  }
}

module attributes {stable_mosaic.version = 11 : i64} {
  func.func @_conv_row_kernel(%arg0: i32, %arg1: i32, %arg2: memref<2x1x16x32xbf16, #tpu.memory_space<vmem>>, %arg3: memref<9x9x32x16xbf16, #tpu.memory_space<vmem>>, %arg4: memref<1x16xf32, #tpu.memory_space<vmem>>, %arg5: memref<1x16xf32, #tpu.memory_space<vmem>>, %arg6: memref<2x1x8x16xbf16, #tpu.memory_space<vmem>>, %arg7: memref<2x8x16xf32, #tpu.memory_space<vmem>>) attributes {dimension_semantics = [#tpu.dimension_semantics<parallel>, #tpu.dimension_semantics<arbitrary>], iteration_bounds = array<i64: 8, 9>, scalar_prefetch = 0 : i64, scratch_operands = 1 : i64, tpu.core_type = #tpu.core_type<tc>, window_params = [{transform_indices = @transform_0, window_bounds = array<i64: 2, 1, 16, 32>}, {pipeline_mode = #tpu.pipeline_mode<synchronous>, transform_indices = @transform_1, window_bounds = array<i64: 9, 9, 32, 16>}, {pipeline_mode = #tpu.pipeline_mode<synchronous>, transform_indices = @transform_2, window_bounds = array<i64: 1, 16>}, {pipeline_mode = #tpu.pipeline_mode<synchronous>, transform_indices = @transform_3, window_bounds = array<i64: 1, 16>}, {transform_indices = @transform_4, window_bounds = array<i64: 2, 1, 8, 16>}]} {
    %c0_i32 = arith.constant 0 : i32
    %0 = arith.cmpi eq, %arg1, %c0_i32 : i32
    %1 = arith.extui %0 : i1 to i32
    %c0_i32_0 = arith.constant 0 : i32
    %2 = arith.cmpi ne, %1, %c0_i32_0 : i32
    scf.if %2 {
      %cst = arith.constant 0.000000e+00 : f32
      %20 = vector.broadcast %cst : f32 to vector<2x8x16xf32>
      %c0 = arith.constant 0 : index
      %c0_8 = arith.constant 0 : index
      %c0_9 = arith.constant 0 : index
      %21 = vector.load %arg7[%c0, %c0_8, %c0_9] : memref<2x8x16xf32, #tpu.memory_space<vmem>>, vector<2x8x16xf32>
      tpu.vector_store %arg7[%c0, %c0_8, %c0_9], %20 {strides = array<i32>} : memref<2x8x16xf32, #tpu.memory_space<vmem>>, vector<2x8x16xf32>,
    } else {
    }
    %3 = arith.addi %arg0, %arg1 : i32
    %c2_i32 = arith.constant 2 : i32
    %c0_i32_1 = arith.constant 0 : i32
    %4 = arith.cmpi eq, %c2_i32, %c0_i32_1 : i32
    %c1_i32 = arith.constant 1 : i32
    %5 = arith.select %4, %c1_i32, %c2_i32 : i32
    %6 = arith.remsi %3, %5 : i32
    %c0_i32_2 = arith.constant 0 : i32
    %7 = arith.cmpi ne, %6, %c0_i32_2 : i32
    %c0_i32_3 = arith.constant 0 : i32
    %8 = arith.cmpi slt, %6, %c0_i32_3 : i32
    %c0_i32_4 = arith.constant 0 : i32
    %9 = arith.cmpi slt, %5, %c0_i32_4 : i32
    %10 = arith.xori %8, %9 : i1
    %11 = arith.andi %10, %7 : i1
    %12 = arith.addi %6, %5 : i32
    %13 = arith.select %11, %12, %6 : i32
    %c0_i32_5 = arith.constant 0 : i32
    %14 = arith.cmpi eq, %13, %c0_i32_5 : i32
    %15 = arith.extui %14 : i1 to i32
    %c0_i32_6 = arith.constant 0 : i32
    %16 = arith.cmpi ne, %15, %c0_i32_6 : i32
    scf.if %16 {
      %cst = arith.constant 0.000000e+00 : f32
      %20 = vector.broadcast %cst : f32 to vector<8x16xf32>
      %c0 = arith.constant 0 : index
      %c0_8 = arith.constant 0 : index
      %c0_9 = arith.constant 0 : index
      %c0_10 = arith.constant 0 : index
      %21 = vector.load %arg2[%c0, %c0_8, %c0_9, %c0_10] : memref<2x1x16x32xbf16, #tpu.memory_space<vmem>>, vector<1x1x8x32xbf16>
      %22 = vector.shape_cast %21 : vector<1x1x8x32xbf16> to vector<8x32xbf16>
      %23 = arith.index_cast %arg1 : i32 to index
      %c0_11 = arith.constant 0 : index
      %c0_12 = arith.constant 0 : index
      %c0_13 = arith.constant 0 : index
      %24 = vector.load %arg3[%23, %c0_11, %c0_12, %c0_13] : memref<9x9x32x16xbf16, #tpu.memory_space<vmem>>, vector<1x1x32x16xbf16>
      %25 = vector.shape_cast %24 : vector<1x1x32x16xbf16> to vector<32x16xbf16>
      %cst_14 = arith.constant dense<0.000000e+00> : vector<8x16xf32>
      %26 = tpu.matmul %22, %25, %cst_14 {dimension_numbers = #tpu.dot_dimension_numbers<[1], [0], [0], [1], [0, 0, 1, 1], [], []>} : vector<8x32xbf16>, vector<32x16xbf16>, vector<8x16xf32> -> vector<8x16xf32>
      %27 = arith.addf %20, %26 : vector<8x16xf32>
      %c0_15 = arith.constant 0 : index
      %c0_16 = arith.constant 0 : index
      %c1 = arith.constant 1 : index
      %c0_17 = arith.constant 0 : index
      %28 = vector.load %arg2[%c0_15, %c0_16, %c1, %c0_17] : memref<2x1x16x32xbf16, #tpu.memory_space<vmem>>, vector<1x1x8x32xbf16>
      %29 = vector.shape_cast %28 : vector<1x1x8x32xbf16> to vector<8x32xbf16>
      %30 = arith.index_cast %arg1 : i32 to index
      %c1_18 = arith.constant 1 : index
      %c0_19 = arith.constant 0 : index
      %c0_20 = arith.constant 0 : index
      %31 = vector.load %arg3[%30, %c1_18, %c0_19, %c0_20] : memref<9x9x32x16xbf16, #tpu.memory_space<vmem>>, vector<1x1x32x16xbf16>
      %32 = vector.shape_cast %31 : vector<1x1x32x16xbf16> to vector<32x16xbf16>
      %cst_21 = arith.constant dense<0.000000e+00> : vector<8x16xf32>
      %33 = tpu.matmul %29, %32, %cst_21 {dimension_numbers = #tpu.dot_dimension_numbers<[1], [0], [0], [1], [0, 0, 1, 1], [], []>} : vector<8x32xbf16>, vector<32x16xbf16>, vector<8x16xf32> -> vector<8x16xf32>
      %34 = arith.addf %27, %33 : vector<8x16xf32>
      %c0_22 = arith.constant 0 : index
      %c0_23 = arith.constant 0 : index
      %c2 = arith.constant 2 : index
      %c0_24 = arith.constant 0 : index
      %35 = vector.load %arg2[%c0_22, %c0_23, %c2, %c0_24] : memref<2x1x16x32xbf16, #tpu.memory_space<vmem>>, vector<1x1x8x32xbf16>
      %36 = vector.shape_cast %35 : vector<1x1x8x32xbf16> to vector<8x32xbf16>
      %37 = arith.index_cast %arg1 : i32 to index
      %c2_25 = arith.constant 2 : index
      %c0_26 = arith.constant 0 : index
      %c0_27 = arith.constant 0 : index
      %38 = vector.load %arg3[%37, %c2_25, %c0_26, %c0_27] : memref<9x9x32x16xbf16, #tpu.memory_space<vmem>>, vector<1x1x32x16xbf16>
      %39 = vector.shape_cast %38 : vector<1x1x32x16xbf16> to vector<32x16xbf16>
      %cst_28 = arith.constant dense<0.000000e+00> : vector<8x16xf32>
      %40 = tpu.matmul %36, %39, %cst_28 {dimension_numbers = #tpu.dot_dimension_numbers<[1], [0], [0], [1], [0, 0, 1, 1], [], []>} : vector<8x32xbf16>, vector<32x16xbf16>, vector<8x16xf32> -> vector<8x16xf32>
      %41 = arith.addf %34, %40 : vector<8x16xf32>
      %c0_29 = arith.constant 0 : index
      %c0_30 = arith.constant 0 : index
      %c3 = arith.constant 3 : index
      %c0_31 = arith.constant 0 : index
      %42 = vector.load %arg2[%c0_29, %c0_30, %c3, %c0_31] : memref<2x1x16x32xbf16, #tpu.memory_space<vmem>>, vector<1x1x8x32xbf16>
      %43 = vector.shape_cast %42 : vector<1x1x8x32xbf16> to vector<8x32xbf16>
      %44 = arith.index_cast %arg1 : i32 to index
      %c3_32 = arith.constant 3 : index
      %c0_33 = arith.constant 0 : index
      %c0_34 = arith.constant 0 : index
      %45 = vector.load %arg3[%44, %c3_32, %c0_33, %c0_34] : memref<9x9x32x16xbf16, #tpu.memory_space<vmem>>, vector<1x1x32x16xbf16>
      %46 = vector.shape_cast %45 : vector<1x1x32x16xbf16> to vector<32x16xbf16>
      %cst_35 = arith.constant dense<0.000000e+00> : vector<8x16xf32>
      %47 = tpu.matmul %43, %46, %cst_35 {dimension_numbers = #tpu.dot_dimension_numbers<[1], [0], [0], [1], [0, 0, 1, 1], [], []>} : vector<8x32xbf16>, vector<32x16xbf16>, vector<8x16xf32> -> vector<8x16xf32>
      %48 = arith.addf %41, %47 : vector<8x16xf32>
      %c0_36 = arith.constant 0 : index
      %c0_37 = arith.constant 0 : index
      %c4 = arith.constant 4 : index
      %c0_38 = arith.constant 0 : index
      %49 = vector.load %arg2[%c0_36, %c0_37, %c4, %c0_38] : memref<2x1x16x32xbf16, #tpu.memory_space<vmem>>, vector<1x1x8x32xbf16>
      %50 = vector.shape_cast %49 : vector<1x1x8x32xbf16> to vector<8x32xbf16>
      %51 = arith.index_cast %arg1 : i32 to index
      %c4_39 = arith.constant 4 : index
      %c0_40 = arith.constant 0 : index
      %c0_41 = arith.constant 0 : index
      %52 = vector.load %arg3[%51, %c4_39, %c0_40, %c0_41] : memref<9x9x32x16xbf16, #tpu.memory_space<vmem>>, vector<1x1x32x16xbf16>
      %53 = vector.shape_cast %52 : vector<1x1x32x16xbf16> to vector<32x16xbf16>
      %cst_42 = arith.constant dense<0.000000e+00> : vector<8x16xf32>
      %54 = tpu.matmul %50, %53, %cst_42 {dimension_numbers = #tpu.dot_dimension_numbers<[1], [0], [0], [1], [0, 0, 1, 1], [], []>} : vector<8x32xbf16>, vector<32x16xbf16>, vector<8x16xf32> -> vector<8x16xf32>
      %55 = arith.addf %48, %54 : vector<8x16xf32>
      %c0_43 = arith.constant 0 : index
      %c0_44 = arith.constant 0 : index
      %c5 = arith.constant 5 : index
      %c0_45 = arith.constant 0 : index
      %56 = vector.load %arg2[%c0_43, %c0_44, %c5, %c0_45] : memref<2x1x16x32xbf16, #tpu.memory_space<vmem>>, vector<1x1x8x32xbf16>
      %57 = vector.shape_cast %56 : vector<1x1x8x32xbf16> to vector<8x32xbf16>
      %58 = arith.index_cast %arg1 : i32 to index
      %c5_46 = arith.constant 5 : index
      %c0_47 = arith.constant 0 : index
      %c0_48 = arith.constant 0 : index
      %59 = vector.load %arg3[%58, %c5_46, %c0_47, %c0_48] : memref<9x9x32x16xbf16, #tpu.memory_space<vmem>>, vector<1x1x32x16xbf16>
      %60 = vector.shape_cast %59 : vector<1x1x32x16xbf16> to vector<32x16xbf16>
      %cst_49 = arith.constant dense<0.000000e+00> : vector<8x16xf32>
      %61 = tpu.matmul %57, %60, %cst_49 {dimension_numbers = #tpu.dot_dimension_numbers<[1], [0], [0], [1], [0, 0, 1, 1], [], []>} : vector<8x32xbf16>, vector<32x16xbf16>, vector<8x16xf32> -> vector<8x16xf32>
      %62 = arith.addf %55, %61 : vector<8x16xf32>
      %c0_50 = arith.constant 0 : index
      %c0_51 = arith.constant 0 : index
      %c6 = arith.constant 6 : index
      %c0_52 = arith.constant 0 : index
      %63 = vector.load %arg2[%c0_50, %c0_51, %c6, %c0_52] : memref<2x1x16x32xbf16, #tpu.memory_space<vmem>>, vector<1x1x8x32xbf16>
      %64 = vector.shape_cast %63 : vector<1x1x8x32xbf16> to vector<8x32xbf16>
      %65 = arith.index_cast %arg1 : i32 to index
      %c6_53 = arith.constant 6 : index
      %c0_54 = arith.constant 0 : index
      %c0_55 = arith.constant 0 : index
      %66 = vector.load %arg3[%65, %c6_53, %c0_54, %c0_55] : memref<9x9x32x16xbf16, #tpu.memory_space<vmem>>, vector<1x1x32x16xbf16>
      %67 = vector.shape_cast %66 : vector<1x1x32x16xbf16> to vector<32x16xbf16>
      %cst_56 = arith.constant dense<0.000000e+00> : vector<8x16xf32>
      %68 = tpu.matmul %64, %67, %cst_56 {dimension_numbers = #tpu.dot_dimension_numbers<[1], [0], [0], [1], [0, 0, 1, 1], [], []>} : vector<8x32xbf16>, vector<32x16xbf16>, vector<8x16xf32> -> vector<8x16xf32>
      %69 = arith.addf %62, %68 : vector<8x16xf32>
      %c0_57 = arith.constant 0 : index
      %c0_58 = arith.constant 0 : index
      %c7 = arith.constant 7 : index
      %c0_59 = arith.constant 0 : index
      %70 = vector.load %arg2[%c0_57, %c0_58, %c7, %c0_59] : memref<2x1x16x32xbf16, #tpu.memory_space<vmem>>, vector<1x1x8x32xbf16>
      %71 = vector.shape_cast %70 : vector<1x1x8x32xbf16> to vector<8x32xbf16>
      %72 = arith.index_cast %arg1 : i32 to index
      %c7_60 = arith.constant 7 : index
      %c0_61 = arith.constant 0 : index
      %c0_62 = arith.constant 0 : index
      %73 = vector.load %arg3[%72, %c7_60, %c0_61, %c0_62] : memref<9x9x32x16xbf16, #tpu.memory_space<vmem>>, vector<1x1x32x16xbf16>
      %74 = vector.shape_cast %73 : vector<1x1x32x16xbf16> to vector<32x16xbf16>
      %cst_63 = arith.constant dense<0.000000e+00> : vector<8x16xf32>
      %75 = tpu.matmul %71, %74, %cst_63 {dimension_numbers = #tpu.dot_dimension_numbers<[1], [0], [0], [1], [0, 0, 1, 1], [], []>} : vector<8x32xbf16>, vector<32x16xbf16>, vector<8x16xf32> -> vector<8x16xf32>
      %76 = arith.addf %69, %75 : vector<8x16xf32>
      %c0_64 = arith.constant 0 : index
      %c0_65 = arith.constant 0 : index
      %c8 = arith.constant 8 : index
      %c0_66 = arith.constant 0 : index
      %77 = vector.load %arg2[%c0_64, %c0_65, %c8, %c0_66] : memref<2x1x16x32xbf16, #tpu.memory_space<vmem>>, vector<1x1x8x32xbf16>
      %78 = vector.shape_cast %77 : vector<1x1x8x32xbf16> to vector<8x32xbf16>
      %79 = arith.index_cast %arg1 : i32 to index
      %c8_67 = arith.constant 8 : index
      %c0_68 = arith.constant 0 : index
      %c0_69 = arith.constant 0 : index
      %80 = vector.load %arg3[%79, %c8_67, %c0_68, %c0_69] : memref<9x9x32x16xbf16, #tpu.memory_space<vmem>>, vector<1x1x32x16xbf16>
      %81 = vector.shape_cast %80 : vector<1x1x32x16xbf16> to vector<32x16xbf16>
      %cst_70 = arith.constant dense<0.000000e+00> : vector<8x16xf32>
      %82 = tpu.matmul %78, %81, %cst_70 {dimension_numbers = #tpu.dot_dimension_numbers<[1], [0], [0], [1], [0, 0, 1, 1], [], []>} : vector<8x32xbf16>, vector<32x16xbf16>, vector<8x16xf32> -> vector<8x16xf32>
      %83 = arith.addf %76, %82 : vector<8x16xf32>
      %c0_71 = arith.constant 0 : index
      %c0_72 = arith.constant 0 : index
      %c0_73 = arith.constant 0 : index
      %84 = vector.load %arg7[%c0_71, %c0_72, %c0_73] : memref<2x8x16xf32, #tpu.memory_space<vmem>>, vector<1x8x16xf32>
      %85 = vector.shape_cast %84 : vector<1x8x16xf32> to vector<8x16xf32>
      %86 = arith.addf %85, %83 : vector<8x16xf32>
      %c0_74 = arith.constant 0 : index
      %c0_75 = arith.constant 0 : index
      %c0_76 = arith.constant 0 : index
      %87 = vector.load %arg7[%c0_74, %c0_75, %c0_76] : memref<2x8x16xf32, #tpu.memory_space<vmem>>, vector<1x8x16xf32>
      %88 = vector.shape_cast %87 : vector<1x8x16xf32> to vector<8x16xf32>
      %89 = vector.shape_cast %86 : vector<8x16xf32> to vector<1x8x16xf32>
      tpu.vector_store %arg7[%c0_74, %c0_75, %c0_76], %89 {strides = array<i32>} : memref<2x8x16xf32, #tpu.memory_space<vmem>>, vector<1x8x16xf32>,
      %cst_77 = arith.constant 0.000000e+00 : f32
      %90 = vector.broadcast %cst_77 : f32 to vector<8x16xf32>
      %c1_78 = arith.constant 1 : index
      %c0_79 = arith.constant 0 : index
      %c0_80 = arith.constant 0 : index
      %c0_81 = arith.constant 0 : index
      %91 = vector.load %arg2[%c1_78, %c0_79, %c0_80, %c0_81] : memref<2x1x16x32xbf16, #tpu.memory_space<vmem>>, vector<1x1x8x32xbf16>
      %92 = vector.shape_cast %91 : vector<1x1x8x32xbf16> to vector<8x32xbf16>
      %93 = arith.index_cast %arg1 : i32 to index
      %c0_82 = arith.constant 0 : index
      %c0_83 = arith.constant 0 : index
      %c0_84 = arith.constant 0 : index
      %94 = vector.load %arg3[%93, %c0_82, %c0_83, %c0_84] : memref<9x9x32x16xbf16, #tpu.memory_space<vmem>>, vector<1x1x32x16xbf16>
      %95 = vector.shape_cast %94 : vector<1x1x32x16xbf16> to vector<32x16xbf16>
      %cst_85 = arith.constant dense<0.000000e+00> : vector<8x16xf32>
      %96 = tpu.matmul %92, %95, %cst_85 {dimension_numbers = #tpu.dot_dimension_numbers<[1], [0], [0], [1], [0, 0, 1, 1], [], []>} : vector<8x32xbf16>, vector<32x16xbf16>, vector<8x16xf32> -> vector<8x16xf32>
      %97 = arith.addf %90, %96 : vector<8x16xf32>
      %c1_86 = arith.constant 1 : index
      %c0_87 = arith.constant 0 : index
      %c1_88 = arith.constant 1 : index
      %c0_89 = arith.constant 0 : index
      %98 = vector.load %arg2[%c1_86, %c0_87, %c1_88, %c0_89] : memref<2x1x16x32xbf16, #tpu.memory_space<vmem>>, vector<1x1x8x32xbf16>
      %99 = vector.shape_cast %98 : vector<1x1x8x32xbf16> to vector<8x32xbf16>
      %100 = arith.index_cast %arg1 : i32 to index
      %c1_90 = arith.constant 1 : index
      %c0_91 = arith.constant 0 : index
      %c0_92 = arith.constant 0 : index
      %101 = vector.load %arg3[%100, %c1_90, %c0_91, %c0_92] : memref<9x9x32x16xbf16, #tpu.memory_space<vmem>>, vector<1x1x32x16xbf16>
      %102 = vector.shape_cast %101 : vector<1x1x32x16xbf16> to vector<32x16xbf16>
      %cst_93 = arith.constant dense<0.000000e+00> : vector<8x16xf32>
      %103 = tpu.matmul %99, %102, %cst_93 {dimension_numbers = #tpu.dot_dimension_numbers<[1], [0], [0], [1], [0, 0, 1, 1], [], []>} : vector<8x32xbf16>, vector<32x16xbf16>, vector<8x16xf32> -> vector<8x16xf32>
      %104 = arith.addf %97, %103 : vector<8x16xf32>
      %c1_94 = arith.constant 1 : index
      %c0_95 = arith.constant 0 : index
      %c2_96 = arith.constant 2 : index
      %c0_97 = arith.constant 0 : index
      %105 = vector.load %arg2[%c1_94, %c0_95, %c2_96, %c0_97] : memref<2x1x16x32xbf16, #tpu.memory_space<vmem>>, vector<1x1x8x32xbf16>
      %106 = vector.shape_cast %105 : vector<1x1x8x32xbf16> to vector<8x32xbf16>
      %107 = arith.index_cast %arg1 : i32 to index
      %c2_98 = arith.constant 2 : index
      %c0_99 = arith.constant 0 : index
      %c0_100 = arith.constant 0 : index
      %108 = vector.load %arg3[%107, %c2_98, %c0_99, %c0_100] : memref<9x9x32x16xbf16, #tpu.memory_space<vmem>>, vector<1x1x32x16xbf16>
      %109 = vector.shape_cast %108 : vector<1x1x32x16xbf16> to vector<32x16xbf16>
      %cst_101 = arith.constant dense<0.000000e+00> : vector<8x16xf32>
      %110 = tpu.matmul %106, %109, %cst_101 {dimension_numbers = #tpu.dot_dimension_numbers<[1], [0], [0], [1], [0, 0, 1, 1], [], []>} : vector<8x32xbf16>, vector<32x16xbf16>, vector<8x16xf32> -> vector<8x16xf32>
      %111 = arith.addf %104, %110 : vector<8x16xf32>
      %c1_102 = arith.constant 1 : index
      %c0_103 = arith.constant 0 : index
      %c3_104 = arith.constant 3 : index
      %c0_105 = arith.constant 0 : index
      %112 = vector.load %arg2[%c1_102, %c0_103, %c3_104, %c0_105] : memref<2x1x16x32xbf16, #tpu.memory_space<vmem>>, vector<1x1x8x32xbf16>
      %113 = vector.shape_cast %112 : vector<1x1x8x32xbf16> to vector<8x32xbf16>
      %114 = arith.index_cast %arg1 : i32 to index
      %c3_106 = arith.constant 3 : index
      %c0_107 = arith.constant 0 : index
      %c0_108 = arith.constant 0 : index
      %115 = vector.load %arg3[%114, %c3_106, %c0_107, %c0_108] : memref<9x9x32x16xbf16, #tpu.memory_space<vmem>>, vector<1x1x32x16xbf16>
      %116 = vector.shape_cast %115 : vector<1x1x32x16xbf16> to vector<32x16xbf16>
      %cst_109 = arith.constant dense<0.000000e+00> : vector<8x16xf32>
      %117 = tpu.matmul %113, %116, %cst_109 {dimension_numbers = #tpu.dot_dimension_numbers<[1], [0], [0], [1], [0, 0, 1, 1], [], []>} : vector<8x32xbf16>, vector<32x16xbf16>, vector<8x16xf32> -> vector<8x16xf32>
      %118 = arith.addf %111, %117 : vector<8x16xf32>
      %c1_110 = arith.constant 1 : index
      %c0_111 = arith.constant 0 : index
      %c4_112 = arith.constant 4 : index
      %c0_113 = arith.constant 0 : index
      %119 = vector.load %arg2[%c1_110, %c0_111, %c4_112, %c0_113] : memref<2x1x16x32xbf16, #tpu.memory_space<vmem>>, vector<1x1x8x32xbf16>
      %120 = vector.shape_cast %119 : vector<1x1x8x32xbf16> to vector<8x32xbf16>
      %121 = arith.index_cast %arg1 : i32 to index
      %c4_114 = arith.constant 4 : index
      %c0_115 = arith.constant 0 : index
      %c0_116 = arith.constant 0 : index
      %122 = vector.load %arg3[%121, %c4_114, %c0_115, %c0_116] : memref<9x9x32x16xbf16, #tpu.memory_space<vmem>>, vector<1x1x32x16xbf16>
      %123 = vector.shape_cast %122 : vector<1x1x32x16xbf16> to vector<32x16xbf16>
      %cst_117 = arith.constant dense<0.000000e+00> : vector<8x16xf32>
      %124 = tpu.matmul %120, %123, %cst_117 {dimension_numbers = #tpu.dot_dimension_numbers<[1], [0], [0], [1], [0, 0, 1, 1], [], []>} : vector<8x32xbf16>, vector<32x16xbf16>, vector<8x16xf32> -> vector<8x16xf32>
      %125 = arith.addf %118, %124 : vector<8x16xf32>
      %c1_118 = arith.constant 1 : index
      %c0_119 = arith.constant 0 : index
      %c5_120 = arith.constant 5 : index
      %c0_121 = arith.constant 0 : index
      %126 = vector.load %arg2[%c1_118, %c0_119, %c5_120, %c0_121] : memref<2x1x16x32xbf16, #tpu.memory_space<vmem>>, vector<1x1x8x32xbf16>
      %127 = vector.shape_cast %126 : vector<1x1x8x32xbf16> to vector<8x32xbf16>
      %128 = arith.index_cast %arg1 : i32 to index
      %c5_122 = arith.constant 5 : index
      %c0_123 = arith.constant 0 : index
      %c0_124 = arith.constant 0 : index
      %129 = vector.load %arg3[%128, %c5_122, %c0_123, %c0_124] : memref<9x9x32x16xbf16, #tpu.memory_space<vmem>>, vector<1x1x32x16xbf16>
      %130 = vector.shape_cast %129 : vector<1x1x32x16xbf16> to vector<32x16xbf16>
      %cst_125 = arith.constant dense<0.000000e+00> : vector<8x16xf32>
      %131 = tpu.matmul %127, %130, %cst_125 {dimension_numbers = #tpu.dot_dimension_numbers<[1], [0], [0], [1], [0, 0, 1, 1], [], []>} : vector<8x32xbf16>, vector<32x16xbf16>, vector<8x16xf32> -> vector<8x16xf32>
      %132 = arith.addf %125, %131 : vector<8x16xf32>
      %c1_126 = arith.constant 1 : index
      %c0_127 = arith.constant 0 : index
      %c6_128 = arith.constant 6 : index
      %c0_129 = arith.constant 0 : index
      %133 = vector.load %arg2[%c1_126, %c0_127, %c6_128, %c0_129] : memref<2x1x16x32xbf16, #tpu.memory_space<vmem>>, vector<1x1x8x32xbf16>
      %134 = vector.shape_cast %133 : vector<1x1x8x32xbf16> to vector<8x32xbf16>
      %135 = arith.index_cast %arg1 : i32 to index
      %c6_130 = arith.constant 6 : index
      %c0_131 = arith.constant 0 : index
      %c0_132 = arith.constant 0 : index
      %136 = vector.load %arg3[%135, %c6_130, %c0_131, %c0_132] : memref<9x9x32x16xbf16, #tpu.memory_space<vmem>>, vector<1x1x32x16xbf16>
      %137 = vector.shape_cast %136 : vector<1x1x32x16xbf16> to vector<32x16xbf16>
      %cst_133 = arith.constant dense<0.000000e+00> : vector<8x16xf32>
      %138 = tpu.matmul %134, %137, %cst_133 {dimension_numbers = #tpu.dot_dimension_numbers<[1], [0], [0], [1], [0, 0, 1, 1], [], []>} : vector<8x32xbf16>, vector<32x16xbf16>, vector<8x16xf32> -> vector<8x16xf32>
      %139 = arith.addf %132, %138 : vector<8x16xf32>
      %c1_134 = arith.constant 1 : index
      %c0_135 = arith.constant 0 : index
      %c7_136 = arith.constant 7 : index
      %c0_137 = arith.constant 0 : index
      %140 = vector.load %arg2[%c1_134, %c0_135, %c7_136, %c0_137] : memref<2x1x16x32xbf16, #tpu.memory_space<vmem>>, vector<1x1x8x32xbf16>
      %141 = vector.shape_cast %140 : vector<1x1x8x32xbf16> to vector<8x32xbf16>
      %142 = arith.index_cast %arg1 : i32 to index
      %c7_138 = arith.constant 7 : index
      %c0_139 = arith.constant 0 : index
      %c0_140 = arith.constant 0 : index
      %143 = vector.load %arg3[%142, %c7_138, %c0_139, %c0_140] : memref<9x9x32x16xbf16, #tpu.memory_space<vmem>>, vector<1x1x32x16xbf16>
      %144 = vector.shape_cast %143 : vector<1x1x32x16xbf16> to vector<32x16xbf16>
      %cst_141 = arith.constant dense<0.000000e+00> : vector<8x16xf32>
      %145 = tpu.matmul %141, %144, %cst_141 {dimension_numbers = #tpu.dot_dimension_numbers<[1], [0], [0], [1], [0, 0, 1, 1], [], []>} : vector<8x32xbf16>, vector<32x16xbf16>, vector<8x16xf32> -> vector<8x16xf32>
      %146 = arith.addf %139, %145 : vector<8x16xf32>
      %c1_142 = arith.constant 1 : index
      %c0_143 = arith.constant 0 : index
      %c8_144 = arith.constant 8 : index
      %c0_145 = arith.constant 0 : index
      %147 = vector.load %arg2[%c1_142, %c0_143, %c8_144, %c0_145] : memref<2x1x16x32xbf16, #tpu.memory_space<vmem>>, vector<1x1x8x32xbf16>
      %148 = vector.shape_cast %147 : vector<1x1x8x32xbf16> to vector<8x32xbf16>
      %149 = arith.index_cast %arg1 : i32 to index
      %c8_146 = arith.constant 8 : index
      %c0_147 = arith.constant 0 : index
      %c0_148 = arith.constant 0 : index
      %150 = vector.load %arg3[%149, %c8_146, %c0_147, %c0_148] : memref<9x9x32x16xbf16, #tpu.memory_space<vmem>>, vector<1x1x32x16xbf16>
      %151 = vector.shape_cast %150 : vector<1x1x32x16xbf16> to vector<32x16xbf16>
      %cst_149 = arith.constant dense<0.000000e+00> : vector<8x16xf32>
      %152 = tpu.matmul %148, %151, %cst_149 {dimension_numbers = #tpu.dot_dimension_numbers<[1], [0], [0], [1], [0, 0, 1, 1], [], []>} : vector<8x32xbf16>, vector<32x16xbf16>, vector<8x16xf32> -> vector<8x16xf32>
      %153 = arith.addf %146, %152 : vector<8x16xf32>
      %c1_150 = arith.constant 1 : index
      %c0_151 = arith.constant 0 : index
      %c0_152 = arith.constant 0 : index
      %154 = vector.load %arg7[%c1_150, %c0_151, %c0_152] : memref<2x8x16xf32, #tpu.memory_space<vmem>>, vector<1x8x16xf32>
      %155 = vector.shape_cast %154 : vector<1x8x16xf32> to vector<8x16xf32>
      %156 = arith.addf %155, %153 : vector<8x16xf32>
      %c1_153 = arith.constant 1 : index
      %c0_154 = arith.constant 0 : index
      %c0_155 = arith.constant 0 : index
      %157 = vector.load %arg7[%c1_153, %c0_154, %c0_155] : memref<2x8x16xf32, #tpu.memory_space<vmem>>, vector<1x8x16xf32>
      %158 = vector.shape_cast %157 : vector<1x8x16xf32> to vector<8x16xf32>
      %159 = vector.shape_cast %156 : vector<8x16xf32> to vector<1x8x16xf32>
      tpu.vector_store %arg7[%c1_153, %c0_154, %c0_155], %159 {strides = array<i32>} : memref<2x8x16xf32, #tpu.memory_space<vmem>>, vector<1x8x16xf32>,
    } else {
    }
    %c8_i32 = arith.constant 8 : i32
    %17 = arith.cmpi eq, %arg1, %c8_i32 : i32
    %18 = arith.extui %17 : i1 to i32
    %c0_i32_7 = arith.constant 0 : i32
    %19 = arith.cmpi ne, %18, %c0_i32_7 : i32
    scf.if %19 {
      %c0 = arith.constant 0 : index
      %c0_8 = arith.constant 0 : index
      %c0_9 = arith.constant 0 : index
      %20 = vector.load %arg7[%c0, %c0_8, %c0_9] : memref<2x8x16xf32, #tpu.memory_space<vmem>>, vector<2x8x16xf32>
      %c0_10 = arith.constant 0 : index
      %c0_11 = arith.constant 0 : index
      %21 = vector.load %arg4[%c0_10, %c0_11] : memref<1x16xf32, #tpu.memory_space<vmem>>, vector<1x16xf32>
      %22 = vector.shape_cast %21 : vector<1x16xf32> to vector<1x1x16xf32>
      %23 = vector.broadcast %22 : vector<1x1x16xf32> to vector<2x8x16xf32>
      %24 = arith.mulf %20, %23 : vector<2x8x16xf32>
      %c0_12 = arith.constant 0 : index
      %c0_13 = arith.constant 0 : index
      %25 = vector.load %arg5[%c0_12, %c0_13] : memref<1x16xf32, #tpu.memory_space<vmem>>, vector<1x16xf32>
      %26 = vector.shape_cast %25 : vector<1x16xf32> to vector<1x1x16xf32>
      %27 = vector.broadcast %26 : vector<1x1x16xf32> to vector<2x8x16xf32>
      %28 = arith.addf %24, %27 : vector<2x8x16xf32>
      %cst = arith.constant 0.000000e+00 : f32
      %29 = vector.broadcast %cst : f32 to vector<2x8x16xf32>
      %30 = arith.maximumf %28, %29 : vector<2x8x16xf32>
      %31 = arith.truncf %30 : vector<2x8x16xf32> to vector<2x8x16xbf16>
      %c0_14 = arith.constant 0 : index
      %c0_15 = arith.constant 0 : index
      %c0_16 = arith.constant 0 : index
      %c0_17 = arith.constant 0 : index
      %32 = vector.load %arg6[%c0_14, %c0_15, %c0_16, %c0_17] : memref<2x1x8x16xbf16, #tpu.memory_space<vmem>>, vector<2x1x8x16xbf16>
      %33 = vector.shape_cast %32 : vector<2x1x8x16xbf16> to vector<2x8x16xbf16>
      %34 = vector.shape_cast %31 : vector<2x8x16xbf16> to vector<2x1x8x16xbf16>
      tpu.vector_store %arg6[%c0_14, %c0_15, %c0_16, %c0_17], %34 {strides = array<i32>} : memref<2x1x8x16xbf16, #tpu.memory_space<vmem>>, vector<2x1x8x16xbf16>,
    } else {
    }
    return
  }
  func.func @transform_0(%arg0: i32, %arg1: i32) -> (i32, i32, i32, i32) {
    %0 = arith.addi %arg0, %arg1 : i32
    %c0_i32 = arith.constant 0 : i32
    %c0_i32_0 = arith.constant 0 : i32
    %c0_i32_1 = arith.constant 0 : i32
    %c0_i32_2 = arith.constant 0 : i32
    return %c0_i32, %0, %c0_i32_0, %c0_i32_1 : i32, i32, i32, i32
  }
  func.func @transform_1(%arg0: i32, %arg1: i32) -> (i32, i32, i32, i32) {
    %c0_i32 = arith.constant 0 : i32
    %c0_i32_0 = arith.constant 0 : i32
    %c0_i32_1 = arith.constant 0 : i32
    %c0_i32_2 = arith.constant 0 : i32
    %c0_i32_3 = arith.constant 0 : i32
    return %c0_i32, %c0_i32_0, %c0_i32_1, %c0_i32_2 : i32, i32, i32, i32
  }
  func.func @transform_2(%arg0: i32, %arg1: i32) -> (i32, i32) {
    %c0_i32 = arith.constant 0 : i32
    %c0_i32_0 = arith.constant 0 : i32
    %c0_i32_1 = arith.constant 0 : i32
    return %c0_i32, %c0_i32_0 : i32, i32
  }
  func.func @transform_3(%arg0: i32, %arg1: i32) -> (i32, i32) {
    %c0_i32 = arith.constant 0 : i32
    %c0_i32_0 = arith.constant 0 : i32
    %c0_i32_1 = arith.constant 0 : i32
    return %c0_i32, %c0_i32_0 : i32, i32
  }
  func.func @transform_4(%arg0: i32, %arg1: i32) -> (i32, i32, i32, i32) {
    %c0_i32 = arith.constant 0 : i32
    %c0_i32_0 = arith.constant 0 : i32
    %c0_i32_1 = arith.constant 0 : i32
    %c0_i32_2 = arith.constant 0 : i32
    return %c0_i32, %arg0, %c0_i32_0, %c0_i32_1 : i32, i32, i32, i32
  }
}

module attributes {stable_mosaic.version = 11 : i64} {
  func.func @_conv_row_kernel(%arg0: i32, %arg1: i32, %arg2: memref<2x1x12x48xbf16, #tpu.memory_space<vmem>>, %arg3: memref<5x5x48x16xbf16, #tpu.memory_space<vmem>>, %arg4: memref<1x16xf32, #tpu.memory_space<vmem>>, %arg5: memref<1x16xf32, #tpu.memory_space<vmem>>, %arg6: memref<2x1x8x16xbf16, #tpu.memory_space<vmem>>, %arg7: memref<2x8x16xf32, #tpu.memory_space<vmem>>) attributes {dimension_semantics = [#tpu.dimension_semantics<parallel>, #tpu.dimension_semantics<arbitrary>], iteration_bounds = array<i64: 8, 5>, scalar_prefetch = 0 : i64, scratch_operands = 1 : i64, tpu.core_type = #tpu.core_type<tc>, window_params = [{transform_indices = @transform_0, window_bounds = array<i64: 2, 1, 12, 48>}, {pipeline_mode = #tpu.pipeline_mode<synchronous>, transform_indices = @transform_1, window_bounds = array<i64: 5, 5, 48, 16>}, {pipeline_mode = #tpu.pipeline_mode<synchronous>, transform_indices = @transform_2, window_bounds = array<i64: 1, 16>}, {pipeline_mode = #tpu.pipeline_mode<synchronous>, transform_indices = @transform_3, window_bounds = array<i64: 1, 16>}, {transform_indices = @transform_4, window_bounds = array<i64: 2, 1, 8, 16>}]} {
    %c0_i32 = arith.constant 0 : i32
    %0 = arith.cmpi eq, %arg1, %c0_i32 : i32
    %1 = arith.extui %0 : i1 to i32
    %c0_i32_0 = arith.constant 0 : i32
    %2 = arith.cmpi ne, %1, %c0_i32_0 : i32
    scf.if %2 {
      %cst_90 = arith.constant 0.000000e+00 : f32
      %90 = vector.broadcast %cst_90 : f32 to vector<2x8x16xf32>
      %c0_91 = arith.constant 0 : index
      %c0_92 = arith.constant 0 : index
      %c0_93 = arith.constant 0 : index
      %91 = vector.load %arg7[%c0_91, %c0_92, %c0_93] : memref<2x8x16xf32, #tpu.memory_space<vmem>>, vector<2x8x16xf32>
      tpu.vector_store %arg7[%c0_91, %c0_92, %c0_93], %90 {strides = array<i32>} : memref<2x8x16xf32, #tpu.memory_space<vmem>>, vector<2x8x16xf32>,
    } else {
    }
    %cst = arith.constant 0.000000e+00 : f32
    %3 = vector.broadcast %cst : f32 to vector<8x16xf32>
    %c0 = arith.constant 0 : index
    %c0_1 = arith.constant 0 : index
    %c0_2 = arith.constant 0 : index
    %c0_3 = arith.constant 0 : index
    %4 = vector.load %arg2[%c0, %c0_1, %c0_2, %c0_3] : memref<2x1x12x48xbf16, #tpu.memory_space<vmem>>, vector<1x1x8x48xbf16>
    %5 = vector.shape_cast %4 : vector<1x1x8x48xbf16> to vector<8x48xbf16>
    %6 = arith.index_cast %arg1 : i32 to index
    %c0_4 = arith.constant 0 : index
    %c0_5 = arith.constant 0 : index
    %c0_6 = arith.constant 0 : index
    %7 = vector.load %arg3[%6, %c0_4, %c0_5, %c0_6] : memref<5x5x48x16xbf16, #tpu.memory_space<vmem>>, vector<1x1x48x16xbf16>
    %8 = vector.shape_cast %7 : vector<1x1x48x16xbf16> to vector<48x16xbf16>
    %cst_7 = arith.constant dense<0.000000e+00> : vector<8x16xf32>
    %9 = tpu.matmul %5, %8, %cst_7 {dimension_numbers = #tpu.dot_dimension_numbers<[1], [0], [0], [1], [0, 0, 1, 1], [], []>} : vector<8x48xbf16>, vector<48x16xbf16>, vector<8x16xf32> -> vector<8x16xf32>
    %10 = arith.addf %3, %9 : vector<8x16xf32>
    %c0_8 = arith.constant 0 : index
    %c0_9 = arith.constant 0 : index
    %c1 = arith.constant 1 : index
    %c0_10 = arith.constant 0 : index
    %11 = vector.load %arg2[%c0_8, %c0_9, %c1, %c0_10] : memref<2x1x12x48xbf16, #tpu.memory_space<vmem>>, vector<1x1x8x48xbf16>
    %12 = vector.shape_cast %11 : vector<1x1x8x48xbf16> to vector<8x48xbf16>
    %13 = arith.index_cast %arg1 : i32 to index
    %c1_11 = arith.constant 1 : index
    %c0_12 = arith.constant 0 : index
    %c0_13 = arith.constant 0 : index
    %14 = vector.load %arg3[%13, %c1_11, %c0_12, %c0_13] : memref<5x5x48x16xbf16, #tpu.memory_space<vmem>>, vector<1x1x48x16xbf16>
    %15 = vector.shape_cast %14 : vector<1x1x48x16xbf16> to vector<48x16xbf16>
    %cst_14 = arith.constant dense<0.000000e+00> : vector<8x16xf32>
    %16 = tpu.matmul %12, %15, %cst_14 {dimension_numbers = #tpu.dot_dimension_numbers<[1], [0], [0], [1], [0, 0, 1, 1], [], []>} : vector<8x48xbf16>, vector<48x16xbf16>, vector<8x16xf32> -> vector<8x16xf32>
    %17 = arith.addf %10, %16 : vector<8x16xf32>
    %c0_15 = arith.constant 0 : index
    %c0_16 = arith.constant 0 : index
    %c2 = arith.constant 2 : index
    %c0_17 = arith.constant 0 : index
    %18 = vector.load %arg2[%c0_15, %c0_16, %c2, %c0_17] : memref<2x1x12x48xbf16, #tpu.memory_space<vmem>>, vector<1x1x8x48xbf16>
    %19 = vector.shape_cast %18 : vector<1x1x8x48xbf16> to vector<8x48xbf16>
    %20 = arith.index_cast %arg1 : i32 to index
    %c2_18 = arith.constant 2 : index
    %c0_19 = arith.constant 0 : index
    %c0_20 = arith.constant 0 : index
    %21 = vector.load %arg3[%20, %c2_18, %c0_19, %c0_20] : memref<5x5x48x16xbf16, #tpu.memory_space<vmem>>, vector<1x1x48x16xbf16>
    %22 = vector.shape_cast %21 : vector<1x1x48x16xbf16> to vector<48x16xbf16>
    %cst_21 = arith.constant dense<0.000000e+00> : vector<8x16xf32>
    %23 = tpu.matmul %19, %22, %cst_21 {dimension_numbers = #tpu.dot_dimension_numbers<[1], [0], [0], [1], [0, 0, 1, 1], [], []>} : vector<8x48xbf16>, vector<48x16xbf16>, vector<8x16xf32> -> vector<8x16xf32>
    %24 = arith.addf %17, %23 : vector<8x16xf32>
    %c0_22 = arith.constant 0 : index
    %c0_23 = arith.constant 0 : index
    %c3 = arith.constant 3 : index
    %c0_24 = arith.constant 0 : index
    %25 = vector.load %arg2[%c0_22, %c0_23, %c3, %c0_24] : memref<2x1x12x48xbf16, #tpu.memory_space<vmem>>, vector<1x1x8x48xbf16>
    %26 = vector.shape_cast %25 : vector<1x1x8x48xbf16> to vector<8x48xbf16>
    %27 = arith.index_cast %arg1 : i32 to index
    %c3_25 = arith.constant 3 : index
    %c0_26 = arith.constant 0 : index
    %c0_27 = arith.constant 0 : index
    %28 = vector.load %arg3[%27, %c3_25, %c0_26, %c0_27] : memref<5x5x48x16xbf16, #tpu.memory_space<vmem>>, vector<1x1x48x16xbf16>
    %29 = vector.shape_cast %28 : vector<1x1x48x16xbf16> to vector<48x16xbf16>
    %cst_28 = arith.constant dense<0.000000e+00> : vector<8x16xf32>
    %30 = tpu.matmul %26, %29, %cst_28 {dimension_numbers = #tpu.dot_dimension_numbers<[1], [0], [0], [1], [0, 0, 1, 1], [], []>} : vector<8x48xbf16>, vector<48x16xbf16>, vector<8x16xf32> -> vector<8x16xf32>
    %31 = arith.addf %24, %30 : vector<8x16xf32>
    %c0_29 = arith.constant 0 : index
    %c0_30 = arith.constant 0 : index
    %c4 = arith.constant 4 : index
    %c0_31 = arith.constant 0 : index
    %32 = vector.load %arg2[%c0_29, %c0_30, %c4, %c0_31] : memref<2x1x12x48xbf16, #tpu.memory_space<vmem>>, vector<1x1x8x48xbf16>
    %33 = vector.shape_cast %32 : vector<1x1x8x48xbf16> to vector<8x48xbf16>
    %34 = arith.index_cast %arg1 : i32 to index
    %c4_32 = arith.constant 4 : index
    %c0_33 = arith.constant 0 : index
    %c0_34 = arith.constant 0 : index
    %35 = vector.load %arg3[%34, %c4_32, %c0_33, %c0_34] : memref<5x5x48x16xbf16, #tpu.memory_space<vmem>>, vector<1x1x48x16xbf16>
    %36 = vector.shape_cast %35 : vector<1x1x48x16xbf16> to vector<48x16xbf16>
    %cst_35 = arith.constant dense<0.000000e+00> : vector<8x16xf32>
    %37 = tpu.matmul %33, %36, %cst_35 {dimension_numbers = #tpu.dot_dimension_numbers<[1], [0], [0], [1], [0, 0, 1, 1], [], []>} : vector<8x48xbf16>, vector<48x16xbf16>, vector<8x16xf32> -> vector<8x16xf32>
    %38 = arith.addf %31, %37 : vector<8x16xf32>
    %c0_36 = arith.constant 0 : index
    %c0_37 = arith.constant 0 : index
    %c0_38 = arith.constant 0 : index
    %39 = vector.load %arg7[%c0_36, %c0_37, %c0_38] : memref<2x8x16xf32, #tpu.memory_space<vmem>>, vector<1x8x16xf32>
    %40 = vector.shape_cast %39 : vector<1x8x16xf32> to vector<8x16xf32>
    %41 = arith.addf %40, %38 : vector<8x16xf32>
    %c0_39 = arith.constant 0 : index
    %c0_40 = arith.constant 0 : index
    %c0_41 = arith.constant 0 : index
    %42 = vector.load %arg7[%c0_39, %c0_40, %c0_41] : memref<2x8x16xf32, #tpu.memory_space<vmem>>, vector<1x8x16xf32>
    %43 = vector.shape_cast %42 : vector<1x8x16xf32> to vector<8x16xf32>
    %44 = vector.shape_cast %41 : vector<8x16xf32> to vector<1x8x16xf32>
    tpu.vector_store %arg7[%c0_39, %c0_40, %c0_41], %44 {strides = array<i32>} : memref<2x8x16xf32, #tpu.memory_space<vmem>>, vector<1x8x16xf32>,
    %cst_42 = arith.constant 0.000000e+00 : f32
    %45 = vector.broadcast %cst_42 : f32 to vector<8x16xf32>
    %c1_43 = arith.constant 1 : index
    %c0_44 = arith.constant 0 : index
    %c0_45 = arith.constant 0 : index
    %c0_46 = arith.constant 0 : index
    %46 = vector.load %arg2[%c1_43, %c0_44, %c0_45, %c0_46] : memref<2x1x12x48xbf16, #tpu.memory_space<vmem>>, vector<1x1x8x48xbf16>
    %47 = vector.shape_cast %46 : vector<1x1x8x48xbf16> to vector<8x48xbf16>
    %48 = arith.index_cast %arg1 : i32 to index
    %c0_47 = arith.constant 0 : index
    %c0_48 = arith.constant 0 : index
    %c0_49 = arith.constant 0 : index
    %49 = vector.load %arg3[%48, %c0_47, %c0_48, %c0_49] : memref<5x5x48x16xbf16, #tpu.memory_space<vmem>>, vector<1x1x48x16xbf16>
    %50 = vector.shape_cast %49 : vector<1x1x48x16xbf16> to vector<48x16xbf16>
    %cst_50 = arith.constant dense<0.000000e+00> : vector<8x16xf32>
    %51 = tpu.matmul %47, %50, %cst_50 {dimension_numbers = #tpu.dot_dimension_numbers<[1], [0], [0], [1], [0, 0, 1, 1], [], []>} : vector<8x48xbf16>, vector<48x16xbf16>, vector<8x16xf32> -> vector<8x16xf32>
    %52 = arith.addf %45, %51 : vector<8x16xf32>
    %c1_51 = arith.constant 1 : index
    %c0_52 = arith.constant 0 : index
    %c1_53 = arith.constant 1 : index
    %c0_54 = arith.constant 0 : index
    %53 = vector.load %arg2[%c1_51, %c0_52, %c1_53, %c0_54] : memref<2x1x12x48xbf16, #tpu.memory_space<vmem>>, vector<1x1x8x48xbf16>
    %54 = vector.shape_cast %53 : vector<1x1x8x48xbf16> to vector<8x48xbf16>
    %55 = arith.index_cast %arg1 : i32 to index
    %c1_55 = arith.constant 1 : index
    %c0_56 = arith.constant 0 : index
    %c0_57 = arith.constant 0 : index
    %56 = vector.load %arg3[%55, %c1_55, %c0_56, %c0_57] : memref<5x5x48x16xbf16, #tpu.memory_space<vmem>>, vector<1x1x48x16xbf16>
    %57 = vector.shape_cast %56 : vector<1x1x48x16xbf16> to vector<48x16xbf16>
    %cst_58 = arith.constant dense<0.000000e+00> : vector<8x16xf32>
    %58 = tpu.matmul %54, %57, %cst_58 {dimension_numbers = #tpu.dot_dimension_numbers<[1], [0], [0], [1], [0, 0, 1, 1], [], []>} : vector<8x48xbf16>, vector<48x16xbf16>, vector<8x16xf32> -> vector<8x16xf32>
    %59 = arith.addf %52, %58 : vector<8x16xf32>
    %c1_59 = arith.constant 1 : index
    %c0_60 = arith.constant 0 : index
    %c2_61 = arith.constant 2 : index
    %c0_62 = arith.constant 0 : index
    %60 = vector.load %arg2[%c1_59, %c0_60, %c2_61, %c0_62] : memref<2x1x12x48xbf16, #tpu.memory_space<vmem>>, vector<1x1x8x48xbf16>
    %61 = vector.shape_cast %60 : vector<1x1x8x48xbf16> to vector<8x48xbf16>
    %62 = arith.index_cast %arg1 : i32 to index
    %c2_63 = arith.constant 2 : index
    %c0_64 = arith.constant 0 : index
    %c0_65 = arith.constant 0 : index
    %63 = vector.load %arg3[%62, %c2_63, %c0_64, %c0_65] : memref<5x5x48x16xbf16, #tpu.memory_space<vmem>>, vector<1x1x48x16xbf16>
    %64 = vector.shape_cast %63 : vector<1x1x48x16xbf16> to vector<48x16xbf16>
    %cst_66 = arith.constant dense<0.000000e+00> : vector<8x16xf32>
    %65 = tpu.matmul %61, %64, %cst_66 {dimension_numbers = #tpu.dot_dimension_numbers<[1], [0], [0], [1], [0, 0, 1, 1], [], []>} : vector<8x48xbf16>, vector<48x16xbf16>, vector<8x16xf32> -> vector<8x16xf32>
    %66 = arith.addf %59, %65 : vector<8x16xf32>
    %c1_67 = arith.constant 1 : index
    %c0_68 = arith.constant 0 : index
    %c3_69 = arith.constant 3 : index
    %c0_70 = arith.constant 0 : index
    %67 = vector.load %arg2[%c1_67, %c0_68, %c3_69, %c0_70] : memref<2x1x12x48xbf16, #tpu.memory_space<vmem>>, vector<1x1x8x48xbf16>
    %68 = vector.shape_cast %67 : vector<1x1x8x48xbf16> to vector<8x48xbf16>
    %69 = arith.index_cast %arg1 : i32 to index
    %c3_71 = arith.constant 3 : index
    %c0_72 = arith.constant 0 : index
    %c0_73 = arith.constant 0 : index
    %70 = vector.load %arg3[%69, %c3_71, %c0_72, %c0_73] : memref<5x5x48x16xbf16, #tpu.memory_space<vmem>>, vector<1x1x48x16xbf16>
    %71 = vector.shape_cast %70 : vector<1x1x48x16xbf16> to vector<48x16xbf16>
    %cst_74 = arith.constant dense<0.000000e+00> : vector<8x16xf32>
    %72 = tpu.matmul %68, %71, %cst_74 {dimension_numbers = #tpu.dot_dimension_numbers<[1], [0], [0], [1], [0, 0, 1, 1], [], []>} : vector<8x48xbf16>, vector<48x16xbf16>, vector<8x16xf32> -> vector<8x16xf32>
    %73 = arith.addf %66, %72 : vector<8x16xf32>
    %c1_75 = arith.constant 1 : index
    %c0_76 = arith.constant 0 : index
    %c4_77 = arith.constant 4 : index
    %c0_78 = arith.constant 0 : index
    %74 = vector.load %arg2[%c1_75, %c0_76, %c4_77, %c0_78] : memref<2x1x12x48xbf16, #tpu.memory_space<vmem>>, vector<1x1x8x48xbf16>
    %75 = vector.shape_cast %74 : vector<1x1x8x48xbf16> to vector<8x48xbf16>
    %76 = arith.index_cast %arg1 : i32 to index
    %c4_79 = arith.constant 4 : index
    %c0_80 = arith.constant 0 : index
    %c0_81 = arith.constant 0 : index
    %77 = vector.load %arg3[%76, %c4_79, %c0_80, %c0_81] : memref<5x5x48x16xbf16, #tpu.memory_space<vmem>>, vector<1x1x48x16xbf16>
    %78 = vector.shape_cast %77 : vector<1x1x48x16xbf16> to vector<48x16xbf16>
    %cst_82 = arith.constant dense<0.000000e+00> : vector<8x16xf32>
    %79 = tpu.matmul %75, %78, %cst_82 {dimension_numbers = #tpu.dot_dimension_numbers<[1], [0], [0], [1], [0, 0, 1, 1], [], []>} : vector<8x48xbf16>, vector<48x16xbf16>, vector<8x16xf32> -> vector<8x16xf32>
    %80 = arith.addf %73, %79 : vector<8x16xf32>
    %c1_83 = arith.constant 1 : index
    %c0_84 = arith.constant 0 : index
    %c0_85 = arith.constant 0 : index
    %81 = vector.load %arg7[%c1_83, %c0_84, %c0_85] : memref<2x8x16xf32, #tpu.memory_space<vmem>>, vector<1x8x16xf32>
    %82 = vector.shape_cast %81 : vector<1x8x16xf32> to vector<8x16xf32>
    %83 = arith.addf %82, %80 : vector<8x16xf32>
    %c1_86 = arith.constant 1 : index
    %c0_87 = arith.constant 0 : index
    %c0_88 = arith.constant 0 : index
    %84 = vector.load %arg7[%c1_86, %c0_87, %c0_88] : memref<2x8x16xf32, #tpu.memory_space<vmem>>, vector<1x8x16xf32>
    %85 = vector.shape_cast %84 : vector<1x8x16xf32> to vector<8x16xf32>
    %86 = vector.shape_cast %83 : vector<8x16xf32> to vector<1x8x16xf32>
    tpu.vector_store %arg7[%c1_86, %c0_87, %c0_88], %86 {strides = array<i32>} : memref<2x8x16xf32, #tpu.memory_space<vmem>>, vector<1x8x16xf32>,
    %c4_i32 = arith.constant 4 : i32
    %87 = arith.cmpi eq, %arg1, %c4_i32 : i32
    %88 = arith.extui %87 : i1 to i32
    %c0_i32_89 = arith.constant 0 : i32
    %89 = arith.cmpi ne, %88, %c0_i32_89 : i32
    scf.if %89 {
      %c0_90 = arith.constant 0 : index
      %c0_91 = arith.constant 0 : index
      %c0_92 = arith.constant 0 : index
      %90 = vector.load %arg7[%c0_90, %c0_91, %c0_92] : memref<2x8x16xf32, #tpu.memory_space<vmem>>, vector<2x8x16xf32>
      %c0_93 = arith.constant 0 : index
      %c0_94 = arith.constant 0 : index
      %91 = vector.load %arg4[%c0_93, %c0_94] : memref<1x16xf32, #tpu.memory_space<vmem>>, vector<1x16xf32>
      %92 = vector.shape_cast %91 : vector<1x16xf32> to vector<1x1x16xf32>
      %93 = vector.broadcast %92 : vector<1x1x16xf32> to vector<2x8x16xf32>
      %94 = arith.mulf %90, %93 : vector<2x8x16xf32>
      %c0_95 = arith.constant 0 : index
      %c0_96 = arith.constant 0 : index
      %95 = vector.load %arg5[%c0_95, %c0_96] : memref<1x16xf32, #tpu.memory_space<vmem>>, vector<1x16xf32>
      %96 = vector.shape_cast %95 : vector<1x16xf32> to vector<1x1x16xf32>
      %97 = vector.broadcast %96 : vector<1x1x16xf32> to vector<2x8x16xf32>
      %98 = arith.addf %94, %97 : vector<2x8x16xf32>
      %cst_97 = arith.constant 0.000000e+00 : f32
      %99 = vector.broadcast %cst_97 : f32 to vector<2x8x16xf32>
      %100 = arith.maximumf %98, %99 : vector<2x8x16xf32>
      %101 = arith.truncf %100 : vector<2x8x16xf32> to vector<2x8x16xbf16>
      %c0_98 = arith.constant 0 : index
      %c0_99 = arith.constant 0 : index
      %c0_100 = arith.constant 0 : index
      %c0_101 = arith.constant 0 : index
      %102 = vector.load %arg6[%c0_98, %c0_99, %c0_100, %c0_101] : memref<2x1x8x16xbf16, #tpu.memory_space<vmem>>, vector<2x1x8x16xbf16>
      %103 = vector.shape_cast %102 : vector<2x1x8x16xbf16> to vector<2x8x16xbf16>
      %104 = vector.shape_cast %101 : vector<2x8x16xbf16> to vector<2x1x8x16xbf16>
      tpu.vector_store %arg6[%c0_98, %c0_99, %c0_100, %c0_101], %104 {strides = array<i32>} : memref<2x1x8x16xbf16, #tpu.memory_space<vmem>>, vector<2x1x8x16xbf16>,
    } else {
    }
    return
  }
  func.func @transform_0(%arg0: i32, %arg1: i32) -> (i32, i32, i32, i32) {
    %0 = arith.addi %arg0, %arg1 : i32
    %c0_i32 = arith.constant 0 : i32
    %c0_i32_0 = arith.constant 0 : i32
    %c0_i32_1 = arith.constant 0 : i32
    %c0_i32_2 = arith.constant 0 : i32
    return %c0_i32, %0, %c0_i32_0, %c0_i32_1 : i32, i32, i32, i32
  }
  func.func @transform_1(%arg0: i32, %arg1: i32) -> (i32, i32, i32, i32) {
    %c0_i32 = arith.constant 0 : i32
    %c0_i32_0 = arith.constant 0 : i32
    %c0_i32_1 = arith.constant 0 : i32
    %c0_i32_2 = arith.constant 0 : i32
    %c0_i32_3 = arith.constant 0 : i32
    return %c0_i32, %c0_i32_0, %c0_i32_1, %c0_i32_2 : i32, i32, i32, i32
  }
  func.func @transform_2(%arg0: i32, %arg1: i32) -> (i32, i32) {
    %c0_i32 = arith.constant 0 : i32
    %c0_i32_0 = arith.constant 0 : i32
    %c0_i32_1 = arith.constant 0 : i32
    return %c0_i32, %c0_i32_0 : i32, i32
  }
  func.func @transform_3(%arg0: i32, %arg1: i32) -> (i32, i32) {
    %c0_i32 = arith.constant 0 : i32
    %c0_i32_0 = arith.constant 0 : i32
    %c0_i32_1 = arith.constant 0 : i32
    return %c0_i32, %c0_i32_0 : i32, i32
  }
  func.func @transform_4(%arg0: i32, %arg1: i32) -> (i32, i32, i32, i32) {
    %c0_i32 = arith.constant 0 : i32
    %c0_i32_0 = arith.constant 0 : i32
    %c0_i32_1 = arith.constant 0 : i32
    %c0_i32_2 = arith.constant 0 : i32
    return %c0_i32, %arg0, %c0_i32_0, %c0_i32_1 : i32, i32, i32, i32
  }
}

module attributes {stable_mosaic.version = 11 : i64} {
  func.func @_conv_row_kernel(%arg0: i32, %arg1: i32, %arg2: memref<2x1x20x16xbf16, #tpu.memory_space<vmem>>, %arg3: memref<5x5x16x4xbf16, #tpu.memory_space<vmem>>, %arg4: memref<1x4xf32, #tpu.memory_space<vmem>>, %arg5: memref<1x4xf32, #tpu.memory_space<vmem>>, %arg6: memref<2x1x16x4xbf16, #tpu.memory_space<vmem>>, %arg7: memref<2x16x4xf32, #tpu.memory_space<vmem>>) attributes {dimension_semantics = [#tpu.dimension_semantics<parallel>, #tpu.dimension_semantics<arbitrary>], iteration_bounds = array<i64: 16, 5>, scalar_prefetch = 0 : i64, scratch_operands = 1 : i64, tpu.core_type = #tpu.core_type<tc>, window_params = [{transform_indices = @transform_0, window_bounds = array<i64: 2, 1, 20, 16>}, {pipeline_mode = #tpu.pipeline_mode<synchronous>, transform_indices = @transform_1, window_bounds = array<i64: 5, 5, 16, 4>}, {pipeline_mode = #tpu.pipeline_mode<synchronous>, transform_indices = @transform_2, window_bounds = array<i64: 1, 4>}, {pipeline_mode = #tpu.pipeline_mode<synchronous>, transform_indices = @transform_3, window_bounds = array<i64: 1, 4>}, {transform_indices = @transform_4, window_bounds = array<i64: 2, 1, 16, 4>}]} {
    %c0_i32 = arith.constant 0 : i32
    %0 = arith.cmpi eq, %arg1, %c0_i32 : i32
    %1 = arith.extui %0 : i1 to i32
    %c0_i32_0 = arith.constant 0 : i32
    %2 = arith.cmpi ne, %1, %c0_i32_0 : i32
    scf.if %2 {
      %cst = arith.constant 0.000000e+00 : f32
      %20 = vector.broadcast %cst : f32 to vector<2x16x4xf32>
      %c0 = arith.constant 0 : index
      %c0_8 = arith.constant 0 : index
      %c0_9 = arith.constant 0 : index
      %21 = vector.load %arg7[%c0, %c0_8, %c0_9] : memref<2x16x4xf32, #tpu.memory_space<vmem>>, vector<2x16x4xf32>
      tpu.vector_store %arg7[%c0, %c0_8, %c0_9], %20 {strides = array<i32>} : memref<2x16x4xf32, #tpu.memory_space<vmem>>, vector<2x16x4xf32>,
    } else {
    }
    %3 = arith.addi %arg0, %arg1 : i32
    %c2_i32 = arith.constant 2 : i32
    %c0_i32_1 = arith.constant 0 : i32
    %4 = arith.cmpi eq, %c2_i32, %c0_i32_1 : i32
    %c1_i32 = arith.constant 1 : i32
    %5 = arith.select %4, %c1_i32, %c2_i32 : i32
    %6 = arith.remsi %3, %5 : i32
    %c0_i32_2 = arith.constant 0 : i32
    %7 = arith.cmpi ne, %6, %c0_i32_2 : i32
    %c0_i32_3 = arith.constant 0 : i32
    %8 = arith.cmpi slt, %6, %c0_i32_3 : i32
    %c0_i32_4 = arith.constant 0 : i32
    %9 = arith.cmpi slt, %5, %c0_i32_4 : i32
    %10 = arith.xori %8, %9 : i1
    %11 = arith.andi %10, %7 : i1
    %12 = arith.addi %6, %5 : i32
    %13 = arith.select %11, %12, %6 : i32
    %c0_i32_5 = arith.constant 0 : i32
    %14 = arith.cmpi eq, %13, %c0_i32_5 : i32
    %15 = arith.extui %14 : i1 to i32
    %c0_i32_6 = arith.constant 0 : i32
    %16 = arith.cmpi ne, %15, %c0_i32_6 : i32
    scf.if %16 {
      %cst = arith.constant 0.000000e+00 : f32
      %20 = vector.broadcast %cst : f32 to vector<16x4xf32>
      %c0 = arith.constant 0 : index
      %c0_8 = arith.constant 0 : index
      %c0_9 = arith.constant 0 : index
      %c0_10 = arith.constant 0 : index
      %21 = vector.load %arg2[%c0, %c0_8, %c0_9, %c0_10] : memref<2x1x20x16xbf16, #tpu.memory_space<vmem>>, vector<1x1x16x16xbf16>
      %22 = vector.shape_cast %21 : vector<1x1x16x16xbf16> to vector<16x16xbf16>
      %23 = arith.index_cast %arg1 : i32 to index
      %c0_11 = arith.constant 0 : index
      %c0_12 = arith.constant 0 : index
      %c0_13 = arith.constant 0 : index
      %24 = vector.load %arg3[%23, %c0_11, %c0_12, %c0_13] : memref<5x5x16x4xbf16, #tpu.memory_space<vmem>>, vector<1x1x16x4xbf16>
      %25 = vector.shape_cast %24 : vector<1x1x16x4xbf16> to vector<16x4xbf16>
      %cst_14 = arith.constant dense<0.000000e+00> : vector<16x4xf32>
      %26 = tpu.matmul %22, %25, %cst_14 {dimension_numbers = #tpu.dot_dimension_numbers<[1], [0], [0], [1], [0, 0, 1, 1], [], []>} : vector<16x16xbf16>, vector<16x4xbf16>, vector<16x4xf32> -> vector<16x4xf32>
      %27 = arith.addf %20, %26 : vector<16x4xf32>
      %c0_15 = arith.constant 0 : index
      %c0_16 = arith.constant 0 : index
      %c1 = arith.constant 1 : index
      %c0_17 = arith.constant 0 : index
      %28 = vector.load %arg2[%c0_15, %c0_16, %c1, %c0_17] : memref<2x1x20x16xbf16, #tpu.memory_space<vmem>>, vector<1x1x16x16xbf16>
      %29 = vector.shape_cast %28 : vector<1x1x16x16xbf16> to vector<16x16xbf16>
      %30 = arith.index_cast %arg1 : i32 to index
      %c1_18 = arith.constant 1 : index
      %c0_19 = arith.constant 0 : index
      %c0_20 = arith.constant 0 : index
      %31 = vector.load %arg3[%30, %c1_18, %c0_19, %c0_20] : memref<5x5x16x4xbf16, #tpu.memory_space<vmem>>, vector<1x1x16x4xbf16>
      %32 = vector.shape_cast %31 : vector<1x1x16x4xbf16> to vector<16x4xbf16>
      %cst_21 = arith.constant dense<0.000000e+00> : vector<16x4xf32>
      %33 = tpu.matmul %29, %32, %cst_21 {dimension_numbers = #tpu.dot_dimension_numbers<[1], [0], [0], [1], [0, 0, 1, 1], [], []>} : vector<16x16xbf16>, vector<16x4xbf16>, vector<16x4xf32> -> vector<16x4xf32>
      %34 = arith.addf %27, %33 : vector<16x4xf32>
      %c0_22 = arith.constant 0 : index
      %c0_23 = arith.constant 0 : index
      %c2 = arith.constant 2 : index
      %c0_24 = arith.constant 0 : index
      %35 = vector.load %arg2[%c0_22, %c0_23, %c2, %c0_24] : memref<2x1x20x16xbf16, #tpu.memory_space<vmem>>, vector<1x1x16x16xbf16>
      %36 = vector.shape_cast %35 : vector<1x1x16x16xbf16> to vector<16x16xbf16>
      %37 = arith.index_cast %arg1 : i32 to index
      %c2_25 = arith.constant 2 : index
      %c0_26 = arith.constant 0 : index
      %c0_27 = arith.constant 0 : index
      %38 = vector.load %arg3[%37, %c2_25, %c0_26, %c0_27] : memref<5x5x16x4xbf16, #tpu.memory_space<vmem>>, vector<1x1x16x4xbf16>
      %39 = vector.shape_cast %38 : vector<1x1x16x4xbf16> to vector<16x4xbf16>
      %cst_28 = arith.constant dense<0.000000e+00> : vector<16x4xf32>
      %40 = tpu.matmul %36, %39, %cst_28 {dimension_numbers = #tpu.dot_dimension_numbers<[1], [0], [0], [1], [0, 0, 1, 1], [], []>} : vector<16x16xbf16>, vector<16x4xbf16>, vector<16x4xf32> -> vector<16x4xf32>
      %41 = arith.addf %34, %40 : vector<16x4xf32>
      %c0_29 = arith.constant 0 : index
      %c0_30 = arith.constant 0 : index
      %c3 = arith.constant 3 : index
      %c0_31 = arith.constant 0 : index
      %42 = vector.load %arg2[%c0_29, %c0_30, %c3, %c0_31] : memref<2x1x20x16xbf16, #tpu.memory_space<vmem>>, vector<1x1x16x16xbf16>
      %43 = vector.shape_cast %42 : vector<1x1x16x16xbf16> to vector<16x16xbf16>
      %44 = arith.index_cast %arg1 : i32 to index
      %c3_32 = arith.constant 3 : index
      %c0_33 = arith.constant 0 : index
      %c0_34 = arith.constant 0 : index
      %45 = vector.load %arg3[%44, %c3_32, %c0_33, %c0_34] : memref<5x5x16x4xbf16, #tpu.memory_space<vmem>>, vector<1x1x16x4xbf16>
      %46 = vector.shape_cast %45 : vector<1x1x16x4xbf16> to vector<16x4xbf16>
      %cst_35 = arith.constant dense<0.000000e+00> : vector<16x4xf32>
      %47 = tpu.matmul %43, %46, %cst_35 {dimension_numbers = #tpu.dot_dimension_numbers<[1], [0], [0], [1], [0, 0, 1, 1], [], []>} : vector<16x16xbf16>, vector<16x4xbf16>, vector<16x4xf32> -> vector<16x4xf32>
      %48 = arith.addf %41, %47 : vector<16x4xf32>
      %c0_36 = arith.constant 0 : index
      %c0_37 = arith.constant 0 : index
      %c4 = arith.constant 4 : index
      %c0_38 = arith.constant 0 : index
      %49 = vector.load %arg2[%c0_36, %c0_37, %c4, %c0_38] : memref<2x1x20x16xbf16, #tpu.memory_space<vmem>>, vector<1x1x16x16xbf16>
      %50 = vector.shape_cast %49 : vector<1x1x16x16xbf16> to vector<16x16xbf16>
      %51 = arith.index_cast %arg1 : i32 to index
      %c4_39 = arith.constant 4 : index
      %c0_40 = arith.constant 0 : index
      %c0_41 = arith.constant 0 : index
      %52 = vector.load %arg3[%51, %c4_39, %c0_40, %c0_41] : memref<5x5x16x4xbf16, #tpu.memory_space<vmem>>, vector<1x1x16x4xbf16>
      %53 = vector.shape_cast %52 : vector<1x1x16x4xbf16> to vector<16x4xbf16>
      %cst_42 = arith.constant dense<0.000000e+00> : vector<16x4xf32>
      %54 = tpu.matmul %50, %53, %cst_42 {dimension_numbers = #tpu.dot_dimension_numbers<[1], [0], [0], [1], [0, 0, 1, 1], [], []>} : vector<16x16xbf16>, vector<16x4xbf16>, vector<16x4xf32> -> vector<16x4xf32>
      %55 = arith.addf %48, %54 : vector<16x4xf32>
      %c0_43 = arith.constant 0 : index
      %c0_44 = arith.constant 0 : index
      %c0_45 = arith.constant 0 : index
      %56 = vector.load %arg7[%c0_43, %c0_44, %c0_45] : memref<2x16x4xf32, #tpu.memory_space<vmem>>, vector<1x16x4xf32>
      %57 = vector.shape_cast %56 : vector<1x16x4xf32> to vector<16x4xf32>
      %58 = arith.addf %57, %55 : vector<16x4xf32>
      %c0_46 = arith.constant 0 : index
      %c0_47 = arith.constant 0 : index
      %c0_48 = arith.constant 0 : index
      %59 = vector.load %arg7[%c0_46, %c0_47, %c0_48] : memref<2x16x4xf32, #tpu.memory_space<vmem>>, vector<1x16x4xf32>
      %60 = vector.shape_cast %59 : vector<1x16x4xf32> to vector<16x4xf32>
      %61 = vector.shape_cast %58 : vector<16x4xf32> to vector<1x16x4xf32>
      tpu.vector_store %arg7[%c0_46, %c0_47, %c0_48], %61 {strides = array<i32>} : memref<2x16x4xf32, #tpu.memory_space<vmem>>, vector<1x16x4xf32>,
      %cst_49 = arith.constant 0.000000e+00 : f32
      %62 = vector.broadcast %cst_49 : f32 to vector<16x4xf32>
      %c1_50 = arith.constant 1 : index
      %c0_51 = arith.constant 0 : index
      %c0_52 = arith.constant 0 : index
      %c0_53 = arith.constant 0 : index
      %63 = vector.load %arg2[%c1_50, %c0_51, %c0_52, %c0_53] : memref<2x1x20x16xbf16, #tpu.memory_space<vmem>>, vector<1x1x16x16xbf16>
      %64 = vector.shape_cast %63 : vector<1x1x16x16xbf16> to vector<16x16xbf16>
      %65 = arith.index_cast %arg1 : i32 to index
      %c0_54 = arith.constant 0 : index
      %c0_55 = arith.constant 0 : index
      %c0_56 = arith.constant 0 : index
      %66 = vector.load %arg3[%65, %c0_54, %c0_55, %c0_56] : memref<5x5x16x4xbf16, #tpu.memory_space<vmem>>, vector<1x1x16x4xbf16>
      %67 = vector.shape_cast %66 : vector<1x1x16x4xbf16> to vector<16x4xbf16>
      %cst_57 = arith.constant dense<0.000000e+00> : vector<16x4xf32>
      %68 = tpu.matmul %64, %67, %cst_57 {dimension_numbers = #tpu.dot_dimension_numbers<[1], [0], [0], [1], [0, 0, 1, 1], [], []>} : vector<16x16xbf16>, vector<16x4xbf16>, vector<16x4xf32> -> vector<16x4xf32>
      %69 = arith.addf %62, %68 : vector<16x4xf32>
      %c1_58 = arith.constant 1 : index
      %c0_59 = arith.constant 0 : index
      %c1_60 = arith.constant 1 : index
      %c0_61 = arith.constant 0 : index
      %70 = vector.load %arg2[%c1_58, %c0_59, %c1_60, %c0_61] : memref<2x1x20x16xbf16, #tpu.memory_space<vmem>>, vector<1x1x16x16xbf16>
      %71 = vector.shape_cast %70 : vector<1x1x16x16xbf16> to vector<16x16xbf16>
      %72 = arith.index_cast %arg1 : i32 to index
      %c1_62 = arith.constant 1 : index
      %c0_63 = arith.constant 0 : index
      %c0_64 = arith.constant 0 : index
      %73 = vector.load %arg3[%72, %c1_62, %c0_63, %c0_64] : memref<5x5x16x4xbf16, #tpu.memory_space<vmem>>, vector<1x1x16x4xbf16>
      %74 = vector.shape_cast %73 : vector<1x1x16x4xbf16> to vector<16x4xbf16>
      %cst_65 = arith.constant dense<0.000000e+00> : vector<16x4xf32>
      %75 = tpu.matmul %71, %74, %cst_65 {dimension_numbers = #tpu.dot_dimension_numbers<[1], [0], [0], [1], [0, 0, 1, 1], [], []>} : vector<16x16xbf16>, vector<16x4xbf16>, vector<16x4xf32> -> vector<16x4xf32>
      %76 = arith.addf %69, %75 : vector<16x4xf32>
      %c1_66 = arith.constant 1 : index
      %c0_67 = arith.constant 0 : index
      %c2_68 = arith.constant 2 : index
      %c0_69 = arith.constant 0 : index
      %77 = vector.load %arg2[%c1_66, %c0_67, %c2_68, %c0_69] : memref<2x1x20x16xbf16, #tpu.memory_space<vmem>>, vector<1x1x16x16xbf16>
      %78 = vector.shape_cast %77 : vector<1x1x16x16xbf16> to vector<16x16xbf16>
      %79 = arith.index_cast %arg1 : i32 to index
      %c2_70 = arith.constant 2 : index
      %c0_71 = arith.constant 0 : index
      %c0_72 = arith.constant 0 : index
      %80 = vector.load %arg3[%79, %c2_70, %c0_71, %c0_72] : memref<5x5x16x4xbf16, #tpu.memory_space<vmem>>, vector<1x1x16x4xbf16>
      %81 = vector.shape_cast %80 : vector<1x1x16x4xbf16> to vector<16x4xbf16>
      %cst_73 = arith.constant dense<0.000000e+00> : vector<16x4xf32>
      %82 = tpu.matmul %78, %81, %cst_73 {dimension_numbers = #tpu.dot_dimension_numbers<[1], [0], [0], [1], [0, 0, 1, 1], [], []>} : vector<16x16xbf16>, vector<16x4xbf16>, vector<16x4xf32> -> vector<16x4xf32>
      %83 = arith.addf %76, %82 : vector<16x4xf32>
      %c1_74 = arith.constant 1 : index
      %c0_75 = arith.constant 0 : index
      %c3_76 = arith.constant 3 : index
      %c0_77 = arith.constant 0 : index
      %84 = vector.load %arg2[%c1_74, %c0_75, %c3_76, %c0_77] : memref<2x1x20x16xbf16, #tpu.memory_space<vmem>>, vector<1x1x16x16xbf16>
      %85 = vector.shape_cast %84 : vector<1x1x16x16xbf16> to vector<16x16xbf16>
      %86 = arith.index_cast %arg1 : i32 to index
      %c3_78 = arith.constant 3 : index
      %c0_79 = arith.constant 0 : index
      %c0_80 = arith.constant 0 : index
      %87 = vector.load %arg3[%86, %c3_78, %c0_79, %c0_80] : memref<5x5x16x4xbf16, #tpu.memory_space<vmem>>, vector<1x1x16x4xbf16>
      %88 = vector.shape_cast %87 : vector<1x1x16x4xbf16> to vector<16x4xbf16>
      %cst_81 = arith.constant dense<0.000000e+00> : vector<16x4xf32>
      %89 = tpu.matmul %85, %88, %cst_81 {dimension_numbers = #tpu.dot_dimension_numbers<[1], [0], [0], [1], [0, 0, 1, 1], [], []>} : vector<16x16xbf16>, vector<16x4xbf16>, vector<16x4xf32> -> vector<16x4xf32>
      %90 = arith.addf %83, %89 : vector<16x4xf32>
      %c1_82 = arith.constant 1 : index
      %c0_83 = arith.constant 0 : index
      %c4_84 = arith.constant 4 : index
      %c0_85 = arith.constant 0 : index
      %91 = vector.load %arg2[%c1_82, %c0_83, %c4_84, %c0_85] : memref<2x1x20x16xbf16, #tpu.memory_space<vmem>>, vector<1x1x16x16xbf16>
      %92 = vector.shape_cast %91 : vector<1x1x16x16xbf16> to vector<16x16xbf16>
      %93 = arith.index_cast %arg1 : i32 to index
      %c4_86 = arith.constant 4 : index
      %c0_87 = arith.constant 0 : index
      %c0_88 = arith.constant 0 : index
      %94 = vector.load %arg3[%93, %c4_86, %c0_87, %c0_88] : memref<5x5x16x4xbf16, #tpu.memory_space<vmem>>, vector<1x1x16x4xbf16>
      %95 = vector.shape_cast %94 : vector<1x1x16x4xbf16> to vector<16x4xbf16>
      %cst_89 = arith.constant dense<0.000000e+00> : vector<16x4xf32>
      %96 = tpu.matmul %92, %95, %cst_89 {dimension_numbers = #tpu.dot_dimension_numbers<[1], [0], [0], [1], [0, 0, 1, 1], [], []>} : vector<16x16xbf16>, vector<16x4xbf16>, vector<16x4xf32> -> vector<16x4xf32>
      %97 = arith.addf %90, %96 : vector<16x4xf32>
      %c1_90 = arith.constant 1 : index
      %c0_91 = arith.constant 0 : index
      %c0_92 = arith.constant 0 : index
      %98 = vector.load %arg7[%c1_90, %c0_91, %c0_92] : memref<2x16x4xf32, #tpu.memory_space<vmem>>, vector<1x16x4xf32>
      %99 = vector.shape_cast %98 : vector<1x16x4xf32> to vector<16x4xf32>
      %100 = arith.addf %99, %97 : vector<16x4xf32>
      %c1_93 = arith.constant 1 : index
      %c0_94 = arith.constant 0 : index
      %c0_95 = arith.constant 0 : index
      %101 = vector.load %arg7[%c1_93, %c0_94, %c0_95] : memref<2x16x4xf32, #tpu.memory_space<vmem>>, vector<1x16x4xf32>
      %102 = vector.shape_cast %101 : vector<1x16x4xf32> to vector<16x4xf32>
      %103 = vector.shape_cast %100 : vector<16x4xf32> to vector<1x16x4xf32>
      tpu.vector_store %arg7[%c1_93, %c0_94, %c0_95], %103 {strides = array<i32>} : memref<2x16x4xf32, #tpu.memory_space<vmem>>, vector<1x16x4xf32>,
    } else {
    }
    %c4_i32 = arith.constant 4 : i32
    %17 = arith.cmpi eq, %arg1, %c4_i32 : i32
    %18 = arith.extui %17 : i1 to i32
    %c0_i32_7 = arith.constant 0 : i32
    %19 = arith.cmpi ne, %18, %c0_i32_7 : i32
    scf.if %19 {
      %c0 = arith.constant 0 : index
      %c0_8 = arith.constant 0 : index
      %c0_9 = arith.constant 0 : index
      %20 = vector.load %arg7[%c0, %c0_8, %c0_9] : memref<2x16x4xf32, #tpu.memory_space<vmem>>, vector<2x16x4xf32>
      %c0_10 = arith.constant 0 : index
      %c0_11 = arith.constant 0 : index
      %21 = vector.load %arg4[%c0_10, %c0_11] : memref<1x4xf32, #tpu.memory_space<vmem>>, vector<1x4xf32>
      %22 = vector.shape_cast %21 : vector<1x4xf32> to vector<1x1x4xf32>
      %23 = vector.broadcast %22 : vector<1x1x4xf32> to vector<2x16x4xf32>
      %24 = arith.mulf %20, %23 : vector<2x16x4xf32>
      %c0_12 = arith.constant 0 : index
      %c0_13 = arith.constant 0 : index
      %25 = vector.load %arg5[%c0_12, %c0_13] : memref<1x4xf32, #tpu.memory_space<vmem>>, vector<1x4xf32>
      %26 = vector.shape_cast %25 : vector<1x4xf32> to vector<1x1x4xf32>
      %27 = vector.broadcast %26 : vector<1x1x4xf32> to vector<2x16x4xf32>
      %28 = arith.addf %24, %27 : vector<2x16x4xf32>
      %cst = arith.constant 0.000000e+00 : f32
      %29 = vector.broadcast %cst : f32 to vector<2x16x4xf32>
      %30 = arith.maximumf %28, %29 : vector<2x16x4xf32>
      %31 = arith.truncf %30 : vector<2x16x4xf32> to vector<2x16x4xbf16>
      %c0_14 = arith.constant 0 : index
      %c0_15 = arith.constant 0 : index
      %c0_16 = arith.constant 0 : index
      %c0_17 = arith.constant 0 : index
      %32 = vector.load %arg6[%c0_14, %c0_15, %c0_16, %c0_17] : memref<2x1x16x4xbf16, #tpu.memory_space<vmem>>, vector<2x1x16x4xbf16>
      %33 = vector.shape_cast %32 : vector<2x1x16x4xbf16> to vector<2x16x4xbf16>
      %34 = vector.shape_cast %31 : vector<2x16x4xbf16> to vector<2x1x16x4xbf16>
      tpu.vector_store %arg6[%c0_14, %c0_15, %c0_16, %c0_17], %34 {strides = array<i32>} : memref<2x1x16x4xbf16, #tpu.memory_space<vmem>>, vector<2x1x16x4xbf16>,
    } else {
    }
    return
  }
  func.func @transform_0(%arg0: i32, %arg1: i32) -> (i32, i32, i32, i32) {
    %0 = arith.addi %arg0, %arg1 : i32
    %c0_i32 = arith.constant 0 : i32
    %c0_i32_0 = arith.constant 0 : i32
    %c0_i32_1 = arith.constant 0 : i32
    %c0_i32_2 = arith.constant 0 : i32
    return %c0_i32, %0, %c0_i32_0, %c0_i32_1 : i32, i32, i32, i32
  }
  func.func @transform_1(%arg0: i32, %arg1: i32) -> (i32, i32, i32, i32) {
    %c0_i32 = arith.constant 0 : i32
    %c0_i32_0 = arith.constant 0 : i32
    %c0_i32_1 = arith.constant 0 : i32
    %c0_i32_2 = arith.constant 0 : i32
    %c0_i32_3 = arith.constant 0 : i32
    return %c0_i32, %c0_i32_0, %c0_i32_1, %c0_i32_2 : i32, i32, i32, i32
  }
  func.func @transform_2(%arg0: i32, %arg1: i32) -> (i32, i32) {
    %c0_i32 = arith.constant 0 : i32
    %c0_i32_0 = arith.constant 0 : i32
    %c0_i32_1 = arith.constant 0 : i32
    return %c0_i32, %c0_i32_0 : i32, i32
  }
  func.func @transform_3(%arg0: i32, %arg1: i32) -> (i32, i32) {
    %c0_i32 = arith.constant 0 : i32
    %c0_i32_0 = arith.constant 0 : i32
    %c0_i32_1 = arith.constant 0 : i32
    return %c0_i32, %c0_i32_0 : i32, i32
  }
  func.func @transform_4(%arg0: i32, %arg1: i32) -> (i32, i32, i32, i32) {
    %c0_i32 = arith.constant 0 : i32
    %c0_i32_0 = arith.constant 0 : i32
    %c0_i32_1 = arith.constant 0 : i32
    %c0_i32_2 = arith.constant 0 : i32
    return %c0_i32, %arg0, %c0_i32_0, %c0_i32_1 : i32, i32, i32, i32
  }
}

module attributes {stable_mosaic.version = 11 : i64} {
  func.func @_conv_row_kernel(%arg0: i32, %arg1: i32, %arg2: memref<2x1x18x4xbf16, #tpu.memory_space<vmem>>, %arg3: memref<3x3x4x1xbf16, #tpu.memory_space<vmem>>, %arg4: memref<1x1xf32, #tpu.memory_space<vmem>>, %arg5: memref<1x1xf32, #tpu.memory_space<vmem>>, %arg6: memref<2x1x16x1xf32, #tpu.memory_space<vmem>>, %arg7: memref<2x16x1xf32, #tpu.memory_space<vmem>>) attributes {dimension_semantics = [#tpu.dimension_semantics<parallel>, #tpu.dimension_semantics<arbitrary>], iteration_bounds = array<i64: 16, 3>, scalar_prefetch = 0 : i64, scratch_operands = 1 : i64, tpu.core_type = #tpu.core_type<tc>, window_params = [{transform_indices = @transform_0, window_bounds = array<i64: 2, 1, 18, 4>}, {pipeline_mode = #tpu.pipeline_mode<synchronous>, transform_indices = @transform_1, window_bounds = array<i64: 3, 3, 4, 1>}, {pipeline_mode = #tpu.pipeline_mode<synchronous>, transform_indices = @transform_2, window_bounds = array<i64: 1, 1>}, {pipeline_mode = #tpu.pipeline_mode<synchronous>, transform_indices = @transform_3, window_bounds = array<i64: 1, 1>}, {transform_indices = @transform_4, window_bounds = array<i64: 2, 1, 16, 1>}]} {
    %c0_i32 = arith.constant 0 : i32
    %0 = arith.cmpi eq, %arg1, %c0_i32 : i32
    %1 = arith.extui %0 : i1 to i32
    %c0_i32_0 = arith.constant 0 : i32
    %2 = arith.cmpi ne, %1, %c0_i32_0 : i32
    scf.if %2 {
      %cst_60 = arith.constant 0.000000e+00 : f32
      %62 = vector.broadcast %cst_60 : f32 to vector<2x16x1xf32>
      %c0_61 = arith.constant 0 : index
      %c0_62 = arith.constant 0 : index
      %c0_63 = arith.constant 0 : index
      %63 = vector.load %arg7[%c0_61, %c0_62, %c0_63] : memref<2x16x1xf32, #tpu.memory_space<vmem>>, vector<2x16x1xf32>
      tpu.vector_store %arg7[%c0_61, %c0_62, %c0_63], %62 {strides = array<i32>} : memref<2x16x1xf32, #tpu.memory_space<vmem>>, vector<2x16x1xf32>,
    } else {
    }
    %cst = arith.constant 0.000000e+00 : f32
    %3 = vector.broadcast %cst : f32 to vector<16x1xf32>
    %c0 = arith.constant 0 : index
    %c0_1 = arith.constant 0 : index
    %c0_2 = arith.constant 0 : index
    %c0_3 = arith.constant 0 : index
    %4 = vector.load %arg2[%c0, %c0_1, %c0_2, %c0_3] : memref<2x1x18x4xbf16, #tpu.memory_space<vmem>>, vector<1x1x16x4xbf16>
    %5 = vector.shape_cast %4 : vector<1x1x16x4xbf16> to vector<16x4xbf16>
    %6 = arith.index_cast %arg1 : i32 to index
    %c0_4 = arith.constant 0 : index
    %c0_5 = arith.constant 0 : index
    %c0_6 = arith.constant 0 : index
    %7 = vector.load %arg3[%6, %c0_4, %c0_5, %c0_6] : memref<3x3x4x1xbf16, #tpu.memory_space<vmem>>, vector<1x1x4x1xbf16>
    %8 = vector.shape_cast %7 : vector<1x1x4x1xbf16> to vector<4x1xbf16>
    %cst_7 = arith.constant dense<0.000000e+00> : vector<16x1xf32>
    %9 = tpu.matmul %5, %8, %cst_7 {dimension_numbers = #tpu.dot_dimension_numbers<[1], [0], [0], [1], [0, 0, 1, 1], [], []>} : vector<16x4xbf16>, vector<4x1xbf16>, vector<16x1xf32> -> vector<16x1xf32>
    %10 = arith.addf %3, %9 : vector<16x1xf32>
    %c0_8 = arith.constant 0 : index
    %c0_9 = arith.constant 0 : index
    %c1 = arith.constant 1 : index
    %c0_10 = arith.constant 0 : index
    %11 = vector.load %arg2[%c0_8, %c0_9, %c1, %c0_10] : memref<2x1x18x4xbf16, #tpu.memory_space<vmem>>, vector<1x1x16x4xbf16>
    %12 = vector.shape_cast %11 : vector<1x1x16x4xbf16> to vector<16x4xbf16>
    %13 = arith.index_cast %arg1 : i32 to index
    %c1_11 = arith.constant 1 : index
    %c0_12 = arith.constant 0 : index
    %c0_13 = arith.constant 0 : index
    %14 = vector.load %arg3[%13, %c1_11, %c0_12, %c0_13] : memref<3x3x4x1xbf16, #tpu.memory_space<vmem>>, vector<1x1x4x1xbf16>
    %15 = vector.shape_cast %14 : vector<1x1x4x1xbf16> to vector<4x1xbf16>
    %cst_14 = arith.constant dense<0.000000e+00> : vector<16x1xf32>
    %16 = tpu.matmul %12, %15, %cst_14 {dimension_numbers = #tpu.dot_dimension_numbers<[1], [0], [0], [1], [0, 0, 1, 1], [], []>} : vector<16x4xbf16>, vector<4x1xbf16>, vector<16x1xf32> -> vector<16x1xf32>
    %17 = arith.addf %10, %16 : vector<16x1xf32>
    %c0_15 = arith.constant 0 : index
    %c0_16 = arith.constant 0 : index
    %c2 = arith.constant 2 : index
    %c0_17 = arith.constant 0 : index
    %18 = vector.load %arg2[%c0_15, %c0_16, %c2, %c0_17] : memref<2x1x18x4xbf16, #tpu.memory_space<vmem>>, vector<1x1x16x4xbf16>
    %19 = vector.shape_cast %18 : vector<1x1x16x4xbf16> to vector<16x4xbf16>
    %20 = arith.index_cast %arg1 : i32 to index
    %c2_18 = arith.constant 2 : index
    %c0_19 = arith.constant 0 : index
    %c0_20 = arith.constant 0 : index
    %21 = vector.load %arg3[%20, %c2_18, %c0_19, %c0_20] : memref<3x3x4x1xbf16, #tpu.memory_space<vmem>>, vector<1x1x4x1xbf16>
    %22 = vector.shape_cast %21 : vector<1x1x4x1xbf16> to vector<4x1xbf16>
    %cst_21 = arith.constant dense<0.000000e+00> : vector<16x1xf32>
    %23 = tpu.matmul %19, %22, %cst_21 {dimension_numbers = #tpu.dot_dimension_numbers<[1], [0], [0], [1], [0, 0, 1, 1], [], []>} : vector<16x4xbf16>, vector<4x1xbf16>, vector<16x1xf32> -> vector<16x1xf32>
    %24 = arith.addf %17, %23 : vector<16x1xf32>
    %c0_22 = arith.constant 0 : index
    %c0_23 = arith.constant 0 : index
    %c0_24 = arith.constant 0 : index
    %25 = vector.load %arg7[%c0_22, %c0_23, %c0_24] : memref<2x16x1xf32, #tpu.memory_space<vmem>>, vector<1x16x1xf32>
    %26 = vector.shape_cast %25 : vector<1x16x1xf32> to vector<16x1xf32>
    %27 = arith.addf %26, %24 : vector<16x1xf32>
    %c0_25 = arith.constant 0 : index
    %c0_26 = arith.constant 0 : index
    %c0_27 = arith.constant 0 : index
    %28 = vector.load %arg7[%c0_25, %c0_26, %c0_27] : memref<2x16x1xf32, #tpu.memory_space<vmem>>, vector<1x16x1xf32>
    %29 = vector.shape_cast %28 : vector<1x16x1xf32> to vector<16x1xf32>
    %30 = vector.shape_cast %27 : vector<16x1xf32> to vector<1x16x1xf32>
    tpu.vector_store %arg7[%c0_25, %c0_26, %c0_27], %30 {strides = array<i32>} : memref<2x16x1xf32, #tpu.memory_space<vmem>>, vector<1x16x1xf32>,
    %cst_28 = arith.constant 0.000000e+00 : f32
    %31 = vector.broadcast %cst_28 : f32 to vector<16x1xf32>
    %c1_29 = arith.constant 1 : index
    %c0_30 = arith.constant 0 : index
    %c0_31 = arith.constant 0 : index
    %c0_32 = arith.constant 0 : index
    %32 = vector.load %arg2[%c1_29, %c0_30, %c0_31, %c0_32] : memref<2x1x18x4xbf16, #tpu.memory_space<vmem>>, vector<1x1x16x4xbf16>
    %33 = vector.shape_cast %32 : vector<1x1x16x4xbf16> to vector<16x4xbf16>
    %34 = arith.index_cast %arg1 : i32 to index
    %c0_33 = arith.constant 0 : index
    %c0_34 = arith.constant 0 : index
    %c0_35 = arith.constant 0 : index
    %35 = vector.load %arg3[%34, %c0_33, %c0_34, %c0_35] : memref<3x3x4x1xbf16, #tpu.memory_space<vmem>>, vector<1x1x4x1xbf16>
    %36 = vector.shape_cast %35 : vector<1x1x4x1xbf16> to vector<4x1xbf16>
    %cst_36 = arith.constant dense<0.000000e+00> : vector<16x1xf32>
    %37 = tpu.matmul %33, %36, %cst_36 {dimension_numbers = #tpu.dot_dimension_numbers<[1], [0], [0], [1], [0, 0, 1, 1], [], []>} : vector<16x4xbf16>, vector<4x1xbf16>, vector<16x1xf32> -> vector<16x1xf32>
    %38 = arith.addf %31, %37 : vector<16x1xf32>
    %c1_37 = arith.constant 1 : index
    %c0_38 = arith.constant 0 : index
    %c1_39 = arith.constant 1 : index
    %c0_40 = arith.constant 0 : index
    %39 = vector.load %arg2[%c1_37, %c0_38, %c1_39, %c0_40] : memref<2x1x18x4xbf16, #tpu.memory_space<vmem>>, vector<1x1x16x4xbf16>
    %40 = vector.shape_cast %39 : vector<1x1x16x4xbf16> to vector<16x4xbf16>
    %41 = arith.index_cast %arg1 : i32 to index
    %c1_41 = arith.constant 1 : index
    %c0_42 = arith.constant 0 : index
    %c0_43 = arith.constant 0 : index
    %42 = vector.load %arg3[%41, %c1_41, %c0_42, %c0_43] : memref<3x3x4x1xbf16, #tpu.memory_space<vmem>>, vector<1x1x4x1xbf16>
    %43 = vector.shape_cast %42 : vector<1x1x4x1xbf16> to vector<4x1xbf16>
    %cst_44 = arith.constant dense<0.000000e+00> : vector<16x1xf32>
    %44 = tpu.matmul %40, %43, %cst_44 {dimension_numbers = #tpu.dot_dimension_numbers<[1], [0], [0], [1], [0, 0, 1, 1], [], []>} : vector<16x4xbf16>, vector<4x1xbf16>, vector<16x1xf32> -> vector<16x1xf32>
    %45 = arith.addf %38, %44 : vector<16x1xf32>
    %c1_45 = arith.constant 1 : index
    %c0_46 = arith.constant 0 : index
    %c2_47 = arith.constant 2 : index
    %c0_48 = arith.constant 0 : index
    %46 = vector.load %arg2[%c1_45, %c0_46, %c2_47, %c0_48] : memref<2x1x18x4xbf16, #tpu.memory_space<vmem>>, vector<1x1x16x4xbf16>
    %47 = vector.shape_cast %46 : vector<1x1x16x4xbf16> to vector<16x4xbf16>
    %48 = arith.index_cast %arg1 : i32 to index
    %c2_49 = arith.constant 2 : index
    %c0_50 = arith.constant 0 : index
    %c0_51 = arith.constant 0 : index
    %49 = vector.load %arg3[%48, %c2_49, %c0_50, %c0_51] : memref<3x3x4x1xbf16, #tpu.memory_space<vmem>>, vector<1x1x4x1xbf16>
    %50 = vector.shape_cast %49 : vector<1x1x4x1xbf16> to vector<4x1xbf16>
    %cst_52 = arith.constant dense<0.000000e+00> : vector<16x1xf32>
    %51 = tpu.matmul %47, %50, %cst_52 {dimension_numbers = #tpu.dot_dimension_numbers<[1], [0], [0], [1], [0, 0, 1, 1], [], []>} : vector<16x4xbf16>, vector<4x1xbf16>, vector<16x1xf32> -> vector<16x1xf32>
    %52 = arith.addf %45, %51 : vector<16x1xf32>
    %c1_53 = arith.constant 1 : index
    %c0_54 = arith.constant 0 : index
    %c0_55 = arith.constant 0 : index
    %53 = vector.load %arg7[%c1_53, %c0_54, %c0_55] : memref<2x16x1xf32, #tpu.memory_space<vmem>>, vector<1x16x1xf32>
    %54 = vector.shape_cast %53 : vector<1x16x1xf32> to vector<16x1xf32>
    %55 = arith.addf %54, %52 : vector<16x1xf32>
    %c1_56 = arith.constant 1 : index
    %c0_57 = arith.constant 0 : index
    %c0_58 = arith.constant 0 : index
    %56 = vector.load %arg7[%c1_56, %c0_57, %c0_58] : memref<2x16x1xf32, #tpu.memory_space<vmem>>, vector<1x16x1xf32>
    %57 = vector.shape_cast %56 : vector<1x16x1xf32> to vector<16x1xf32>
    %58 = vector.shape_cast %55 : vector<16x1xf32> to vector<1x16x1xf32>
    tpu.vector_store %arg7[%c1_56, %c0_57, %c0_58], %58 {strides = array<i32>} : memref<2x16x1xf32, #tpu.memory_space<vmem>>, vector<1x16x1xf32>,
    %c2_i32 = arith.constant 2 : i32
    %59 = arith.cmpi eq, %arg1, %c2_i32 : i32
    %60 = arith.extui %59 : i1 to i32
    %c0_i32_59 = arith.constant 0 : i32
    %61 = arith.cmpi ne, %60, %c0_i32_59 : i32
    scf.if %61 {
      %c0_60 = arith.constant 0 : index
      %c0_61 = arith.constant 0 : index
      %c0_62 = arith.constant 0 : index
      %62 = vector.load %arg7[%c0_60, %c0_61, %c0_62] : memref<2x16x1xf32, #tpu.memory_space<vmem>>, vector<2x16x1xf32>
      %c0_63 = arith.constant 0 : index
      %c0_64 = arith.constant 0 : index
      %63 = vector.load %arg4[%c0_63, %c0_64] : memref<1x1xf32, #tpu.memory_space<vmem>>, vector<1x1xf32>
      %64 = vector.shape_cast %63 : vector<1x1xf32> to vector<1x1x1xf32>
      %65 = vector.broadcast %64 : vector<1x1x1xf32> to vector<2x16x1xf32>
      %66 = arith.mulf %62, %65 : vector<2x16x1xf32>
      %c0_65 = arith.constant 0 : index
      %c0_66 = arith.constant 0 : index
      %67 = vector.load %arg5[%c0_65, %c0_66] : memref<1x1xf32, #tpu.memory_space<vmem>>, vector<1x1xf32>
      %68 = vector.shape_cast %67 : vector<1x1xf32> to vector<1x1x1xf32>
      %69 = vector.broadcast %68 : vector<1x1x1xf32> to vector<2x16x1xf32>
      %70 = arith.addf %66, %69 : vector<2x16x1xf32>
      %c0_67 = arith.constant 0 : index
      %c0_68 = arith.constant 0 : index
      %c0_69 = arith.constant 0 : index
      %c0_70 = arith.constant 0 : index
      %71 = vector.load %arg6[%c0_67, %c0_68, %c0_69, %c0_70] : memref<2x1x16x1xf32, #tpu.memory_space<vmem>>, vector<2x1x16x1xf32>
      %72 = vector.shape_cast %71 : vector<2x1x16x1xf32> to vector<2x16x1xf32>
      %73 = vector.shape_cast %70 : vector<2x16x1xf32> to vector<2x1x16x1xf32>
      tpu.vector_store %arg6[%c0_67, %c0_68, %c0_69, %c0_70], %73 {strides = array<i32>} : memref<2x1x16x1xf32, #tpu.memory_space<vmem>>, vector<2x1x16x1xf32>,
    } else {
    }
    return
  }
  func.func @transform_0(%arg0: i32, %arg1: i32) -> (i32, i32, i32, i32) {
    %0 = arith.addi %arg0, %arg1 : i32
    %c0_i32 = arith.constant 0 : i32
    %c0_i32_0 = arith.constant 0 : i32
    %c0_i32_1 = arith.constant 0 : i32
    %c0_i32_2 = arith.constant 0 : i32
    return %c0_i32, %0, %c0_i32_0, %c0_i32_1 : i32, i32, i32, i32
  }
  func.func @transform_1(%arg0: i32, %arg1: i32) -> (i32, i32, i32, i32) {
    %c0_i32 = arith.constant 0 : i32
    %c0_i32_0 = arith.constant 0 : i32
    %c0_i32_1 = arith.constant 0 : i32
    %c0_i32_2 = arith.constant 0 : i32
    %c0_i32_3 = arith.constant 0 : i32
    return %c0_i32, %c0_i32_0, %c0_i32_1, %c0_i32_2 : i32, i32, i32, i32
  }
  func.func @transform_2(%arg0: i32, %arg1: i32) -> (i32, i32) {
    %c0_i32 = arith.constant 0 : i32
    %c0_i32_0 = arith.constant 0 : i32
    %c0_i32_1 = arith.constant 0 : i32
    return %c0_i32, %c0_i32_0 : i32, i32
  }
  func.func @transform_3(%arg0: i32, %arg1: i32) -> (i32, i32) {
    %c0_i32 = arith.constant 0 : i32
    %c0_i32_0 = arith.constant 0 : i32
    %c0_i32_1 = arith.constant 0 : i32
    return %c0_i32, %c0_i32_0 : i32, i32
  }
  func.func @transform_4(%arg0: i32, %arg1: i32) -> (i32, i32, i32, i32) {
    %c0_i32 = arith.constant 0 : i32
    %c0_i32_0 = arith.constant 0 : i32
    %c0_i32_1 = arith.constant 0 : i32
    %c0_i32_2 = arith.constant 0 : i32
    return %c0_i32, %arg0, %c0_i32_0, %c0_i32_1 : i32, i32, i32, i32
  }
}

</mosaic_0001>

<bundles_post_ra>
// kernel: routenet_fcn_forward.11
= control target key start
LH: loop header
LB: loop body
LE: loop exit
PB: predicated region body
PF: predicated region fallthrough
CT: control target
= control target key end

     0   :  { %8 = vsyncpa [#allocation3], 0  ;;  %s711_s12 = smov [#allocation2]   ;;  %s1318_s0 = inlined_call_operand.vmem [shape: f32[512,4], index: 0, kind: input, shape index: {}]   ;;  %s1319_s1 = inlined_call_operand.vmem [shape: f32[1,4], index: 1, kind: input, shape index: {}]   ;;  %s1320_s2 = inlined_call_operand.hbm [shape: f32[1,4], index: 2, kind: input, shape index: {}]   ;;  %s1321_s3 = inlined_call_operand.vmem [shape: bf16[512,4], index: 3, kind: output, shape index: {}]  }
   0x1   :  { %s19_s13 = sshll.u32 %s711_s12, 4  ;;  %s20_s13 = int_to_ptr.vmem [resolvable:$true] %s19_s13 }
   0x2   :  { %s697_s14 = scalar_lea.vmem %s20_s13, 16  ;;  %s701_s15 = scalar_lea.vmem %s20_s13, 32 }
   0x3   :  { %p698_p0 = scmp.ne.s32.totalorder %s20_s13, %s697_s14  ;;  %p702_p1 = scmp.lt.s32.totalorder %s20_s13, %s20_s13 }
   0x4   :  { %p703_p2 = scmp.lt.s32.totalorder %s701_s15, %s697_s14 }
   0x6   :  { %p704_p3 = por %p703_p2, %p702_p1 }
   0x8   :  { %p705_p4 = pnand %p704_p3, %p698_p0 }
   0xa   :  { %708 = shalt.err (!%p705_p4)
}
   0xb   :  { %22 = dma.hbm_to_vmem [thread:$0]  %s1320_s2, 16, %s20_s13, [#allocation3]  }
   0xc   :  { %709 = dma.done.wait [#allocation3], 16  }
   0xd   :  { %710 = vsyncadd [#allocation3], 4294967280  ;;  %v26_v0 = vld [vmem:[%s1318_s0] sm:$0xff]  ;;  %v27_v4 = vld [vmem:[%s1318_s0 + $0x8] sm:$0xff]  ;;  %vm488_vm0 = vcmask 27648  }
   0xe   :  { %v741_v1 = vld [vmem:[%s1319_s1] ss:$0 sm:$0xff]  ;;  %v28_v5 = vld [vmem:[%s1318_s0 + $0x10] sm:$0xff]  ;;  %v29_v6 = vld [vmem:[%s1318_s0 + $0x18] sm:$0xff] }
   0xf   :  { %v743_v2 = vld [vmem:[#allocation2] ss:$0 sm:$0xff]  ;;  %v97_v3 = vmul.f32 %v741_v1, %v26_v0  ;;  %v98_v7 = vmul.f32 %v741_v1, %v27_v4  ;;  %v99_v8 = vmul.f32 %v741_v1, %v28_v5  ;;  %v100_v9 = vmul.f32 %v741_v1, %v29_v6  ;;  %v31_v11 = vld [vmem:[%s1318_s0 + $0x28] sm:$0xff]  ;;  %v32_v12 = vld [vmem:[%s1318_s0 + $0x30] sm:$0xff] }
  0x10   :  { %v30_v10 = vld [vmem:[%s1318_s0 + $0x20] sm:$0xff]  ;;  %v102_v15 = vmul.f32 %v741_v1, %v31_v11  ;;  %v103_v16 = vmul.f32 %v741_v1, %v32_v12  ;;  %v33_v17 = vld [vmem:[%s1318_s0 + $0x38] sm:$0xff]  ;;  %v35_v27 = vld [vmem:[%s1318_s0 + $0x48] sm:$0xff] }
  0x11   :  { %v168_v13 = vadd.f32 %v743_v2, %v97_v3  ;;  %v101_v14 = vmul.f32 %v741_v1, %v30_v10  ;;  %v169_v18 = vadd.f32 %v743_v2, %v98_v7  ;;  %v170_v19 = vadd.f32 %v743_v2, %v99_v8  ;;  %v34_v22 = vld [vmem:[%s1318_s0 + $0x40] sm:$0xff]  ;;  %v36_v28 = vld [vmem:[%s1318_s0 + $0x50] sm:$0xff]  ;;  %v37_v29 = vld [vmem:[%s1318_s0 + $0x58] sm:$0xff] }
  0x12   :  { %v171_v20 = vadd.f32 %v743_v2, %v100_v9  ;;  %v104_v21 = vmul.f32 %v741_v1, %v33_v17  ;;  %v173_v25 = vadd.f32 %v743_v2, %v102_v15  ;;  %v174_v26 = vadd.f32 %v743_v2, %v103_v16  ;;  %v38_v34 = vld [vmem:[%s1318_s0 + $0x60] sm:$0xff]  ;;  %v39_v35 = vld [vmem:[%s1318_s0 + $0x68] sm:$0xff]  ;;  %v40_v36 = vld [vmem:[%s1318_s0 + $0x70] sm:$0xff] }
  0x13   :  { %v624_v23 = vpack.c.bf16 %v168_v13, %v168_v13  ;;  %v172_v24 = vadd.f32 %v743_v2, %v101_v14  ;;  %v625_v30 = vpack.c.bf16 %v169_v18, %v169_v18  ;;  %v626_v31 = vpack.c.bf16 %v170_v19, %v170_v19  ;;  %v41_v41 = vld [vmem:[%s1318_s0 + $0x78] sm:$0xff]  ;;  %v42_v54 = vld [vmem:[%s1318_s0 + $0x80] sm:$0xff]  ;;  %v43_v59 = vld [vmem:[%s1318_s0 + $0x88] sm:$0xff] }
  0x14   :  { %v627_v32 = vpack.c.bf16 %v171_v20, %v171_v20  ;;  %v175_v33 = vadd.f32 %v743_v2, %v104_v21  ;;  %v629_v38 = vpack.c.bf16 %v173_v25, %v173_v25  ;;  %v630_v39 = vpack.c.bf16 %v174_v26, %v174_v26  ;;  %v44_v60 = vld [vmem:[%s1318_s0 + $0x90] sm:$0xff]  ;;  %v45_v61 = vld [vmem:[%s1318_s0 + $0x98] sm:$0xff]  ;;  %v46_v4 = vld [vmem:[%s1318_s0 + $0xa0] sm:$0xff] }
  0x15   :  { %489 = vst.msk [vmem:[%s1321_s3] sm:$0xf] %vm488_vm0, %v624_v23  ;;  %v628_v37 = vpack.c.bf16 %v172_v24, %v172_v24  ;;  %v105_v40 = vmul.f32 %v741_v1, %v34_v22  ;;  %490 = vst.msk [vmem:[%s1321_s3 + $0x4] sm:$0xf] %vm488_vm0, %v625_v30  ;;  %v106_v43 = vmul.f32 %v741_v1, %v35_v27  ;;  %v47_v5 = vld [vmem:[%s1318_s0 + $0xa8] sm:$0xff]  ;;  %v48_v6 = vld [vmem:[%s1318_s0 + $0xb0] sm:$0xff] }
  0x16   :  { %491 = vst.msk [vmem:[%s1321_s3 + $0x8] sm:$0xf] %vm488_vm0, %v626_v31  ;;  %492 = vst.msk [vmem:[%s1321_s3 + $0xc] sm:$0xf] %vm488_vm0, %v627_v32  ;;  %v631_v42 = vpack.c.bf16 %v175_v33, %v175_v33  ;;  %v107_v44 = vmul.f32 %v741_v1, %v36_v28  ;;  %v108_v45 = vmul.f32 %v741_v1, %v37_v29  ;;  %v49_v11 = vld [vmem:[%s1318_s0 + $0xb8] sm:$0xff]  ;;  %v50_v24 = vld [vmem:[%s1318_s0 + $0xc0] sm:$0xff] }
  0x17   :  { %493 = vst.msk [vmem:[%s1321_s3 + $0x10] sm:$0xf] %vm488_vm0, %v628_v37  ;;  %494 = vst.msk [vmem:[%s1321_s3 + $0x14] sm:$0xf] %vm488_vm0, %v629_v38  ;;  %v176_v46 = vadd.f32 %v743_v2, %v105_v40  ;;  %v109_v47 = vmul.f32 %v741_v1, %v38_v34  ;;  %v110_v48 = vmul.f32 %v741_v1, %v39_v35  ;;  %v51_v29 = vld [vmem:[%s1318_s0 + $0xc8] sm:$0xff]  ;;  %v52_v30 = vld [vmem:[%s1318_s0 + $0xd0] sm:$0xff] }
  0x18   :  { %495 = vst.msk [vmem:[%s1321_s3 + $0x18] sm:$0xf] %vm488_vm0, %v630_v39  ;;  %v111_v49 = vmul.f32 %v741_v1, %v40_v36  ;;  %496 = vst.msk [vmem:[%s1321_s3 + $0x1c] sm:$0xf] %vm488_vm0, %v631_v42  ;;  %v177_v50 = vadd.f32 %v743_v2, %v106_v43  ;;  %v178_v51 = vadd.f32 %v743_v2, %v107_v44  ;;  %v53_v31 = vld [vmem:[%s1318_s0 + $0xd8] sm:$0xff]  ;;  %v54_v36 = vld [vmem:[%s1318_s0 + $0xe0] sm:$0xff] }
  0x19   :  { %v179_v52 = vadd.f32 %v743_v2, %v108_v45  ;;  %v112_v53 = vmul.f32 %v741_v1, %v41_v41  ;;  %v632_v55 = vpack.c.bf16 %v176_v46, %v176_v46  ;;  %v180_v56 = vadd.f32 %v743_v2, %v109_v47  ;;  %v55_v37 = vld [vmem:[%s1318_s0 + $0xe8] sm:$0xff]  ;;  %v56_v38 = vld [vmem:[%s1318_s0 + $0xf0] sm:$0xff]  ;;  %v57_v43 = vld [vmem:[%s1318_s0 + $0xf8] sm:$0xff] }
  0x1a   :  { %v181_v57 = vadd.f32 %v743_v2, %v110_v48  ;;  %v182_v58 = vadd.f32 %v743_v2, %v111_v49  ;;  %v633_v62 = vpack.c.bf16 %v177_v50, %v177_v50  ;;  %v634_v63 = vpack.c.bf16 %v178_v51, %v178_v51 }
  0x1b   :  { %v635_v0 = vpack.c.bf16 %v179_v52, %v179_v52  ;;  %v183_v3 = vadd.f32 %v743_v2, %v112_v53  ;;  %497 = vst.msk [vmem:[%s1321_s3 + $0x20] sm:$0xf] %vm488_vm0, %v632_v55  ;;  %v636_v7 = vpack.c.bf16 %v180_v56, %v180_v56  ;;  %v113_v10 = vmul.f32 %v741_v1, %v42_v54  ;;  %v58_v56 = vld [vmem:[%s1318_s0 + $0x100] sm:$0xff] }
  0x1c   :  { %v637_v8 = vpack.c.bf16 %v181_v57, %v181_v57  ;;  %v638_v9 = vpack.c.bf16 %v182_v58, %v182_v58  ;;  %498 = vst.msk [vmem:[%s1321_s3 + $0x24] sm:$0xf] %vm488_vm0, %v633_v62  ;;  %499 = vst.msk [vmem:[%s1321_s3 + $0x28] sm:$0xf] %vm488_vm0, %v634_v63  ;;  %v114_v13 = vmul.f32 %v741_v1, %v43_v59  ;;  %v60_v62 = vld [vmem:[%s1318_s0 + $0x110] sm:$0xff]  ;;  %v61_v63 = vld [vmem:[%s1318_s0 + $0x118] sm:$0xff] }
  0x1d   :  { %500 = vst.msk [vmem:[%s1321_s3 + $0x2c] sm:$0xf] %vm488_vm0, %v635_v0  ;;  %v639_v12 = vpack.c.bf16 %v183_v3, %v183_v3  ;;  %v115_v14 = vmul.f32 %v741_v1, %v44_v60  ;;  %v116_v15 = vmul.f32 %v741_v1, %v45_v61  ;;  %501 = vst.msk [vmem:[%s1321_s3 + $0x30] sm:$0xf] %vm488_vm0, %v636_v7  ;;  %v59_v61 = vld [vmem:[%s1318_s0 + $0x108] sm:$0xff] }
  0x1e   :  { %502 = vst.msk [vmem:[%s1321_s3 + $0x34] sm:$0xf] %vm488_vm0, %v637_v8  ;;  %503 = vst.msk [vmem:[%s1321_s3 + $0x38] sm:$0xf] %vm488_vm0, %v638_v9  ;;  %v184_v16 = vadd.f32 %v743_v2, %v113_v10  ;;  %v117_v17 = vmul.f32 %v741_v1, %v46_v4  ;;  %v118_v18 = vmul.f32 %v741_v1, %v47_v5  ;;  %v63_v7 = vld [vmem:[%s1318_s0 + $0x128] sm:$0xff]  ;;  %v64_v8 = vld [vmem:[%s1318_s0 + $0x130] sm:$0xff] }
  0x1f   :  { %v119_v19 = vmul.f32 %v741_v1, %v48_v6  ;;  %504 = vst.msk [vmem:[%s1321_s3 + $0x3c] sm:$0xf] %vm488_vm0, %v639_v12  ;;  %v185_v20 = vadd.f32 %v743_v2, %v114_v13  ;;  %v186_v21 = vadd.f32 %v743_v2, %v115_v14  ;;  %v187_v22 = vadd.f32 %v743_v2, %v116_v15  ;;  %v62_v6 = vld [vmem:[%s1318_s0 + $0x120] sm:$0xff]  ;;  %v65_v13 = vld [vmem:[%s1318_s0 + $0x138] sm:$0xff] }
  0x20   :  { %v120_v23 = vmul.f32 %v741_v1, %v49_v11  ;;  %v640_v25 = vpack.c.bf16 %v184_v16, %v184_v16  ;;  %v188_v26 = vadd.f32 %v743_v2, %v117_v17  ;;  %v189_v27 = vadd.f32 %v743_v2, %v118_v18 }
  0x21   :  { %v190_v28 = vadd.f32 %v743_v2, %v119_v19  ;;  %v641_v32 = vpack.c.bf16 %v185_v20, %v185_v20  ;;  %v642_v33 = vpack.c.bf16 %v186_v21, %v186_v21  ;;  %v643_v34 = vpack.c.bf16 %v187_v22, %v187_v22 }
  0x22   :  { %v191_v35 = vadd.f32 %v743_v2, %v120_v23  ;;  %505 = vst.msk [vmem:[%s1321_s3 + $0x40] sm:$0xf] %vm488_vm0, %v640_v25  ;;  %v644_v39 = vpack.c.bf16 %v188_v26, %v188_v26  ;;  %v645_v40 = vpack.c.bf16 %v189_v27, %v189_v27  ;;  %v121_v42 = vmul.f32 %v741_v1, %v50_v24  ;;  %v66_v26 = vld [vmem:[%s1318_s0 + $0x140] sm:$0xff] }
  0x23   :  { %v646_v41 = vpack.c.bf16 %v190_v28, %v190_v28  ;;  %506 = vst.msk [vmem:[%s1321_s3 + $0x44] sm:$0xf] %vm488_vm0, %v641_v32  ;;  %507 = vst.msk [vmem:[%s1321_s3 + $0x48] sm:$0xf] %vm488_vm0, %v642_v33  ;;  %v122_v45 = vmul.f32 %v741_v1, %v51_v29  ;;  %v123_v46 = vmul.f32 %v741_v1, %v52_v30  ;;  %v68_v32 = vld [vmem:[%s1318_s0 + $0x150] sm:$0xff]  ;;  %v69_v33 = vld [vmem:[%s1318_s0 + $0x158] sm:$0xff] }
  0x24   :  { %508 = vst.msk [vmem:[%s1321_s3 + $0x4c] sm:$0xf] %vm488_vm0, %v643_v34  ;;  %v647_v44 = vpack.c.bf16 %v191_v35, %v191_v35  ;;  %v124_v47 = vmul.f32 %v741_v1, %v53_v31  ;;  %509 = vst.msk [vmem:[%s1321_s3 + $0x50] sm:$0xf] %vm488_vm0, %v644_v39  ;;  %v192_v48 = vadd.f32 %v743_v2, %v121_v42  ;;  %v67_v31 = vld [vmem:[%s1318_s0 + $0x148] sm:$0xff] }
  0x25   :  { %510 = vst.msk [vmem:[%s1321_s3 + $0x54] sm:$0xf] %vm488_vm0, %v645_v40  ;;  %511 = vst.msk [vmem:[%s1321_s3 + $0x58] sm:$0xf] %vm488_vm0, %v646_v41  ;;  %v125_v49 = vmul.f32 %v741_v1, %v54_v36  ;;  %v126_v50 = vmul.f32 %v741_v1, %v55_v37  ;;  %v127_v51 = vmul.f32 %v741_v1, %v56_v38  ;;  %v70_v38 = vld [vmem:[%s1318_s0 + $0x160] sm:$0xff]  ;;  %v71_v39 = vld [vmem:[%s1318_s0 + $0x168] sm:$0xff] }
  0x26   :  { %512 = vst.msk [vmem:[%s1321_s3 + $0x5c] sm:$0xf] %vm488_vm0, %v647_v44  ;;  %v193_v52 = vadd.f32 %v743_v2, %v122_v45  ;;  %v194_v53 = vadd.f32 %v743_v2, %v123_v46  ;;  %v195_v54 = vadd.f32 %v743_v2, %v124_v47  ;;  %v128_v55 = vmul.f32 %v741_v1, %v57_v43  ;;  %v72_v40 = vld [vmem:[%s1318_s0 + $0x170] sm:$0xff]  ;;  %v73_v45 = vld [vmem:[%s1318_s0 + $0x178] sm:$0xff] }
  0x27   :  { %v648_v57 = vpack.c.bf16 %v192_v48, %v192_v48  ;;  %v196_v58 = vadd.f32 %v743_v2, %v125_v49  ;;  %v197_v59 = vadd.f32 %v743_v2, %v126_v50  ;;  %v198_v60 = vadd.f32 %v743_v2, %v127_v51 }
  0x28   :  { %v649_v0 = vpack.c.bf16 %v193_v52, %v193_v52  ;;  %v650_v3 = vpack.c.bf16 %v194_v53, %v194_v53  ;;  %v651_v4 = vpack.c.bf16 %v195_v54, %v195_v54  ;;  %v199_v5 = vadd.f32 %v743_v2, %v128_v55 }
  0x29   :  { %513 = vst.msk [vmem:[%s1321_s3 + $0x60] sm:$0xf] %vm488_vm0, %v648_v57  ;;  %v652_v9 = vpack.c.bf16 %v196_v58, %v196_v58  ;;  %v653_v10 = vpack.c.bf16 %v197_v59, %v197_v59  ;;  %v654_v11 = vpack.c.bf16 %v198_v60, %v198_v60  ;;  %v129_v12 = vmul.f32 %v741_v1, %v58_v56  ;;  %v74_v58 = vld [vmem:[%s1318_s0 + $0x180] sm:$0xff] }
  0x2a   :  { %514 = vst.msk [vmem:[%s1321_s3 + $0x64] sm:$0xf] %vm488_vm0, %v649_v0  ;;  %515 = vst.msk [vmem:[%s1321_s3 + $0x68] sm:$0xf] %vm488_vm0, %v650_v3  ;;  %v655_v14 = vpack.c.bf16 %v199_v5, %v199_v5  ;;  %v130_v15 = vmul.f32 %v741_v1, %v59_v61  ;;  %v131_v16 = vmul.f32 %v741_v1, %v60_v62  ;;  %v76_v0 = vld [vmem:[%s1318_s0 + $0x190] sm:$0xff]  ;;  %v77_v3 = vld [vmem:[%s1318_s0 + $0x198] sm:$0xff] }
  0x2b   :  { %516 = vst.msk [vmem:[%s1321_s3 + $0x6c] sm:$0xf] %vm488_vm0, %v651_v4  ;;  %v132_v17 = vmul.f32 %v741_v1, %v61_v63  ;;  %517 = vst.msk [vmem:[%s1321_s3 + $0x70] sm:$0xf] %vm488_vm0, %v652_v9  ;;  %v200_v18 = vadd.f32 %v743_v2, %v129_v12  ;;  %v133_v19 = vmul.f32 %v741_v1, %v62_v6  ;;  %v75_v63 = vld [vmem:[%s1318_s0 + $0x188] sm:$0xff] }
  0x2c   :  { %518 = vst.msk [vmem:[%s1321_s3 + $0x74] sm:$0xf] %vm488_vm0, %v653_v10  ;;  %519 = vst.msk [vmem:[%s1321_s3 + $0x78] sm:$0xf] %vm488_vm0, %v654_v11  ;;  %v134_v20 = vmul.f32 %v741_v1, %v63_v7  ;;  %v135_v21 = vmul.f32 %v741_v1, %v64_v8  ;;  %v201_v22 = vadd.f32 %v743_v2, %v130_v15  ;;  %v78_v8 = vld [vmem:[%s1318_s0 + $0x1a0] sm:$0xff]  ;;  %v79_v9 = vld [vmem:[%s1318_s0 + $0x1a8] sm:$0xff] }
  0x2d   :  { %520 = vst.msk [vmem:[%s1321_s3 + $0x7c] sm:$0xf] %vm488_vm0, %v655_v14  ;;  %v202_v23 = vadd.f32 %v743_v2, %v131_v16  ;;  %v203_v24 = vadd.f32 %v743_v2, %v132_v17  ;;  %v136_v25 = vmul.f32 %v741_v1, %v65_v13  ;;  %v656_v27 = vpack.c.bf16 %v200_v18, %v200_v18  ;;  %v80_v10 = vld [vmem:[%s1318_s0 + $0x1b0] sm:$0xff]  ;;  %v81_v15 = vld [vmem:[%s1318_s0 + $0x1b8] sm:$0xff] }
  0x2e   :  { %v204_v28 = vadd.f32 %v743_v2, %v133_v19  ;;  %v205_v29 = vadd.f32 %v743_v2, %v134_v20  ;;  %v206_v30 = vadd.f32 %v743_v2, %v135_v21  ;;  %v657_v34 = vpack.c.bf16 %v201_v22, %v201_v22 }
  0x2f   :  { %v658_v35 = vpack.c.bf16 %v202_v23, %v202_v23  ;;  %v659_v36 = vpack.c.bf16 %v203_v24, %v203_v24  ;;  %v207_v37 = vadd.f32 %v743_v2, %v136_v25  ;;  %521 = vst.msk [vmem:[%s1321_s3 + $0x80] sm:$0xf] %vm488_vm0, %v656_v27  ;;  %v137_v44 = vmul.f32 %v741_v1, %v66_v26 }
  0x30   :  { %v660_v41 = vpack.c.bf16 %v204_v28, %v204_v28  ;;  %v661_v42 = vpack.c.bf16 %v205_v29, %v205_v29  ;;  %v662_v43 = vpack.c.bf16 %v206_v30, %v206_v30  ;;  %522 = vst.msk [vmem:[%s1321_s3 + $0x84] sm:$0xf] %vm488_vm0, %v657_v34  ;;  %v138_v47 = vmul.f32 %v741_v1, %v67_v31  ;;  %v82_v28 = vld [vmem:[%s1318_s0 + $0x1c0] sm:$0xff]  ;;  %v84_v34 = vld [vmem:[%s1318_s0 + $0x1d0] sm:$0xff] }
  0x31   :  { %523 = vst.msk [vmem:[%s1321_s3 + $0x88] sm:$0xf] %vm488_vm0, %v658_v35  ;;  %524 = vst.msk [vmem:[%s1321_s3 + $0x8c] sm:$0xf] %vm488_vm0, %v659_v36  ;;  %v663_v46 = vpack.c.bf16 %v207_v37, %v207_v37  ;;  %v139_v48 = vmul.f32 %v741_v1, %v68_v32  ;;  %v140_v49 = vmul.f32 %v741_v1, %v69_v33  ;;  %v83_v33 = vld [vmem:[%s1318_s0 + $0x1c8] sm:$0xff]  ;;  %v85_v35 = vld [vmem:[%s1318_s0 + $0x1d8] sm:$0xff] }
  0x32   :  { %525 = vst.msk [vmem:[%s1321_s3 + $0x90] sm:$0xf] %vm488_vm0, %v660_v41  ;;  %526 = vst.msk [vmem:[%s1321_s3 + $0x94] sm:$0xf] %vm488_vm0, %v661_v42  ;;  %v208_v50 = vadd.f32 %v743_v2, %v137_v44  ;;  %v141_v51 = vmul.f32 %v741_v1, %v70_v38  ;;  %v142_v52 = vmul.f32 %v741_v1, %v71_v39  ;;  %v87_v41 = vld [vmem:[%s1318_s0 + $0x1e8] sm:$0xff]  ;;  %v88_v42 = vld [vmem:[%s1318_s0 + $0x1f0] sm:$0xff] }
  0x33   :  { %527 = vst.msk [vmem:[%s1321_s3 + $0x98] sm:$0xf] %vm488_vm0, %v662_v43  ;;  %v143_v53 = vmul.f32 %v741_v1, %v72_v40  ;;  %528 = vst.msk [vmem:[%s1321_s3 + $0x9c] sm:$0xf] %vm488_vm0, %v663_v46  ;;  %v209_v54 = vadd.f32 %v743_v2, %v138_v47  ;;  %v210_v55 = vadd.f32 %v743_v2, %v139_v48  ;;  %v86_v40 = vld [vmem:[%s1318_s0 + $0x1e0] sm:$0xff]  ;;  %v89_v47 = vld [vmem:[%s1318_s0 + $0x1f8] sm:$0xff] }
  0x34   :  { %v211_v56 = vadd.f32 %v743_v2, %v140_v49  ;;  %v144_v57 = vmul.f32 %v741_v1, %v73_v45  ;;  %v664_v59 = vpack.c.bf16 %v208_v50, %v208_v50  ;;  %v212_v60 = vadd.f32 %v743_v2, %v141_v51 }
  0x35   :  { %v213_v61 = vadd.f32 %v743_v2, %v142_v52  ;;  %v214_v62 = vadd.f32 %v743_v2, %v143_v53  ;;  %v665_v4 = vpack.c.bf16 %v209_v54, %v209_v54  ;;  %v666_v5 = vpack.c.bf16 %v210_v55, %v210_v55 }
  0x36   :  { %v667_v6 = vpack.c.bf16 %v211_v56, %v211_v56  ;;  %v215_v7 = vadd.f32 %v743_v2, %v144_v57  ;;  %529 = vst.msk [vmem:[%s1321_s3 + $0xa0] sm:$0xf] %vm488_vm0, %v664_v59  ;;  %v668_v11 = vpack.c.bf16 %v212_v60, %v212_v60  ;;  %v145_v14 = vmul.f32 %v741_v1, %v74_v58 }
  0x37   :  { %v669_v12 = vpack.c.bf16 %v213_v61, %v213_v61  ;;  %v670_v13 = vpack.c.bf16 %v214_v62, %v214_v62  ;;  %530 = vst.msk [vmem:[%s1321_s3 + $0xa4] sm:$0xf] %vm488_vm0, %v665_v4  ;;  %531 = vst.msk [vmem:[%s1321_s3 + $0xa8] sm:$0xf] %vm488_vm0, %v666_v5  ;;  %v146_v17 = vmul.f32 %v741_v1, %v75_v63 }
  0x38   :  { %532 = vst.msk [vmem:[%s1321_s3 + $0xac] sm:$0xf] %vm488_vm0, %v667_v6  ;;  %v671_v16 = vpack.c.bf16 %v215_v7, %v215_v7  ;;  %v147_v18 = vmul.f32 %v741_v1, %v76_v0  ;;  %v148_v19 = vmul.f32 %v741_v1, %v77_v3  ;;  %533 = vst.msk [vmem:[%s1321_s3 + $0xb0] sm:$0xf] %vm488_vm0, %v668_v11 }
  0x39   :  { %534 = vst.msk [vmem:[%s1321_s3 + $0xb4] sm:$0xf] %vm488_vm0, %v669_v12  ;;  %535 = vst.msk [vmem:[%s1321_s3 + $0xb8] sm:$0xf] %vm488_vm0, %v670_v13  ;;  %v216_v20 = vadd.f32 %v743_v2, %v145_v14  ;;  %v149_v21 = vmul.f32 %v741_v1, %v78_v8  ;;  %v150_v22 = vmul.f32 %v741_v1, %v79_v9 }
  0x3a   :  { %v151_v23 = vmul.f32 %v741_v1, %v80_v10  ;;  %536 = vst.msk [vmem:[%s1321_s3 + $0xbc] sm:$0xf] %vm488_vm0, %v671_v16  ;;  %v217_v24 = vadd.f32 %v743_v2, %v146_v17  ;;  %v218_v25 = vadd.f32 %v743_v2, %v147_v18  ;;  %v219_v26 = vadd.f32 %v743_v2, %v148_v19 }
  0x3b   :  { %v152_v27 = vmul.f32 %v741_v1, %v81_v15  ;;  %v672_v29 = vpack.c.bf16 %v216_v20, %v216_v20  ;;  %v220_v30 = vadd.f32 %v743_v2, %v149_v21  ;;  %v221_v31 = vadd.f32 %v743_v2, %v150_v22 }
  0x3c   :  { %v222_v32 = vadd.f32 %v743_v2, %v151_v23  ;;  %v673_v36 = vpack.c.bf16 %v217_v24, %v217_v24  ;;  %v674_v37 = vpack.c.bf16 %v218_v25, %v218_v25  ;;  %v675_v38 = vpack.c.bf16 %v219_v26, %v219_v26 }
  0x3d   :  { %v223_v39 = vadd.f32 %v743_v2, %v152_v27  ;;  %537 = vst.msk [vmem:[%s1321_s3 + $0xc0] sm:$0xf] %vm488_vm0, %v672_v29  ;;  %v676_v43 = vpack.c.bf16 %v220_v30, %v220_v30  ;;  %v677_v44 = vpack.c.bf16 %v221_v31, %v221_v31  ;;  %v153_v46 = vmul.f32 %v741_v1, %v82_v28 }
  0x3e   :  { %v678_v45 = vpack.c.bf16 %v222_v32, %v222_v32  ;;  %538 = vst.msk [vmem:[%s1321_s3 + $0xc4] sm:$0xf] %vm488_vm0, %v673_v36  ;;  %539 = vst.msk [vmem:[%s1321_s3 + $0xc8] sm:$0xf] %vm488_vm0, %v674_v37  ;;  %v154_v49 = vmul.f32 %v741_v1, %v83_v33  ;;  %v155_v50 = vmul.f32 %v741_v1, %v84_v34 }
  0x3f   :  { %540 = vst.msk [vmem:[%s1321_s3 + $0xcc] sm:$0xf] %vm488_vm0, %v675_v38  ;;  %v679_v48 = vpack.c.bf16 %v223_v39, %v223_v39  ;;  %v156_v51 = vmul.f32 %v741_v1, %v85_v35  ;;  %541 = vst.msk [vmem:[%s1321_s3 + $0xd0] sm:$0xf] %vm488_vm0, %v676_v43  ;;  %v224_v52 = vadd.f32 %v743_v2, %v153_v46 }
  0x40   :  { %542 = vst.msk [vmem:[%s1321_s3 + $0xd4] sm:$0xf] %vm488_vm0, %v677_v44  ;;  %543 = vst.msk [vmem:[%s1321_s3 + $0xd8] sm:$0xf] %vm488_vm0, %v678_v45  ;;  %v157_v53 = vmul.f32 %v741_v1, %v86_v40  ;;  %v158_v54 = vmul.f32 %v741_v1, %v87_v41  ;;  %v159_v55 = vmul.f32 %v741_v1, %v88_v42 }
  0x41   :  { %544 = vst.msk [vmem:[%s1321_s3 + $0xdc] sm:$0xf] %vm488_vm0, %v679_v48  ;;  %v225_v56 = vadd.f32 %v743_v2, %v154_v49  ;;  %v226_v57 = vadd.f32 %v743_v2, %v155_v50  ;;  %v227_v58 = vadd.f32 %v743_v2, %v156_v51  ;;  %v160_v59 = vmul.f32 %v741_v1, %v89_v47 }
  0x42   :  { %v680_v60 = vpack.c.bf16 %v224_v52, %v224_v52  ;;  %v228_v61 = vadd.f32 %v743_v2, %v157_v53  ;;  %v229_v62 = vadd.f32 %v743_v2, %v158_v54  ;;  %v230_v63 = vadd.f32 %v743_v2, %v159_v55 }
  0x43   :  { %v681_v0 = vpack.c.bf16 %v225_v56, %v225_v56  ;;  %v682_v3 = vpack.c.bf16 %v226_v57, %v226_v57  ;;  %v683_v4 = vpack.c.bf16 %v227_v58, %v227_v58  ;;  %v231_v5 = vadd.f32 %v743_v2, %v160_v59 }
  0x44   :  { %545 = vst.msk [vmem:[%s1321_s3 + $0xe0] sm:$0xf] %vm488_vm0, %v680_v60  ;;  %v684_v6 = vpack.c.bf16 %v228_v61, %v228_v61  ;;  %v685_v7 = vpack.c.bf16 %v229_v62, %v229_v62  ;;  %v686_v1 = vpack.c.bf16 %v230_v63, %v230_v63 }
  0x45   :  { %546 = vst.msk [vmem:[%s1321_s3 + $0xe4] sm:$0xf] %vm488_vm0, %v681_v0  ;;  %547 = vst.msk [vmem:[%s1321_s3 + $0xe8] sm:$0xf] %vm488_vm0, %v682_v3  ;;  %v687_v2 = vpack.c.bf16 %v231_v5, %v231_v5 }
  0x46   :  { %548 = vst.msk [vmem:[%s1321_s3 + $0xec] sm:$0xf] %vm488_vm0, %v683_v4  ;;  %549 = vst.msk [vmem:[%s1321_s3 + $0xf0] sm:$0xf] %vm488_vm0, %v684_v6 }
  0x47   :  { %550 = vst.msk [vmem:[%s1321_s3 + $0xf4] sm:$0xf] %vm488_vm0, %v685_v7  ;;  %551 = vst.msk [vmem:[%s1321_s3 + $0xf8] sm:$0xf] %vm488_vm0, %v686_v1 }
  0x48   :  { %552 = vst.msk [vmem:[%s1321_s3 + $0xfc] sm:$0xf] %vm488_vm0, %v687_v2 }
  0x49   :  { %557 = vsyncpa [#allocation3], 1 }

// kernel: routenet_fcn_forward.13
= control target key start
LH: loop header
LB: loop body
LE: loop exit
PB: predicated region body
PF: predicated region fallthrough
CT: control target
= control target key end

     0   :  { %s375_s6 = smov 0   ;;  %s377_s7 = smov 0   ;;  %s435_s0 = inlined_call_operand.vmem [shape: bf16[2,16,8,64], index: 0, kind: input, shape index: {}]   ;;  %s436_s1 = inlined_call_operand.vmem [shape: bf16[2,8,8,32], index: 1, kind: output, shape index: {}]  }
   0x1   :  { %s379_s8 = smov 0  }
   0x2 LB: > { %s298_s9 = sadd.s32 4294967295, %s362_s8   ;;  %s392_s10 = sadd.s32 1, %s362_s8   ;;  %s362_s8 = sphi %s379_s8, %s440_s8   ;;  %s358_s7 = sphi %s377_s7, %s439_s7   ;;  %s354_s6 = sphi %s375_s6, %s438_s6  }
   0x3   : > { %s15_s11 = ssub.s32 %s362_s8, %s392_s10  ;;  %s18_s12 = sadd.s32 1, %s358_s7 }
   0x4   : > { %p16_p0 = scmp.eq.s32.totalorder %s15_s11, 0  ;;  %p25_p1 = scmp.ne.s32.totalorder %s358_s7, %s354_s6 }
   0x5   : > { %p26_p2 = scmp.eq.s32.totalorder %s362_s8, 0  ;;  %p55_p3 = scmp.eq.s32.totalorder %s298_s9, 7 }
   0x6   : > { %s403_s13 = scalar_select %p16_p0, %s358_s7, %s18_s12  }
   0x7   : > { %p27_p4 = por %p26_p2, %p25_p1  ;;  %p405_p5 = por %p55_p3, %p25_p1 }
   0x8   : > { %p301_p6 = scmp.ge.s32.totalorder %s362_s8, 8 }
   0xa   : > { %77 = sbr.rel (%p301_p6) target bundleno = 21 (0x15), region = 16 }
   0xf   : > { %80 = sbr.rel (!%p27_p4) target bundleno = 21 (0x15), region = 20  ;;  %s82_s15 = sand.u32 (%p27_p4), 1, %s358_s7  }
  0x10   : > { %s314_s16 = sshll.u32 (%p27_p4), %s362_s8, 3  ;;  %s302_s17 = sshll.u32 (%p27_p4), %s82_s15, 4 }
  0x11   : > { %s87_s20 = scalar_lea.vmem (%p27_p4), %s435_s0, %s314_s16  ;;  %s84_s21 = scalar_lea.vmem (%p27_p4), [#allocation2], %s302_s17 }
  0x12   : > { %v104_v0 = vld [vmem:[%s87_s20] sm:$0xff] (%p27_p4)  }
  0x13   : > { %v108_v1 = vld [vmem:[%s87_s20 + $0x40] sm:$0xff] (%p27_p4)   ;;  %105 = vst [vmem:[%s84_s21] sm:$0xff] (%p27_p4), %v104_v0  }
  0x14   : > { %109 = vst [vmem:[%s84_s21 + $0x8] sm:$0xff] %v108_v1  }
  0x15 PF: > { %p305_p7 = scmp.ge.s32.totalorder %s362_s8, 1  ;;  %p142_p8 = scmp.lt.s32.totalorder %s362_s8, 9 }
  0x17   : > { %p143_p9 = pnand %p305_p7, %p142_p8 }
  0x18   : > { %s149_s22 = sand.u32 (!%p143_p9), 1, %s354_s6   ;;  %s364_s25 = smov (!%p143_p9), 96  }
  0x19   : > { %146 = sbr.rel (%p143_p9) target bundleno = 163 (0xa3), region = 61  ;;  %s306_s23 = sshll.u32 (!%p143_p9), %s149_s22, 4 }
  0x1a   : > { %s151_s24 = scalar_lea.vmem (!%p143_p9), [#allocation2], %s306_s23  ;;  %s307_s26 = sshll.u32 (!%p143_p9), %s149_s22, 3 }
  0x1b   : > { %s166_s27 = scalar_lea.vmem (!%p143_p9), [#allocation3], %s307_s26 }
  0x1e   : > { %v168_v2 = vld [vmem:[%s151_s24] sm:$0xf]  ;;  %v308_v3 = vld [vmem:[%s151_s24 + $0x4] sm:$0xf]  ;;  %v169_v4 = vld [vmem:[%s151_s24 + $0x8] sm:$0xf] }
  0x1f   : > { %v173_v5 = vmax.bf16 %v308_v3, %v168_v2  ;;  %v309_v6 = vld [vmem:[%s151_s24 + $0xc] sm:$0xf]  ;;  %vm185_vm0 = vcmask 257024   ;;  %s311_s28 = sshll.u32 (%p405_p5), %s298_s9, 2 }
  0x20   : > { %v174_v7 = vmax.bf16 %v309_v6, %v169_v4  ;;  %s196_s2 = scalar_lea.vmem (%p405_p5), %s436_s1, %s311_s28 }
  0x21   : > { %177 = vrot.lane.b32.xlu0 %v173_v5, %s364_s25 }
  0x25   : > { %179 = vrot.lane.b32.xlu0 %v174_v7, %s364_s25 }
  0x93   : > { %v178_v8 = vpop.permute.xlu0 %177 }
  0x94   : > { %v183_v9 = vmax.bf16 %v178_v8, %v173_v5 }
  0x96   : > { %186 = vst.msk [vmem:[%s166_s27] sm:$0xf] %vm185_vm0, %v183_v9  ;;  %194 = sbr.rel (!%p405_p5) target bundleno = 163 (0xa3), region = 69 }
  0x97   : > { %v180_v10 = vpop.permute.xlu0 %179 }
  0x98   : > { %v184_v11 = vmax.bf16 %v180_v10, %v174_v7 }
  0x9a   : > { %187 = vst.msk [vmem:[%s166_s27 + $0x4] sm:$0xf] %vm185_vm0, %v184_v11 }
  0x9d   : > { %v213_v12 = vld [vmem:[%s166_s27] sm:$0xf] }
  0x9e   : > { %214 = vst [vmem:[%s196_s2] sm:$0xf] %v213_v12 }
  0xa1   : > { %v215_v13 = vld [vmem:[%s166_s27 + $0x4] sm:$0xf] }
  0xa2   : > { %216 = vst [vmem:[%s196_s2 + $0x20] sm:$0xf] %v215_v13 }
  0xa3 PF: > { %p8_p10 = scmp.ge.s32.totalorder %s392_s10, 10   ;;  %s438_s6 = smov %s358_s7 }
  0xa4   : > { %s439_s7 = smov %s403_s13  ;;  %s440_s8 = smov %s392_s10 }
  0xa5   :  { %10 = sbr.rel (!%p8_p10) target bundleno = 2 (0x2), region = 142 }

// kernel: routenet_fcn_forward.12
= control target key start
LH: loop header
LB: loop body
LE: loop exit
PB: predicated region body
PF: predicated region fallthrough
CT: control target
= control target key end

     0   :  { %s2096_s15 = smov 0   ;;  %s2098_s16 = smov 0   ;;  %s2426_s0 = inlined_call_operand.vmem [shape: bf16[2,24,24,4], index: 0, kind: input, shape index: {}]   ;;  %s2427_s1 = inlined_call_operand.vmem [shape: bf16[9,9,4,32], index: 1, kind: input, shape index: {}]   ;;  %s2428_s2 = inlined_call_operand.vmem [shape: f32[1,32], index: 2, kind: input, shape index: {}]   ;;  %s2429_s3 = inlined_call_operand.vmem [shape: f32[1,32], index: 3, kind: input, shape index: {}]   ;;  %s2430_s4 = inlined_call_operand.vmem [shape: bf16[2,16,16,32], index: 4, kind: output, shape index: {}]  }
   0x1   :  { %s2100_s17 = smov 0   ;;  %s2102_s18 = smov 0  }
   0x2   :  { %s2104_s19 = smov 0   ;;  %s2106_s20 = smov 0  }
   0x3   :  { %s2108_s21 = smov 0   ;;  %s2110_s22 = smov 0  }
   0x4   :  { %s2112_s23 = smov 0  }
   0x5 LB: > { %s23_s24 = sadd.s32 1, %s2058_s21  ;;  %s26_s25 = sadd.s32 1, %s2062_s22  ;;  %s2066_s23 = sphi %s2112_s23, %s14_s23   ;;  %s2062_s22 = sphi %s2110_s22, %s2440_s22   ;;  %s2058_s21 = sphi %s2108_s21, %s2439_s21   ;;  %s2054_s20 = sphi %s2106_s20, %s2438_s20   ;;  %s2050_s19 = sphi %s2104_s19, %s2437_s19   ;;  %s2046_s18 = sphi %s2102_s18, %s2436_s18   ;;  %s2042_s17 = sphi %s2100_s17, %s2435_s17   ;;  %s2038_s16 = sphi %s2098_s16, %s2434_s16   ;;  %s2034_s15 = sphi %s2096_s15, %s2433_s15  }
   0x6   : > { %p24_p0 = scmp.ge.s32.totalorder %s23_s24, 9  ;;  %s1660_s26 = sadd.s32 4294967295, %s2066_s23  }
   0x7   : > { %s30_s27 = sadd.s32 %s2058_s21, %s2062_s22  ;;  %p42_p1 = scmp.ne.s32.totalorder %s2046_s18, %s2042_s17 }
   0x8   : > { %s2442_s24 = smov (%p24_p0, %s23_s24), 0  ;;  %s2444_s25 = smov (!%p24_p0, %s26_s25), %s2062_s22 }
   0x9   : > { %p43_p2 = scmp.eq.s32.totalorder %s2066_s23, 0  ;;  %p28_p3 = scmp.ge.s32.totalorder %s2444_s25, 16 }
   0xa   : > { %s35_s28 = sadd.s32 1, %s2046_s18  ;;  %p134_p5 = scmp.ne.s32.totalorder %s2038_s16, %s2034_s15 }
   0xb   : > { %p2153_p4 = por %p43_p2, %p42_p1  ;;  %s2446_s25 = smov (%p28_p3, %s2444_s25), 0 }
   0xc   : > { %s124_s30 = sadd.s32 1, %s2038_s16  ;;  %p135_p6 = scmp.eq.s32.totalorder %s1660_s26, 143 }
   0xd   : > { %s31_s5 = sadd.s32 %s2446_s25, %s2442_s24  ;;  %s121_s6 = ssub.s32 %s2062_s22, %s2446_s25 }
   0xe   : > { %s32_s7 = ssub.s32 %s30_s27, %s31_s5  ;;  %p122_p7 = scmp.eq.s32.totalorder %s121_s6, 0 }
   0xf   : > { %p33_p8 = scmp.eq.s32.totalorder %s32_s7, 0  ;;  %p2166_p9 = por %p135_p6, %p134_p5 }
  0x10   : > { %s2171_s9 = scalar_select %p122_p7, %s2038_s16, %s124_s30  }
  0x11   : > { %s2174_s10 = scalar_select %p33_p8, %s2046_s18, %s35_s28  }
  0x12   : > { %p1663_p10 = scmp.ge.s32.totalorder %s2066_s23, 144 }
  0x14   : > { %166 = sbr.rel (%p1663_p10) target bundleno = 32 (0x20), region = 28 }
  0x19   : > { %169 = sbr.rel (!%p2153_p4) target bundleno = 32 (0x20), region = 32  ;;  %s171_s11 = sand.u32 (%p2153_p4), 1, %s2046_s18  }
  0x1a   : > { %s1901_s12 = smul.u32 (%p2153_p4), 12, %s30_s27 }
  0x1b   : > { %s1900_s13 = smul.u32 (%p2153_p4), 24, %s171_s11 }
  0x1c   : > { %s177_s5 = scalar_lea.vmem (%p2153_p4), %s2426_s0, %s1901_s12 }
  0x1d   : > { %v194_v0 = vld [vmem:[%s177_s5] sm:$0xff] (%p2153_p4)   ;;  %v198_v1 = vld [vmem:[%s177_s5 + $0x8] sm:$0xf] (%p2153_p4)  ;;  %s173_s30 = scalar_lea.vmem (%p2153_p4), [#allocation3], %s1900_s13 }
  0x1e   : > { %v200_v2 = vld [vmem:[%s177_s5 + $0x120] sm:$0xff]   ;;  %195 = vst [vmem:[%s173_s30] sm:$0xff] %v194_v0   ;;  %199 = vst [vmem:[%s173_s30 + $0x8] sm:$0xf] %v198_v1  ;;  %v204_v3 = vld [vmem:[%s177_s5 + $0x128] sm:$0xf] }
  0x1f   : > { %201 = vst [vmem:[%s173_s30 + $0xc] sm:$0xff] %v200_v2   ;;  %205 = vst [vmem:[%s173_s30 + $0x14] sm:$0xf] %v204_v3 }
  0x20 PF: > { %p1665_p11 = scmp.ge.s32.totalorder %s2066_s23, 1  ;;  %p240_p12 = scmp.lt.s32.totalorder %s2066_s23, 145 }
  0x22   : > { %p241_p13 = pnand %p1665_p11, %p240_p12 }
  0x23   : > { %s247_s27 = sand.u32 (!%p241_p13), 1, %s2042_s17   ;;  %s268_s28 = sand.u32 (!%p241_p13), 1, %s2034_s15  }
  0x24   : > { %244 = sbr.rel (%p241_p13) target bundleno = 352 (0x160), region = 73  ;;  %s1666_s6 = sshll.u32 (!%p241_p13), %s268_s28, 4 }
  0x25   : > { %s1902_s29 = smul.u32 (!%p241_p13), 24, %s247_s27  ;;  %s2189_s11 = scalar_lea.vmem (!%p241_p13), [#allocation4], %s1666_s6 }
  0x26   : > { %p1667_p0 = scmp.ne.s32.totalorder (!%p241_p13), %s2050_s19, 0 }
  0x27   : > { %s2187_s7 = scalar_lea.vmem (!%p241_p13), [#allocation3], %s1902_s29 }
  0x29   : > { %276 = sbr.rel (%p1667_p0) target bundleno = 49 (0x31), region = 81 }
  0x2e   : > { %vm277_vm0 = vcmask 261120   ;;  %v2068_v4 = vmov 0.0  }
  0x2f   : > { %278 = vst.msk [vmem:[#allocation2] sm:$0xff] %vm277_vm0, %v2068_v4  ;;  %279 = vst.msk [vmem:[#allocation2 + $0x8] sm:$0xff] %vm277_vm0, %v2068_v4 }
  0x30   : > { %280 = vst.msk [vmem:[#allocation2 + $0x10] sm:$0xff] %vm277_vm0, %v2068_v4  ;;  %281 = vst.msk [vmem:[#allocation2 + $0x18] sm:$0xff] %vm277_vm0, %v2068_v4 }
  0x31 PF: > { %s1750_s15 = smul.u32 18, %s2050_s19  ;;  %v282_v5 = vld [vmem:[%s2187_s7] sm:$0xf]  ;;  %v2069_v6 = vmov 0.0   ;;  %vm318_vm1 = vcmask 1041408   ;;  %vm2070_vm2 = vmmov 0  }
  0x32   : > { %1798 = vmatprep.subr.bf16.mxu1 %v2069_v6  ;;  %1792 = vmatprep.subr.bf16.mxu0 %v2069_v6  ;;  %v2197_v7 = vld [vmem:[%s2187_s7 + $0x4] sm:$0xf]  ;;  %v2210_v9 = vld [vmem:[%s2187_s7 + $0x8] ss:$0 sps:$4 sm:$0x11]   ;;  %vm314_vm3 = vcmask 31744  }
  0x33   : > { %s2202_s13 = scalar_lea.vmem %s2427_s1, %s1750_s15  ;;  %1800 = vmatprep.mubr.msk.bf16.mxu1 %vm2070_vm2, %v2069_v6  ;;  %v1671_v8 = vcombine.low %v282_v5, %v2197_v7  ;;  %1794 = vmatprep.mubr.msk.bf16.mxu0 %vm2070_vm2, %v2069_v6  ;;  %v310_v17 = vshll.u32 %v2210_v9, 16  ;;  %v409_v20 = vld [vmem:[%s2187_s7] sm:$0xe]  ;;  %v2225_v23 = vld [vmem:[%s2187_s7 + $0x8] ss:$0 sps:$4 sm:$0x33]  }
  0x34   : > { %v287_v10 = vld [vmem:[%s2202_s13] sm:$0x3]  ;;  %v1670_v11 = vld [vmem:[%s2202_s13 + $0x2] sm:$0x3]  ;;  %v1680_v16 = vld [vmem:[%s2202_s13 + $0x6] sm:$0x3]  ;;  %v1677_v22 = vcombine.low %v409_v20, %v2197_v7 }
  0x35   : > { %v366_v12 = vsel %vm318_vm1, %v287_v10, 0  ;;  %v320_v13 = vsel %vm318_vm1, %v1670_v11, 0  ;;  %v303_v14 = vshrl.u32 %v1671_v8, 16  ;;  %v305_v15 = vshll.u32 %v1671_v8, 16  ;;  %v1676_v18 = vld [vmem:[%s2202_s13 + $0x4] sm:$0x3] }
  0x36   : > { %1799 = vmatpush3.bf16.msra.mxu1 %v366_v12  ;;  %1793 = vmatpush3.bf16.msra.mxu0 %v320_v13  ;;  %v500_v19 = vsel %vm318_vm1, %v1680_v16, 0  ;;  %vm301_vm4 = vsmask.f32 7424  ;;  %v312_v24 = vrot.slane %v310_v17, 1  ;;  %vm417_vm5 = vcmask 1046528   ;;  %p1738_p1 = scmp.ne.s32.totalorder %s2050_s19, 8 }
  0x37   : > { %1804 = vmatprep.subr.bf16.mxu0 %v2069_v6  ;;  %v307_v21 = vrot.slane %v305_v15, 1  ;;  %1810 = vmatprep.subr.bf16.mxu1 %v2069_v6  ;;  %v480_v26 = vshrl.u32 %v1677_v22, 16  ;;  %v483_v27 = vshll.u32 %v1677_v22, 16  ;;  %v488_v28 = vshrl.u32 %v2225_v23, 16  ;;  %v1684_v31 = vld [vmem:[%s2202_s13 + $0x8] sm:$0x3] }
  0x38   : > { %v425_v29 = vsel %vm318_vm1, %v1676_v18, 0  ;;  %v491_v30 = vshll.u32 %v2225_v23, 16  ;;  %v545_v32 = vld [vmem:[%s2187_s7] sm:$0xc]  ;;  %v1688_v38 = vld [vmem:[%s2202_s13 + $0xa] sm:$0x3] }
  0x39   : > { %1801 = vmatmul.mubr.msk.bf16.vlgmr.msra.gmra.mxu1 %vm314_vm3, %v1671_v8  ;;  %v308_v25 = vor.u32 %v307_v21, %v303_v14  ;;  %v482_v34 = vrot.slane %v480_v26, 1  ;;  %v485_v35 = vrot.slane %v483_v27, 2  ;;  %v490_v36 = vrot.slane %v488_v28, 1  ;;  %v2241_v40 = vld [vmem:[%s2187_s7 + $0x8] ss:$0 sps:$4 sm:$0x77]  }
  0x3a   : > { %1811 = vmatpush3.bf16.msra.mxu1 %v500_v19  ;;  %1812 = vmatprep.mubr.msk.bf16.mxu1 %vm2070_vm2, %v2069_v6  ;;  %v493_v37 = vrot.slane %v491_v30, 2  ;;  %v1685_v39 = vcombine.low %v545_v32, %v2197_v7  ;;  %vm478_vm6 = vsmask.f32 6400  ;;  %v418_v42 = vrot.slane %v1677_v22, 1  ;;  %v681_v48 = vld [vmem:[%s2187_s7] sm:$0x8] }
  0x3b   : > { %v313_v33 = vsel %vm301_vm4, %v308_v25, %v312_v24  ;;  %1822 = vmatprep.subr.bf16.mxu1 %v2069_v6  ;;  %v486_v41 = vor.u32 %v485_v35, %v482_v34  ;;  %v419_v43 = vrot.slane %v2210_v9, 1  ;;  %v624_v47 = vshrl.u32 %v2241_v40, 16  ;;  %v2253_v52 = vld [vmem:[%s2187_s7 + $0x8] sm:$0xf]  ;;  %v1703_v62 = vld [vmem:[%s2187_s7 + $0xc] sm:$0xf] }
  0x3c   : > { %1795 = vmatmul.mubr.msk.bf16.vlgmr.msra.gmra.mxu0 %vm314_vm3, %v313_v33  ;;  %v494_v44 = vor.u32 %v493_v37, %v490_v36  ;;  %v616_v45 = vshrl.u32 %v1685_v39, 16  ;;  %v619_v46 = vshll.u32 %v1685_v39, 16  ;;  %v561_v49 = vsel %vm318_vm1, %v1684_v31, 0  ;;  %v2265_v63 = vld [vmem:[%s2187_s7 + $0x10] sm:$0xf] }
  0x3d   : > { %1805 = vmatpush3.bf16.msra.mxu0 %v425_v29  ;;  %1806 = vmatprep.mubr.msk.bf16.mxu0 %vm2070_vm2, %v2069_v6  ;;  %v636_v50 = vsel %vm318_vm1, %v1688_v38, 0  ;;  %v627_v51 = vshll.u32 %v2241_v40, 16  ;;  %v626_v56 = vrot.slane %v624_v47, 2  ;;  %v420_v57 = vsel %vm417_vm5, %v418_v42, %v419_v43  ;;  %v1696_v4 = vld [vmem:[%s2202_s13 + $0xe] sm:$0x3] }
  0x3e   : > { %1816 = vmatprep.subr.bf16.mxu0 %v2069_v6  ;;  %v495_v53 = vsel %vm478_vm6, %v486_v41, %v494_v44  ;;  %v618_v54 = vrot.slane %v616_v45, 2  ;;  %v621_v55 = vrot.slane %v619_v46, 3  ;;  %v1693_v59 = vcombine.low %v681_v48, %v2197_v7  ;;  %v1692_v16 = vld [vmem:[%s2202_s13 + $0xc] sm:$0x3]  ;;  %v1706_v24 = vld [vmem:[%s2202_s13 + $0x2] sm:$0x3] }
  0x3f   : > { %v629_v58 = vrot.slane %v627_v51, 3  ;;  %v1697_v60 = vcombine.low %v2253_v52, %v2253_v52  ;;  %vm614_vm7 = vsmask.f32 5376  ;;  %vm553_vm8 = vcmask 1045504   ;;  %v1700_v31 = vld [vmem:[%s2202_s13 + $0x10] sm:$0x3] }
  0x40   : > { %v622_v61 = vor.u32 %v621_v55, %v618_v54  ;;  %v752_v1 = vshrl.u32 %v1693_v59, 16  ;;  %v755_v2 = vshll.u32 %v1693_v59, 16  ;;  %v554_v9 = vrot.slane %v1685_v39, 2  ;;  %v1987_v22 = vld [vmem:[%s2187_s7 + $0x14] ss:$0 sps:$4 sm:$0x11]  }
  0x41   : > { %1813 = vmatmul.mubr.msk.bf16.vlgmr.msra.gmra.mxu1 %vm314_vm3, %v495_v53  ;;  %v630_v0 = vor.u32 %v629_v58, %v626_v56  ;;  %v760_v3 = vshrl.u32 %v1697_v60, 16  ;;  %v763_v5 = vshll.u32 %v1697_v60, 16  ;;  %v555_v10 = vrot.slane %v2225_v23, 2  ;;  %v1711_v37 = vld [vmem:[%s2187_s7 + $0xc] sm:$0xe] }
  0x42   : > { %1823 = vmatpush3.bf16.msra.mxu1 %v636_v50  ;;  %1824 = vmatprep.mubr.msk.bf16.mxu1 %vm2070_vm2, %v2069_v6  ;;  %v2275_v11 = vcombine.low %v1703_v62, %v2265_v63  ;;  %v754_v12 = vrot.slane %v752_v1, 3  ;;  %v757_v13 = vrot.slane %v755_v2, 4  ;;  %v772_v17 = vsel %vm318_vm1, %v1696_v4, 0  ;;  %v1712_v38 = vld [vmem:[%s2202_s13 + $0x4] sm:$0x3] }
  0x43   : > { %1834 = vmatprep.subr.bf16.mxu1 %v2069_v6  ;;  %v631_v8 = vsel %vm614_vm7, %v622_v61, %v630_v0  ;;  %v762_v14 = vrot.slane %v760_v3, 3  ;;  %v765_v15 = vrot.slane %v763_v5, 4  ;;  %v556_v18 = vsel %vm553_vm8, %v554_v9, %v555_v10  ;;  %v881_v41 = vld [vmem:[%s2202_s13] sm:$0x3]  ;;  %v1719_v48 = vld [vmem:[%s2187_s7 + $0xc] sm:$0xc] }
  0x44   : > { %1807 = vmatmul.mubr.msk.bf16.vlgmr.msra.gmra.mxu0 %vm314_vm3, %v420_v57  ;;  %v697_v19 = vsel %vm318_vm1, %v1692_v16, 0  ;;  %v758_v20 = vor.u32 %v757_v13, %v754_v12  ;;  %v895_v23 = vshll.u32 %v2275_v11, 16  ;;  %vm750_vm9 = vsmask.f32 4352  ;;  %v1716_v55 = vld [vmem:[%s2202_s13 + $0x6] sm:$0x3] }
  0x45   : > { %1817 = vmatpush3.bf16.msra.mxu0 %v561_v49  ;;  %1818 = vmatprep.mubr.msk.bf16.mxu0 %vm2070_vm2, %v2069_v6  ;;  %v766_v21 = vor.u32 %v765_v15, %v762_v14  ;;  %vm689_vm10 = vcmask 1044480   ;;  %v690_v25 = vrot.slane %v1693_v59, 3  ;;  %v691_v26 = vrot.slane %v2241_v40, 3  ;;  %v1990_v44 = vld [vmem:[%s2187_s7 + $0x14] ss:$0 sps:$4 sm:$0x33]  }
  0x46   : > { %1828 = vmatprep.subr.bf16.mxu0 %v2069_v6  ;;  %v893_v28 = vshrl.u32 %v2275_v11, 16  ;;  %v897_v29 = vrot.slane %v895_v23, 1  ;;  %v900_v30 = vshll.u32 %v1987_v22, 16  ;;  %v908_v32 = vsel %vm318_vm1, %v1706_v24, 0  ;;  %v1720_v49 = vld [vmem:[%s2202_s13 + $0x8] sm:$0x3] }
  0x47   : > { %v767_v27 = vsel %vm750_vm9, %v758_v20, %v766_v21  ;;  %v692_v33 = vsel %vm689_vm10, %v690_v25, %v691_v26  ;;  %v826_v34 = vsel %vm318_vm1, %v1700_v31, 0  ;;  %v1713_v40 = vcombine.low %v1711_v37, %v2265_v63  ;;  %v1992_v61 = vld [vmem:[%s2187_s7 + $0x14] ss:$0 sps:$4 sm:$0x77]   ;;  %v1727_v2 = vld [vmem:[%s2187_s7 + $0xc] sm:$0x8] }
  0x48   : > { %v898_v35 = vor.u32 %v897_v29, %v893_v28  ;;  %v902_v36 = vrot.slane %v900_v30, 1  ;;  %v1009_v42 = vsel %vm318_vm1, %v1712_v38, 0  ;;  %v1701_v43 = vcombine.low %v2197_v7, %v2253_v52  ;;  %v1728_v3 = vld [vmem:[%s2202_s13 + $0xc] sm:$0x3]  ;;  %v1724_v16 = vld [vmem:[%s2202_s13 + $0xa] sm:$0x3] }
  0x49   : > { %1825 = vmatmul.mubr.msk.bf16.vlgmr.msra.gmra.mxu1 %vm314_vm3, %v631_v8  ;;  %v954_v45 = vsel %vm318_vm1, %v881_v41, 0  ;;  %v1002_v46 = vrot.slane %v1713_v40, 1  ;;  %v1003_v47 = vrot.slane %v1987_v22, 1  ;;  %v1060_v50 = vshrl.u32 %v1713_v40, 16  ;;  %v1731_v15 = vld [vmem:[%s2187_s7 + $0x14] sm:$0xf] }
  0x4a   : > { %1835 = vmatpush3.bf16.msra.mxu1 %v772_v17  ;;  %1836 = vmatprep.mubr.msk.bf16.mxu1 %vm2070_vm2, %v2069_v6  ;;  %v903_v39 = vsel %vm301_vm4, %v898_v35, %v902_v36  ;;  %v1063_v7 = vshll.u32 %v1713_v40, 16  ;;  %v1068_v51 = vshrl.u32 %v1990_v44, 16  ;;  %v1071_v52 = vshll.u32 %v1990_v44, 16 }
  0x4b   : > { %1846 = vmatprep.subr.bf16.mxu1 %v2069_v6  ;;  %v1004_v53 = vsel %vm417_vm5, %v1002_v46, %v1003_v47  ;;  %v1721_v54 = vcombine.low %v1719_v48, %v2265_v63  ;;  %v1137_v56 = vsel %vm318_vm1, %v1720_v49, 0  ;;  %v1062_v57 = vrot.slane %v1060_v50, 1 }
  0x4c   : > { %1819 = vmatmul.mubr.msk.bf16.vlgmr.msra.gmra.mxu0 %vm314_vm3, %v556_v18  ;;  %v1065_v58 = vrot.slane %v1063_v7, 2  ;;  %v1070_v59 = vrot.slane %v1068_v51, 1  ;;  %v1073_v60 = vrot.slane %v1071_v52, 2  ;;  %v1080_v62 = vsel %vm318_vm1, %v1716_v55, 0 }
  0x4d   : > { %1829 = vmatpush3.bf16.msra.mxu0 %v697_v19  ;;  %1830 = vmatprep.mubr.msk.bf16.mxu0 %vm2070_vm2, %v2069_v6  ;;  %v1130_v0 = vrot.slane %v1721_v54, 2  ;;  %v1131_v1 = vrot.slane %v1990_v44, 2  ;;  %v1188_v4 = vshrl.u32 %v1721_v54, 16  ;;  %v1191_v5 = vshll.u32 %v1721_v54, 16 }
  0x4e   : > { %1840 = vmatprep.subr.bf16.mxu0 %v2069_v6  ;;  %v1066_v8 = vor.u32 %v1065_v58, %v1062_v57  ;;  %v1074_v9 = vor.u32 %v1073_v60, %v1070_v59  ;;  %v1196_v10 = vshrl.u32 %v1992_v61, 16  ;;  %v1199_v12 = vshll.u32 %v1992_v61, 16 }
  0x4f   : > { %v1132_v13 = vsel %vm553_vm8, %v1130_v0, %v1131_v1  ;;  %v1729_v14 = vcombine.low %v1727_v2, %v2265_v63  ;;  %v1190_v17 = vrot.slane %v1188_v4, 2  ;;  %v1193_v18 = vrot.slane %v1191_v5, 3 }
  0x50   : > { %v1075_v19 = vsel %vm478_vm6, %v1066_v8, %v1074_v9  ;;  %v1198_v20 = vrot.slane %v1196_v10, 2  ;;  %v1201_v21 = vrot.slane %v1199_v12, 3  ;;  %v1733_v22 = vcombine.low %v1731_v15, %v1731_v15 }
  0x51   : > { %1837 = vmatmul.mubr.msk.bf16.vlgmr.msra.gmra.mxu1 %vm314_vm3, %v767_v27  ;;  %v1208_v23 = vsel %vm318_vm1, %v1724_v16, 0  ;;  %v1258_v24 = vrot.slane %v1729_v14, 3  ;;  %v1259_v25 = vrot.slane %v1992_v61, 3  ;;  %v1194_v26 = vor.u32 %v1193_v18, %v1190_v17  ;;  %v1735_v27 = vld [vmem:[%s2202_s13 + $0x10] sm:$0x3] }
  0x52   : > { %1847 = vmatpush3.bf16.msra.mxu1 %v908_v32  ;;  %1848 = vmatprep.mubr.msk.bf16.mxu1 %vm2070_vm2, %v2069_v6  ;;  %v1316_v28 = vshrl.u32 %v1729_v14, 16  ;;  %v1202_v29 = vor.u32 %v1201_v21, %v1198_v20  ;;  %v1319_v30 = vshll.u32 %v1729_v14, 16  ;;  %v1324_v31 = vshrl.u32 %v1733_v22, 16 }
  0x53   : > { %1858 = vmatprep.subr.bf16.mxu1 %v2069_v6  ;;  %v1327_v32 = vshll.u32 %v1733_v22, 16  ;;  %v1387_v35 = vsel %vm318_vm1, %v1735_v27, 0  ;;  %vm875_vm11 = vcmask 261120  }
  0x54   : > { %1831 = vmatmul.mubr.msk.bf16.vlgmr.msra.gmra.mxu0 %vm314_vm3, %v692_v33  ;;  %v1260_v33 = vsel %vm689_vm10, %v1258_v24, %v1259_v25  ;;  %v1318_v36 = vrot.slane %v1316_v28, 3  ;;  %v1203_v37 = vsel %vm614_vm7, %v1194_v26, %v1202_v29  ;;  %v1321_v38 = vrot.slane %v1319_v30, 4  ;;  %v871_v30 = vld [vmem:[#allocation2] sm:$0xff] }
  0x55   : > { %1841 = vmatpush3.bf16.msra.mxu0 %v826_v34  ;;  %1842 = vmatprep.mubr.msk.bf16.mxu0 %vm2070_vm2, %v2069_v6  ;;  %v1732_v34 = vld [vmem:[%s2202_s13 + $0xe] sm:$0x3]  ;;  %v1329_v40 = vrot.slane %v1327_v32, 4 }
  0x56   : > { %1852 = vmatprep.subr.bf16.mxu0 %v2069_v6  ;;  %v1336_v41 = vsel %vm318_vm1, %v1732_v34, 0 }
  0x59   : > { %1849 = vmatmul.mubr.msk.bf16.vlgmr.msra.gmra.mxu1 %vm314_vm3, %v903_v39  ;;  %v1326_v39 = vrot.slane %v1324_v31, 3 }
  0x5a   : > { %1859 = vmatpush3.bf16.msra.mxu1 %v1009_v42  ;;  %1860 = vmatprep.mubr.msk.bf16.mxu1 %vm2070_vm2, %v2069_v6  ;;  %v1736_v42 = vcombine.low %v2265_v63, %v1731_v15 }
  0x5b   : > { %1870 = vmatprep.subr.bf16.mxu1 %v2069_v6  ;;  %v1330_v44 = vor.u32 %v1329_v40, %v1326_v39 }
  0x5c   : > { %1843 = vmatmul.mubr.msk.bf16.vlgmr.msra.gmra.mxu0 %vm314_vm3, %v1701_v43  ;;  %v1322_v43 = vor.u32 %v1321_v38, %v1318_v36  ;;  %v872_v38 = vld [vmem:[#allocation2 + $0x8] sm:$0xff] }
  0x5d   : > { %1853 = vmatpush3.bf16.msra.mxu0 %v954_v45  ;;  %1854 = vmatprep.mubr.msk.bf16.mxu0 %vm2070_vm2, %v2069_v6 }
  0x5e   : > { %1864 = vmatprep.subr.bf16.mxu0 %v2069_v6  ;;  %v1331_v45 = vsel %vm750_vm9, %v1322_v43, %v1330_v44 }
  0x61   : > { %1861 = vmatmul.mubr.msk.bf16.vlgmr.msra.gmra.mxu1 %vm314_vm3, %v1004_v53 }
  0x62   : > { %1871 = vmatpush3.bf16.msra.mxu1 %v1137_v56  ;;  %1872 = vmatprep.mubr.msk.bf16.mxu1 %vm2070_vm2, %v2069_v6 }
  0x63   : > { %1882 = vmatprep.subr.bf16.mxu1 %v2069_v6 }
  0x64   : > { %1855 = vmatmul.mubr.msk.bf16.vlgmr.msra.gmra.mxu0 %vm314_vm3, %v2275_v11  ;;  %v1265_v11 = vsel %vm318_vm1, %v1728_v3, 0 }
  0x65   : > { %1865 = vmatpush3.bf16.msra.mxu0 %v1080_v62  ;;  %1866 = vmatprep.mubr.msk.bf16.mxu0 %vm2070_vm2, %v2069_v6 }
  0x66   : > { %1876 = vmatprep.subr.bf16.mxu0 %v2069_v6 }
  0x69   : > { %1873 = vmatmul.mubr.msk.bf16.vlgmr.msra.gmra.mxu1 %vm314_vm3, %v1132_v13 }
  0x6a   : > { %1883 = vmatpush3.bf16.msra.mxu1 %v1265_v11  ;;  %1884 = vmatprep.mubr.msk.bf16.mxu1 %vm2070_vm2, %v2069_v6 }
  0x6b   : > { %1894 = vmatprep.subr.bf16.mxu1 %v2069_v6 }
  0x6c   : > { %1867 = vmatmul.mubr.msk.bf16.vlgmr.msra.gmra.mxu0 %vm314_vm3, %v1075_v19 }
  0x6d   : > { %1877 = vmatpush3.bf16.msra.mxu0 %v1208_v23  ;;  %1878 = vmatprep.mubr.msk.bf16.mxu0 %vm2070_vm2, %v2069_v6 }
  0x6e   : > { %1888 = vmatprep.subr.bf16.mxu0 %v2069_v6 }
  0x71   : > { %1885 = vmatmul.mubr.msk.bf16.vlgmr.msra.gmra.mxu1 %vm314_vm3, %v1260_v33 }
  0x72   : > { %1895 = vmatpush3.bf16.msra.mxu1 %v1387_v35  ;;  %1896 = vmatprep.mubr.msk.bf16.mxu1 %vm2070_vm2, %v2069_v6 }
  0x74   : > { %1879 = vmatmul.mubr.msk.bf16.vlgmr.msra.gmra.mxu0 %vm314_vm3, %v1203_v37 }
  0x75   : > { %1889 = vmatpush3.bf16.msra.mxu0 %v1336_v41  ;;  %1890 = vmatprep.mubr.msk.bf16.mxu0 %vm2070_vm2, %v2069_v6 }
  0x79   : > { %1897 = vmatmul.mubr.msk.bf16.vlgmr.msra.gmra.mxu1 %vm314_vm3, %v1736_v42 }
  0x7c   : > { %1891 = vmatmul.mubr.msk.bf16.vlgmr.msra.gmra.mxu0 %vm314_vm3, %v1331_v45 }
  0xf9   : > { %v402_v46 = vpop.f32.mrf.mxu1 }
  0xfb   : > { %v1802_v47 = vpop.f32.mrf.mxu1 }
  0xfc   : > { %v356_v48 = vpop.f32.mrf.mxu0 }
  0xfd   : > { %v405_v49 = vpop.f32.mrf.mxu1  ;;  %v403_v58 = vadd.f32 %v402_v46, %v356_v48 }
  0xfe   : > { %v1796_v50 = vpop.f32.mrf.mxu0 }
  0xff   : > { %v1803_v7 = vpop.f32.mrf.mxu1 }
 0x100   : > { %v359_v51 = vpop.f32.mrf.mxu0 }
 0x101   : > { %v536_v52 = vpop.f32.mrf.mxu1  ;;  %v406_v1 = vadd.f32 %v405_v49, %v359_v51 }
 0x102   : > { %v1797_v63 = vpop.f32.mrf.mxu0 }
 0x103   : > { %v1814_v53 = vpop.f32.mrf.mxu1 }
 0x104   : > { %v461_v54 = vpop.f32.mrf.mxu0 }
 0x105   : > { %v539_v6 = vpop.f32.mrf.mxu1  ;;  %v468_v61 = vadd.f32 %v461_v54, %v403_v58 }
 0x106   : > { %v1808_v55 = vpop.f32.mrf.mxu0 }
 0x107   : > { %v1815_v56 = vpop.f32.mrf.mxu1  ;;  %v543_v5 = vadd.f32 %v536_v52, %v468_v61 }
 0x108   : > { %v464_v57 = vpop.f32.mrf.mxu0 }
 0x109   : > { %v672_v59 = vpop.f32.mrf.mxu1  ;;  %v469_v4 = vadd.f32 %v464_v57, %v406_v1 }
 0x10a   : > { %v1809_v60 = vpop.f32.mrf.mxu0 }
 0x10b   : > { %v1826_v62 = vpop.f32.mrf.mxu1  ;;  %v544_v14 = vadd.f32 %v539_v6, %v469_v4 }
 0x10c   : > { %v597_v0 = vpop.f32.mrf.mxu0 }
 0x10d   : > { %v675_v2 = vpop.f32.mrf.mxu1  ;;  %v604_v10 = vadd.f32 %v597_v0, %v543_v5 }
 0x10e   : > { %v1820_v3 = vpop.f32.mrf.mxu0 }
 0x10f   : > { %v1827_v8 = vpop.f32.mrf.mxu1  ;;  %v679_v17 = vadd.f32 %v672_v59, %v604_v10 }
 0x110   : > { %v600_v9 = vpop.f32.mrf.mxu0 }
 0x111   : > { %v808_v12 = vpop.f32.mrf.mxu1  ;;  %v605_v11 = vadd.f32 %v600_v9, %v544_v14 }
 0x112   : > { %v1821_v13 = vpop.f32.mrf.mxu0 }
 0x113   : > { %v1838_v15 = vpop.f32.mrf.mxu1  ;;  %v680_v23 = vadd.f32 %v675_v2, %v605_v11 }
 0x114   : > { %v733_v16 = vpop.f32.mrf.mxu0 }
 0x115   : > { %v811_v18 = vpop.f32.mrf.mxu1  ;;  %v740_v20 = vadd.f32 %v733_v16, %v679_v17 }
 0x116   : > { %v1832_v19 = vpop.f32.mrf.mxu0 }
 0x117   : > { %v1839_v21 = vpop.f32.mrf.mxu1  ;;  %v815_v27 = vadd.f32 %v808_v12, %v740_v20 }
 0x118   : > { %v736_v22 = vpop.f32.mrf.mxu0 }
 0x119   : > { %v944_v24 = vpop.f32.mrf.mxu1  ;;  %v741_v26 = vadd.f32 %v736_v22, %v680_v23 }
 0x11a   : > { %v1833_v25 = vpop.f32.mrf.mxu0 }
 0x11b   : > { %v1850_v28 = vpop.f32.mrf.mxu1  ;;  %v816_v35 = vadd.f32 %v811_v18, %v741_v26  ;;  %v1433_v18 = vld [vmem:[#allocation2 + $0x10] sm:$0xff]  ;;  %v1434_v26 = vld [vmem:[#allocation2 + $0x18] sm:$0xff] }
 0x11c   : > { %v862_v29 = vpop.f32.mrf.mxu0 }
 0x11d   : > { %v869_v31 = vadd.f32 %v862_v29, %v815_v27  ;;  %v947_v32 = vpop.f32.mrf.mxu1 }
 0x11e   : > { %v1844_v33 = vpop.f32.mrf.mxu0 }
 0x11f   : > { %v873_v34 = vadd.f32 %v871_v30, %v869_v31  ;;  %v1851_v36 = vpop.f32.mrf.mxu1 }
 0x120   : > { %v865_v37 = vpop.f32.mrf.mxu0 }
 0x121   : > { %876 = vst.msk [vmem:[#allocation2] sm:$0xff] %vm875_vm11, %v873_v34  ;;  %v870_v39 = vadd.f32 %v865_v37, %v816_v35  ;;  %v1045_v40 = vpop.f32.mrf.mxu1 }
 0x122   : > { %v1845_v41 = vpop.f32.mrf.mxu0 }
 0x123   : > { %v874_v42 = vadd.f32 %v872_v38, %v870_v39  ;;  %v1862_v43 = vpop.f32.mrf.mxu1 }
 0x124   : > { %v990_v44 = vpop.f32.mrf.mxu0 }
 0x125   : > { %877 = vst.msk [vmem:[#allocation2 + $0x8] sm:$0xff] %vm875_vm11, %v874_v42  ;;  %v1048_v45 = vpop.f32.mrf.mxu1  ;;  %v991_v7 = vadd.f32 %v990_v44, %v944_v24 }
 0x126   : > { %v1856_v46 = vpop.f32.mrf.mxu0 }
 0x127   : > { %v1863_v47 = vpop.f32.mrf.mxu1  ;;  %v1052_v6 = vadd.f32 %v1045_v40, %v991_v7 }
 0x128   : > { %v993_v48 = vpop.f32.mrf.mxu0 }
 0x129   : > { %v1173_v49 = vpop.f32.mrf.mxu1  ;;  %v994_v54 = vadd.f32 %v993_v48, %v947_v32 }
 0x12a   : > { %v1857_v50 = vpop.f32.mrf.mxu0 }
 0x12b   : > { %v1874_v51 = vpop.f32.mrf.mxu1  ;;  %v1053_v60 = vadd.f32 %v1048_v45, %v994_v54 }
 0x12c   : > { %v1116_v52 = vpop.f32.mrf.mxu0 }
 0x12d   : > { %v1176_v63 = vpop.f32.mrf.mxu1  ;;  %v1123_v57 = vadd.f32 %v1116_v52, %v1052_v6 }
 0x12e   : > { %v1868_v53 = vpop.f32.mrf.mxu0 }
 0x12f   : > { %v1875_v55 = vpop.f32.mrf.mxu1  ;;  %v1180_v1 = vadd.f32 %v1173_v49, %v1123_v57 }
 0x130   : > { %v1119_v56 = vpop.f32.mrf.mxu0 }
 0x131   : > { %v1301_v58 = vpop.f32.mrf.mxu1  ;;  %v1124_v0 = vadd.f32 %v1119_v56, %v1053_v60 }
 0x132   : > { %v1869_v59 = vpop.f32.mrf.mxu0 }
 0x133   : > { %v1886_v61 = vpop.f32.mrf.mxu1  ;;  %v1181_v9 = vadd.f32 %v1176_v63, %v1124_v0 }
 0x134   : > { %v1244_v62 = vpop.f32.mrf.mxu0 }
 0x135   : > { %v1304_v2 = vpop.f32.mrf.mxu1  ;;  %v1251_v4 = vadd.f32 %v1244_v62, %v1180_v1 }
 0x136   : > { %v1880_v3 = vpop.f32.mrf.mxu0 }
 0x137   : > { %v1887_v5 = vpop.f32.mrf.mxu1  ;;  %v1308_v14 = vadd.f32 %v1301_v58, %v1251_v4 }
 0x138   : > { %v1247_v8 = vpop.f32.mrf.mxu0 }
 0x139   : > { %v1423_v10 = vpop.f32.mrf.mxu1  ;;  %v1252_v13 = vadd.f32 %v1247_v8, %v1181_v9 }
 0x13a   : > { %v1881_v12 = vpop.f32.mrf.mxu0 }
 0x13b   : > { %v1898_v15 = vpop.f32.mrf.mxu1  ;;  %v1309_v21 = vadd.f32 %v1304_v2, %v1252_v13 }
 0x13c   : > { %v1372_v16 = vpop.f32.mrf.mxu0 }
 0x13d   : > { %v1379_v11 = vadd.f32 %v1372_v16, %v1308_v14  ;;  %v1426_v17 = vpop.f32.mrf.mxu1 }
 0x13e   : > { %v1892_v19 = vpop.f32.mrf.mxu0 }
 0x13f   : > { %v1430_v20 = vadd.f32 %v1423_v10, %v1379_v11  ;;  %v1899_v22 = vpop.f32.mrf.mxu1 }
 0x140   : > { %v1375_v23 = vpop.f32.mrf.mxu0 }
 0x141   : > { %v1435_v24 = vadd.f32 %v1433_v18, %v1430_v20  ;;  %v1380_v25 = vadd.f32 %v1375_v23, %v1309_v21 }
 0x142   : > { %v1893_v27 = vpop.f32.mrf.mxu0 }
 0x143   : > { %1437 = vst.msk [vmem:[#allocation2 + $0x10] sm:$0xff] %vm875_vm11, %v1435_v24  ;;  %v1431_v28 = vadd.f32 %v1426_v17, %v1380_v25  ;;  %1442 = sbr.rel (%p1738_p1) target bundleno = 344 (0x158), region = 85 }
 0x145   : > { %v1436_v29 = vadd.f32 %v1434_v26, %v1431_v28 }
 0x147   : > { %1438 = vst.msk [vmem:[#allocation2 + $0x18] sm:$0xff] %vm875_vm11, %v1436_v29 }
 0x148   : > { %v1443_v30 = vld [vmem:[#allocation2] sm:$0xff]  ;;  %v1444_v34 = vld [vmem:[#allocation2 + $0x8] sm:$0xff]  ;;  %vm1489_vm12 = vcmask 257024  }
 0x149   : > { %v1739_v31 = vld [vmem:[%s2428_s2] ss:$0 sm:$0xff] }
 0x14a   : > { %v1740_v32 = vld [vmem:[%s2429_s3] ss:$0 sm:$0xff]  ;;  %v1454_v33 = vmul.f32 %v1739_v31, %v1443_v30  ;;  %v1445_v35 = vld [vmem:[#allocation2 + $0x10] sm:$0xff]  ;;  %v1455_v37 = vmul.f32 %v1739_v31, %v1444_v34 }
 0x14b   : > { %v1456_v38 = vmul.f32 %v1739_v31, %v1445_v35 }
 0x14c   : > { %v1465_v40 = vadd.f32 %v1740_v32, %v1454_v33  ;;  %v1466_v41 = vadd.f32 %v1740_v32, %v1455_v37 }
 0x14d   : > { %v1467_v42 = vadd.f32 %v1740_v32, %v1456_v38 }
 0x14e   : > { %v1446_v36 = vld [vmem:[#allocation2 + $0x18] sm:$0xff]  ;;  %v1469_v44 = vmax.f32 %v1465_v40, 0.0  ;;  %v1470_v45 = vmax.f32 %v1466_v41, 0.0 }
 0x14f   : > { %v1457_v39 = vmul.f32 %v1739_v31, %v1446_v36  ;;  %v1471_v46 = vmax.f32 %v1467_v42, 0.0 }
 0x150   : > { %v1751_v48 = vpack.c.bf16 %v1469_v44, %v1469_v44  ;;  %v1752_v49 = vpack.c.bf16 %v1470_v45, %v1470_v45 }
 0x151   : > { %v1468_v43 = vadd.f32 %v1740_v32, %v1457_v39  ;;  %v1753_v50 = vpack.c.bf16 %v1471_v46, %v1471_v46 }
 0x152   : > { %1490 = vst.msk [vmem:[%s2189_s11] sm:$0xf] %vm1489_vm12, %v1751_v48  ;;  %1491 = vst.msk [vmem:[%s2189_s11 + $0x4] sm:$0xf] %vm1489_vm12, %v1752_v49 }
 0x153   : > { %v1472_v47 = vmax.f32 %v1468_v43, 0.0  ;;  %1492 = vst.msk [vmem:[%s2189_s11 + $0x8] sm:$0xf] %vm1489_vm12, %v1753_v50 }
 0x155   : > { %v1754_v7 = vpack.c.bf16 %v1472_v47, %v1472_v47 }
 0x157   : > { %1493 = vst.msk [vmem:[%s2189_s11 + $0xc] sm:$0xf] %vm1489_vm12, %v1754_v7 }
 0x158 PF: > { %1500 = sbr.rel (!%p2166_p9) target bundleno = 352 (0x160), region = 89  ;;  %s1755_s19 = sshll.u32 (%p2166_p9), %s2054_s20, 3 }
 0x159   : > { %v1520_v51 = vld [vmem:[%s2189_s11] sm:$0xff] (%p2166_p9)   ;;  %s1503_s29 = scalar_lea.vmem (%p2166_p9), %s2430_s4, %s1755_s19 }
 0x15a   : > { %1521 = vst [vmem:[%s1503_s29] sm:$0xff] (%p2166_p9), %v1520_v51  }
 0x15e   : > { %v1524_v52 = vld [vmem:[%s2189_s11 + $0x8] sm:$0xff]  }
 0x15f   : > { %1525 = vst [vmem:[%s1503_s29 + $0x80] sm:$0xff] %v1524_v52  }
 0x160 PF: > { %s14_s23 = sadd.s32 1, %s2066_s23   ;;  %s2433_s15 = smov %s2038_s16 }
 0x161   : > { %p11_p2 = scmp.ge.s32.totalorder %s14_s23, 146   ;;  %s2434_s16 = smov %s2171_s9 }
 0x162   : > { %s2435_s17 = smov %s2046_s18  ;;  %s2436_s18 = smov %s2174_s10 }
 0x163   : > { %s2437_s19 = smov %s2058_s21  ;;  %s2438_s20 = smov %s2062_s22 }
 0x164   : > { %s2439_s21 = smov %s2442_s24  ;;  %s2440_s22 = smov %s2446_s25 }
 0x165   :  { %13 = sbr.rel (!%p11_p2) target bundleno = 5 (0x5), region = 172 }

// kernel: routenet_fcn_forward.15
= control target key start
LH: loop header
LB: loop body
LE: loop exit
PB: predicated region body
PF: predicated region fallthrough
CT: control target
= control target key end

     0   :  { %s367_s6 = smov 0   ;;  %s369_s7 = smov 0   ;;  %s427_s0 = inlined_call_operand.vmem [shape: bf16[2,8,4,128], index: 0, kind: input, shape index: {}]   ;;  %s428_s1 = inlined_call_operand.vmem [shape: bf16[2,4,4,64], index: 1, kind: output, shape index: {}]  }
   0x1   :  { %s371_s8 = smov 0  }
   0x2 LB: > { %s290_s9 = sadd.s32 4294967295, %s354_s8   ;;  %s384_s10 = sadd.s32 1, %s354_s8   ;;  %s354_s8 = sphi %s371_s8, %s432_s8   ;;  %s350_s7 = sphi %s369_s7, %s431_s7   ;;  %s346_s6 = sphi %s367_s6, %s430_s6  }
   0x3   : > { %s15_s11 = ssub.s32 %s354_s8, %s384_s10  ;;  %s18_s12 = sadd.s32 1, %s350_s7 }
   0x4   : > { %p16_p0 = scmp.eq.s32.totalorder %s15_s11, 0  ;;  %p25_p1 = scmp.ne.s32.totalorder %s350_s7, %s346_s6 }
   0x5   : > { %p26_p2 = scmp.eq.s32.totalorder %s354_s8, 0  ;;  %p55_p3 = scmp.eq.s32.totalorder %s290_s9, 3 }
   0x6   : > { %s395_s13 = scalar_select %p16_p0, %s350_s7, %s18_s12  }
   0x7   : > { %p27_p4 = por %p26_p2, %p25_p1  ;;  %p397_p5 = por %p55_p3, %p25_p1 }
   0x8   : > { %p293_p6 = scmp.ge.s32.totalorder %s354_s8, 4 }
   0xa   : > { %77 = sbr.rel (%p293_p6) target bundleno = 20 (0x14), region = 16 }
   0xf   : > { %80 = sbr.rel (!%p27_p4) target bundleno = 20 (0x14), region = 20  ;;  %s82_s15 = sand.u32 (%p27_p4), 1, %s350_s7  }
  0x10   : > { %s306_s16 = sshll.u32 (%p27_p4), %s354_s8, 2  ;;  %s294_s17 = sshll.u32 (%p27_p4), %s82_s15, 3 }
  0x11   : > { %s87_s20 = scalar_lea.vmem (%p27_p4), %s427_s0, %s306_s16  ;;  %s84_s21 = scalar_lea.vmem (%p27_p4), [#allocation2], %s294_s17 }
  0x12   : > { %v104_v0 = vld [vmem:[%s87_s20] sm:$0xf] (%p27_p4)   ;;  %v108_v1 = vld [vmem:[%s87_s20 + $0x10] sm:$0xf] (%p27_p4)  }
  0x13   : > { %105 = vst [vmem:[%s84_s21] sm:$0xf] (%p27_p4), %v104_v0   ;;  %109 = vst [vmem:[%s84_s21 + $0x4] sm:$0xf] (%p27_p4), %v108_v1  }
  0x14 PF: > { %p297_p7 = scmp.ge.s32.totalorder %s354_s8, 1  ;;  %p142_p8 = scmp.lt.s32.totalorder %s354_s8, 5 }
  0x16   : > { %p143_p9 = pnand %p297_p7, %p142_p8 }
  0x17   : > { %s149_s22 = sand.u32 (!%p143_p9), 1, %s346_s6   ;;  %s356_s25 = smov (!%p143_p9), 64  }
  0x18   : > { %146 = sbr.rel (%p143_p9) target bundleno = 162 (0xa2), region = 61  ;;  %s298_s23 = sshll.u32 (!%p143_p9), %s149_s22, 3 }
  0x19   : > { %s151_s24 = scalar_lea.vmem (!%p143_p9), [#allocation2], %s298_s23  ;;  %s299_s26 = sshll.u32 (!%p143_p9), %s149_s22, 2 }
  0x1a   : > { %s166_s27 = scalar_lea.vmem (!%p143_p9), [#allocation3], %s299_s26 }
  0x1d   : > { %v168_v2 = vld [vmem:[%s151_s24] sm:$0x3]  ;;  %v300_v3 = vld [vmem:[%s151_s24 + $0x2] sm:$0x3]  ;;  %v169_v4 = vld [vmem:[%s151_s24 + $0x4] sm:$0x3] }
  0x1e   : > { %v173_v5 = vmax.bf16 %v300_v3, %v168_v2  ;;  %v301_v6 = vld [vmem:[%s151_s24 + $0x6] sm:$0x3]  ;;  %vm185_vm0 = vcmask 517120   ;;  %s303_s28 = sshll.u32 (%p397_p5), %s290_s9, 1 }
  0x1f   : > { %v174_v7 = vmax.bf16 %v301_v6, %v169_v4  ;;  %s196_s2 = scalar_lea.vmem (%p397_p5), %s428_s1, %s303_s28 }
  0x20   : > { %177 = vrot.lane.b32.xlu0 %v173_v5, %s356_s25 }
  0x24   : > { %179 = vrot.lane.b32.xlu0 %v174_v7, %s356_s25 }
  0x92   : > { %v178_v8 = vpop.permute.xlu0 %177 }
  0x93   : > { %v183_v9 = vmax.bf16 %v178_v8, %v173_v5 }
  0x95   : > { %186 = vst.msk [vmem:[%s166_s27] sm:$0x3] %vm185_vm0, %v183_v9  ;;  %194 = sbr.rel (!%p397_p5) target bundleno = 162 (0xa2), region = 69 }
  0x96   : > { %v180_v10 = vpop.permute.xlu0 %179 }
  0x97   : > { %v184_v11 = vmax.bf16 %v180_v10, %v174_v7 }
  0x99   : > { %187 = vst.msk [vmem:[%s166_s27 + $0x2] sm:$0x3] %vm185_vm0, %v184_v11 }
  0x9c   : > { %v213_v12 = vld [vmem:[%s166_s27] sm:$0x3] }
  0x9d   : > { %214 = vst [vmem:[%s196_s2] sm:$0x3] %v213_v12 }
  0xa0   : > { %v215_v13 = vld [vmem:[%s166_s27 + $0x2] sm:$0x3] }
  0xa1   : > { %216 = vst [vmem:[%s196_s2 + $0x8] sm:$0x3] %v215_v13 }
  0xa2 PF: > { %p8_p10 = scmp.ge.s32.totalorder %s384_s10, 6   ;;  %s430_s6 = smov %s350_s7 }
  0xa3   : > { %s431_s7 = smov %s395_s13  ;;  %s432_s8 = smov %s384_s10 }
  0xa4   :  { %10 = sbr.rel (!%p8_p10) target bundleno = 2 (0x2), region = 135 }

// kernel: routenet_fcn_forward.14
= control target key start
LH: loop header
LB: loop body
LE: loop exit
PB: predicated region body
PF: predicated region fallthrough
CT: control target
= control target key end

     0   :  { %s1930_s15 = smov 0   ;;  %s1932_s16 = smov 0   ;;  %s2206_s0 = inlined_call_operand.vmem [shape: bf16[2,14,14,32], index: 0, kind: input, shape index: {}]   ;;  %s2207_s1 = inlined_call_operand.vmem [shape: bf16[7,7,32,64], index: 1, kind: input, shape index: {}]   ;;  %s2208_s2 = inlined_call_operand.vmem [shape: f32[1,64], index: 2, kind: input, shape index: {}]   ;;  %s2209_s3 = inlined_call_operand.vmem [shape: f32[1,64], index: 3, kind: input, shape index: {}]   ;;  %s2210_s4 = inlined_call_operand.vmem [shape: bf16[2,8,8,64], index: 4, kind: output, shape index: {}]  }
   0x1   :  { %s1934_s17 = smov 0   ;;  %s1936_s18 = smov 0  }
   0x2   :  { %s1938_s19 = smov 0   ;;  %s1940_s20 = smov 0  }
   0x3   :  { %s1942_s21 = smov 0   ;;  %s1944_s22 = smov 0  }
   0x4   :  { %s1946_s23 = smov 0  }
   0x5 LB: > { %s23_s24 = sadd.s32 1, %s1892_s21  ;;  %s26_s25 = sadd.s32 1, %s1896_s22  ;;  %s1900_s23 = sphi %s1946_s23, %s14_s23   ;;  %s1896_s22 = sphi %s1944_s22, %s2220_s22   ;;  %s1892_s21 = sphi %s1942_s21, %s2219_s21   ;;  %s1888_s20 = sphi %s1940_s20, %s2218_s20   ;;  %s1884_s19 = sphi %s1938_s19, %s2217_s19   ;;  %s1880_s18 = sphi %s1936_s18, %s2216_s18   ;;  %s1876_s17 = sphi %s1934_s17, %s2215_s17   ;;  %s1872_s16 = sphi %s1932_s16, %s2214_s16   ;;  %s1868_s15 = sphi %s1930_s15, %s2213_s15  }
   0x6   : > { %p24_p0 = scmp.ge.s32.totalorder %s23_s24, 7  ;;  %s1425_s26 = sadd.s32 4294967295, %s1900_s23  }
   0x7   : > { %s30_s27 = sadd.s32 %s1892_s21, %s1896_s22  ;;  %p42_p1 = scmp.ne.s32.totalorder %s1880_s18, %s1876_s17 }
   0x8   : > { %s2222_s24 = smov (%p24_p0, %s23_s24), 0  ;;  %s2224_s25 = smov (!%p24_p0, %s26_s25), %s1896_s22 }
   0x9   : > { %p43_p2 = scmp.eq.s32.totalorder %s1900_s23, 0  ;;  %p28_p3 = scmp.ge.s32.totalorder %s2224_s25, 8 }
   0xa   : > { %s35_s28 = sadd.s32 1, %s1880_s18  ;;  %p134_p5 = scmp.ne.s32.totalorder %s1872_s16, %s1868_s15 }
   0xb   : > { %p1987_p4 = por %p43_p2, %p42_p1  ;;  %s2226_s25 = smov (%p28_p3, %s2224_s25), 0 }
   0xc   : > { %s124_s30 = sadd.s32 1, %s1872_s16  ;;  %p135_p6 = scmp.eq.s32.totalorder %s1425_s26, 55 }
   0xd   : > { %s31_s5 = sadd.s32 %s2226_s25, %s2222_s24  ;;  %s121_s6 = ssub.s32 %s1896_s22, %s2226_s25 }
   0xe   : > { %s32_s7 = ssub.s32 %s30_s27, %s31_s5  ;;  %p122_p7 = scmp.eq.s32.totalorder %s121_s6, 0 }
   0xf   : > { %p33_p8 = scmp.eq.s32.totalorder %s32_s7, 0  ;;  %p2000_p9 = por %p135_p6, %p134_p5 }
  0x10   : > { %s2005_s9 = scalar_select %p122_p7, %s1872_s16, %s124_s30  }
  0x11   : > { %s2008_s10 = scalar_select %p33_p8, %s1880_s18, %s35_s28  }
  0x12   : > { %p1428_p10 = scmp.ge.s32.totalorder %s1900_s23, 56 }
  0x14   : > { %166 = sbr.rel (%p1428_p10) target bundleno = 30 (0x1e), region = 28 }
  0x19   : > { %169 = sbr.rel (!%p1987_p4) target bundleno = 30 (0x1e), region = 32  ;;  %s171_s11 = sand.u32 (%p1987_p4), 1, %s1880_s18  }
  0x1a   : > { %s1559_s12 = sshll.u32 (%p1987_p4), %s30_s27, 3  ;;  %s1429_s13 = sshll.u32 (%p1987_p4), %s171_s11, 4 }
  0x1b   : > { %s177_s5 = scalar_lea.vmem (%p1987_p4), %s2206_s0, %s1559_s12  ;;  %s173_s30 = scalar_lea.vmem (%p1987_p4), [#allocation3], %s1429_s13 }
  0x1c   : > { %v194_v0 = vld [vmem:[%s177_s5] sm:$0xff] (%p1987_p4)   ;;  %v198_v1 = vld [vmem:[%s177_s5 + $0x70] sm:$0xff] (%p1987_p4)  }
  0x1d   : > { %195 = vst [vmem:[%s173_s30] sm:$0xff] (%p1987_p4), %v194_v0   ;;  %199 = vst [vmem:[%s173_s30 + $0x8] sm:$0xff] (%p1987_p4), %v198_v1  }
  0x1e PF: > { %p1432_p11 = scmp.ge.s32.totalorder %s1900_s23, 1  ;;  %p232_p12 = scmp.lt.s32.totalorder %s1900_s23, 57 }
  0x20   : > { %p233_p13 = pnand %p1432_p11, %p232_p12 }
  0x21   : > { %s239_s27 = sand.u32 (!%p233_p13), 1, %s1876_s17   ;;  %s260_s28 = sand.u32 (!%p233_p13), 1, %s1868_s15  }
  0x22   : > { %236 = sbr.rel (%p233_p13) target bundleno = 329 (0x149), region = 73  ;;  %s1433_s29 = sshll.u32 (!%p233_p13), %s239_s27, 4 }
  0x23   : > { %s1434_s6 = sshll.u32 (!%p233_p13), %s260_s28, 3  ;;  %s2021_s7 = scalar_lea.vmem (!%p233_p13), [#allocation3], %s1433_s29 }
  0x24   : > { %s2023_s11 = scalar_lea.vmem (!%p233_p13), [#allocation4], %s1434_s6  ;;  %p1435_p0 = scmp.ne.s32.totalorder (!%p233_p13), %s1884_s19, 0 }
  0x27   : > { %268 = sbr.rel (%p1435_p0) target bundleno = 46 (0x2e), region = 81 }
  0x2c   : > { %vm269_vm0 = vcmask 523264   ;;  %v1902_v2 = vmov 0.0  }
  0x2d   : > { %270 = vst.msk [vmem:[#allocation2] sm:$0xff] %vm269_vm0, %v1902_v2  ;;  %271 = vst.msk [vmem:[#allocation2 + $0x8] sm:$0xff] %vm269_vm0, %v1902_v2 }
  0x2e PF: > { %s1560_s15 = smul.u32 112, %s1884_s19  ;;  %v272_v3 = vld [vmem:[%s2021_s7] sm:$0xf]  ;;  %v1903_v4 = vmov 0.0   ;;  %v280_v5 = vld [vmem:[%s2021_s7 + $0x4] sm:$0x1] }
  0x2f   : > { %1603 = vmatprep.subr.bf16.mxu0 %v1903_v4  ;;  %1611 = vmatprep.subr.bf16.mxu1 %v1903_v4  ;;  %vm1904_vm1 = vmmov 0   ;;  %v1442_v6 = vcombine.low %v272_v3, %v280_v5  ;;  %v411_v7 = vld [vmem:[%s2021_s7] sm:$0xe]  ;;  %v2042_v8 = vld [vmem:[%s2021_s7 + $0x4] sm:$0x3]  ;;  %vm312_vm2 = vcmask 261120  }
  0x30   : > { %s2034_s13 = scalar_lea.vmem %s2207_s1, %s1560_s15  ;;  %1607 = vmatprep.mubr.msk.bf16.mxu0 %vm1904_vm1, %v1903_v4  ;;  %1615 = vmatprep.mubr.msk.bf16.mxu1 %vm1904_vm1, %v1903_v4  ;;  %v1463_v14 = vcombine.low %v411_v7, %v2042_v8  ;;  %v554_v18 = vld [vmem:[%s2021_s7] sm:$0xc]  ;;  %v2054_v19 = vld [vmem:[%s2021_s7 + $0x4] sm:$0x7]  ;;  %v1454_v25 = vcombine.low %v411_v7, %v280_v5  ;;  %v2075_v36 = vld [vmem:[%s2021_s7 + $0x8] sm:$0xf] }
  0x31   : > { %v1790_v9 = vld [vmem:[%s2034_s13 + $0x18] sm:$0xff]   ;;  %v1791_v10 = vld [vmem:[%s2034_s13 + $0x8] sm:$0xff]   ;;  %v294_v11 = vshrl.u32 %v1442_v6, 16  ;;  %v1792_v12 = vld [vmem:[%s2034_s13 + $0x10] sm:$0xff]   ;;  %v296_v13 = vshll.u32 %v1442_v6, 16  ;;  %v1481_v28 = vcombine.low %v554_v18, %v2054_v19  ;;  %v1472_v39 = vcombine.low %v554_v18, %v2042_v8  ;;  %p1552_p1 = scmp.ne.s32.totalorder %s1884_s19, 6 }
  0x32   : > { %1604 = vmatpush3.bf16.msra.mxu0 %v1790_v9  ;;  %1612 = vmatpush3.bf16.msra.mxu1 %v1791_v10  ;;  %v1793_v15 = vld [vmem:[%s2034_s13] sm:$0xff]   ;;  %v1795_v17 = vld [vmem:[%s2034_s13 + $0x28] sm:$0xff]   ;;  %v491_v21 = vshrl.u32 %v1463_v14, 16  ;;  %v494_v22 = vshll.u32 %v1463_v14, 16  ;;  %v1796_v23 = vld [vmem:[%s2034_s13 + $0x38] sm:$0xff]   ;;  %v422_v30 = vrot.slane %v1454_v25, 1 }
  0x33   : > { %1605 = vmatprep.subr.bf16.mxu0 %v1903_v4  ;;  %1613 = vmatprep.subr.bf16.mxu1 %v1903_v4  ;;  %v298_v16 = vrot.slane %v296_v13, 1  ;;  %v1797_v24 = vld [vmem:[%s2034_s13 + $0x20] sm:$0xff]   ;;  %v1798_v29 = vld [vmem:[%s2034_s13 + $0x30] sm:$0xff]   ;;  %v1801_v31 = vld [vmem:[%s2034_s13 + $0x48] sm:$0xff]   ;;  %v634_v33 = vshrl.u32 %v1481_v28, 16  ;;  %v637_v34 = vshll.u32 %v1481_v28, 16 }
  0x34   : > { %v493_v26 = vrot.slane %v491_v21, 1  ;;  %v496_v27 = vrot.slane %v494_v22, 2  ;;  %v1802_v35 = vld [vmem:[%s2034_s13 + $0x58] sm:$0xff]   ;;  %v1803_v38 = vld [vmem:[%s2034_s13 + $0x40] sm:$0xff]   ;;  %v1804_v43 = vld [vmem:[%s2034_s13 + $0x50] sm:$0xff]   ;;  %v565_v45 = vrot.slane %v1472_v39, 2 }
  0x35   : > { %v299_v20 = vor.u32 %v298_v16, %v294_v11  ;;  %v2078_v37 = vld [vmem:[%s2021_s7 + $0xc] sm:$0x1]  ;;  %v636_v41 = vrot.slane %v634_v33, 2  ;;  %v639_v42 = vrot.slane %v637_v34, 3  ;;  %v697_v44 = vld [vmem:[%s2021_s7] sm:$0x8] }
  0x36   : > { %1606 = vmatpush3.bf16.msra.mxu0 %v1792_v12  ;;  %1614 = vmatpush3.bf16.msra.mxu1 %v1793_v15  ;;  %v497_v32 = vor.u32 %v496_v27, %v493_v26  ;;  %v1500_v40 = vcombine.low %v2075_v36, %v2078_v37  ;;  %v1807_v46 = vld [vmem:[%s2034_s13 + $0x68] sm:$0xff]   ;;  %v1808_v49 = vld [vmem:[%s2034_s13 + $0x18] sm:$0xff]   ;;  %v1809_v50 = vld [vmem:[%s2034_s13 + $0x60] sm:$0xff]   ;;  %v1490_v51 = vcombine.low %v697_v44, %v2054_v19  ;;  %vm767_vm3 = vcmask 523264  }
  0x37   : > { %1619 = vmatprep.subr.bf16.mxu0 %v1903_v4  ;;  %1627 = vmatprep.subr.bf16.mxu1 %v1903_v4  ;;  %v640_v48 = vor.u32 %v639_v42, %v636_v41  ;;  %v1810_v54 = vld [vmem:[%s2034_s13 + $0x10] sm:$0xff]   ;;  %v1813_v57 = vld [vmem:[%s2034_s13 + $0x8] sm:$0xff]   ;;  %v1815_v62 = vld [vmem:[%s2034_s13] sm:$0xff]  }
  0x38   : > { %v788_v47 = vshll.u32 %v1500_v40, 16  ;;  %v786_v52 = vshrl.u32 %v1500_v40, 16  ;;  %v708_v55 = vrot.slane %v1490_v51, 3  ;;  %v1516_v58 = vld [vmem:[%s2021_s7 + $0xc] sm:$0x3]  ;;  %v1816_v0 = vld [vmem:[%s2034_s13 + $0x20] sm:$0xff]  }
  0x39   : > { %1608 = vmatmul.mubr.msk.bf16.vlgmr.msra.gmra.mxu0 %vm312_vm2, %v299_v20  ;;  %1616 = vmatmul.mubr.msk.bf16.vlgmr.msra.gmra.mxu1 %vm312_vm2, %v272_v3  ;;  %v1814_v59 = vld [vmem:[%s2034_s13 + $0x28] sm:$0xff]   ;;  %v1819_v5 = vld [vmem:[%s2034_s13 + $0x38] sm:$0xff]   ;;  %v1821_v12 = vld [vmem:[%s2034_s13 + $0x30] sm:$0xff]  }
  0x3a   : > { %1620 = vmatpush3.bf16.msra.mxu0 %v1795_v17  ;;  %1628 = vmatpush3.bf16.msra.mxu1 %v1796_v23  ;;  %v790_v53 = vrot.slane %v788_v47, 1  ;;  %v1507_v60 = vld [vmem:[%s2021_s7 + $0x8] sm:$0xe]  ;;  %v1534_v6 = vld [vmem:[%s2021_s7 + $0xc] sm:$0x7]  ;;  %v1822_v14 = vld [vmem:[%s2034_s13 + $0x40] sm:$0xff]  }
  0x3b   : > { %1621 = vmatprep.subr.bf16.mxu0 %v1903_v4  ;;  %1629 = vmatprep.subr.bf16.mxu1 %v1903_v4  ;;  %v1521_v61 = vcombine.low %v1507_v60, %v1516_v58  ;;  %v1512_v63 = vcombine.low %v1507_v60, %v2078_v37  ;;  %v1820_v7 = vld [vmem:[%s2034_s13 + $0x48] sm:$0xff]   ;;  %v1825_v19 = vld [vmem:[%s2034_s13 + $0x58] sm:$0xff]   ;;  %v1828_v26 = vld [vmem:[%s2034_s13 + $0x60] sm:$0xff]  }
  0x3c   : > { %1623 = vmatprep.mubr.msk.bf16.mxu0 %vm1904_vm1, %v1903_v4  ;;  %1631 = vmatprep.mubr.msk.bf16.mxu1 %vm1904_vm1, %v1903_v4  ;;  %v791_v56 = vor.u32 %v790_v53, %v786_v52  ;;  %v1525_v8 = vld [vmem:[%s2021_s7 + $0x8] sm:$0xc] }
  0x3d   : > { %v976_v1 = vshrl.u32 %v1521_v61, 16  ;;  %v979_v2 = vshll.u32 %v1521_v61, 16  ;;  %v910_v3 = vrot.slane %v1512_v63, 1  ;;  %v1539_v11 = vcombine.low %v1525_v8, %v1534_v6  ;;  %v1826_v20 = vld [vmem:[%s2034_s13 + $0x68] sm:$0xff]  }
  0x3e   : > { %1622 = vmatpush3.bf16.msra.mxu0 %v1797_v24  ;;  %1630 = vmatpush3.bf16.msra.mxu1 %v1798_v29  ;;  %v1530_v13 = vcombine.low %v1525_v8, %v1516_v58  ;;  %v1543_v21 = vld [vmem:[%s2021_s7 + $0x8] sm:$0x8]  ;;  %v1827_v24 = vld [vmem:[%s2034_s13 + $0x50] sm:$0xff]   ;;  %v765_v58 = vld [vmem:[#allocation2] sm:$0xff] }
  0x3f   : > { %1635 = vmatprep.subr.bf16.mxu0 %v1903_v4  ;;  %1643 = vmatprep.subr.bf16.mxu1 %v1903_v4  ;;  %v978_v9 = vrot.slane %v976_v1, 1  ;;  %v981_v10 = vrot.slane %v979_v2, 2  ;;  %v1113_v16 = vshrl.u32 %v1539_v11, 16  ;;  %v1116_v17 = vshll.u32 %v1539_v11, 16 }
  0x40   : > { %v1047_v18 = vrot.slane %v1530_v13, 2  ;;  %v1548_v25 = vcombine.low %v1543_v21, %v1534_v6 }
  0x41   : > { %1624 = vmatmul.mubr.msk.bf16.vlgmr.msra.gmra.mxu0 %vm312_vm2, %v422_v30  ;;  %1632 = vmatmul.mubr.msk.bf16.vlgmr.msra.gmra.mxu1 %vm312_vm2, %v497_v32  ;;  %v982_v15 = vor.u32 %v981_v10, %v978_v9  ;;  %v1115_v22 = vrot.slane %v1113_v16, 2  ;;  %v1118_v23 = vrot.slane %v1116_v17, 3 }
  0x42   : > { %1636 = vmatpush3.bf16.msra.mxu0 %v1801_v31  ;;  %1644 = vmatpush3.bf16.msra.mxu1 %v1802_v35  ;;  %v1184_v28 = vrot.slane %v1548_v25, 3 }
  0x43   : > { %1637 = vmatprep.subr.bf16.mxu0 %v1903_v4  ;;  %1645 = vmatprep.subr.bf16.mxu1 %v1903_v4  ;;  %v1119_v27 = vor.u32 %v1118_v23, %v1115_v22 }
  0x44   : > { %1639 = vmatprep.mubr.msk.bf16.mxu0 %vm1904_vm1, %v1903_v4  ;;  %1647 = vmatprep.mubr.msk.bf16.mxu1 %vm1904_vm1, %v1903_v4 }
  0x46   : > { %1638 = vmatpush3.bf16.msra.mxu0 %v1803_v38  ;;  %1646 = vmatpush3.bf16.msra.mxu1 %v1804_v43 }
  0x47   : > { %1651 = vmatprep.subr.bf16.mxu0 %v1903_v4  ;;  %1659 = vmatprep.subr.bf16.mxu1 %v1903_v4 }
  0x49   : > { %1640 = vmatmul.mubr.msk.bf16.vlgmr.msra.gmra.mxu0 %vm312_vm2, %v565_v45  ;;  %1648 = vmatmul.mubr.msk.bf16.vlgmr.msra.gmra.mxu1 %vm312_vm2, %v640_v48 }
  0x4a   : > { %1652 = vmatpush3.bf16.msra.mxu0 %v1807_v46  ;;  %1660 = vmatpush3.bf16.msra.mxu1 %v1808_v49 }
  0x4b   : > { %1653 = vmatprep.subr.bf16.mxu0 %v1903_v4  ;;  %1661 = vmatprep.subr.bf16.mxu1 %v1903_v4 }
  0x4c   : > { %1655 = vmatprep.mubr.msk.bf16.mxu0 %vm1904_vm1, %v1903_v4  ;;  %1663 = vmatprep.mubr.msk.bf16.mxu1 %vm1904_vm1, %v1903_v4 }
  0x4e   : > { %1654 = vmatpush3.bf16.msra.mxu0 %v1809_v50  ;;  %1662 = vmatpush3.bf16.msra.mxu1 %v1810_v54 }
  0x4f   : > { %1667 = vmatprep.subr.bf16.mxu0 %v1903_v4  ;;  %1675 = vmatprep.subr.bf16.mxu1 %v1903_v4 }
  0x51   : > { %1656 = vmatmul.mubr.msk.bf16.vlgmr.msra.gmra.mxu0 %vm312_vm2, %v708_v55  ;;  %1664 = vmatmul.mubr.msk.bf16.vlgmr.msra.gmra.mxu1 %vm312_vm2, %v791_v56 }
  0x52   : > { %1668 = vmatpush3.bf16.msra.mxu0 %v1813_v57  ;;  %1676 = vmatpush3.bf16.msra.mxu1 %v1814_v59 }
  0x53   : > { %1669 = vmatprep.subr.bf16.mxu0 %v1903_v4  ;;  %1677 = vmatprep.subr.bf16.mxu1 %v1903_v4 }
  0x54   : > { %1671 = vmatprep.mubr.msk.bf16.mxu0 %vm1904_vm1, %v1903_v4  ;;  %1679 = vmatprep.mubr.msk.bf16.mxu1 %vm1904_vm1, %v1903_v4 }
  0x56   : > { %1670 = vmatpush3.bf16.msra.mxu0 %v1815_v62  ;;  %1678 = vmatpush3.bf16.msra.mxu1 %v1816_v0 }
  0x57   : > { %1683 = vmatprep.subr.bf16.mxu0 %v1903_v4  ;;  %1691 = vmatprep.subr.bf16.mxu1 %v1903_v4 }
  0x59   : > { %1672 = vmatmul.mubr.msk.bf16.vlgmr.msra.gmra.mxu0 %vm312_vm2, %v2075_v36  ;;  %1680 = vmatmul.mubr.msk.bf16.vlgmr.msra.gmra.mxu1 %vm312_vm2, %v910_v3 }
  0x5a   : > { %1684 = vmatpush3.bf16.msra.mxu0 %v1819_v5  ;;  %1692 = vmatpush3.bf16.msra.mxu1 %v1820_v7 }
  0x5b   : > { %1685 = vmatprep.subr.bf16.mxu0 %v1903_v4  ;;  %1693 = vmatprep.subr.bf16.mxu1 %v1903_v4 }
  0x5c   : > { %1687 = vmatprep.mubr.msk.bf16.mxu0 %vm1904_vm1, %v1903_v4  ;;  %1695 = vmatprep.mubr.msk.bf16.mxu1 %vm1904_vm1, %v1903_v4 }
  0x5e   : > { %1686 = vmatpush3.bf16.msra.mxu0 %v1821_v12  ;;  %1694 = vmatpush3.bf16.msra.mxu1 %v1822_v14 }
  0x5f   : > { %1699 = vmatprep.subr.bf16.mxu0 %v1903_v4  ;;  %1707 = vmatprep.subr.bf16.mxu1 %v1903_v4 }
  0x61   : > { %1688 = vmatmul.mubr.msk.bf16.vlgmr.msra.gmra.mxu0 %vm312_vm2, %v982_v15  ;;  %1696 = vmatmul.mubr.msk.bf16.vlgmr.msra.gmra.mxu1 %vm312_vm2, %v1047_v18 }
  0x62   : > { %1700 = vmatpush3.bf16.msra.mxu0 %v1825_v19  ;;  %1708 = vmatpush3.bf16.msra.mxu1 %v1826_v20 }
  0x63   : > { %1701 = vmatprep.subr.bf16.mxu0 %v1903_v4  ;;  %1709 = vmatprep.subr.bf16.mxu1 %v1903_v4 }
  0x64   : > { %1703 = vmatprep.mubr.msk.bf16.mxu0 %vm1904_vm1, %v1903_v4  ;;  %1711 = vmatprep.mubr.msk.bf16.mxu1 %vm1904_vm1, %v1903_v4 }
  0x66   : > { %1702 = vmatpush3.bf16.msra.mxu0 %v1827_v24  ;;  %1710 = vmatpush3.bf16.msra.mxu1 %v1828_v26 }
  0x69   : > { %1704 = vmatmul.mubr.msk.bf16.vlgmr.msra.gmra.mxu0 %vm312_vm2, %v1119_v27  ;;  %1712 = vmatmul.mubr.msk.bf16.vlgmr.msra.gmra.mxu1 %vm312_vm2, %v1184_v28  ;;  %v1242_v28 = vld [vmem:[#allocation2 + $0x8] sm:$0xff] }
  0xf9   : > { %v350_v29 = vpop.f32.mrf.mxu0  ;;  %v405_v30 = vpop.f32.mrf.mxu1 }
  0xfa   : > { %v406_v4 = vadd.f32 %v405_v30, %v350_v29 }
  0xfb   : > { %v1609_v31 = vpop.f32.mrf.mxu0  ;;  %v1617_v32 = vpop.f32.mrf.mxu1 }
  0xfd   : > { %v353_v33 = vpop.f32.mrf.mxu0  ;;  %v408_v34 = vpop.f32.mrf.mxu1 }
  0xff   : > { %v1610_v35 = vpop.f32.mrf.mxu0  ;;  %v1618_v36 = vpop.f32.mrf.mxu1 }
 0x101   : > { %v472_v37 = vpop.f32.mrf.mxu0  ;;  %v547_v38 = vpop.f32.mrf.mxu1 }
 0x102   : > { %v478_v42 = vadd.f32 %v472_v37, %v406_v4 }
 0x103   : > { %v1625_v39 = vpop.f32.mrf.mxu0  ;;  %v1633_v40 = vpop.f32.mrf.mxu1 }
 0x104   : > { %v553_v47 = vadd.f32 %v547_v38, %v478_v42 }
 0x105   : > { %v475_v41 = vpop.f32.mrf.mxu0  ;;  %v550_v43 = vpop.f32.mrf.mxu1 }
 0x107   : > { %v1626_v44 = vpop.f32.mrf.mxu0  ;;  %v1634_v45 = vpop.f32.mrf.mxu1 }
 0x109   : > { %v615_v46 = vpop.f32.mrf.mxu0  ;;  %v690_v48 = vpop.f32.mrf.mxu1 }
 0x10a   : > { %v621_v50 = vadd.f32 %v615_v46, %v553_v47 }
 0x10b   : > { %v1641_v49 = vpop.f32.mrf.mxu0  ;;  %v1649_v51 = vpop.f32.mrf.mxu1 }
 0x10c   : > { %v696_v55 = vadd.f32 %v690_v48, %v621_v50 }
 0x10d   : > { %v618_v52 = vpop.f32.mrf.mxu0  ;;  %v693_v53 = vpop.f32.mrf.mxu1 }
 0x10f   : > { %v1642_v54 = vpop.f32.mrf.mxu0  ;;  %v1650_v56 = vpop.f32.mrf.mxu1 }
 0x111   : > { %v758_v57 = vpop.f32.mrf.mxu0  ;;  %v841_v60 = vpop.f32.mrf.mxu1 }
 0x112   : > { %v764_v59 = vadd.f32 %v758_v57, %v696_v55 }
 0x113   : > { %v1657_v61 = vpop.f32.mrf.mxu0  ;;  %v1665_v63 = vpop.f32.mrf.mxu1 }
 0x114   : > { %v766_v62 = vadd.f32 %v765_v58, %v764_v59 }
 0x115   : > { %v761_v0 = vpop.f32.mrf.mxu0  ;;  %v844_v1 = vpop.f32.mrf.mxu1 }
 0x116   : > { %768 = vst.msk [vmem:[#allocation2] sm:$0xff] %vm767_vm3, %v766_v62 }
 0x117   : > { %v1658_v2 = vpop.f32.mrf.mxu0  ;;  %v1666_v3 = vpop.f32.mrf.mxu1 }
 0x119   : > { %v896_v5 = vpop.f32.mrf.mxu0  ;;  %v960_v6 = vpop.f32.mrf.mxu1 }
 0x11a   : > { %v897_v10 = vadd.f32 %v896_v5, %v841_v60 }
 0x11b   : > { %v1673_v7 = vpop.f32.mrf.mxu0  ;;  %v1681_v8 = vpop.f32.mrf.mxu1 }
 0x11c   : > { %v966_v15 = vadd.f32 %v960_v6, %v897_v10 }
 0x11d   : > { %v899_v9 = vpop.f32.mrf.mxu0  ;;  %v963_v11 = vpop.f32.mrf.mxu1 }
 0x11f   : > { %v1674_v12 = vpop.f32.mrf.mxu0  ;;  %v1682_v13 = vpop.f32.mrf.mxu1 }
 0x121   : > { %v1032_v14 = vpop.f32.mrf.mxu0  ;;  %v1097_v16 = vpop.f32.mrf.mxu1 }
 0x122   : > { %v1038_v18 = vadd.f32 %v1032_v14, %v966_v15 }
 0x123   : > { %v1689_v17 = vpop.f32.mrf.mxu0  ;;  %v1697_v19 = vpop.f32.mrf.mxu1 }
 0x124   : > { %v1103_v23 = vadd.f32 %v1097_v16, %v1038_v18 }
 0x125   : > { %v1035_v20 = vpop.f32.mrf.mxu0  ;;  %v1100_v21 = vpop.f32.mrf.mxu1 }
 0x127   : > { %v1690_v22 = vpop.f32.mrf.mxu0  ;;  %v1698_v24 = vpop.f32.mrf.mxu1 }
 0x129   : > { %v1169_v25 = vpop.f32.mrf.mxu0  ;;  %v1234_v27 = vpop.f32.mrf.mxu1 }
 0x12a   : > { %v1175_v26 = vadd.f32 %v1169_v25, %v1103_v23 }
 0x12b   : > { %v1705_v29 = vpop.f32.mrf.mxu0  ;;  %v1713_v31 = vpop.f32.mrf.mxu1 }
 0x12c   : > { %v1240_v30 = vadd.f32 %v1234_v27, %v1175_v26  ;;  %1248 = sbr.rel (%p1552_p1) target bundleno = 321 (0x141), region = 85 }
 0x12d   : > { %v1172_v32 = vpop.f32.mrf.mxu0  ;;  %v1237_v34 = vpop.f32.mrf.mxu1 }
 0x12e   : > { %v1243_v33 = vadd.f32 %v1242_v28, %v1240_v30 }
 0x12f   : > { %v1706_v35 = vpop.f32.mrf.mxu0  ;;  %v1714_v36 = vpop.f32.mrf.mxu1 }
 0x130   : > { %1244 = vst.msk [vmem:[#allocation2 + $0x8] sm:$0xff] %vm767_vm3, %v1243_v33 }
 0x131   : > { %v1249_v37 = vld [vmem:[#allocation2] sm:$0xff]  ;;  %vm1273_vm4 = vcmask 519168  }
 0x132   : > { %v1553_v38 = vld [vmem:[%s2208_s2] ss:$0 sm:$0xff] }
 0x133   : > { %v1554_v39 = vld [vmem:[%s2209_s3] ss:$0 sm:$0xff]  ;;  %v1258_v4 = vmul.f32 %v1553_v38, %v1249_v37 }
 0x135   : > { %v1267_v42 = vadd.f32 %v1554_v39, %v1258_v4 }
 0x137   : > { %v1250_v40 = vld [vmem:[#allocation2 + $0x8] sm:$0xff]  ;;  %v1269_v44 = vmax.f32 %v1267_v42, 0.0 }
 0x138   : > { %v1259_v41 = vmul.f32 %v1553_v38, %v1250_v40 }
 0x139   : > { %v1271_v46 = vpack.c.bf16 %v1269_v44, %v1269_v44 }
 0x13a   : > { %v1268_v43 = vadd.f32 %v1554_v39, %v1259_v41 }
 0x13b   : > { %1274 = vst.msk [vmem:[%s2023_s11] sm:$0xf] %vm1273_vm4, %v1271_v46 }
 0x13c   : > { %v1270_v45 = vmax.f32 %v1268_v43, 0.0 }
 0x13e   : > { %v1272_v47 = vpack.c.bf16 %v1270_v45, %v1270_v45 }
 0x140   : > { %1275 = vst.msk [vmem:[%s2023_s11 + $0x4] sm:$0xf] %vm1273_vm4, %v1272_v47 }
 0x141 PF: > { %1282 = sbr.rel (!%p2000_p9) target bundleno = 329 (0x149), region = 89  ;;  %s1556_s19 = sshll.u32 (%p2000_p9), %s1888_s20, 2 }
 0x142   : > { %v1301_v48 = vld [vmem:[%s2023_s11] sm:$0xf] (%p2000_p9)  ;;  %s1284_s29 = scalar_lea.vmem (%p2000_p9), %s2210_s4, %s1556_s19 }
 0x143   : > { %1302 = vst [vmem:[%s1284_s29] sm:$0xf] (%p2000_p9), %v1301_v48 }
 0x147   : > { %v1303_v49 = vld [vmem:[%s2023_s11 + $0x4] sm:$0xf] }
 0x148   : > { %1304 = vst [vmem:[%s1284_s29 + $0x20] sm:$0xf] %v1303_v49 }
 0x149 PF: > { %s14_s23 = sadd.s32 1, %s1900_s23   ;;  %s2213_s15 = smov %s1872_s16 }
 0x14a   : > { %p11_p2 = scmp.ge.s32.totalorder %s14_s23, 58   ;;  %s2214_s16 = smov %s2005_s9 }
 0x14b   : > { %s2215_s17 = smov %s1880_s18  ;;  %s2216_s18 = smov %s2008_s10 }
 0x14c   : > { %s2217_s19 = smov %s1892_s21  ;;  %s2218_s20 = smov %s1896_s22 }
 0x14d   : > { %s2219_s21 = smov %s2222_s24  ;;  %s2220_s22 = smov %s2226_s25 }
 0x14e   :  { %13 = sbr.rel (!%p11_p2) target bundleno = 5 (0x5), region = 170 }

// kernel: routenet_fcn_forward.16
= control target key start
LH: loop header
LB: loop body
LE: loop exit
PB: predicated region body
PF: predicated region fallthrough
CT: control target
= control target key end

     0   :  { %s2822_s15 = smov 0   ;;  %s2824_s16 = smov 0   ;;  %s3194_s0 = inlined_call_operand.vmem [shape: bf16[2,12,12,64], index: 0, kind: input, shape index: {}]   ;;  %s3195_s1 = inlined_call_operand.vmem [shape: bf16[9,9,64,32], index: 1, kind: input, shape index: {}]   ;;  %s3196_s2 = inlined_call_operand.vmem [shape: f32[1,32], index: 2, kind: input, shape index: {}]   ;;  %s3197_s3 = inlined_call_operand.vmem [shape: f32[1,32], index: 3, kind: input, shape index: {}]   ;;  %s3198_s4 = inlined_call_operand.vmem [shape: bf16[2,4,4,32], index: 4, kind: output, shape index: {}]  }
   0x1   :  { %s2826_s17 = smov 0   ;;  %s2828_s18 = smov 0  }
   0x2   :  { %s2830_s19 = smov 0   ;;  %s2832_s20 = smov 0  }
   0x3   :  { %s2834_s21 = smov 0   ;;  %s2836_s22 = smov 0  }
   0x4   :  { %s2838_s23 = smov 0  }
   0x5 LB: > { %s23_s24 = sadd.s32 1, %s2784_s21  ;;  %s26_s25 = sadd.s32 1, %s2788_s22  ;;  %s2792_s23 = sphi %s2838_s23, %s14_s23   ;;  %s2788_s22 = sphi %s2836_s22, %s3208_s22   ;;  %s2784_s21 = sphi %s2834_s21, %s3207_s21   ;;  %s2780_s20 = sphi %s2832_s20, %s3206_s20   ;;  %s2776_s19 = sphi %s2830_s19, %s3205_s19   ;;  %s2772_s18 = sphi %s2828_s18, %s3204_s18   ;;  %s2768_s17 = sphi %s2826_s17, %s3203_s17   ;;  %s2764_s16 = sphi %s2824_s16, %s3202_s16   ;;  %s2760_s15 = sphi %s2822_s15, %s3201_s15  }
   0x6   : > { %p24_p0 = scmp.ge.s32.totalorder %s23_s24, 9  ;;  %s1985_s26 = sadd.s32 4294967295, %s2792_s23  }
   0x7   : > { %s30_s27 = sadd.s32 %s2784_s21, %s2788_s22  ;;  %p42_p1 = scmp.ne.s32.totalorder %s2772_s18, %s2768_s17 }
   0x8   : > { %s3210_s24 = smov (%p24_p0, %s23_s24), 0  ;;  %s3212_s25 = smov (!%p24_p0, %s26_s25), %s2788_s22 }
   0x9   : > { %p43_p2 = scmp.eq.s32.totalorder %s2792_s23, 0  ;;  %p28_p3 = scmp.ge.s32.totalorder %s3212_s25, 4 }
   0xa   : > { %s35_s28 = sadd.s32 1, %s2772_s18  ;;  %p134_p5 = scmp.ne.s32.totalorder %s2764_s16, %s2760_s15 }
   0xb   : > { %p2879_p4 = por %p43_p2, %p42_p1  ;;  %s3214_s25 = smov (%p28_p3, %s3212_s25), 0 }
   0xc   : > { %s124_s30 = sadd.s32 1, %s2764_s16  ;;  %p135_p6 = scmp.eq.s32.totalorder %s1985_s26, 35 }
   0xd   : > { %s31_s5 = sadd.s32 %s3214_s25, %s3210_s24  ;;  %s121_s6 = ssub.s32 %s2788_s22, %s3214_s25 }
   0xe   : > { %s32_s7 = ssub.s32 %s30_s27, %s31_s5  ;;  %p122_p7 = scmp.eq.s32.totalorder %s121_s6, 0 }
   0xf   : > { %p33_p8 = scmp.eq.s32.totalorder %s32_s7, 0  ;;  %p2892_p9 = por %p135_p6, %p134_p5 }
  0x10   : > { %s2897_s9 = scalar_select %p122_p7, %s2764_s16, %s124_s30  }
  0x11   : > { %s2900_s10 = scalar_select %p33_p8, %s2772_s18, %s35_s28  }
  0x12   : > { %p1988_p10 = scmp.ge.s32.totalorder %s2792_s23, 36 }
  0x14   : > { %166 = sbr.rel (%p1988_p10) target bundleno = 31 (0x1f), region = 28 }
  0x19   : > { %169 = sbr.rel (!%p2879_p4) target bundleno = 31 (0x1f), region = 32  ;;  %s171_s11 = sand.u32 (%p2879_p4), 1, %s2772_s18  }
  0x1a   : > { %s2253_s12 = sshll.u32 (%p2879_p4), %s30_s27, 3  ;;  %s1989_s13 = sshll.u32 (%p2879_p4), %s171_s11, 4 }
  0x1b   : > { %s177_s5 = scalar_lea.vmem (%p2879_p4), %s3194_s0, %s2253_s12  ;;  %s173_s30 = scalar_lea.vmem (%p2879_p4), [#allocation3], %s1989_s13 }
  0x1c   : > { %v194_v0 = vld [vmem:[%s177_s5] sm:$0xff] (%p2879_p4)  }
  0x1d   : > { %v198_v1 = vld [vmem:[%s177_s5 + $0x60] sm:$0xff] (%p2879_p4)   ;;  %195 = vst [vmem:[%s173_s30] sm:$0xff] (%p2879_p4), %v194_v0  }
  0x1e   : > { %199 = vst [vmem:[%s173_s30 + $0x8] sm:$0xff] %v198_v1  }
  0x1f PF: > { %p1992_p11 = scmp.ge.s32.totalorder %s2792_s23, 1  ;;  %p232_p12 = scmp.lt.s32.totalorder %s2792_s23, 37 }
  0x21   : > { %p233_p13 = pnand %p1992_p11, %p232_p12 }
  0x22   : > { %s239_s27 = sand.u32 (!%p233_p13), 1, %s2768_s17   ;;  %s260_s28 = sand.u32 (!%p233_p13), 1, %s2760_s15  }
  0x23   : > { %236 = sbr.rel (%p233_p13) target bundleno = 418 (0x1a2), region = 73  ;;  %s1993_s29 = sshll.u32 (!%p233_p13), %s239_s27, 4 }
  0x24   : > { %s1994_s6 = sshll.u32 (!%p233_p13), %s260_s28, 2  ;;  %s2913_s7 = scalar_lea.vmem (!%p233_p13), [#allocation3], %s1993_s29 }
  0x25   : > { %s2915_s11 = scalar_lea.vmem (!%p233_p13), [#allocation4], %s1994_s6  ;;  %p1995_p0 = scmp.ne.s32.totalorder (!%p233_p13), %s2776_s19, 0 }
  0x28   : > { %268 = sbr.rel (%p1995_p0) target bundleno = 47 (0x2f), region = 81 }
  0x2d   : > { %vm269_vm0 = vcmask 257024   ;;  %v2794_v2 = vmov 0.0  }
  0x2e   : > { %270 = vst.msk [vmem:[#allocation2] sm:$0xf] %vm269_vm0, %v2794_v2  ;;  %271 = vst.msk [vmem:[#allocation2 + $0x4] sm:$0xf] %vm269_vm0, %v2794_v2 }
  0x2f PF: > { %s2254_s12 = smul.u32 288, %s2776_s19  ;;  %v2795_v3 = vmov 0.0   ;;  %vm2796_vm1 = vmmov 0   ;;  %v2644_v4 = vld [vmem:[%s2913_s7] ss:$0 sps:$4 sm:$0x77]  }
  0x30   : > { %2345 = vmatprep.subr.bf16.mxu0 %v2795_v3  ;;  %2357 = vmatprep.subr.bf16.mxu1 %v2795_v3  ;;  %v302_v9 = vshll.u32 %v2644_v4, 16  ;;  %v300_v12 = vshrl.u32 %v2644_v4, 16  ;;  %v272_v17 = vld [vmem:[%s2913_s7] sm:$0x3]  ;;  %vm330_vm2 = vcmask 523264   ;;  %vm1050_vm3 = vcmask 257024  }
  0x31   : > { %s2924_s13 = scalar_lea.vmem %s3195_s1, %s2254_s12  ;;  %2353 = vmatprep.mubr.msk.bf16.mxu0 %vm2796_vm1, %v2795_v3  ;;  %2365 = vmatprep.mubr.msk.bf16.mxu1 %vm2796_vm1, %v2795_v3  ;;  %v2654_v22 = vld [vmem:[%s2913_s7] ss:$0 sps:$4 sm:$0xee]   ;;  %v700_v34 = vld [vmem:[%s2913_s7] sm:$0xc]  ;;  %p2246_p1 = scmp.ne.s32.totalorder %s2776_s19, 8 }
  0x32   : > { %v2636_v5 = vld [vmem:[%s2924_s13 + $0x38] sm:$0xff]   ;;  %v2638_v7 = vld [vmem:[%s2924_s13 + $0x30] sm:$0xff]   ;;  %v2640_v10 = vld [vmem:[%s2924_s13 + $0x28] sm:$0xff]   ;;  %v304_v13 = vrot.slane %v302_v9, 1  ;;  %v541_v25 = vshrl.u32 %v2654_v22, 16  ;;  %v544_v26 = vshll.u32 %v2654_v22, 16 }
  0x33   : > { %v2637_v6 = vld [vmem:[%s2924_s13 + $0x18] sm:$0xff]   ;;  %2346 = vmatpush3.bf16.msra.mxu0 %v2636_v5  ;;  %v2639_v8 = vld [vmem:[%s2924_s13 + $0x10] sm:$0xff]   ;;  %v2641_v11 = vld [vmem:[%s2924_s13 + $0x8] sm:$0xff]  }
  0x34   : > { %2358 = vmatpush3.bf16.msra.mxu1 %v2637_v6  ;;  %2347 = vmatprep.subr.bf16.mxu0 %v2795_v3  ;;  %v2642_v14 = vld [vmem:[%s2924_s13 + $0x20] sm:$0xff]   ;;  %v305_v16 = vor.u32 %v304_v13, %v300_v12  ;;  %v2645_v18 = vld [vmem:[%s2924_s13 + $0x58] sm:$0xff]   ;;  %v2647_v20 = vld [vmem:[%s2924_s13 + $0x50] sm:$0xff]   ;;  %v543_v29 = vrot.slane %v541_v25, 1  ;;  %v546_v30 = vrot.slane %v544_v26, 2 }
  0x35   : > { %2359 = vmatprep.subr.bf16.mxu1 %v2795_v3  ;;  %v2643_v15 = vld [vmem:[%s2924_s13] sm:$0xff]   ;;  %v2646_v19 = vld [vmem:[%s2924_s13 + $0x78] sm:$0xff]   ;;  %v2648_v21 = vld [vmem:[%s2924_s13 + $0x70] sm:$0xff]  }
  0x36   : > { %v2649_v23 = vld [vmem:[%s2924_s13 + $0x48] sm:$0xff]   ;;  %v2651_v28 = vld [vmem:[%s2924_s13 + $0x40] sm:$0xff]   ;;  %v2655_v33 = vld [vmem:[%s2924_s13 + $0x98] sm:$0xff]   ;;  %v547_v35 = vor.u32 %v546_v30, %v543_v29 }
  0x37   : > { %2348 = vmatpush3.bf16.msra.mxu0 %v2638_v7  ;;  %v2653_v24 = vld [vmem:[%s2913_s7] ss:$0 sps:$4 sm:$0x66]   ;;  %v2652_v31 = vld [vmem:[%s2924_s13 + $0x60] sm:$0xff]   ;;  %v2973_v36 = vld [vmem:[%s2913_s7 + $0x4] sm:$0x1] }
  0x38   : > { %2360 = vmatpush3.bf16.msra.mxu1 %v2639_v8  ;;  %2349 = vmatprep.subr.bf16.mxu0 %v2795_v3  ;;  %v2650_v27 = vld [vmem:[%s2924_s13 + $0x68] sm:$0xff]   ;;  %v456_v32 = vrot.slane %v2653_v24, 1  ;;  %v2656_v37 = vld [vmem:[%s2924_s13 + $0xb8] sm:$0xff]   ;;  %v2071_v38 = vcombine.low %v700_v34, %v2973_v36  ;;  %v2657_v39 = vld [vmem:[%s2924_s13 + $0x90] sm:$0xff]  }
  0x39   : > { %2361 = vmatprep.subr.bf16.mxu1 %v2795_v3  ;;  %v2658_v40 = vld [vmem:[%s2924_s13 + $0xb0] sm:$0xff]   ;;  %v2659_v41 = vld [vmem:[%s2924_s13 + $0x88] sm:$0xff]   ;;  %v2661_v46 = vld [vmem:[%s2924_s13 + $0x80] sm:$0xff]  }
  0x3a   : > { %v719_v42 = vshrl.u32 %v2071_v38, 16  ;;  %v722_v43 = vshll.u32 %v2071_v38, 16  ;;  %v2660_v44 = vld [vmem:[%s2924_s13 + $0xa8] sm:$0xff]   ;;  %v2662_v49 = vld [vmem:[%s2924_s13 + $0xa0] sm:$0xff]   ;;  %v2665_v51 = vld [vmem:[%s2924_s13 + $0xd8] sm:$0xff]  }
  0x3b   : > { %2350 = vmatpush3.bf16.msra.mxu0 %v2640_v10  ;;  %v2663_v45 = vld [vmem:[%s2913_s7] ss:$0 sps:$4 sm:$0xcc]   ;;  %v794_v52 = vld [vmem:[%s2913_s7] sm:$0x8]  ;;  %v2667_v57 = vld [vmem:[%s2924_s13 + $0xd0] sm:$0xff]  }
  0x3c   : > { %2362 = vmatpush3.bf16.msra.mxu1 %v2641_v11  ;;  %2351 = vmatprep.subr.bf16.mxu0 %v2795_v3  ;;  %v721_v47 = vrot.slane %v719_v42, 2  ;;  %v724_v48 = vrot.slane %v722_v43, 3  ;;  %v631_v50 = vrot.slane %v2663_v45, 2  ;;  %v3001_v54 = vld [vmem:[%s2913_s7 + $0x4] sm:$0x3]  ;;  %v2668_v58 = vld [vmem:[%s2924_s13 + $0xf0] sm:$0xff]   ;;  %v2086_v0 = vcombine.low %v794_v52, %v2973_v36 }
  0x3d   : > { %2363 = vmatprep.subr.bf16.mxu1 %v2795_v3  ;;  %v2666_v55 = vld [vmem:[%s2924_s13 + $0xf8] sm:$0xff]   ;;  %v2101_v56 = vcombine.low %v794_v52, %v3001_v54  ;;  %v2669_v59 = vld [vmem:[%s2924_s13 + $0xc8] sm:$0xff]   ;;  %v2671_v63 = vld [vmem:[%s2924_s13 + $0xc0] sm:$0xff]  }
  0x3e   : > { %v725_v53 = vor.u32 %v724_v48, %v721_v47  ;;  %v2670_v62 = vld [vmem:[%s2924_s13 + $0xe8] sm:$0xff]   ;;  %v2672_v4 = vld [vmem:[%s2924_s13 + $0xe0] sm:$0xff]   ;;  %v809_v5 = vrot.slane %v2086_v0, 3  ;;  %v2675_v7 = vld [vmem:[%s2924_s13 + $0x118] sm:$0xff]  }
  0x3f   : > { %2352 = vmatpush3.bf16.msra.mxu0 %v2642_v14  ;;  %v894_v60 = vshrl.u32 %v2101_v56, 16  ;;  %v897_v61 = vshll.u32 %v2101_v56, 16  ;;  %v2676_v8 = vld [vmem:[%s2924_s13 + $0x38] sm:$0xff]   ;;  %v2683_v9 = vld [vmem:[%s2913_s7 + $0x8] ss:$0 sps:$4 sm:$0x77]  }
  0x40   : > { %2364 = vmatpush3.bf16.msra.mxu1 %v2643_v15  ;;  %2369 = vmatprep.subr.bf16.mxu0 %v2795_v3  ;;  %v2677_v10 = vld [vmem:[%s2924_s13 + $0x110] sm:$0xff]   ;;  %v2679_v12 = vld [vmem:[%s2924_s13 + $0x108] sm:$0xff]   ;;  %v1077_v13 = vshll.u32 %v2683_v9, 16  ;;  %v2681_v15 = vld [vmem:[%s2924_s13 + $0x100] sm:$0xff]  }
  0x41   : > { %2381 = vmatprep.subr.bf16.mxu1 %v2795_v3  ;;  %v896_v1 = vrot.slane %v894_v60, 3  ;;  %v899_v2 = vrot.slane %v897_v61, 4  ;;  %v2678_v11 = vld [vmem:[%s2924_s13 + $0x30] sm:$0xff]   ;;  %v2680_v14 = vld [vmem:[%s2924_s13 + $0x28] sm:$0xff]   ;;  %v2690_v26 = vld [vmem:[%s2924_s13] sm:$0xff]  }
  0x42   : > { %2354 = vmatmul.mubr.msk.bf16.vlgmr.msra.gmra.mxu0 %vm330_vm2, %v305_v16  ;;  %v1075_v16 = vshrl.u32 %v2683_v9, 16  ;;  %v2686_v22 = vld [vmem:[%s2924_s13 + $0x10] sm:$0xff]   ;;  %v2688_v24 = vld [vmem:[%s2924_s13 + $0x8] sm:$0xff]   ;;  %v2699_v42 = vld [vmem:[%s2924_s13 + $0x60] sm:$0xff]  }
  0x43   : > { %2366 = vmatmul.mubr.msk.bf16.vlgmr.msra.gmra.mxu1 %vm330_vm2, %v272_v17  ;;  %2370 = vmatpush3.bf16.msra.mxu0 %v2645_v18  ;;  %v900_v6 = vor.u32 %v899_v2, %v896_v1  ;;  %v1079_v17 = vrot.slane %v1077_v13, 1  ;;  %v2682_v18 = vld [vmem:[%s2924_s13 + $0x20] sm:$0xff]   ;;  %v2689_v25 = vld [vmem:[%s2924_s13 + $0x48] sm:$0xff]   ;;  %v2695_v34 = vld [vmem:[%s2924_s13 + $0x70] sm:$0xff]  }
  0x44   : > { %2382 = vmatpush3.bf16.msra.mxu1 %v2646_v19  ;;  %2371 = vmatprep.subr.bf16.mxu0 %v2795_v3  ;;  %v2121_v29 = vld [vmem:[%s2913_s7 + $0x8] sm:$0x3]  ;;  %v2697_v38 = vld [vmem:[%s2924_s13 + $0x68] sm:$0xff]   ;;  %v2703_v47 = vld [vmem:[%s2924_s13 + $0xb8] sm:$0xff]  }
  0x45   : > { %2383 = vmatprep.subr.bf16.mxu1 %v2795_v3  ;;  %2377 = vmatprep.mubr.msk.bf16.mxu0 %vm2796_vm1, %v2795_v3  ;;  %v1080_v19 = vor.u32 %v1079_v17, %v1075_v16  ;;  %v2702_v43 = vld [vmem:[%s2913_s7 + $0x8] ss:$0 sps:$4 sm:$0xcc]   ;;  %v2187_v48 = vld [vmem:[%s2913_s7 + $0x8] sm:$0xc]  ;;  %v2707_v56 = vld [vmem:[%s2924_s13 + $0xa8] sm:$0xff]  }
  0x46   : > { %2389 = vmatprep.mubr.msk.bf16.mxu1 %vm2796_vm1, %v2795_v3  ;;  %v2705_v52 = vld [vmem:[%s2924_s13 + $0xb0] sm:$0xff]   ;;  %v2709_v61 = vld [vmem:[%s2924_s13 + $0xa0] sm:$0xff]  }
  0x47   : > { %2372 = vmatpush3.bf16.msra.mxu0 %v2647_v20  ;;  %v2684_v20 = vld [vmem:[%s2924_s13 + $0x18] sm:$0xff]   ;;  %v2218_v2 = vld [vmem:[%s2913_s7 + $0xc] sm:$0x3] }
  0x48   : > { %2384 = vmatpush3.bf16.msra.mxu1 %v2648_v21  ;;  %2373 = vmatprep.subr.bf16.mxu0 %v2795_v3  ;;  %v2685_v21 = vld [vmem:[%s2924_s13 + $0x58] sm:$0xff]   ;;  %v2721_v16 = vld [vmem:[%s2924_s13 + $0x100] sm:$0xff]  }
  0x49   : > { %2385 = vmatprep.subr.bf16.mxu1 %v2795_v3 }
  0x4b   : > { %2374 = vmatpush3.bf16.msra.mxu0 %v2649_v23  ;;  %v2687_v23 = vld [vmem:[%s2924_s13 + $0x50] sm:$0xff]  }
  0x4c   : > { %2386 = vmatpush3.bf16.msra.mxu1 %v2650_v27  ;;  %2375 = vmatprep.subr.bf16.mxu0 %v2795_v3  ;;  %v2692_v27 = vld [vmem:[%s2913_s7 + $0x8] ss:$0 sps:$4 sm:$0x66]  }
  0x4d   : > { %2387 = vmatprep.subr.bf16.mxu1 %v2795_v3  ;;  %v1227_v30 = vrot.slane %v2692_v27, 1 }
  0x4f   : > { %2376 = vmatpush3.bf16.msra.mxu0 %v2651_v28  ;;  %v2691_v28 = vld [vmem:[%s2924_s13 + $0x40] sm:$0xff]  }
  0x50   : > { %2388 = vmatpush3.bf16.msra.mxu1 %v2652_v31  ;;  %2393 = vmatprep.subr.bf16.mxu0 %v2795_v3  ;;  %v2693_v31 = vld [vmem:[%s2924_s13 + $0x78] sm:$0xff]  }
  0x51   : > { %2405 = vmatprep.subr.bf16.mxu1 %v2795_v3 }
  0x52   : > { %2378 = vmatmul.mubr.msk.bf16.vlgmr.msra.gmra.mxu0 %vm330_vm2, %v456_v32  ;;  %v2694_v32 = vld [vmem:[%s2924_s13 + $0x98] sm:$0xff]  }
  0x53   : > { %2390 = vmatmul.mubr.msk.bf16.vlgmr.msra.gmra.mxu1 %vm330_vm2, %v547_v35  ;;  %2394 = vmatpush3.bf16.msra.mxu0 %v2655_v33  ;;  %v2701_v33 = vld [vmem:[%s2913_s7 + $0x8] ss:$0 sps:$4 sm:$0xee]  }
  0x54   : > { %2406 = vmatpush3.bf16.msra.mxu1 %v2656_v37  ;;  %2395 = vmatprep.subr.bf16.mxu0 %v2795_v3  ;;  %v2696_v35 = vld [vmem:[%s2924_s13 + $0x90] sm:$0xff]   ;;  %v1309_v36 = vshrl.u32 %v2701_v33, 16  ;;  %v1312_v37 = vshll.u32 %v2701_v33, 16 }
  0x55   : > { %2407 = vmatprep.subr.bf16.mxu1 %v2795_v3  ;;  %2401 = vmatprep.mubr.msk.bf16.mxu0 %vm2796_vm1, %v2795_v3 }
  0x56   : > { %2413 = vmatprep.mubr.msk.bf16.mxu1 %vm2796_vm1, %v2795_v3 }
  0x57   : > { %2396 = vmatpush3.bf16.msra.mxu0 %v2657_v39  ;;  %v2698_v39 = vld [vmem:[%s2924_s13 + $0x88] sm:$0xff]  }
  0x58   : > { %2408 = vmatpush3.bf16.msra.mxu1 %v2658_v40  ;;  %2397 = vmatprep.subr.bf16.mxu0 %v2795_v3  ;;  %v1311_v40 = vrot.slane %v1309_v36, 1 }
  0x59   : > { %2409 = vmatprep.subr.bf16.mxu1 %v2795_v3 }
  0x5b   : > { %2398 = vmatpush3.bf16.msra.mxu0 %v2659_v41  ;;  %v1314_v41 = vrot.slane %v1312_v37, 2 }
  0x5c   : > { %2410 = vmatpush3.bf16.msra.mxu1 %v2660_v44  ;;  %2399 = vmatprep.subr.bf16.mxu0 %v2795_v3  ;;  %v2700_v44 = vld [vmem:[%s2924_s13 + $0x80] sm:$0xff]  }
  0x5d   : > { %2411 = vmatprep.subr.bf16.mxu1 %v2795_v3  ;;  %v1315_v45 = vor.u32 %v1314_v41, %v1311_v40 }
  0x5f   : > { %2400 = vmatpush3.bf16.msra.mxu0 %v2661_v46  ;;  %v1396_v46 = vrot.slane %v2702_v43, 2 }
  0x60   : > { %2412 = vmatpush3.bf16.msra.mxu1 %v2662_v49  ;;  %2417 = vmatprep.subr.bf16.mxu0 %v2795_v3  ;;  %v2188_v49 = vld [vmem:[%s2913_s7 + $0xc] sm:$0x1] }
  0x61   : > { %2429 = vmatprep.subr.bf16.mxu1 %v2795_v3 }
  0x62   : > { %2402 = vmatmul.mubr.msk.bf16.vlgmr.msra.gmra.mxu0 %vm330_vm2, %v631_v50  ;;  %v2704_v50 = vld [vmem:[%s2924_s13 + $0xd8] sm:$0xff]  }
  0x63   : > { %2414 = vmatmul.mubr.msk.bf16.vlgmr.msra.gmra.mxu1 %vm330_vm2, %v725_v53  ;;  %2418 = vmatpush3.bf16.msra.mxu0 %v2665_v51  ;;  %v2197_v51 = vcombine.low %v2187_v48, %v2188_v49  ;;  %v2706_v53 = vld [vmem:[%s2924_s13 + $0xd0] sm:$0xff]  }
  0x64   : > { %2430 = vmatpush3.bf16.msra.mxu1 %v2666_v55  ;;  %2419 = vmatprep.subr.bf16.mxu0 %v2795_v3 }
  0x65   : > { %2431 = vmatprep.subr.bf16.mxu1 %v2795_v3  ;;  %2425 = vmatprep.mubr.msk.bf16.mxu0 %vm2796_vm1, %v2795_v3  ;;  %v1484_v55 = vshll.u32 %v2197_v51, 16 }
  0x66   : > { %2437 = vmatprep.mubr.msk.bf16.mxu1 %vm2796_vm1, %v2795_v3 }
  0x67   : > { %2420 = vmatpush3.bf16.msra.mxu0 %v2667_v57  ;;  %v2708_v57 = vld [vmem:[%s2924_s13 + $0xc8] sm:$0xff]   ;;  %v1486_v60 = vrot.slane %v1484_v55, 3 }
  0x68   : > { %2432 = vmatpush3.bf16.msra.mxu1 %v2668_v58  ;;  %2421 = vmatprep.subr.bf16.mxu0 %v2795_v3  ;;  %v2203_v58 = vld [vmem:[%s2913_s7 + $0x8] sm:$0x8] }
  0x69   : > { %2433 = vmatprep.subr.bf16.mxu1 %v2795_v3 }
  0x6b   : > { %2422 = vmatpush3.bf16.msra.mxu0 %v2669_v59 }
  0x6c   : > { %2434 = vmatpush3.bf16.msra.mxu1 %v2670_v62  ;;  %2423 = vmatprep.subr.bf16.mxu0 %v2795_v3  ;;  %v2212_v62 = vcombine.low %v2203_v58, %v2188_v49 }
  0x6d   : > { %2435 = vmatprep.subr.bf16.mxu1 %v2795_v3 }
  0x6e   : > { %v1568_v1 = vrot.slane %v2212_v62, 3 }
  0x6f   : > { %2424 = vmatpush3.bf16.msra.mxu0 %v2671_v63  ;;  %v2710_v63 = vld [vmem:[%s2924_s13 + $0xc0] sm:$0xff]  }
  0x70   : > { %2436 = vmatpush3.bf16.msra.mxu1 %v2672_v4  ;;  %2441 = vmatprep.subr.bf16.mxu0 %v2795_v3  ;;  %v2714_v4 = vld [vmem:[%s2924_s13 + $0xf8] sm:$0xff]  }
  0x71   : > { %2453 = vmatprep.subr.bf16.mxu1 %v2795_v3 }
  0x72   : > { %2426 = vmatmul.mubr.msk.bf16.vlgmr.msra.gmra.mxu0 %vm330_vm2, %v809_v5  ;;  %v2715_v5 = vld [vmem:[%s2924_s13 + $0x118] sm:$0xff]  }
  0x73   : > { %2438 = vmatmul.mubr.msk.bf16.vlgmr.msra.gmra.mxu1 %vm330_vm2, %v900_v6  ;;  %2442 = vmatpush3.bf16.msra.mxu0 %v2675_v7  ;;  %v2227_v6 = vcombine.low %v2203_v58, %v2218_v2  ;;  %v2716_v7 = vld [vmem:[%s2924_s13 + $0xf0] sm:$0xff]  }
  0x74   : > { %2454 = vmatpush3.bf16.msra.mxu1 %v2676_v8  ;;  %2443 = vmatprep.subr.bf16.mxu0 %v2795_v3  ;;  %v2717_v8 = vld [vmem:[%s2924_s13 + $0x110] sm:$0xff]  }
  0x75   : > { %2455 = vmatprep.subr.bf16.mxu1 %v2795_v3  ;;  %2449 = vmatprep.mubr.msk.bf16.mxu0 %vm2796_vm1, %v2795_v3  ;;  %v1650_v9 = vshrl.u32 %v2227_v6, 16 }
  0x76   : > { %2461 = vmatprep.mubr.msk.bf16.mxu1 %vm2796_vm1, %v2795_v3 }
  0x77   : > { %2444 = vmatpush3.bf16.msra.mxu0 %v2677_v10  ;;  %v1653_v10 = vshll.u32 %v2227_v6, 16  ;;  %v1652_v13 = vrot.slane %v1650_v9, 3 }
  0x78   : > { %2456 = vmatpush3.bf16.msra.mxu1 %v2678_v11  ;;  %2445 = vmatprep.subr.bf16.mxu0 %v2795_v3  ;;  %v2718_v11 = vld [vmem:[%s2924_s13 + $0xe8] sm:$0xff]  }
  0x79   : > { %2457 = vmatprep.subr.bf16.mxu1 %v2795_v3 }
  0x7b   : > { %2446 = vmatpush3.bf16.msra.mxu0 %v2679_v12  ;;  %v2719_v12 = vld [vmem:[%s2924_s13 + $0x108] sm:$0xff]  }
  0x7c   : > { %2458 = vmatpush3.bf16.msra.mxu1 %v2680_v14  ;;  %2447 = vmatprep.subr.bf16.mxu0 %v2795_v3  ;;  %v1655_v14 = vrot.slane %v1653_v10, 4 }
  0x7d   : > { %2459 = vmatprep.subr.bf16.mxu1 %v2795_v3 }
  0x7e   : > { %v1656_v17 = vor.u32 %v1655_v14, %v1652_v13 }
  0x7f   : > { %2448 = vmatpush3.bf16.msra.mxu0 %v2681_v15  ;;  %v2720_v15 = vld [vmem:[%s2924_s13 + $0xe0] sm:$0xff]  }
  0x80   : > { %2460 = vmatpush3.bf16.msra.mxu1 %v2682_v18  ;;  %2465 = vmatprep.subr.bf16.mxu0 %v2795_v3 }
  0x81   : > { %2477 = vmatprep.subr.bf16.mxu1 %v2795_v3 }
  0x82   : > { %2450 = vmatmul.mubr.msk.bf16.vlgmr.msra.gmra.mxu0 %vm330_vm2, %v3001_v54  ;;  %v1481_v54 = vshrl.u32 %v2197_v51, 16 }
  0x83   : > { %2462 = vmatmul.mubr.msk.bf16.vlgmr.msra.gmra.mxu1 %vm330_vm2, %v1080_v19  ;;  %2466 = vmatpush3.bf16.msra.mxu0 %v2684_v20 }
  0x84   : > { %2478 = vmatpush3.bf16.msra.mxu1 %v2685_v21  ;;  %2467 = vmatprep.subr.bf16.mxu0 %v2795_v3  ;;  %v1483_v59 = vrot.slane %v1481_v54, 2 }
  0x85   : > { %2479 = vmatprep.subr.bf16.mxu1 %v2795_v3  ;;  %2473 = vmatprep.mubr.msk.bf16.mxu0 %vm2796_vm1, %v2795_v3 }
  0x86   : > { %2485 = vmatprep.mubr.msk.bf16.mxu1 %vm2796_vm1, %v2795_v3  ;;  %v1487_v0 = vor.u32 %v1486_v60, %v1483_v59 }
  0x87   : > { %2468 = vmatpush3.bf16.msra.mxu0 %v2686_v22 }
  0x88   : > { %2480 = vmatpush3.bf16.msra.mxu1 %v2687_v23  ;;  %2469 = vmatprep.subr.bf16.mxu0 %v2795_v3 }
  0x89   : > { %2481 = vmatprep.subr.bf16.mxu1 %v2795_v3 }
  0x8b   : > { %2470 = vmatpush3.bf16.msra.mxu0 %v2688_v24 }
  0x8c   : > { %2482 = vmatpush3.bf16.msra.mxu1 %v2689_v25  ;;  %2471 = vmatprep.subr.bf16.mxu0 %v2795_v3 }
  0x8d   : > { %2483 = vmatprep.subr.bf16.mxu1 %v2795_v3 }
  0x8f   : > { %2472 = vmatpush3.bf16.msra.mxu0 %v2690_v26 }
  0x90   : > { %2484 = vmatpush3.bf16.msra.mxu1 %v2691_v28  ;;  %2489 = vmatprep.subr.bf16.mxu0 %v2795_v3 }
  0x91   : > { %2501 = vmatprep.subr.bf16.mxu1 %v2795_v3 }
  0x92   : > { %2474 = vmatmul.mubr.msk.bf16.vlgmr.msra.gmra.mxu0 %vm330_vm2, %v2121_v29 }
  0x93   : > { %2486 = vmatmul.mubr.msk.bf16.vlgmr.msra.gmra.mxu1 %vm330_vm2, %v1227_v30  ;;  %2490 = vmatpush3.bf16.msra.mxu0 %v2693_v31 }
  0x94   : > { %2502 = vmatpush3.bf16.msra.mxu1 %v2694_v32  ;;  %2491 = vmatprep.subr.bf16.mxu0 %v2795_v3 }
  0x95   : > { %2503 = vmatprep.subr.bf16.mxu1 %v2795_v3  ;;  %2497 = vmatprep.mubr.msk.bf16.mxu0 %vm2796_vm1, %v2795_v3 }
  0x96   : > { %2509 = vmatprep.mubr.msk.bf16.mxu1 %vm2796_vm1, %v2795_v3 }
  0x97   : > { %2492 = vmatpush3.bf16.msra.mxu0 %v2695_v34 }
  0x98   : > { %2504 = vmatpush3.bf16.msra.mxu1 %v2696_v35  ;;  %2493 = vmatprep.subr.bf16.mxu0 %v2795_v3 }
  0x99   : > { %2505 = vmatprep.subr.bf16.mxu1 %v2795_v3 }
  0x9b   : > { %2494 = vmatpush3.bf16.msra.mxu0 %v2697_v38 }
  0x9c   : > { %2506 = vmatpush3.bf16.msra.mxu1 %v2698_v39  ;;  %2495 = vmatprep.subr.bf16.mxu0 %v2795_v3 }
  0x9d   : > { %2507 = vmatprep.subr.bf16.mxu1 %v2795_v3 }
  0x9f   : > { %2496 = vmatpush3.bf16.msra.mxu0 %v2699_v42 }
  0xa0   : > { %2508 = vmatpush3.bf16.msra.mxu1 %v2700_v44  ;;  %2513 = vmatprep.subr.bf16.mxu0 %v2795_v3 }
  0xa1   : > { %2525 = vmatprep.subr.bf16.mxu1 %v2795_v3 }
  0xa2   : > { %2498 = vmatmul.mubr.msk.bf16.vlgmr.msra.gmra.mxu0 %vm330_vm2, %v1315_v45 }
  0xa3   : > { %2510 = vmatmul.mubr.msk.bf16.vlgmr.msra.gmra.mxu1 %vm330_vm2, %v1396_v46  ;;  %2514 = vmatpush3.bf16.msra.mxu0 %v2703_v47 }
  0xa4   : > { %2526 = vmatpush3.bf16.msra.mxu1 %v2704_v50  ;;  %2515 = vmatprep.subr.bf16.mxu0 %v2795_v3 }
  0xa5   : > { %2527 = vmatprep.subr.bf16.mxu1 %v2795_v3  ;;  %2521 = vmatprep.mubr.msk.bf16.mxu0 %vm2796_vm1, %v2795_v3 }
  0xa6   : > { %2533 = vmatprep.mubr.msk.bf16.mxu1 %vm2796_vm1, %v2795_v3 }
  0xa7   : > { %2516 = vmatpush3.bf16.msra.mxu0 %v2705_v52 }
  0xa8   : > { %2528 = vmatpush3.bf16.msra.mxu1 %v2706_v53  ;;  %2517 = vmatprep.subr.bf16.mxu0 %v2795_v3 }
  0xa9   : > { %2529 = vmatprep.subr.bf16.mxu1 %v2795_v3 }
  0xab   : > { %2518 = vmatpush3.bf16.msra.mxu0 %v2707_v56 }
  0xac   : > { %2530 = vmatpush3.bf16.msra.mxu1 %v2708_v57  ;;  %2519 = vmatprep.subr.bf16.mxu0 %v2795_v3  ;;  %v1048_v57 = vld [vmem:[#allocation2] sm:$0xf] }
  0xad   : > { %2531 = vmatprep.subr.bf16.mxu1 %v2795_v3 }
  0xaf   : > { %2520 = vmatpush3.bf16.msra.mxu0 %v2709_v61 }
  0xb0   : > { %2532 = vmatpush3.bf16.msra.mxu1 %v2710_v63  ;;  %2537 = vmatprep.subr.bf16.mxu0 %v2795_v3 }
  0xb1   : > { %2549 = vmatprep.subr.bf16.mxu1 %v2795_v3 }
  0xb2   : > { %2522 = vmatmul.mubr.msk.bf16.vlgmr.msra.gmra.mxu0 %vm330_vm2, %v1487_v0 }
  0xb3   : > { %2534 = vmatmul.mubr.msk.bf16.vlgmr.msra.gmra.mxu1 %vm330_vm2, %v1568_v1  ;;  %2538 = vmatpush3.bf16.msra.mxu0 %v2714_v4 }
  0xb4   : > { %2550 = vmatpush3.bf16.msra.mxu1 %v2715_v5  ;;  %2539 = vmatprep.subr.bf16.mxu0 %v2795_v3 }
  0xb5   : > { %2551 = vmatprep.subr.bf16.mxu1 %v2795_v3  ;;  %2545 = vmatprep.mubr.msk.bf16.mxu0 %vm2796_vm1, %v2795_v3 }
  0xb6   : > { %2557 = vmatprep.mubr.msk.bf16.mxu1 %vm2796_vm1, %v2795_v3 }
  0xb7   : > { %2540 = vmatpush3.bf16.msra.mxu0 %v2716_v7 }
  0xb8   : > { %2552 = vmatpush3.bf16.msra.mxu1 %v2717_v8  ;;  %2541 = vmatprep.subr.bf16.mxu0 %v2795_v3 }
  0xb9   : > { %2553 = vmatprep.subr.bf16.mxu1 %v2795_v3 }
  0xbb   : > { %2542 = vmatpush3.bf16.msra.mxu0 %v2718_v11 }
  0xbc   : > { %2554 = vmatpush3.bf16.msra.mxu1 %v2719_v12  ;;  %2543 = vmatprep.subr.bf16.mxu0 %v2795_v3 }
  0xbd   : > { %2555 = vmatprep.subr.bf16.mxu1 %v2795_v3 }
  0xbf   : > { %2544 = vmatpush3.bf16.msra.mxu0 %v2720_v15 }
  0xc0   : > { %2556 = vmatpush3.bf16.msra.mxu1 %v2721_v16 }
  0xc2   : > { %2546 = vmatmul.mubr.msk.bf16.vlgmr.msra.gmra.mxu0 %vm330_vm2, %v1656_v17 }
  0xc3   : > { %2558 = vmatmul.mubr.msk.bf16.vlgmr.msra.gmra.mxu1 %vm330_vm2, %v2218_v2 }
 0x102   : > { %v368_v18 = vpop.f32.mrf.mxu0 }
 0x103   : > { %v435_v19 = vpop.f32.mrf.mxu1 }
 0x104   : > { %v2355_v20 = vpop.f32.mrf.mxu0  ;;  %v436_v41 = vadd.f32 %v435_v19, %v368_v18 }
 0x105   : > { %v2367_v21 = vpop.f32.mrf.mxu1 }
 0x106   : > { %v371_v22 = vpop.f32.mrf.mxu0 }
 0x107   : > { %v438_v23 = vpop.f32.mrf.mxu1 }
 0x108   : > { %v2356_v24 = vpop.f32.mrf.mxu0 }
 0x109   : > { %v2368_v25 = vpop.f32.mrf.mxu1 }
 0x112   : > { %v518_v26 = vpop.f32.mrf.mxu0 }
 0x113   : > { %v609_v27 = vpop.f32.mrf.mxu1  ;;  %v524_v42 = vadd.f32 %v518_v26, %v436_v41 }
 0x114   : > { %v2379_v28 = vpop.f32.mrf.mxu0 }
 0x115   : > { %v2391_v29 = vpop.f32.mrf.mxu1  ;;  %v615_v46 = vadd.f32 %v609_v27, %v524_v42 }
 0x116   : > { %v521_v3 = vpop.f32.mrf.mxu0 }
 0x117   : > { %v612_v30 = vpop.f32.mrf.mxu1 }
 0x118   : > { %v2380_v31 = vpop.f32.mrf.mxu0 }
 0x119   : > { %v2392_v32 = vpop.f32.mrf.mxu1 }
 0x122   : > { %v693_v33 = vpop.f32.mrf.mxu0 }
 0x123   : > { %v787_v34 = vpop.f32.mrf.mxu1  ;;  %v699_v49 = vadd.f32 %v693_v33, %v615_v46 }
 0x124   : > { %v2403_v35 = vpop.f32.mrf.mxu0 }
 0x125   : > { %v2415_v36 = vpop.f32.mrf.mxu1  ;;  %v793_v53 = vadd.f32 %v787_v34, %v699_v49 }
 0x126   : > { %v696_v37 = vpop.f32.mrf.mxu0  ;;  %v1802_v36 = vld [vmem:[#allocation2 + $0x4] sm:$0xf] }
 0x127   : > { %v790_v38 = vpop.f32.mrf.mxu1 }
 0x128   : > { %v2404_v39 = vpop.f32.mrf.mxu0 }
 0x129   : > { %v2416_v40 = vpop.f32.mrf.mxu1 }
 0x132   : > { %v871_v43 = vpop.f32.mrf.mxu0 }
 0x133   : > { %v962_v44 = vpop.f32.mrf.mxu1  ;;  %v877_v54 = vadd.f32 %v871_v43, %v793_v53 }
 0x134   : > { %v2427_v45 = vpop.f32.mrf.mxu0 }
 0x135   : > { %v2439_v47 = vpop.f32.mrf.mxu1  ;;  %v968_v55 = vadd.f32 %v962_v44, %v877_v54 }
 0x136   : > { %v874_v48 = vpop.f32.mrf.mxu0 }
 0x137   : > { %v965_v50 = vpop.f32.mrf.mxu1 }
 0x138   : > { %v2428_v51 = vpop.f32.mrf.mxu0 }
 0x139   : > { %v2440_v52 = vpop.f32.mrf.mxu1 }
 0x142   : > { %v1041_v56 = vpop.f32.mrf.mxu0 }
 0x143   : > { %v1047_v58 = vadd.f32 %v1041_v56, %v968_v55  ;;  %v1142_v59 = vpop.f32.mrf.mxu1 }
 0x144   : > { %v2451_v60 = vpop.f32.mrf.mxu0 }
 0x145   : > { %v1049_v61 = vadd.f32 %v1048_v57, %v1047_v58  ;;  %v2463_v62 = vpop.f32.mrf.mxu1 }
 0x146   : > { %v1044_v63 = vpop.f32.mrf.mxu0 }
 0x147   : > { %1051 = vst.msk [vmem:[#allocation2] sm:$0xf] %vm1050_vm3, %v1049_v61  ;;  %v1145_v0 = vpop.f32.mrf.mxu1 }
 0x148   : > { %v2452_v1 = vpop.f32.mrf.mxu0 }
 0x149   : > { %v2464_v2 = vpop.f32.mrf.mxu1 }
 0x152   : > { %v1209_v4 = vpop.f32.mrf.mxu0 }
 0x153   : > { %v1289_v5 = vpop.f32.mrf.mxu1  ;;  %v1210_v20 = vadd.f32 %v1209_v4, %v1142_v59 }
 0x154   : > { %v2475_v6 = vpop.f32.mrf.mxu0 }
 0x155   : > { %v2487_v7 = vpop.f32.mrf.mxu1  ;;  %v1295_v24 = vadd.f32 %v1289_v5, %v1210_v20 }
 0x156   : > { %v1212_v8 = vpop.f32.mrf.mxu0 }
 0x157   : > { %v1292_v9 = vpop.f32.mrf.mxu1 }
 0x158   : > { %v2476_v10 = vpop.f32.mrf.mxu0 }
 0x159   : > { %v2488_v11 = vpop.f32.mrf.mxu1 }
 0x162   : > { %v1377_v12 = vpop.f32.mrf.mxu0 }
 0x163   : > { %v1458_v13 = vpop.f32.mrf.mxu1  ;;  %v1383_v27 = vadd.f32 %v1377_v12, %v1295_v24 }
 0x164   : > { %v2499_v14 = vpop.f32.mrf.mxu0 }
 0x165   : > { %v2511_v15 = vpop.f32.mrf.mxu1  ;;  %v1464_v30 = vadd.f32 %v1458_v13, %v1383_v27 }
 0x166   : > { %v1380_v16 = vpop.f32.mrf.mxu0 }
 0x167   : > { %v1461_v17 = vpop.f32.mrf.mxu1 }
 0x168   : > { %v2500_v18 = vpop.f32.mrf.mxu0 }
 0x169   : > { %v2512_v19 = vpop.f32.mrf.mxu1 }
 0x172   : > { %v1549_v21 = vpop.f32.mrf.mxu0 }
 0x173   : > { %v1630_v22 = vpop.f32.mrf.mxu1  ;;  %v1555_v31 = vadd.f32 %v1549_v21, %v1464_v30 }
 0x174   : > { %v2523_v23 = vpop.f32.mrf.mxu0 }
 0x175   : > { %v2535_v25 = vpop.f32.mrf.mxu1  ;;  %v1636_v32 = vadd.f32 %v1630_v22, %v1555_v31 }
 0x176   : > { %v1552_v26 = vpop.f32.mrf.mxu0 }
 0x177   : > { %v1633_v28 = vpop.f32.mrf.mxu1 }
 0x178   : > { %v2524_v29 = vpop.f32.mrf.mxu0 }
 0x179   : > { %v2536_v3 = vpop.f32.mrf.mxu1 }
 0x182   : > { %v1718_v33 = vpop.f32.mrf.mxu0 }
 0x183   : > { %v1724_v34 = vadd.f32 %v1718_v33, %v1636_v32  ;;  %v1794_v35 = vpop.f32.mrf.mxu1 }
 0x184   : > { %v2547_v37 = vpop.f32.mrf.mxu0 }
 0x185   : > { %v1800_v38 = vadd.f32 %v1794_v35, %v1724_v34  ;;  %v2559_v39 = vpop.f32.mrf.mxu1  ;;  %1808 = sbr.rel (%p2246_p1) target bundleno = 410 (0x19a), region = 85 }
 0x186   : > { %v1721_v40 = vpop.f32.mrf.mxu0 }
 0x187   : > { %v1803_v41 = vadd.f32 %v1802_v36, %v1800_v38  ;;  %v1797_v42 = vpop.f32.mrf.mxu1 }
 0x188   : > { %v2548_v43 = vpop.f32.mrf.mxu0 }
 0x189   : > { %1804 = vst.msk [vmem:[#allocation2 + $0x4] sm:$0xf] %vm1050_vm3, %v1803_v41  ;;  %v2560_v44 = vpop.f32.mrf.mxu1 }
 0x18a   : > { %v1809_v45 = vld [vmem:[#allocation2] sm:$0xf]  ;;  %vm1833_vm4 = vcmask 254976  }
 0x18b   : > { %v2247_v46 = vld [vmem:[%s3196_s2] ss:$0 sm:$0xff] }
 0x18c   : > { %v2248_v47 = vld [vmem:[%s3197_s3] ss:$0 sm:$0xff]  ;;  %v1818_v48 = vmul.f32 %v2247_v46, %v1809_v45 }
 0x18e   : > { %v1827_v51 = vadd.f32 %v2248_v47, %v1818_v48 }
 0x190   : > { %v1810_v49 = vld [vmem:[#allocation2 + $0x4] sm:$0xf]  ;;  %v1829_v53 = vmax.f32 %v1827_v51, 0.0 }
 0x191   : > { %v1819_v50 = vmul.f32 %v2247_v46, %v1810_v49 }
 0x192   : > { %v1831_v55 = vpack.c.bf16 %v1829_v53, %v1829_v53 }
 0x193   : > { %v1828_v52 = vadd.f32 %v2248_v47, %v1819_v50 }
 0x194   : > { %1834 = vst.msk [vmem:[%s2915_s11] sm:$0x3] %vm1833_vm4, %v1831_v55 }
 0x195   : > { %v1830_v54 = vmax.f32 %v1828_v52, 0.0 }
 0x197   : > { %v1832_v56 = vpack.c.bf16 %v1830_v54, %v1830_v54 }
 0x199   : > { %1835 = vst.msk [vmem:[%s2915_s11 + $0x2] sm:$0x3] %vm1833_vm4, %v1832_v56 }
 0x19a PF: > { %1842 = sbr.rel (!%p2892_p9) target bundleno = 418 (0x1a2), region = 89  ;;  %s2250_s19 = sshll.u32 (%p2892_p9), %s2780_s20, 1 }
 0x19b   : > { %v1861_v57 = vld [vmem:[%s2915_s11] sm:$0x3] (%p2892_p9)  ;;  %s1844_s29 = scalar_lea.vmem (%p2892_p9), %s3198_s4, %s2250_s19 }
 0x19c   : > { %1862 = vst [vmem:[%s1844_s29] sm:$0x3] (%p2892_p9), %v1861_v57 }
 0x1a0   : > { %v1863_v58 = vld [vmem:[%s2915_s11 + $0x2] sm:$0x3] }
 0x1a1   : > { %1864 = vst [vmem:[%s1844_s29 + $0x8] sm:$0x3] %v1863_v58 }
 0x1a2 PF: > { %s14_s23 = sadd.s32 1, %s2792_s23   ;;  %s3201_s15 = smov %s2764_s16 }
 0x1a3   : > { %p11_p2 = scmp.ge.s32.totalorder %s14_s23, 38   ;;  %s3202_s16 = smov %s2897_s9 }
 0x1a4   : > { %s3203_s17 = smov %s2772_s18  ;;  %s3204_s18 = smov %s2900_s10 }
 0x1a5   : > { %s3205_s19 = smov %s2784_s21  ;;  %s3206_s20 = smov %s2788_s22 }
 0x1a6   : > { %s3207_s21 = smov %s3210_s24  ;;  %s3208_s22 = smov %s3214_s25 }
 0x1a7   :  { %13 = sbr.rel (!%p11_p2) target bundleno = 5 (0x5), region = 165 }

// kernel: routenet_fcn_forward.17
= control target key start
LH: loop header
LB: loop body
LE: loop exit
PB: predicated region body
PF: predicated region fallthrough
CT: control target
= control target key end

     0   :  { %s1925_s15 = smov 0   ;;  %s1927_s16 = smov 0   ;;  %s2187_s0 = inlined_call_operand.vmem [shape: bf16[2,10,10,32], index: 0, kind: input, shape index: {}]   ;;  %s2188_s1 = inlined_call_operand.vmem [shape: bf16[7,7,32,32], index: 1, kind: input, shape index: {}]   ;;  %s2189_s2 = inlined_call_operand.vmem [shape: f32[1,32], index: 2, kind: input, shape index: {}]   ;;  %s2190_s3 = inlined_call_operand.vmem [shape: f32[1,32], index: 3, kind: input, shape index: {}]   ;;  %s2191_s4 = inlined_call_operand.vmem [shape: bf16[2,4,4,32], index: 4, kind: output, shape index: {}]  }
   0x1   :  { %s1929_s17 = smov 0   ;;  %s1931_s18 = smov 0  }
   0x2   :  { %s1933_s19 = smov 0   ;;  %s1935_s20 = smov 0  }
   0x3   :  { %s1937_s21 = smov 0   ;;  %s1939_s22 = smov 0  }
   0x4   :  { %s1941_s23 = smov 0  }
   0x5 LB: > { %s23_s24 = sadd.s32 1, %s1887_s21  ;;  %s26_s25 = sadd.s32 1, %s1891_s22  ;;  %s1895_s23 = sphi %s1941_s23, %s14_s23   ;;  %s1891_s22 = sphi %s1939_s22, %s2201_s22   ;;  %s1887_s21 = sphi %s1937_s21, %s2200_s21   ;;  %s1883_s20 = sphi %s1935_s20, %s2199_s20   ;;  %s1879_s19 = sphi %s1933_s19, %s2198_s19   ;;  %s1875_s18 = sphi %s1931_s18, %s2197_s18   ;;  %s1871_s17 = sphi %s1929_s17, %s2196_s17   ;;  %s1867_s16 = sphi %s1927_s16, %s2195_s16   ;;  %s1863_s15 = sphi %s1925_s15, %s2194_s15  }
   0x6   : > { %p24_p0 = scmp.ge.s32.totalorder %s23_s24, 7  ;;  %s1419_s26 = sadd.s32 4294967295, %s1895_s23  }
   0x7   : > { %s30_s27 = sadd.s32 %s1887_s21, %s1891_s22  ;;  %p42_p1 = scmp.ne.s32.totalorder %s1875_s18, %s1871_s17 }
   0x8   : > { %s2203_s24 = smov (%p24_p0, %s23_s24), 0  ;;  %s2205_s25 = smov (!%p24_p0, %s26_s25), %s1891_s22 }
   0x9   : > { %p43_p2 = scmp.eq.s32.totalorder %s1895_s23, 0  ;;  %p28_p3 = scmp.ge.s32.totalorder %s2205_s25, 4 }
   0xa   : > { %s35_s28 = sadd.s32 1, %s1875_s18  ;;  %p134_p5 = scmp.ne.s32.totalorder %s1867_s16, %s1863_s15 }
   0xb   : > { %p1982_p4 = por %p43_p2, %p42_p1  ;;  %s2207_s25 = smov (%p28_p3, %s2205_s25), 0 }
   0xc   : > { %s124_s30 = sadd.s32 1, %s1867_s16  ;;  %p135_p6 = scmp.eq.s32.totalorder %s1419_s26, 27 }
   0xd   : > { %s31_s5 = sadd.s32 %s2207_s25, %s2203_s24  ;;  %s121_s6 = ssub.s32 %s1891_s22, %s2207_s25 }
   0xe   : > { %s32_s7 = ssub.s32 %s30_s27, %s31_s5  ;;  %p122_p7 = scmp.eq.s32.totalorder %s121_s6, 0 }
   0xf   : > { %p33_p8 = scmp.eq.s32.totalorder %s32_s7, 0  ;;  %p1995_p9 = por %p135_p6, %p134_p5 }
  0x10   : > { %s2000_s9 = scalar_select %p122_p7, %s1867_s16, %s124_s30  }
  0x11   : > { %s2003_s10 = scalar_select %p33_p8, %s1875_s18, %s35_s28  }
  0x12   : > { %p1422_p10 = scmp.ge.s32.totalorder %s1895_s23, 28 }
  0x14   : > { %166 = sbr.rel (%p1422_p10) target bundleno = 30 (0x1e), region = 28 }
  0x19   : > { %169 = sbr.rel (!%p1982_p4) target bundleno = 30 (0x1e), region = 32  ;;  %s171_s11 = sand.u32 (%p1982_p4), 1, %s1875_s18  }
  0x1a   : > { %s1554_s12 = sshll.u32 (%p1982_p4), %s30_s27, 3  ;;  %s1423_s13 = sshll.u32 (%p1982_p4), %s171_s11, 4 }
  0x1b   : > { %s177_s5 = scalar_lea.vmem (%p1982_p4), %s2187_s0, %s1554_s12  ;;  %s173_s30 = scalar_lea.vmem (%p1982_p4), [#allocation3], %s1423_s13 }
  0x1c   : > { %v194_v0 = vld [vmem:[%s177_s5] sm:$0xff] (%p1982_p4)   ;;  %v198_v1 = vld [vmem:[%s177_s5 + $0x50] sm:$0xff] (%p1982_p4)  }
  0x1d   : > { %195 = vst [vmem:[%s173_s30] sm:$0xff] (%p1982_p4), %v194_v0   ;;  %199 = vst [vmem:[%s173_s30 + $0x8] sm:$0xff] (%p1982_p4), %v198_v1  }
  0x1e PF: > { %p1426_p11 = scmp.ge.s32.totalorder %s1895_s23, 1  ;;  %p232_p12 = scmp.lt.s32.totalorder %s1895_s23, 29 }
  0x20   : > { %p233_p13 = pnand %p1426_p11, %p232_p12 }
  0x21   : > { %s239_s27 = sand.u32 (!%p233_p13), 1, %s1871_s17   ;;  %s260_s28 = sand.u32 (!%p233_p13), 1, %s1863_s15  }
  0x22   : > { %236 = sbr.rel (%p233_p13) target bundleno = 329 (0x149), region = 73  ;;  %s1427_s29 = sshll.u32 (!%p233_p13), %s239_s27, 4 }
  0x23   : > { %s1428_s6 = sshll.u32 (!%p233_p13), %s260_s28, 2  ;;  %s2016_s7 = scalar_lea.vmem (!%p233_p13), [#allocation3], %s1427_s29 }
  0x24   : > { %s2018_s11 = scalar_lea.vmem (!%p233_p13), [#allocation4], %s1428_s6  ;;  %p1429_p0 = scmp.ne.s32.totalorder (!%p233_p13), %s1879_s19, 0 }
  0x27   : > { %268 = sbr.rel (%p1429_p0) target bundleno = 46 (0x2e), region = 81 }
  0x2c   : > { %vm269_vm0 = vcmask 257024   ;;  %v1897_v2 = vmov 0.0  }
  0x2d   : > { %270 = vst.msk [vmem:[#allocation2] sm:$0xf] %vm269_vm0, %v1897_v2  ;;  %271 = vst.msk [vmem:[#allocation2 + $0x4] sm:$0xf] %vm269_vm0, %v1897_v2 }
  0x2e PF: > { %s1555_s12 = smul.u32 112, %s1879_s19  ;;  %v1898_v3 = vmov 0.0   ;;  %v1789_v4 = vld [vmem:[%s2016_s7] ss:$0 sps:$4 sm:$0x77]   ;;  %vm1899_vm1 = vmmov 0  }
  0x2f   : > { %1598 = vmatprep.subr.bf16.mxu0 %v1898_v3  ;;  %1606 = vmatprep.subr.bf16.mxu1 %v1898_v3  ;;  %v292_v6 = vshrl.u32 %v1789_v4, 16  ;;  %v294_v8 = vshll.u32 %v1789_v4, 16  ;;  %v272_v13 = vld [vmem:[%s2016_s7] sm:$0x3]  ;;  %vm310_vm2 = vcmask 261120   ;;  %vm768_vm3 = vcmask 257024  }
  0x30   : > { %s2028_s13 = scalar_lea.vmem %s2188_s1, %s1555_s12  ;;  %1602 = vmatprep.mubr.msk.bf16.mxu0 %vm1899_vm1, %v1898_v3  ;;  %1610 = vmatprep.mubr.msk.bf16.mxu1 %vm1899_vm1, %v1898_v3  ;;  %v1794_v16 = vld [vmem:[%s2016_s7] ss:$0 sps:$4 sm:$0x66]   ;;  %v620_v27 = vld [vmem:[%s2016_s7] sm:$0xc]  ;;  %p1547_p1 = scmp.ne.s32.totalorder %s1879_s19, 6 }
  0x31   : > { %v1785_v5 = vld [vmem:[%s2028_s13 + $0x18] sm:$0xff]   ;;  %v1786_v7 = vld [vmem:[%s2028_s13 + $0x8] sm:$0xff]   ;;  %v1787_v9 = vld [vmem:[%s2028_s13 + $0x10] sm:$0xff]   ;;  %v296_v11 = vrot.slane %v294_v8, 1  ;;  %v420_v24 = vrot.slane %v1794_v16, 1 }
  0x32   : > { %1599 = vmatpush3.bf16.msra.mxu0 %v1785_v5  ;;  %1607 = vmatpush3.bf16.msra.mxu1 %v1786_v7  ;;  %v1788_v10 = vld [vmem:[%s2028_s13] sm:$0xff]   ;;  %v1790_v14 = vld [vmem:[%s2028_s13 + $0x28] sm:$0xff]   ;;  %v1791_v15 = vld [vmem:[%s2028_s13 + $0x38] sm:$0xff]  }
  0x33   : > { %1600 = vmatprep.subr.bf16.mxu0 %v1898_v3  ;;  %1608 = vmatprep.subr.bf16.mxu1 %v1898_v3  ;;  %v297_v12 = vor.u32 %v296_v11, %v292_v6  ;;  %v1795_v17 = vld [vmem:[%s2016_s7] ss:$0 sps:$4 sm:$0xee]   ;;  %v1792_v18 = vld [vmem:[%s2028_s13 + $0x20] sm:$0xff]   ;;  %v1793_v19 = vld [vmem:[%s2028_s13 + $0x30] sm:$0xff]  }
  0x34   : > { %v489_v20 = vshrl.u32 %v1795_v17, 16  ;;  %v492_v21 = vshll.u32 %v1795_v17, 16  ;;  %v1796_v25 = vld [vmem:[%s2028_s13 + $0x48] sm:$0xff]   ;;  %v1797_v29 = vld [vmem:[%s2028_s13 + $0x58] sm:$0xff]   ;;  %v1798_v34 = vld [vmem:[%s2028_s13 + $0x40] sm:$0xff]  }
  0x35   : > { %v621_v28 = vld [vmem:[%s2016_s7 + $0x4] sm:$0x1]  ;;  %v1800_v30 = vld [vmem:[%s2016_s7] ss:$0 sps:$4 sm:$0xcc]   ;;  %v1799_v35 = vld [vmem:[%s2028_s13 + $0x50] sm:$0xff]  }
  0x36   : > { %1601 = vmatpush3.bf16.msra.mxu0 %v1787_v9  ;;  %1609 = vmatpush3.bf16.msra.mxu1 %v1788_v10  ;;  %v491_v22 = vrot.slane %v489_v20, 1  ;;  %v494_v23 = vrot.slane %v492_v21, 2  ;;  %v1475_v31 = vcombine.low %v620_v27, %v621_v28  ;;  %v1807_v38 = vld [vmem:[%s2016_s7 + $0x8] ss:$0 sps:$4 sm:$0x77]   ;;  %v563_v39 = vrot.slane %v1800_v30, 2 }
  0x37   : > { %1614 = vmatprep.subr.bf16.mxu0 %v1898_v3  ;;  %1622 = vmatprep.subr.bf16.mxu1 %v1898_v3  ;;  %v698_v40 = vld [vmem:[%s2016_s7] sm:$0x8]  ;;  %v787_v43 = vshll.u32 %v1807_v38, 16  ;;  %v1804_v45 = vld [vmem:[%s2028_s13 + $0x60] sm:$0xff]   ;;  %v785_v47 = vshrl.u32 %v1807_v38, 16  ;;  %v1805_v49 = vld [vmem:[%s2028_s13 + $0x10] sm:$0xff]  }
  0x38   : > { %v495_v26 = vor.u32 %v494_v23, %v491_v22  ;;  %v635_v32 = vshrl.u32 %v1475_v31, 16  ;;  %v638_v33 = vshll.u32 %v1475_v31, 16  ;;  %v1802_v42 = vld [vmem:[%s2028_s13 + $0x68] sm:$0xff]   ;;  %v1803_v44 = vld [vmem:[%s2028_s13 + $0x18] sm:$0xff]   ;;  %v1484_v46 = vcombine.low %v698_v40, %v621_v28  ;;  %v1810_v56 = vld [vmem:[%s2028_s13] sm:$0xff]  }
  0x39   : > { %1603 = vmatmul.mubr.msk.bf16.vlgmr.msra.gmra.mxu0 %vm310_vm2, %v297_v12  ;;  %1611 = vmatmul.mubr.msk.bf16.vlgmr.msra.gmra.mxu1 %vm310_vm2, %v272_v13  ;;  %v789_v48 = vrot.slane %v787_v43, 1  ;;  %v1808_v52 = vld [vmem:[%s2028_s13 + $0x8] sm:$0xff]   ;;  %v1817_v54 = vld [vmem:[%s2016_s7 + $0x8] ss:$0 sps:$4 sm:$0xee]   ;;  %v1813_v62 = vld [vmem:[%s2028_s13 + $0x38] sm:$0xff]  }
  0x3a   : > { %1615 = vmatpush3.bf16.msra.mxu0 %v1790_v14  ;;  %1623 = vmatpush3.bf16.msra.mxu1 %v1791_v15  ;;  %v637_v36 = vrot.slane %v635_v32, 2  ;;  %v640_v37 = vrot.slane %v638_v33, 3  ;;  %v709_v50 = vrot.slane %v1484_v46, 3  ;;  %v1809_v53 = vld [vmem:[%s2028_s13 + $0x28] sm:$0xff]   ;;  %v1811_v57 = vld [vmem:[%s2028_s13 + $0x20] sm:$0xff]   ;;  %v975_v59 = vshrl.u32 %v1817_v54, 16 }
  0x3b   : > { %1616 = vmatprep.subr.bf16.mxu0 %v1898_v3  ;;  %1624 = vmatprep.subr.bf16.mxu1 %v1898_v3  ;;  %v790_v51 = vor.u32 %v789_v48, %v785_v47  ;;  %v1812_v55 = vld [vmem:[%s2016_s7 + $0x8] ss:$0 sps:$4 sm:$0x66]   ;;  %v978_v60 = vshll.u32 %v1817_v54, 16  ;;  %v1528_v63 = vld [vmem:[%s2016_s7 + $0x8] sm:$0xc] }
  0x3c   : > { %1618 = vmatprep.mubr.msk.bf16.mxu0 %vm1899_vm1, %v1898_v3  ;;  %1626 = vmatprep.mubr.msk.bf16.mxu1 %vm1899_vm1, %v1898_v3  ;;  %v641_v41 = vor.u32 %v640_v37, %v637_v36  ;;  %v1488_v58 = vld [vmem:[%s2016_s7 + $0x8] sm:$0x3]  ;;  %v909_v61 = vrot.slane %v1812_v55, 1  ;;  %v1529_v0 = vld [vmem:[%s2016_s7 + $0xc] sm:$0x1]  ;;  %v1814_v1 = vld [vmem:[%s2028_s13 + $0x48] sm:$0xff]  }
  0x3d   : > { %v977_v2 = vrot.slane %v975_v59, 1  ;;  %v980_v4 = vrot.slane %v978_v60, 2  ;;  %v1534_v5 = vcombine.low %v1528_v63, %v1529_v0  ;;  %v1815_v6 = vld [vmem:[%s2028_s13 + $0x30] sm:$0xff]   ;;  %v1816_v8 = vld [vmem:[%s2028_s13 + $0x40] sm:$0xff]   ;;  %v1819_v13 = vld [vmem:[%s2028_s13 + $0x58] sm:$0xff]  }
  0x3e   : > { %1617 = vmatpush3.bf16.msra.mxu0 %v1792_v18  ;;  %1625 = vmatpush3.bf16.msra.mxu1 %v1793_v19  ;;  %v1818_v7 = vld [vmem:[%s2016_s7 + $0x8] ss:$0 sps:$4 sm:$0xcc]   ;;  %v1820_v14 = vld [vmem:[%s2028_s13 + $0x68] sm:$0xff]   ;;  %v1538_v15 = vld [vmem:[%s2016_s7 + $0x8] sm:$0x8] }
  0x3f   : > { %1630 = vmatprep.subr.bf16.mxu0 %v1898_v3  ;;  %1638 = vmatprep.subr.bf16.mxu1 %v1898_v3  ;;  %v981_v9 = vor.u32 %v980_v4, %v977_v2  ;;  %v1115_v10 = vshrl.u32 %v1534_v5, 16  ;;  %v1118_v11 = vshll.u32 %v1534_v5, 16  ;;  %v1046_v12 = vrot.slane %v1818_v7, 2  ;;  %v1821_v18 = vld [vmem:[%s2028_s13 + $0x50] sm:$0xff]   ;;  %v1822_v20 = vld [vmem:[%s2028_s13 + $0x60] sm:$0xff]  }
  0x40   : > { %v1543_v19 = vcombine.low %v1538_v15, %v1529_v0 }
  0x41   : > { %1619 = vmatmul.mubr.msk.bf16.vlgmr.msra.gmra.mxu0 %vm310_vm2, %v420_v24  ;;  %1627 = vmatmul.mubr.msk.bf16.vlgmr.msra.gmra.mxu1 %vm310_vm2, %v495_v26  ;;  %v1117_v16 = vrot.slane %v1115_v10, 2  ;;  %v1120_v17 = vrot.slane %v1118_v11, 3 }
  0x42   : > { %1631 = vmatpush3.bf16.msra.mxu0 %v1796_v25  ;;  %1639 = vmatpush3.bf16.msra.mxu1 %v1797_v29  ;;  %v1186_v22 = vrot.slane %v1543_v19, 3 }
  0x43   : > { %1632 = vmatprep.subr.bf16.mxu0 %v1898_v3  ;;  %1640 = vmatprep.subr.bf16.mxu1 %v1898_v3  ;;  %v1121_v21 = vor.u32 %v1120_v17, %v1117_v16 }
  0x44   : > { %1634 = vmatprep.mubr.msk.bf16.mxu0 %vm1899_vm1, %v1898_v3  ;;  %1642 = vmatprep.mubr.msk.bf16.mxu1 %vm1899_vm1, %v1898_v3 }
  0x46   : > { %1633 = vmatpush3.bf16.msra.mxu0 %v1798_v34  ;;  %1641 = vmatpush3.bf16.msra.mxu1 %v1799_v35 }
  0x47   : > { %1646 = vmatprep.subr.bf16.mxu0 %v1898_v3  ;;  %1654 = vmatprep.subr.bf16.mxu1 %v1898_v3 }
  0x49   : > { %1635 = vmatmul.mubr.msk.bf16.vlgmr.msra.gmra.mxu0 %vm310_vm2, %v563_v39  ;;  %1643 = vmatmul.mubr.msk.bf16.vlgmr.msra.gmra.mxu1 %vm310_vm2, %v641_v41 }
  0x4a   : > { %1647 = vmatpush3.bf16.msra.mxu0 %v1802_v42  ;;  %1655 = vmatpush3.bf16.msra.mxu1 %v1803_v44 }
  0x4b   : > { %1648 = vmatprep.subr.bf16.mxu0 %v1898_v3  ;;  %1656 = vmatprep.subr.bf16.mxu1 %v1898_v3 }
  0x4c   : > { %1650 = vmatprep.mubr.msk.bf16.mxu0 %vm1899_vm1, %v1898_v3  ;;  %1658 = vmatprep.mubr.msk.bf16.mxu1 %vm1899_vm1, %v1898_v3 }
  0x4e   : > { %1649 = vmatpush3.bf16.msra.mxu0 %v1804_v45  ;;  %1657 = vmatpush3.bf16.msra.mxu1 %v1805_v49 }
  0x4f   : > { %1662 = vmatprep.subr.bf16.mxu0 %v1898_v3  ;;  %1670 = vmatprep.subr.bf16.mxu1 %v1898_v3 }
  0x51   : > { %1651 = vmatmul.mubr.msk.bf16.vlgmr.msra.gmra.mxu0 %vm310_vm2, %v709_v50  ;;  %1659 = vmatmul.mubr.msk.bf16.vlgmr.msra.gmra.mxu1 %vm310_vm2, %v790_v51 }
  0x52   : > { %1663 = vmatpush3.bf16.msra.mxu0 %v1808_v52  ;;  %1671 = vmatpush3.bf16.msra.mxu1 %v1809_v53  ;;  %v766_v52 = vld [vmem:[#allocation2] sm:$0xf] }
  0x53   : > { %1664 = vmatprep.subr.bf16.mxu0 %v1898_v3  ;;  %1672 = vmatprep.subr.bf16.mxu1 %v1898_v3 }
  0x54   : > { %1666 = vmatprep.mubr.msk.bf16.mxu0 %vm1899_vm1, %v1898_v3  ;;  %1674 = vmatprep.mubr.msk.bf16.mxu1 %vm1899_vm1, %v1898_v3 }
  0x56   : > { %1665 = vmatpush3.bf16.msra.mxu0 %v1810_v56  ;;  %1673 = vmatpush3.bf16.msra.mxu1 %v1811_v57 }
  0x57   : > { %1678 = vmatprep.subr.bf16.mxu0 %v1898_v3  ;;  %1686 = vmatprep.subr.bf16.mxu1 %v1898_v3 }
  0x59   : > { %1667 = vmatmul.mubr.msk.bf16.vlgmr.msra.gmra.mxu0 %vm310_vm2, %v1488_v58  ;;  %1675 = vmatmul.mubr.msk.bf16.vlgmr.msra.gmra.mxu1 %vm310_vm2, %v909_v61 }
  0x5a   : > { %1679 = vmatpush3.bf16.msra.mxu0 %v1813_v62  ;;  %1687 = vmatpush3.bf16.msra.mxu1 %v1814_v1 }
  0x5b   : > { %1680 = vmatprep.subr.bf16.mxu0 %v1898_v3  ;;  %1688 = vmatprep.subr.bf16.mxu1 %v1898_v3 }
  0x5c   : > { %1682 = vmatprep.mubr.msk.bf16.mxu0 %vm1899_vm1, %v1898_v3  ;;  %1690 = vmatprep.mubr.msk.bf16.mxu1 %vm1899_vm1, %v1898_v3 }
  0x5e   : > { %1681 = vmatpush3.bf16.msra.mxu0 %v1815_v6  ;;  %1689 = vmatpush3.bf16.msra.mxu1 %v1816_v8 }
  0x5f   : > { %1694 = vmatprep.subr.bf16.mxu0 %v1898_v3  ;;  %1702 = vmatprep.subr.bf16.mxu1 %v1898_v3 }
  0x61   : > { %1683 = vmatmul.mubr.msk.bf16.vlgmr.msra.gmra.mxu0 %vm310_vm2, %v981_v9  ;;  %1691 = vmatmul.mubr.msk.bf16.vlgmr.msra.gmra.mxu1 %vm310_vm2, %v1046_v12 }
  0x62   : > { %1695 = vmatpush3.bf16.msra.mxu0 %v1819_v13  ;;  %1703 = vmatpush3.bf16.msra.mxu1 %v1820_v14 }
  0x63   : > { %1696 = vmatprep.subr.bf16.mxu0 %v1898_v3  ;;  %1704 = vmatprep.subr.bf16.mxu1 %v1898_v3 }
  0x64   : > { %1698 = vmatprep.mubr.msk.bf16.mxu0 %vm1899_vm1, %v1898_v3  ;;  %1706 = vmatprep.mubr.msk.bf16.mxu1 %vm1899_vm1, %v1898_v3 }
  0x66   : > { %1697 = vmatpush3.bf16.msra.mxu0 %v1821_v18  ;;  %1705 = vmatpush3.bf16.msra.mxu1 %v1822_v20 }
  0x69   : > { %1699 = vmatmul.mubr.msk.bf16.vlgmr.msra.gmra.mxu0 %vm310_vm2, %v1121_v21  ;;  %1707 = vmatmul.mubr.msk.bf16.vlgmr.msra.gmra.mxu1 %vm310_vm2, %v1186_v22  ;;  %v1244_v22 = vld [vmem:[#allocation2 + $0x4] sm:$0xf] }
  0xf9   : > { %v348_v23 = vpop.f32.mrf.mxu0  ;;  %v403_v24 = vpop.f32.mrf.mxu1 }
  0xfa   : > { %v404_v3 = vadd.f32 %v403_v24, %v348_v23 }
  0xfb   : > { %v1604_v25 = vpop.f32.mrf.mxu0  ;;  %v1612_v26 = vpop.f32.mrf.mxu1 }
  0xfd   : > { %v351_v27 = vpop.f32.mrf.mxu0  ;;  %v406_v28 = vpop.f32.mrf.mxu1 }
  0xff   : > { %v1605_v29 = vpop.f32.mrf.mxu0  ;;  %v1613_v30 = vpop.f32.mrf.mxu1 }
 0x101   : > { %v470_v31 = vpop.f32.mrf.mxu0  ;;  %v545_v32 = vpop.f32.mrf.mxu1 }
 0x102   : > { %v476_v36 = vadd.f32 %v470_v31, %v404_v3 }
 0x103   : > { %v1620_v33 = vpop.f32.mrf.mxu0  ;;  %v1628_v34 = vpop.f32.mrf.mxu1 }
 0x104   : > { %v551_v41 = vadd.f32 %v545_v32, %v476_v36 }
 0x105   : > { %v473_v35 = vpop.f32.mrf.mxu0  ;;  %v548_v37 = vpop.f32.mrf.mxu1 }
 0x107   : > { %v1621_v38 = vpop.f32.mrf.mxu0  ;;  %v1629_v39 = vpop.f32.mrf.mxu1 }
 0x109   : > { %v613_v40 = vpop.f32.mrf.mxu0  ;;  %v691_v42 = vpop.f32.mrf.mxu1 }
 0x10a   : > { %v619_v44 = vadd.f32 %v613_v40, %v551_v41 }
 0x10b   : > { %v1636_v43 = vpop.f32.mrf.mxu0  ;;  %v1644_v45 = vpop.f32.mrf.mxu1 }
 0x10c   : > { %v697_v49 = vadd.f32 %v691_v42, %v619_v44 }
 0x10d   : > { %v616_v46 = vpop.f32.mrf.mxu0  ;;  %v694_v47 = vpop.f32.mrf.mxu1 }
 0x10f   : > { %v1637_v48 = vpop.f32.mrf.mxu0  ;;  %v1645_v50 = vpop.f32.mrf.mxu1 }
 0x111   : > { %v759_v51 = vpop.f32.mrf.mxu0  ;;  %v840_v54 = vpop.f32.mrf.mxu1 }
 0x112   : > { %v765_v53 = vadd.f32 %v759_v51, %v697_v49 }
 0x113   : > { %v1652_v55 = vpop.f32.mrf.mxu0  ;;  %v1660_v57 = vpop.f32.mrf.mxu1 }
 0x114   : > { %v767_v56 = vadd.f32 %v766_v52, %v765_v53 }
 0x115   : > { %v762_v58 = vpop.f32.mrf.mxu0  ;;  %v843_v59 = vpop.f32.mrf.mxu1 }
 0x116   : > { %769 = vst.msk [vmem:[#allocation2] sm:$0xf] %vm768_vm3, %v767_v56 }
 0x117   : > { %v1653_v60 = vpop.f32.mrf.mxu0  ;;  %v1661_v61 = vpop.f32.mrf.mxu1 }
 0x119   : > { %v895_v62 = vpop.f32.mrf.mxu0  ;;  %v959_v63 = vpop.f32.mrf.mxu1 }
 0x11a   : > { %v896_v4 = vadd.f32 %v895_v62, %v840_v54 }
 0x11b   : > { %v1668_v0 = vpop.f32.mrf.mxu0  ;;  %v1676_v1 = vpop.f32.mrf.mxu1 }
 0x11c   : > { %v965_v9 = vadd.f32 %v959_v63, %v896_v4 }
 0x11d   : > { %v898_v2 = vpop.f32.mrf.mxu0  ;;  %v962_v5 = vpop.f32.mrf.mxu1 }
 0x11f   : > { %v1669_v6 = vpop.f32.mrf.mxu0  ;;  %v1677_v7 = vpop.f32.mrf.mxu1 }
 0x121   : > { %v1031_v8 = vpop.f32.mrf.mxu0  ;;  %v1096_v10 = vpop.f32.mrf.mxu1 }
 0x122   : > { %v1037_v12 = vadd.f32 %v1031_v8, %v965_v9 }
 0x123   : > { %v1684_v11 = vpop.f32.mrf.mxu0  ;;  %v1692_v13 = vpop.f32.mrf.mxu1 }
 0x124   : > { %v1102_v17 = vadd.f32 %v1096_v10, %v1037_v12 }
 0x125   : > { %v1034_v14 = vpop.f32.mrf.mxu0  ;;  %v1099_v15 = vpop.f32.mrf.mxu1 }
 0x127   : > { %v1685_v16 = vpop.f32.mrf.mxu0  ;;  %v1693_v18 = vpop.f32.mrf.mxu1 }
 0x129   : > { %v1171_v19 = vpop.f32.mrf.mxu0  ;;  %v1236_v21 = vpop.f32.mrf.mxu1 }
 0x12a   : > { %v1177_v20 = vadd.f32 %v1171_v19, %v1102_v17 }
 0x12b   : > { %v1700_v23 = vpop.f32.mrf.mxu0  ;;  %v1708_v25 = vpop.f32.mrf.mxu1 }
 0x12c   : > { %v1242_v24 = vadd.f32 %v1236_v21, %v1177_v20  ;;  %1250 = sbr.rel (%p1547_p1) target bundleno = 321 (0x141), region = 85 }
 0x12d   : > { %v1174_v26 = vpop.f32.mrf.mxu0  ;;  %v1239_v28 = vpop.f32.mrf.mxu1 }
 0x12e   : > { %v1245_v27 = vadd.f32 %v1244_v22, %v1242_v24 }
 0x12f   : > { %v1701_v29 = vpop.f32.mrf.mxu0  ;;  %v1709_v30 = vpop.f32.mrf.mxu1 }
 0x130   : > { %1246 = vst.msk [vmem:[#allocation2 + $0x4] sm:$0xf] %vm768_vm3, %v1245_v27 }
 0x131   : > { %v1251_v31 = vld [vmem:[#allocation2] sm:$0xf]  ;;  %vm1275_vm4 = vcmask 254976  }
 0x132   : > { %v1548_v32 = vld [vmem:[%s2189_s2] ss:$0 sm:$0xff] }
 0x133   : > { %v1549_v33 = vld [vmem:[%s2190_s3] ss:$0 sm:$0xff]  ;;  %v1260_v3 = vmul.f32 %v1548_v32, %v1251_v31 }
 0x135   : > { %v1269_v36 = vadd.f32 %v1549_v33, %v1260_v3 }
 0x137   : > { %v1252_v34 = vld [vmem:[#allocation2 + $0x4] sm:$0xf]  ;;  %v1271_v38 = vmax.f32 %v1269_v36, 0.0 }
 0x138   : > { %v1261_v35 = vmul.f32 %v1548_v32, %v1252_v34 }
 0x139   : > { %v1273_v40 = vpack.c.bf16 %v1271_v38, %v1271_v38 }
 0x13a   : > { %v1270_v37 = vadd.f32 %v1549_v33, %v1261_v35 }
 0x13b   : > { %1276 = vst.msk [vmem:[%s2018_s11] sm:$0x3] %vm1275_vm4, %v1273_v40 }
 0x13c   : > { %v1272_v39 = vmax.f32 %v1270_v37, 0.0 }
 0x13e   : > { %v1274_v41 = vpack.c.bf16 %v1272_v39, %v1272_v39 }
 0x140   : > { %1277 = vst.msk [vmem:[%s2018_s11 + $0x2] sm:$0x3] %vm1275_vm4, %v1274_v41 }
 0x141 PF: > { %1284 = sbr.rel (!%p1995_p9) target bundleno = 329 (0x149), region = 89  ;;  %s1551_s19 = sshll.u32 (%p1995_p9), %s1883_s20, 1 }
 0x142   : > { %v1303_v42 = vld [vmem:[%s2018_s11] sm:$0x3] (%p1995_p9)  ;;  %s1286_s29 = scalar_lea.vmem (%p1995_p9), %s2191_s4, %s1551_s19 }
 0x143   : > { %1304 = vst [vmem:[%s1286_s29] sm:$0x3] (%p1995_p9), %v1303_v42 }
 0x147   : > { %v1305_v43 = vld [vmem:[%s2018_s11 + $0x2] sm:$0x3] }
 0x148   : > { %1306 = vst [vmem:[%s1286_s29 + $0x8] sm:$0x3] %v1305_v43 }
 0x149 PF: > { %s14_s23 = sadd.s32 1, %s1895_s23   ;;  %s2194_s15 = smov %s1867_s16 }
 0x14a   : > { %p11_p2 = scmp.ge.s32.totalorder %s14_s23, 30   ;;  %s2195_s16 = smov %s2000_s9 }
 0x14b   : > { %s2196_s17 = smov %s1875_s18  ;;  %s2197_s18 = smov %s2003_s10 }
 0x14c   : > { %s2198_s19 = smov %s1887_s21  ;;  %s2199_s20 = smov %s1891_s22 }
 0x14d   : > { %s2200_s21 = smov %s2203_s24  ;;  %s2201_s22 = smov %s2207_s25 }
 0x14e   :  { %13 = sbr.rel (!%p11_p2) target bundleno = 5 (0x5), region = 163 }

// kernel: routenet_fcn_forward.18
= control target key start
LH: loop header
LB: loop body
LE: loop exit
PB: predicated region body
PF: predicated region fallthrough
CT: control target
= control target key end

     0   :  { %s2316_s15 = smov 0   ;;  %s2318_s16 = smov 0   ;;  %s2624_s0 = inlined_call_operand.vmem [shape: bf16[2,16,16,32], index: 0, kind: input, shape index: {}]   ;;  %s2625_s1 = inlined_call_operand.vmem [shape: bf16[9,9,32,16], index: 1, kind: input, shape index: {}]   ;;  %s2626_s2 = inlined_call_operand.vmem [shape: f32[1,16], index: 2, kind: input, shape index: {}]   ;;  %s2627_s3 = inlined_call_operand.vmem [shape: f32[1,16], index: 3, kind: input, shape index: {}]   ;;  %s2628_s4 = inlined_call_operand.vmem [shape: bf16[2,8,8,16], index: 4, kind: output, shape index: {}]  }
   0x1   :  { %s2320_s17 = smov 0   ;;  %s2322_s18 = smov 0  }
   0x2   :  { %s2324_s19 = smov 0   ;;  %s2326_s20 = smov 0  }
   0x3   :  { %s2328_s21 = smov 0   ;;  %s2330_s22 = smov 0  }
   0x4   :  { %s2332_s23 = smov 0  }
   0x5 LB: > { %s23_s24 = sadd.s32 1, %s2278_s21  ;;  %s26_s25 = sadd.s32 1, %s2282_s22  ;;  %s2286_s23 = sphi %s2332_s23, %s14_s23   ;;  %s2282_s22 = sphi %s2330_s22, %s2638_s22   ;;  %s2278_s21 = sphi %s2328_s21, %s2637_s21   ;;  %s2274_s20 = sphi %s2326_s20, %s2636_s20   ;;  %s2270_s19 = sphi %s2324_s19, %s2635_s19   ;;  %s2266_s18 = sphi %s2322_s18, %s2634_s18   ;;  %s2262_s17 = sphi %s2320_s17, %s2633_s17   ;;  %s2258_s16 = sphi %s2318_s16, %s2632_s16   ;;  %s2254_s15 = sphi %s2316_s15, %s2631_s15  }
   0x6   : > { %p24_p0 = scmp.ge.s32.totalorder %s23_s24, 9  ;;  %s1720_s26 = sadd.s32 4294967295, %s2286_s23  }
   0x7   : > { %s30_s27 = sadd.s32 %s2278_s21, %s2282_s22  ;;  %p42_p1 = scmp.ne.s32.totalorder %s2266_s18, %s2262_s17 }
   0x8   : > { %s2640_s24 = smov (%p24_p0, %s23_s24), 0  ;;  %s2642_s25 = smov (!%p24_p0, %s26_s25), %s2282_s22 }
   0x9   : > { %p43_p2 = scmp.eq.s32.totalorder %s2286_s23, 0  ;;  %p28_p3 = scmp.ge.s32.totalorder %s2642_s25, 8 }
   0xa   : > { %s35_s28 = sadd.s32 1, %s2266_s18  ;;  %p134_p5 = scmp.ne.s32.totalorder %s2258_s16, %s2254_s15 }
   0xb   : > { %p2373_p4 = por %p43_p2, %p42_p1  ;;  %s2644_s25 = smov (%p28_p3, %s2642_s25), 0 }
   0xc   : > { %s124_s30 = sadd.s32 1, %s2258_s16  ;;  %p135_p6 = scmp.eq.s32.totalorder %s1720_s26, 71 }
   0xd   : > { %s31_s5 = sadd.s32 %s2644_s25, %s2640_s24  ;;  %s121_s6 = ssub.s32 %s2282_s22, %s2644_s25 }
   0xe   : > { %s32_s7 = ssub.s32 %s30_s27, %s31_s5  ;;  %p122_p7 = scmp.eq.s32.totalorder %s121_s6, 0 }
   0xf   : > { %p33_p8 = scmp.eq.s32.totalorder %s32_s7, 0  ;;  %p2386_p9 = por %p135_p6, %p134_p5 }
  0x10   : > { %s2391_s9 = scalar_select %p122_p7, %s2258_s16, %s124_s30  }
  0x11   : > { %s2394_s10 = scalar_select %p33_p8, %s2266_s18, %s35_s28  }
  0x12   : > { %p1723_p10 = scmp.ge.s32.totalorder %s2286_s23, 72 }
  0x14   : > { %166 = sbr.rel (%p1723_p10) target bundleno = 31 (0x1f), region = 28 }
  0x19   : > { %169 = sbr.rel (!%p2373_p4) target bundleno = 31 (0x1f), region = 32  ;;  %s171_s11 = sand.u32 (%p2373_p4), 1, %s2266_s18  }
  0x1a   : > { %s1891_s12 = sshll.u32 (%p2373_p4), %s30_s27, 3  ;;  %s1724_s13 = sshll.u32 (%p2373_p4), %s171_s11, 4 }
  0x1b   : > { %s177_s5 = scalar_lea.vmem (%p2373_p4), %s2624_s0, %s1891_s12  ;;  %s173_s30 = scalar_lea.vmem (%p2373_p4), [#allocation3], %s1724_s13 }
  0x1c   : > { %v194_v0 = vld [vmem:[%s177_s5] sm:$0xff] (%p2373_p4)  }
  0x1d   : > { %v198_v1 = vld [vmem:[%s177_s5 + $0x80] sm:$0xff] (%p2373_p4)   ;;  %195 = vst [vmem:[%s173_s30] sm:$0xff] (%p2373_p4), %v194_v0  }
  0x1e   : > { %199 = vst [vmem:[%s173_s30 + $0x8] sm:$0xff] %v198_v1  }
  0x1f PF: > { %p1727_p11 = scmp.ge.s32.totalorder %s2286_s23, 1  ;;  %p232_p12 = scmp.lt.s32.totalorder %s2286_s23, 73 }
  0x21   : > { %p233_p13 = pnand %p1727_p11, %p232_p12 }
  0x22   : > { %s239_s27 = sand.u32 (!%p233_p13), 1, %s2262_s17   ;;  %s260_s28 = sand.u32 (!%p233_p13), 1, %s2254_s15  }
  0x23   : > { %236 = sbr.rel (%p233_p13) target bundleno = 363 (0x16b), region = 73  ;;  %s1728_s29 = sshll.u32 (!%p233_p13), %s239_s27, 4 }
  0x24   : > { %s1729_s6 = sshll.u32 (!%p233_p13), %s260_s28, 3  ;;  %s2407_s7 = scalar_lea.vmem (!%p233_p13), [#allocation3], %s1728_s29 }
  0x25   : > { %s2409_s11 = scalar_lea.vmem (!%p233_p13), [#allocation4], %s1729_s6  ;;  %p1730_p0 = scmp.ne.s32.totalorder (!%p233_p13), %s2270_s19, 0 }
  0x28   : > { %268 = sbr.rel (%p1730_p0) target bundleno = 47 (0x2f), region = 81 }
  0x2d   : > { %vm269_vm0 = vcmask 130048   ;;  %v2288_v2 = vmov 0.0  }
  0x2e   : > { %270 = vst.msk [vmem:[#allocation2] sm:$0xff] %vm269_vm0, %v2288_v2  ;;  %271 = vst.msk [vmem:[#allocation2 + $0x8] sm:$0xff] %vm269_vm0, %v2288_v2 }
  0x2f PF: > { %s272_s12 = sadd.s32 %s2270_s19, %s2274_s20 }
  0x30   : > { %p273_p1 = scmp.lt.s32.totalorder %s272_s12, 0  ;;  %s274_s17 = ssub.s32 0, %s272_s12 }
  0x31   : > { %s1731_s15 = smin.u32 %s274_s17, %s272_s12 }
  0x32   : > { %s276_s13 = sand.u32 1, %s1731_s15  }
  0x33   : > { %s277_s14 = ssub.s32 0, %s276_s13 }
  0x34   : > { %s2646_s14 = smov (!%p273_p1, %s277_s14), %s276_s13 }
  0x35   : > { %p1733_p2 = scmp.lt.s32.totalorder %s2646_s14, 0  ;;  %s283_s26 = sadd.s32 2, %s2646_s14 }
  0x37   : > { %s2648_s26 = smov (!%p1733_p2, %s283_s26), %s2646_s14 }
  0x38   : > { %p1734_p3 = scmp.ne.s32.totalorder %s2648_s26, 0 }
  0x39   : > { %s1892_s5 = smul.u32 (!%p1734_p3), 144, %s2270_s19 }
  0x3a   : > { %288 = sbr.rel (%p1734_p3) target bundleno = 337 (0x151), region = 85 }
  0x3b   : > { %s2422_s28 = scalar_lea.vmem (!%p1734_p3), %s2625_s1, %s1892_s5 }
  0x3f   : > { %v289_v3 = vld [vmem:[%s2407_s7] sm:$0xf]  ;;  %v2289_v4 = vmov 0.0   ;;  %v297_v5 = vld [vmem:[%s2407_s7 + $0x4] sm:$0x1]  ;;  %vm2290_vm1 = vmmov 0  }
  0x40   : > { %1947 = vmatprep.subr.bf16.mxu0 %v2289_v4  ;;  %1955 = vmatprep.subr.bf16.mxu1 %v2289_v4  ;;  %v1741_v6 = vcombine.low %v289_v3, %v297_v5  ;;  %v428_v7 = vld [vmem:[%s2407_s7] sm:$0xe]  ;;  %v2430_v8 = vld [vmem:[%s2407_s7 + $0x4] sm:$0x3]  ;;  %v2166_v9 = vld [vmem:[%s2422_s28 + $0x18] sm:$0xff]   ;;  %vm329_vm2 = vcmask 261120  }
  0x41   : > { %1951 = vmatprep.mubr.msk.bf16.mxu0 %vm2290_vm1, %v2289_v4  ;;  %1959 = vmatprep.mubr.msk.bf16.mxu1 %vm2290_vm1, %v2289_v4  ;;  %v2167_v10 = vld [vmem:[%s2422_s28 + $0x8] sm:$0xff]   ;;  %v2168_v12 = vld [vmem:[%s2422_s28 + $0x10] sm:$0xff]   ;;  %v1762_v14 = vcombine.low %v428_v7, %v2430_v8  ;;  %v2169_v15 = vld [vmem:[%s2422_s28] sm:$0xff]   ;;  %v1753_v25 = vcombine.low %v428_v7, %v297_v5  ;;  %vm922_vm3 = vcmask 130048  }
  0x42   : > { %v311_v11 = vshrl.u32 %v1741_v6, 16  ;;  %1948 = vmatpush3.bf16.msra.mxu0 %v2166_v9  ;;  %v313_v13 = vshll.u32 %v1741_v6, 16  ;;  %1956 = vmatpush3.bf16.msra.mxu1 %v2167_v10  ;;  %v2171_v17 = vld [vmem:[%s2422_s28 + $0x28] sm:$0xff]   ;;  %v571_v18 = vld [vmem:[%s2407_s7] sm:$0xc]  ;;  %v2172_v23 = vld [vmem:[%s2422_s28 + $0x38] sm:$0xff]  }
  0x43   : > { %1949 = vmatprep.subr.bf16.mxu0 %v2289_v4  ;;  %1957 = vmatprep.subr.bf16.mxu1 %v2289_v4  ;;  %v2442_v19 = vld [vmem:[%s2407_s7 + $0x4] sm:$0x7]  ;;  %v508_v21 = vshrl.u32 %v1762_v14, 16  ;;  %v511_v22 = vshll.u32 %v1762_v14, 16  ;;  %v439_v30 = vrot.slane %v1753_v25, 1  ;;  %v2177_v31 = vld [vmem:[%s2422_s28 + $0x48] sm:$0xff]   ;;  %v1771_v39 = vcombine.low %v571_v18, %v2430_v8 }
  0x44   : > { %v315_v16 = vrot.slane %v313_v13, 1  ;;  %v2173_v24 = vld [vmem:[%s2422_s28 + $0x20] sm:$0xff]   ;;  %v1780_v28 = vcombine.low %v571_v18, %v2442_v19  ;;  %v2174_v29 = vld [vmem:[%s2422_s28 + $0x30] sm:$0xff]   ;;  %v2178_v36 = vld [vmem:[%s2422_s28 + $0x58] sm:$0xff]  }
  0x45   : > { %v510_v26 = vrot.slane %v508_v21, 1  ;;  %v513_v27 = vrot.slane %v511_v22, 2  ;;  %v714_v32 = vld [vmem:[%s2407_s7] sm:$0x8]  ;;  %v2464_v37 = vld [vmem:[%s2407_s7 + $0x4] sm:$0xf] }
  0x46   : > { %1950 = vmatpush3.bf16.msra.mxu0 %v2168_v12  ;;  %v316_v20 = vor.u32 %v315_v16, %v311_v11  ;;  %1958 = vmatpush3.bf16.msra.mxu1 %v2169_v15  ;;  %v651_v34 = vshrl.u32 %v1780_v28, 16  ;;  %v654_v35 = vshll.u32 %v1780_v28, 16  ;;  %v2179_v38 = vld [vmem:[%s2422_s28 + $0x40] sm:$0xff]   ;;  %v1798_v42 = vcombine.low %v714_v32, %v2464_v37  ;;  %v2180_v43 = vld [vmem:[%s2422_s28 + $0x50] sm:$0xff]   ;;  %v2183_v44 = vld [vmem:[%s2422_s28 + $0x68] sm:$0xff]  }
  0x47   : > { %1963 = vmatprep.subr.bf16.mxu0 %v2289_v4  ;;  %1971 = vmatprep.subr.bf16.mxu1 %v2289_v4  ;;  %v514_v33 = vor.u32 %v513_v27, %v510_v26  ;;  %v582_v45 = vrot.slane %v1771_v39, 2  ;;  %v2184_v46 = vld [vmem:[%s2422_s28 + $0x78] sm:$0xff]   ;;  %v2185_v52 = vld [vmem:[%s2422_s28 + $0x60] sm:$0xff]   ;;  %v1789_v53 = vcombine.low %v714_v32, %v2442_v19  ;;  %v2186_v57 = vld [vmem:[%s2422_s28 + $0x70] sm:$0xff]  }
  0x48   : > { %v653_v40 = vrot.slane %v651_v34, 2  ;;  %v656_v41 = vrot.slane %v654_v35, 3  ;;  %v794_v48 = vshrl.u32 %v1798_v42, 16  ;;  %v797_v49 = vshll.u32 %v1798_v42, 16  ;;  %v2482_v50 = vld [vmem:[%s2407_s7 + $0x8] sm:$0xf] }
  0x49   : > { %1952 = vmatmul.mubr.msk.bf16.vlgmr.msra.gmra.mxu0 %vm329_vm2, %v316_v20  ;;  %1960 = vmatmul.mubr.msk.bf16.vlgmr.msra.gmra.mxu1 %vm329_vm2, %v289_v3  ;;  %v1811_v51 = vld [vmem:[%s2407_s7 + $0xc] sm:$0x1]  ;;  %v725_v58 = vrot.slane %v1789_v53, 3  ;;  %v2191_v63 = vld [vmem:[%s2422_s28 + $0x80] sm:$0xff]   ;;  %v2192_v2 = vld [vmem:[%s2422_s28 + $0x10] sm:$0xff]  }
  0x4a   : > { %1964 = vmatpush3.bf16.msra.mxu0 %v2171_v17  ;;  %1972 = vmatpush3.bf16.msra.mxu1 %v2172_v23  ;;  %v657_v47 = vor.u32 %v656_v41, %v653_v40  ;;  %v796_v54 = vrot.slane %v794_v48, 3  ;;  %v799_v55 = vrot.slane %v797_v49, 4  ;;  %v1816_v56 = vcombine.low %v2482_v50, %v1811_v51  ;;  %v2189_v60 = vld [vmem:[%s2422_s28 + $0x88] sm:$0xff]   ;;  %v2190_v62 = vld [vmem:[%s2422_s28 + $0x18] sm:$0xff]   ;;  %v2196_v10 = vld [vmem:[%s2422_s28] sm:$0xff]  }
  0x4b   : > { %1965 = vmatprep.subr.bf16.mxu0 %v2289_v4  ;;  %1973 = vmatprep.subr.bf16.mxu1 %v2289_v4  ;;  %v2194_v3 = vld [vmem:[%s2422_s28 + $0x8] sm:$0xff]   ;;  %v2197_v12 = vld [vmem:[%s2422_s28 + $0x20] sm:$0xff]   ;;  %v2200_v16 = vld [vmem:[%s2422_s28 + $0x38] sm:$0xff]  }
  0x4c   : > { %1967 = vmatprep.mubr.msk.bf16.mxu0 %vm2290_vm1, %v2289_v4  ;;  %1975 = vmatprep.mubr.msk.bf16.mxu1 %vm2290_vm1, %v2289_v4  ;;  %v800_v59 = vor.u32 %v799_v55, %v796_v54  ;;  %v943_v61 = vshll.u32 %v1816_v56, 16  ;;  %v941_v0 = vshrl.u32 %v1816_v56, 16  ;;  %v1832_v6 = vld [vmem:[%s2407_s7 + $0xc] sm:$0x3]  ;;  %v1823_v8 = vld [vmem:[%s2407_s7 + $0x8] sm:$0xe] }
  0x4d   : > { %v2195_v7 = vld [vmem:[%s2422_s28 + $0x28] sm:$0xff]   ;;  %v1837_v9 = vcombine.low %v1823_v8, %v1832_v6  ;;  %v1828_v11 = vcombine.low %v1823_v8, %v1811_v51  ;;  %v2202_v23 = vld [vmem:[%s2422_s28 + $0x30] sm:$0xff]   ;;  %v2203_v25 = vld [vmem:[%s2422_s28 + $0x40] sm:$0xff]  }
  0x4e   : > { %1966 = vmatpush3.bf16.msra.mxu0 %v2173_v24  ;;  %1974 = vmatpush3.bf16.msra.mxu1 %v2174_v29  ;;  %v945_v1 = vrot.slane %v943_v61, 1  ;;  %v1850_v17 = vld [vmem:[%s2407_s7 + $0xc] sm:$0x7]  ;;  %v1841_v19 = vld [vmem:[%s2407_s7 + $0x8] sm:$0xc]  ;;  %v2209_v39 = vld [vmem:[%s2422_s28 + $0x60] sm:$0xff]  }
  0x4f   : > { %1979 = vmatprep.subr.bf16.mxu0 %v2289_v4  ;;  %1987 = vmatprep.subr.bf16.mxu1 %v2289_v4  ;;  %v1131_v13 = vshrl.u32 %v1837_v9, 16  ;;  %v1134_v14 = vshll.u32 %v1837_v9, 16  ;;  %v1065_v15 = vrot.slane %v1828_v11, 1  ;;  %v2201_v18 = vld [vmem:[%s2422_s28 + $0x48] sm:$0xff]   ;;  %v1855_v22 = vcombine.low %v1841_v19, %v1850_v17  ;;  %v2214_v48 = vld [vmem:[%s2422_s28 + $0x70] sm:$0xff]   ;;  %v2215_v49 = vld [vmem:[%s2422_s28 + $0x80] sm:$0xff]  }
  0x50   : > { %v946_v5 = vor.u32 %v945_v1, %v941_v0  ;;  %v1846_v24 = vcombine.low %v1841_v19, %v1832_v6  ;;  %v2207_v32 = vld [vmem:[%s2422_s28 + $0x68] sm:$0xff]  }
  0x51   : > { %1968 = vmatmul.mubr.msk.bf16.vlgmr.msra.gmra.mxu0 %vm329_vm2, %v439_v30  ;;  %1976 = vmatmul.mubr.msk.bf16.vlgmr.msra.gmra.mxu1 %vm329_vm2, %v514_v33  ;;  %v1133_v20 = vrot.slane %v1131_v13, 1  ;;  %v1136_v21 = vrot.slane %v1134_v14, 2  ;;  %v1268_v27 = vshrl.u32 %v1855_v22, 16  ;;  %v1271_v28 = vshll.u32 %v1855_v22, 16  ;;  %v2206_v30 = vld [vmem:[%s2422_s28 + $0x58] sm:$0xff]  }
  0x52   : > { %1980 = vmatpush3.bf16.msra.mxu0 %v2177_v31  ;;  %1988 = vmatpush3.bf16.msra.mxu1 %v2178_v36  ;;  %v1202_v29 = vrot.slane %v1846_v24, 2  ;;  %v1868_v31 = vld [vmem:[%s2407_s7 + $0xc] sm:$0xf]  ;;  %v1859_v33 = vld [vmem:[%s2407_s7 + $0x8] sm:$0x8] }
  0x53   : > { %1981 = vmatprep.subr.bf16.mxu0 %v2289_v4  ;;  %1989 = vmatprep.subr.bf16.mxu1 %v2289_v4  ;;  %v1137_v26 = vor.u32 %v1136_v21, %v1133_v20  ;;  %v1270_v34 = vrot.slane %v1268_v27, 2  ;;  %v1273_v35 = vrot.slane %v1271_v28, 3  ;;  %v1873_v36 = vcombine.low %v1859_v33, %v1868_v31  ;;  %v920_v27 = vld [vmem:[#allocation2] sm:$0xff] }
  0x54   : > { %1983 = vmatprep.mubr.msk.bf16.mxu0 %vm2290_vm1, %v2289_v4  ;;  %1991 = vmatprep.mubr.msk.bf16.mxu1 %vm2290_vm1, %v2289_v4 }
  0x55   : > { %v1274_v40 = vor.u32 %v1273_v35, %v1270_v34  ;;  %v1405_v41 = vshrl.u32 %v1873_v36, 16  ;;  %v1408_v42 = vshll.u32 %v1873_v36, 16 }
  0x56   : > { %1982 = vmatpush3.bf16.msra.mxu0 %v2179_v38  ;;  %1990 = vmatpush3.bf16.msra.mxu1 %v2180_v43  ;;  %v1864_v38 = vcombine.low %v1859_v33, %v1850_v17 }
  0x57   : > { %1995 = vmatprep.subr.bf16.mxu0 %v2289_v4  ;;  %2003 = vmatprep.subr.bf16.mxu1 %v2289_v4 }
  0x58   : > { %v1339_v43 = vrot.slane %v1864_v38, 3 }
  0x59   : > { %1984 = vmatmul.mubr.msk.bf16.vlgmr.msra.gmra.mxu0 %vm329_vm2, %v582_v45  ;;  %1992 = vmatmul.mubr.msk.bf16.vlgmr.msra.gmra.mxu1 %vm329_vm2, %v657_v47  ;;  %v2213_v45 = vld [vmem:[%s2422_s28 + $0x88] sm:$0xff]   ;;  %v1410_v47 = vrot.slane %v1408_v42, 4 }
  0x5a   : > { %1996 = vmatpush3.bf16.msra.mxu0 %v2183_v44  ;;  %2004 = vmatpush3.bf16.msra.mxu1 %v2184_v46  ;;  %v2212_v44 = vld [vmem:[%s2422_s28 + $0x78] sm:$0xff]   ;;  %v1407_v46 = vrot.slane %v1405_v41, 3 }
  0x5b   : > { %1997 = vmatprep.subr.bf16.mxu0 %v2289_v4  ;;  %2005 = vmatprep.subr.bf16.mxu1 %v2289_v4 }
  0x5c   : > { %1999 = vmatprep.mubr.msk.bf16.mxu0 %vm2290_vm1, %v2289_v4  ;;  %2007 = vmatprep.mubr.msk.bf16.mxu1 %vm2290_vm1, %v2289_v4 }
  0x5e   : > { %1998 = vmatpush3.bf16.msra.mxu0 %v2185_v52  ;;  %2006 = vmatpush3.bf16.msra.mxu1 %v2186_v57 }
  0x5f   : > { %2011 = vmatprep.subr.bf16.mxu0 %v2289_v4  ;;  %2019 = vmatprep.subr.bf16.mxu1 %v2289_v4 }
  0x61   : > { %2000 = vmatmul.mubr.msk.bf16.vlgmr.msra.gmra.mxu0 %vm329_vm2, %v725_v58  ;;  %2008 = vmatmul.mubr.msk.bf16.vlgmr.msra.gmra.mxu1 %vm329_vm2, %v800_v59 }
  0x62   : > { %2012 = vmatpush3.bf16.msra.mxu0 %v2189_v60  ;;  %2020 = vmatpush3.bf16.msra.mxu1 %v2190_v62 }
  0x63   : > { %2013 = vmatprep.subr.bf16.mxu0 %v2289_v4  ;;  %2021 = vmatprep.subr.bf16.mxu1 %v2289_v4 }
  0x64   : > { %2015 = vmatprep.mubr.msk.bf16.mxu0 %vm2290_vm1, %v2289_v4  ;;  %2023 = vmatprep.mubr.msk.bf16.mxu1 %vm2290_vm1, %v2289_v4 }
  0x66   : > { %2014 = vmatpush3.bf16.msra.mxu0 %v2191_v63  ;;  %2022 = vmatpush3.bf16.msra.mxu1 %v2192_v2 }
  0x67   : > { %2027 = vmatprep.subr.bf16.mxu0 %v2289_v4  ;;  %2035 = vmatprep.subr.bf16.mxu1 %v2289_v4 }
  0x69   : > { %2016 = vmatmul.mubr.msk.bf16.vlgmr.msra.gmra.mxu0 %vm329_vm2, %v2464_v37  ;;  %2024 = vmatmul.mubr.msk.bf16.vlgmr.msra.gmra.mxu1 %vm329_vm2, %v946_v5  ;;  %v2208_v37 = vld [vmem:[%s2422_s28 + $0x50] sm:$0xff]  }
  0x6a   : > { %2028 = vmatpush3.bf16.msra.mxu0 %v2194_v3  ;;  %2036 = vmatpush3.bf16.msra.mxu1 %v2195_v7 }
  0x6b   : > { %2029 = vmatprep.subr.bf16.mxu0 %v2289_v4  ;;  %2037 = vmatprep.subr.bf16.mxu1 %v2289_v4 }
  0x6c   : > { %2031 = vmatprep.mubr.msk.bf16.mxu0 %vm2290_vm1, %v2289_v4  ;;  %2039 = vmatprep.mubr.msk.bf16.mxu1 %vm2290_vm1, %v2289_v4 }
  0x6e   : > { %2030 = vmatpush3.bf16.msra.mxu0 %v2196_v10  ;;  %2038 = vmatpush3.bf16.msra.mxu1 %v2197_v12 }
  0x6f   : > { %2043 = vmatprep.subr.bf16.mxu0 %v2289_v4  ;;  %2051 = vmatprep.subr.bf16.mxu1 %v2289_v4 }
  0x71   : > { %2032 = vmatmul.mubr.msk.bf16.vlgmr.msra.gmra.mxu0 %vm329_vm2, %v2482_v50  ;;  %2040 = vmatmul.mubr.msk.bf16.vlgmr.msra.gmra.mxu1 %vm329_vm2, %v1065_v15  ;;  %v1411_v50 = vor.u32 %v1410_v47, %v1407_v46 }
  0x72   : > { %2044 = vmatpush3.bf16.msra.mxu0 %v2200_v16  ;;  %2052 = vmatpush3.bf16.msra.mxu1 %v2201_v18 }
  0x73   : > { %2045 = vmatprep.subr.bf16.mxu0 %v2289_v4  ;;  %2053 = vmatprep.subr.bf16.mxu1 %v2289_v4 }
  0x74   : > { %2047 = vmatprep.mubr.msk.bf16.mxu0 %vm2290_vm1, %v2289_v4  ;;  %2055 = vmatprep.mubr.msk.bf16.mxu1 %vm2290_vm1, %v2289_v4 }
  0x76   : > { %2046 = vmatpush3.bf16.msra.mxu0 %v2202_v23  ;;  %2054 = vmatpush3.bf16.msra.mxu1 %v2203_v25 }
  0x77   : > { %2059 = vmatprep.subr.bf16.mxu0 %v2289_v4  ;;  %2067 = vmatprep.subr.bf16.mxu1 %v2289_v4 }
  0x79   : > { %2048 = vmatmul.mubr.msk.bf16.vlgmr.msra.gmra.mxu0 %vm329_vm2, %v1137_v26  ;;  %2056 = vmatmul.mubr.msk.bf16.vlgmr.msra.gmra.mxu1 %vm329_vm2, %v1202_v29 }
  0x7a   : > { %2060 = vmatpush3.bf16.msra.mxu0 %v2206_v30  ;;  %2068 = vmatpush3.bf16.msra.mxu1 %v2207_v32 }
  0x7b   : > { %2061 = vmatprep.subr.bf16.mxu0 %v2289_v4  ;;  %2069 = vmatprep.subr.bf16.mxu1 %v2289_v4 }
  0x7c   : > { %2063 = vmatprep.mubr.msk.bf16.mxu0 %vm2290_vm1, %v2289_v4  ;;  %2071 = vmatprep.mubr.msk.bf16.mxu1 %vm2290_vm1, %v2289_v4 }
  0x7e   : > { %2062 = vmatpush3.bf16.msra.mxu0 %v2208_v37  ;;  %2070 = vmatpush3.bf16.msra.mxu1 %v2209_v39 }
  0x7f   : > { %2075 = vmatprep.subr.bf16.mxu0 %v2289_v4  ;;  %2083 = vmatprep.subr.bf16.mxu1 %v2289_v4 }
  0x81   : > { %2064 = vmatmul.mubr.msk.bf16.vlgmr.msra.gmra.mxu0 %vm329_vm2, %v1274_v40  ;;  %2072 = vmatmul.mubr.msk.bf16.vlgmr.msra.gmra.mxu1 %vm329_vm2, %v1339_v43 }
  0x82   : > { %2076 = vmatpush3.bf16.msra.mxu0 %v2212_v44  ;;  %2084 = vmatpush3.bf16.msra.mxu1 %v2213_v45 }
  0x83   : > { %2077 = vmatprep.subr.bf16.mxu0 %v2289_v4  ;;  %2085 = vmatprep.subr.bf16.mxu1 %v2289_v4 }
  0x84   : > { %2079 = vmatprep.mubr.msk.bf16.mxu0 %vm2290_vm1, %v2289_v4  ;;  %2087 = vmatprep.mubr.msk.bf16.mxu1 %vm2290_vm1, %v2289_v4 }
  0x86   : > { %2078 = vmatpush3.bf16.msra.mxu0 %v2214_v48  ;;  %2086 = vmatpush3.bf16.msra.mxu1 %v2215_v49 }
  0x89   : > { %2080 = vmatmul.mubr.msk.bf16.vlgmr.msra.gmra.mxu0 %vm329_vm2, %v1411_v50  ;;  %2088 = vmatmul.mubr.msk.bf16.vlgmr.msra.gmra.mxu1 %vm329_vm2, %v1868_v31 }
 0x109   : > { %v367_v51 = vpop.f32.mrf.mxu0  ;;  %v422_v52 = vpop.f32.mrf.mxu1 }
 0x10a   : > { %v423_v63 = vadd.f32 %v422_v52, %v367_v51 }
 0x10b   : > { %v1953_v53 = vpop.f32.mrf.mxu0  ;;  %v1961_v54 = vpop.f32.mrf.mxu1 }
 0x10d   : > { %v370_v55 = vpop.f32.mrf.mxu0  ;;  %v425_v56 = vpop.f32.mrf.mxu1 }
 0x10f   : > { %v1954_v57 = vpop.f32.mrf.mxu0  ;;  %v1962_v58 = vpop.f32.mrf.mxu1 }
 0x111   : > { %v489_v59 = vpop.f32.mrf.mxu0  ;;  %v564_v60 = vpop.f32.mrf.mxu1 }
 0x112   : > { %v495_v2 = vadd.f32 %v489_v59, %v423_v63 }
 0x113   : > { %v1969_v61 = vpop.f32.mrf.mxu0  ;;  %v1977_v62 = vpop.f32.mrf.mxu1 }
 0x114   : > { %v570_v8 = vadd.f32 %v564_v60, %v495_v2 }
 0x115   : > { %v492_v4 = vpop.f32.mrf.mxu0  ;;  %v567_v0 = vpop.f32.mrf.mxu1 }
 0x117   : > { %v1970_v1 = vpop.f32.mrf.mxu0  ;;  %v1978_v3 = vpop.f32.mrf.mxu1 }
 0x119   : > { %v632_v5 = vpop.f32.mrf.mxu0  ;;  %v707_v6 = vpop.f32.mrf.mxu1 }
 0x11a   : > { %v638_v11 = vadd.f32 %v632_v5, %v570_v8 }
 0x11b   : > { %v1985_v7 = vpop.f32.mrf.mxu0  ;;  %v1993_v9 = vpop.f32.mrf.mxu1 }
 0x11c   : > { %v713_v16 = vadd.f32 %v707_v6, %v638_v11  ;;  %v1529_v6 = vld [vmem:[#allocation2 + $0x8] sm:$0xff] }
 0x11d   : > { %v635_v10 = vpop.f32.mrf.mxu0  ;;  %v710_v12 = vpop.f32.mrf.mxu1 }
 0x11f   : > { %v1986_v13 = vpop.f32.mrf.mxu0  ;;  %v1994_v14 = vpop.f32.mrf.mxu1 }
 0x121   : > { %v775_v15 = vpop.f32.mrf.mxu0  ;;  %v850_v17 = vpop.f32.mrf.mxu1 }
 0x122   : > { %v781_v19 = vadd.f32 %v775_v15, %v713_v16 }
 0x123   : > { %v2001_v18 = vpop.f32.mrf.mxu0  ;;  %v2009_v20 = vpop.f32.mrf.mxu1 }
 0x124   : > { %v856_v24 = vadd.f32 %v850_v17, %v781_v19 }
 0x125   : > { %v778_v21 = vpop.f32.mrf.mxu0  ;;  %v853_v22 = vpop.f32.mrf.mxu1 }
 0x127   : > { %v2002_v23 = vpop.f32.mrf.mxu0  ;;  %v2010_v25 = vpop.f32.mrf.mxu1 }
 0x129   : > { %v913_v26 = vpop.f32.mrf.mxu0  ;;  %v996_v29 = vpop.f32.mrf.mxu1 }
 0x12a   : > { %v919_v28 = vadd.f32 %v913_v26, %v856_v24 }
 0x12b   : > { %v2017_v30 = vpop.f32.mrf.mxu0  ;;  %v2025_v32 = vpop.f32.mrf.mxu1 }
 0x12c   : > { %v921_v31 = vadd.f32 %v920_v27, %v919_v28 }
 0x12d   : > { %v916_v33 = vpop.f32.mrf.mxu0  ;;  %v999_v34 = vpop.f32.mrf.mxu1 }
 0x12e   : > { %923 = vst.msk [vmem:[#allocation2] sm:$0xff] %vm922_vm3, %v921_v31 }
 0x12f   : > { %v2018_v35 = vpop.f32.mrf.mxu0  ;;  %v2026_v36 = vpop.f32.mrf.mxu1 }
 0x131   : > { %v1051_v37 = vpop.f32.mrf.mxu0  ;;  %v1115_v38 = vpop.f32.mrf.mxu1 }
 0x132   : > { %v1052_v44 = vadd.f32 %v1051_v37, %v996_v29 }
 0x133   : > { %v2033_v39 = vpop.f32.mrf.mxu0  ;;  %v2041_v40 = vpop.f32.mrf.mxu1 }
 0x134   : > { %v1121_v49 = vadd.f32 %v1115_v38, %v1052_v44 }
 0x135   : > { %v1054_v41 = vpop.f32.mrf.mxu0  ;;  %v1118_v42 = vpop.f32.mrf.mxu1 }
 0x137   : > { %v2034_v43 = vpop.f32.mrf.mxu0  ;;  %v2042_v45 = vpop.f32.mrf.mxu1 }
 0x139   : > { %v1187_v46 = vpop.f32.mrf.mxu0  ;;  %v1252_v47 = vpop.f32.mrf.mxu1 }
 0x13a   : > { %v1193_v52 = vadd.f32 %v1187_v46, %v1121_v49 }
 0x13b   : > { %v2049_v48 = vpop.f32.mrf.mxu0  ;;  %v2057_v50 = vpop.f32.mrf.mxu1 }
 0x13c   : > { %v1258_v57 = vadd.f32 %v1252_v47, %v1193_v52 }
 0x13d   : > { %v1190_v51 = vpop.f32.mrf.mxu0  ;;  %v1255_v53 = vpop.f32.mrf.mxu1 }
 0x13f   : > { %v2050_v54 = vpop.f32.mrf.mxu0  ;;  %v2058_v55 = vpop.f32.mrf.mxu1 }
 0x141   : > { %v1324_v56 = vpop.f32.mrf.mxu0  ;;  %v1389_v58 = vpop.f32.mrf.mxu1 }
 0x142   : > { %v1330_v60 = vadd.f32 %v1324_v56, %v1258_v57 }
 0x143   : > { %v2065_v59 = vpop.f32.mrf.mxu0  ;;  %v2073_v61 = vpop.f32.mrf.mxu1 }
 0x144   : > { %v1395_v0 = vadd.f32 %v1389_v58, %v1330_v60 }
 0x145   : > { %v1327_v62 = vpop.f32.mrf.mxu0  ;;  %v1392_v4 = vpop.f32.mrf.mxu1 }
 0x147   : > { %v2066_v63 = vpop.f32.mrf.mxu0  ;;  %v2074_v1 = vpop.f32.mrf.mxu1 }
 0x149   : > { %v1461_v2 = vpop.f32.mrf.mxu0  ;;  %v1521_v5 = vpop.f32.mrf.mxu1 }
 0x14a   : > { %v1467_v3 = vadd.f32 %v1461_v2, %v1395_v0 }
 0x14b   : > { %v2081_v7 = vpop.f32.mrf.mxu0  ;;  %v2089_v9 = vpop.f32.mrf.mxu1 }
 0x14c   : > { %v1527_v8 = vadd.f32 %v1521_v5, %v1467_v3 }
 0x14d   : > { %v1464_v10 = vpop.f32.mrf.mxu0  ;;  %v1524_v12 = vpop.f32.mrf.mxu1 }
 0x14e   : > { %v1530_v11 = vadd.f32 %v1529_v6, %v1527_v8 }
 0x14f   : > { %v2082_v13 = vpop.f32.mrf.mxu0  ;;  %v2090_v14 = vpop.f32.mrf.mxu1 }
 0x150   : > { %1531 = vst.msk [vmem:[#allocation2 + $0x8] sm:$0xff] %vm922_vm3, %v1530_v11 }
 0x151 PF: > { %p1884_p4 = scmp.ne.s32.totalorder %s2270_s19, 8 }
 0x153   : > { %1535 = sbr.rel (%p1884_p4) target bundleno = 355 (0x163), region = 89 }
 0x158   : > { %v1536_v15 = vld [vmem:[#allocation2] sm:$0xff]  ;;  %v1537_v19 = vld [vmem:[#allocation2 + $0x8] sm:$0xff]  ;;  %vm1560_vm4 = vcmask 125952  }
 0x159   : > { %v1885_v16 = vld [vmem:[%s2626_s2] ss:$0 sm:$0xff] }
 0x15a   : > { %v1886_v17 = vld [vmem:[%s2627_s3] ss:$0 sm:$0xff]  ;;  %v1545_v18 = vmul.f32 %v1885_v16, %v1536_v15  ;;  %v1546_v20 = vmul.f32 %v1885_v16, %v1537_v19 }
 0x15c   : > { %v1554_v21 = vadd.f32 %v1886_v17, %v1545_v18  ;;  %v1555_v22 = vadd.f32 %v1886_v17, %v1546_v20 }
 0x15e   : > { %v1556_v23 = vmax.f32 %v1554_v21, 0.0  ;;  %v1557_v24 = vmax.f32 %v1555_v22, 0.0 }
 0x160   : > { %v1558_v25 = vpack.c.bf16 %v1556_v23, %v1556_v23  ;;  %v1559_v26 = vpack.c.bf16 %v1557_v24, %v1557_v24 }
 0x162   : > { %1561 = vst.msk [vmem:[%s2409_s11] sm:$0xf] %vm1560_vm4, %v1558_v25  ;;  %1562 = vst.msk [vmem:[%s2409_s11 + $0x4] sm:$0xf] %vm1560_vm4, %v1559_v26 }
 0x163 PF: > { %1569 = sbr.rel (!%p2386_p9) target bundleno = 363 (0x16b), region = 93  ;;  %s1888_s19 = sshll.u32 (%p2386_p9), %s2274_s20, 2 }
 0x164   : > { %s1571_s13 = scalar_lea.vmem (%p2386_p9), %s2628_s4, %s1888_s19 }
 0x169   : > { %v1588_v27 = vld [vmem:[%s2409_s11] sm:$0xf]  ;;  %v1590_v28 = vld [vmem:[%s2409_s11 + $0x4] sm:$0xf] }
 0x16a   : > { %1589 = vst [vmem:[%s1571_s13] sm:$0xf] %v1588_v27  ;;  %1591 = vst [vmem:[%s1571_s13 + $0x20] sm:$0xf] %v1590_v28 }
 0x16b PF: > { %s14_s23 = sadd.s32 1, %s2286_s23   ;;  %s2631_s15 = smov %s2258_s16 }
 0x16c   : > { %p11_p5 = scmp.ge.s32.totalorder %s14_s23, 74   ;;  %s2632_s16 = smov %s2391_s9 }
 0x16d   : > { %s2633_s17 = smov %s2266_s18  ;;  %s2634_s18 = smov %s2394_s10 }
 0x16e   : > { %s2635_s19 = smov %s2278_s21  ;;  %s2636_s20 = smov %s2282_s22 }
 0x16f   : > { %s2637_s21 = smov %s2640_s24  ;;  %s2638_s22 = smov %s2644_s25 }
 0x170   :  { %13 = sbr.rel (!%p11_p5) target bundleno = 5 (0x5), region = 176 }

// kernel: routenet_fcn_forward.19
= control target key start
LH: loop header
LB: loop body
LE: loop exit
PB: predicated region body
PF: predicated region fallthrough
CT: control target
= control target key end

     0   :  { %s1696_s15 = smov 0   ;;  %s1698_s16 = smov 0   ;;  %s1956_s0 = inlined_call_operand.vmem [shape: bf16[2,12,12,48], index: 0, kind: input, shape index: {}]   ;;  %s1957_s1 = inlined_call_operand.vmem [shape: bf16[5,5,48,16], index: 1, kind: input, shape index: {}]   ;;  %s1958_s2 = inlined_call_operand.vmem [shape: f32[1,16], index: 2, kind: input, shape index: {}]   ;;  %s1959_s3 = inlined_call_operand.vmem [shape: f32[1,16], index: 3, kind: input, shape index: {}]   ;;  %s1960_s4 = inlined_call_operand.vmem [shape: bf16[2,8,8,16], index: 4, kind: output, shape index: {}]  }
   0x1   :  { %s1700_s17 = smov 0   ;;  %s1702_s18 = smov 0  }
   0x2   :  { %s1704_s19 = smov 0   ;;  %s1706_s20 = smov 0  }
   0x3   :  { %s1708_s21 = smov 0   ;;  %s1710_s22 = smov 0  }
   0x4   :  { %s1712_s23 = smov 0  }
   0x5 LB: > { %s23_s24 = sadd.s32 1, %s1658_s21  ;;  %s26_s25 = sadd.s32 1, %s1662_s22  ;;  %s1666_s23 = sphi %s1712_s23, %s14_s23   ;;  %s1662_s22 = sphi %s1710_s22, %s1970_s22   ;;  %s1658_s21 = sphi %s1708_s21, %s1969_s21   ;;  %s1654_s20 = sphi %s1706_s20, %s1968_s20   ;;  %s1650_s19 = sphi %s1704_s19, %s1967_s19   ;;  %s1646_s18 = sphi %s1702_s18, %s1966_s18   ;;  %s1642_s17 = sphi %s1700_s17, %s1965_s17   ;;  %s1638_s16 = sphi %s1698_s16, %s1964_s16   ;;  %s1634_s15 = sphi %s1696_s15, %s1963_s15  }
   0x6   : > { %p24_p0 = scmp.ge.s32.totalorder %s23_s24, 5  ;;  %s1217_s26 = sadd.s32 4294967295, %s1666_s23  }
   0x7   : > { %s30_s27 = sadd.s32 %s1658_s21, %s1662_s22  ;;  %p42_p1 = scmp.ne.s32.totalorder %s1646_s18, %s1642_s17 }
   0x8   : > { %s1972_s24 = smov (%p24_p0, %s23_s24), 0  ;;  %s1974_s25 = smov (!%p24_p0, %s26_s25), %s1662_s22 }
   0x9   : > { %p43_p2 = scmp.eq.s32.totalorder %s1666_s23, 0  ;;  %p28_p3 = scmp.ge.s32.totalorder %s1974_s25, 8 }
   0xa   : > { %s35_s28 = sadd.s32 1, %s1646_s18  ;;  %p134_p5 = scmp.ne.s32.totalorder %s1638_s16, %s1634_s15 }
   0xb   : > { %p1753_p4 = por %p43_p2, %p42_p1  ;;  %s1976_s25 = smov (%p28_p3, %s1974_s25), 0 }
   0xc   : > { %s124_s30 = sadd.s32 1, %s1638_s16  ;;  %p135_p6 = scmp.eq.s32.totalorder %s1217_s26, 39 }
   0xd   : > { %s31_s5 = sadd.s32 %s1976_s25, %s1972_s24  ;;  %s121_s6 = ssub.s32 %s1662_s22, %s1976_s25 }
   0xe   : > { %s32_s7 = ssub.s32 %s30_s27, %s31_s5  ;;  %p122_p7 = scmp.eq.s32.totalorder %s121_s6, 0 }
   0xf   : > { %p33_p8 = scmp.eq.s32.totalorder %s32_s7, 0  ;;  %p1766_p9 = por %p135_p6, %p134_p5 }
  0x10   : > { %s1771_s9 = scalar_select %p122_p7, %s1638_s16, %s124_s30  }
  0x11   : > { %s1774_s10 = scalar_select %p33_p8, %s1646_s18, %s35_s28  }
  0x12   : > { %p1220_p10 = scmp.ge.s32.totalorder %s1666_s23, 40 }
  0x14   : > { %166 = sbr.rel (%p1220_p10) target bundleno = 31 (0x1f), region = 28 }
  0x19   : > { %169 = sbr.rel (!%p1753_p4) target bundleno = 31 (0x1f), region = 32  ;;  %s171_s11 = sand.u32 (%p1753_p4), 1, %s1646_s18  }
  0x1a   : > { %s1341_s12 = sshll.u32 (%p1753_p4), %s30_s27, 3  ;;  %s1221_s13 = sshll.u32 (%p1753_p4), %s171_s11, 4 }
  0x1b   : > { %s177_s5 = scalar_lea.vmem (%p1753_p4), %s1956_s0, %s1341_s12  ;;  %s173_s30 = scalar_lea.vmem (%p1753_p4), [#allocation3], %s1221_s13 }
  0x1c   : > { %v194_v0 = vld [vmem:[%s177_s5] sm:$0xff] (%p1753_p4)  }
  0x1d   : > { %v198_v1 = vld [vmem:[%s177_s5 + $0x60] sm:$0xff] (%p1753_p4)   ;;  %195 = vst [vmem:[%s173_s30] sm:$0xff] (%p1753_p4), %v194_v0  }
  0x1e   : > { %199 = vst [vmem:[%s173_s30 + $0x8] sm:$0xff] %v198_v1  }
  0x1f PF: > { %p1224_p11 = scmp.ge.s32.totalorder %s1666_s23, 1  ;;  %p232_p12 = scmp.lt.s32.totalorder %s1666_s23, 41 }
  0x21   : > { %p233_p13 = pnand %p1224_p11, %p232_p12 }
  0x22   : > { %s239_s27 = sand.u32 (!%p233_p13), 1, %s1642_s17   ;;  %s260_s28 = sand.u32 (!%p233_p13), 1, %s1634_s15  }
  0x23   : > { %236 = sbr.rel (%p233_p13) target bundleno = 334 (0x14e), region = 73  ;;  %s1225_s29 = sshll.u32 (!%p233_p13), %s239_s27, 4 }
  0x24   : > { %s1226_s6 = sshll.u32 (!%p233_p13), %s260_s28, 3  ;;  %s1787_s7 = scalar_lea.vmem (!%p233_p13), [#allocation3], %s1225_s29 }
  0x25   : > { %s1789_s11 = scalar_lea.vmem (!%p233_p13), [#allocation4], %s1226_s6  ;;  %p1227_p0 = scmp.ne.s32.totalorder (!%p233_p13), %s1650_s19, 0 }
  0x28   : > { %268 = sbr.rel (%p1227_p0) target bundleno = 47 (0x2f), region = 81 }
  0x2d   : > { %vm269_vm0 = vcmask 130048   ;;  %v1668_v2 = vmov 0.0  }
  0x2e   : > { %270 = vst.msk [vmem:[#allocation2] sm:$0xff] %vm269_vm0, %v1668_v2  ;;  %271 = vst.msk [vmem:[#allocation2 + $0x8] sm:$0xff] %vm269_vm0, %v1668_v2 }
  0x2f PF: > { %s1342_s12 = smul.u32 120, %s1650_s19  ;;  %v272_v3 = vld [vmem:[%s1787_s7] sm:$0xf]  ;;  %v1669_v4 = vmov 0.0   ;;  %v282_v5 = vld [vmem:[%s1787_s7 + $0x4] sm:$0x1] }
  0x30   : > { %1383 = vmatprep.subr.bf16.mxu0 %v1669_v4  ;;  %1393 = vmatprep.subr.bf16.mxu1 %v1669_v4  ;;  %vm1670_vm1 = vmmov 0   ;;  %v1236_v6 = vcombine.low %v272_v3, %v282_v5  ;;  %v427_v12 = vld [vmem:[%s1787_s7] sm:$0xe]  ;;  %v1814_v13 = vld [vmem:[%s1787_s7 + $0x4] sm:$0x3]  ;;  %vm322_vm2 = vcmask 392192  }
  0x31   : > { %s1800_s13 = scalar_lea.vmem %s1957_s1, %s1342_s12  ;;  %1389 = vmatprep.mubr.msk.bf16.mxu0 %vm1670_vm1, %v1669_v4  ;;  %1399 = vmatprep.mubr.msk.bf16.mxu1 %vm1670_vm1, %v1669_v4  ;;  %v1264_v19 = vcombine.low %v427_v12, %v1814_v13  ;;  %v1252_v26 = vcombine.low %v427_v12, %v282_v5  ;;  %v1836_v28 = vld [vmem:[%s1787_s7 + $0x8] sm:$0xf]  ;;  %v1839_v29 = vld [vmem:[%s1787_s7 + $0xc] sm:$0x1]  ;;  %v586_v38 = vld [vmem:[%s1787_s7] sm:$0xc] }
  0x32   : > { %v1558_v7 = vld [vmem:[%s1800_s13 + $0x28] sm:$0xff]   ;;  %v1559_v8 = vld [vmem:[%s1800_s13 + $0x10] sm:$0xff]   ;;  %v1560_v9 = vld [vmem:[%s1800_s13 + $0x20] sm:$0xff]   ;;  %v300_v10 = vshll.u32 %v1236_v6, 16  ;;  %v298_v14 = vshrl.u32 %v1236_v6, 16  ;;  %v1289_v36 = vcombine.low %v1836_v28, %v1839_v29  ;;  %v1276_v42 = vcombine.low %v586_v38, %v1814_v13  ;;  %p1334_p1 = scmp.ne.s32.totalorder %s1650_s19, 4 }
  0x33   : > { %1384 = vmatpush3.bf16.msra.mxu0 %v1558_v7  ;;  %1394 = vmatpush3.bf16.msra.mxu1 %v1559_v8  ;;  %v1561_v11 = vld [vmem:[%s1800_s13 + $0x8] sm:$0xff]   ;;  %v1562_v16 = vld [vmem:[%s1800_s13 + $0x18] sm:$0xff]   ;;  %v1563_v17 = vld [vmem:[%s1800_s13] sm:$0xff]   ;;  %v517_v22 = vshrl.u32 %v1264_v19, 16  ;;  %v520_v24 = vshll.u32 %v1264_v19, 16  ;;  %v440_v33 = vrot.slane %v1252_v26, 1 }
  0x34   : > { %1385 = vmatprep.subr.bf16.mxu0 %v1669_v4  ;;  %1395 = vmatprep.subr.bf16.mxu1 %v1669_v4  ;;  %v302_v15 = vrot.slane %v300_v10, 1  ;;  %v1565_v20 = vld [vmem:[%s1800_s13 + $0x40] sm:$0xff]   ;;  %v1566_v21 = vld [vmem:[%s1800_s13 + $0x58] sm:$0xff]   ;;  %v1568_v25 = vld [vmem:[%s1800_s13 + $0x50] sm:$0xff]   ;;  %v689_v40 = vshll.u32 %v1289_v36, 16  ;;  %v687_v44 = vshrl.u32 %v1289_v36, 16 }
  0x35   : > { %v1567_v23 = vld [vmem:[%s1800_s13 + $0x38] sm:$0xff]   ;;  %v519_v27 = vrot.slane %v517_v22, 1  ;;  %v1569_v30 = vld [vmem:[%s1800_s13 + $0x30] sm:$0xff]   ;;  %v522_v31 = vrot.slane %v520_v24, 2  ;;  %v1570_v32 = vld [vmem:[%s1800_s13 + $0x48] sm:$0xff]   ;;  %v599_v47 = vrot.slane %v1276_v42, 2 }
  0x36   : > { %v303_v18 = vor.u32 %v302_v15, %v298_v14  ;;  %v1573_v35 = vld [vmem:[%s1800_s13 + $0x70] sm:$0xff]   ;;  %v1574_v37 = vld [vmem:[%s1800_s13 + $0x28] sm:$0xff]   ;;  %v1576_v41 = vld [vmem:[%s1800_s13 + $0x20] sm:$0xff]   ;;  %v691_v45 = vrot.slane %v689_v40, 1  ;;  %vm664_vm3 = vcmask 130048  }
  0x37   : > { %1386 = vmatpush3.bf16.msra.mxu0 %v1560_v9  ;;  %1396 = vmatpush3.bf16.msra.mxu1 %v1561_v11  ;;  %v523_v34 = vor.u32 %v522_v31, %v519_v27  ;;  %v1575_v39 = vld [vmem:[%s1800_s13 + $0x68] sm:$0xff]   ;;  %v1577_v43 = vld [vmem:[%s1800_s13 + $0x60] sm:$0xff]   ;;  %v1578_v46 = vld [vmem:[%s1800_s13 + $0x18] sm:$0xff]  }
  0x38   : > { %1387 = vmatprep.subr.bf16.mxu0 %v1669_v4  ;;  %1397 = vmatprep.subr.bf16.mxu1 %v1669_v4  ;;  %v692_v48 = vor.u32 %v691_v45, %v687_v44  ;;  %v1581_v49 = vld [vmem:[%s1800_s13 + $0x10] sm:$0xff]   ;;  %v1582_v50 = vld [vmem:[%s1800_s13 + $0x40] sm:$0xff]   ;;  %v1583_v51 = vld [vmem:[%s1800_s13 + $0x8] sm:$0xff]  }
  0x39   : > { %v1584_v52 = vld [vmem:[%s1800_s13 + $0x38] sm:$0xff]   ;;  %v1585_v54 = vld [vmem:[%s1800_s13] sm:$0xff]   ;;  %v1586_v57 = vld [vmem:[%s1800_s13 + $0x30] sm:$0xff]  }
  0x3a   : > { %v1298_v53 = vld [vmem:[%s1787_s7 + $0x8] sm:$0xe]  ;;  %v1310_v56 = vld [vmem:[%s1787_s7 + $0xc] sm:$0x3]  ;;  %v1590_v61 = vld [vmem:[%s1800_s13 + $0x70] sm:$0xff]  }
  0x3b   : > { %1388 = vmatpush3.bf16.msra.mxu0 %v1562_v16  ;;  %1398 = vmatpush3.bf16.msra.mxu1 %v1563_v17  ;;  %v1305_v55 = vcombine.low %v1298_v53, %v1839_v29  ;;  %v1317_v58 = vcombine.low %v1298_v53, %v1310_v56  ;;  %v1589_v60 = vld [vmem:[%s1800_s13 + $0x58] sm:$0xff]   ;;  %v1591_v0 = vld [vmem:[%s1800_s13 + $0x50] sm:$0xff]   ;;  %v1592_v1 = vld [vmem:[%s1800_s13 + $0x68] sm:$0xff]  }
  0x3c   : > { %1403 = vmatprep.subr.bf16.mxu0 %v1669_v4  ;;  %1413 = vmatprep.subr.bf16.mxu1 %v1669_v4  ;;  %v1322_v2 = vld [vmem:[%s1787_s7 + $0x8] sm:$0xc]  ;;  %v1594_v8 = vld [vmem:[%s1800_s13 + $0x60] sm:$0xff]  }
  0x3d   : > { %v825_v59 = vrot.slane %v1305_v55, 1  ;;  %v899_v62 = vshrl.u32 %v1317_v58, 16  ;;  %v902_v63 = vshll.u32 %v1317_v58, 16  ;;  %v1593_v6 = vld [vmem:[%s1800_s13 + $0x48] sm:$0xff]   ;;  %v1329_v7 = vcombine.low %v1322_v2, %v1310_v56 }
  0x3e   : > { %1390 = vmatmul.mubr.msk.bf16.vlgmr.msra.gmra.mxu0 %vm322_vm2, %v303_v18  ;;  %1400 = vmatmul.mubr.msk.bf16.vlgmr.msra.gmra.mxu1 %vm322_vm2, %v272_v3  ;;  %v1042_v53 = vld [vmem:[#allocation2 + $0x8] sm:$0xff] }
  0x3f   : > { %1404 = vmatpush3.bf16.msra.mxu0 %v1565_v20  ;;  %1414 = vmatpush3.bf16.msra.mxu1 %v1566_v21  ;;  %v901_v3 = vrot.slane %v899_v62, 1  ;;  %v904_v5 = vrot.slane %v902_v63, 2  ;;  %v978_v10 = vrot.slane %v1329_v7, 2 }
  0x40   : > { %1405 = vmatprep.subr.bf16.mxu0 %v1669_v4  ;;  %1415 = vmatprep.subr.bf16.mxu1 %v1669_v4 }
  0x41   : > { %1409 = vmatprep.mubr.msk.bf16.mxu0 %vm1670_vm1, %v1669_v4  ;;  %1419 = vmatprep.mubr.msk.bf16.mxu1 %vm1670_vm1, %v1669_v4  ;;  %v905_v9 = vor.u32 %v904_v5, %v901_v3 }
  0x43   : > { %1406 = vmatpush3.bf16.msra.mxu0 %v1567_v23  ;;  %1416 = vmatpush3.bf16.msra.mxu1 %v1568_v25 }
  0x44   : > { %1407 = vmatprep.subr.bf16.mxu0 %v1669_v4  ;;  %1417 = vmatprep.subr.bf16.mxu1 %v1669_v4 }
  0x47   : > { %1408 = vmatpush3.bf16.msra.mxu0 %v1569_v30  ;;  %1418 = vmatpush3.bf16.msra.mxu1 %v1570_v32  ;;  %v662_v30 = vld [vmem:[#allocation2] sm:$0xff] }
  0x48   : > { %1423 = vmatprep.subr.bf16.mxu0 %v1669_v4  ;;  %1433 = vmatprep.subr.bf16.mxu1 %v1669_v4 }
  0x4a   : > { %1410 = vmatmul.mubr.msk.bf16.vlgmr.msra.gmra.mxu0 %vm322_vm2, %v440_v33  ;;  %1420 = vmatmul.mubr.msk.bf16.vlgmr.msra.gmra.mxu1 %vm322_vm2, %v523_v34 }
  0x4b   : > { %1424 = vmatpush3.bf16.msra.mxu0 %v1573_v35  ;;  %1434 = vmatpush3.bf16.msra.mxu1 %v1574_v37 }
  0x4c   : > { %1425 = vmatprep.subr.bf16.mxu0 %v1669_v4  ;;  %1435 = vmatprep.subr.bf16.mxu1 %v1669_v4 }
  0x4d   : > { %1429 = vmatprep.mubr.msk.bf16.mxu0 %vm1670_vm1, %v1669_v4  ;;  %1439 = vmatprep.mubr.msk.bf16.mxu1 %vm1670_vm1, %v1669_v4 }
  0x4f   : > { %1426 = vmatpush3.bf16.msra.mxu0 %v1575_v39  ;;  %1436 = vmatpush3.bf16.msra.mxu1 %v1576_v41 }
  0x50   : > { %1427 = vmatprep.subr.bf16.mxu0 %v1669_v4  ;;  %1437 = vmatprep.subr.bf16.mxu1 %v1669_v4 }
  0x53   : > { %1428 = vmatpush3.bf16.msra.mxu0 %v1577_v43  ;;  %1438 = vmatpush3.bf16.msra.mxu1 %v1578_v46 }
  0x54   : > { %1443 = vmatprep.subr.bf16.mxu0 %v1669_v4  ;;  %1453 = vmatprep.subr.bf16.mxu1 %v1669_v4 }
  0x56   : > { %1430 = vmatmul.mubr.msk.bf16.vlgmr.msra.gmra.mxu0 %vm322_vm2, %v599_v47  ;;  %1440 = vmatmul.mubr.msk.bf16.vlgmr.msra.gmra.mxu1 %vm322_vm2, %v692_v48 }
  0x57   : > { %1444 = vmatpush3.bf16.msra.mxu0 %v1581_v49  ;;  %1454 = vmatpush3.bf16.msra.mxu1 %v1582_v50 }
  0x58   : > { %1445 = vmatprep.subr.bf16.mxu0 %v1669_v4  ;;  %1455 = vmatprep.subr.bf16.mxu1 %v1669_v4 }
  0x59   : > { %1449 = vmatprep.mubr.msk.bf16.mxu0 %vm1670_vm1, %v1669_v4  ;;  %1459 = vmatprep.mubr.msk.bf16.mxu1 %vm1670_vm1, %v1669_v4 }
  0x5b   : > { %1446 = vmatpush3.bf16.msra.mxu0 %v1583_v51  ;;  %1456 = vmatpush3.bf16.msra.mxu1 %v1584_v52 }
  0x5c   : > { %1447 = vmatprep.subr.bf16.mxu0 %v1669_v4  ;;  %1457 = vmatprep.subr.bf16.mxu1 %v1669_v4 }
  0x5f   : > { %1448 = vmatpush3.bf16.msra.mxu0 %v1585_v54  ;;  %1458 = vmatpush3.bf16.msra.mxu1 %v1586_v57 }
  0x60   : > { %1463 = vmatprep.subr.bf16.mxu0 %v1669_v4  ;;  %1473 = vmatprep.subr.bf16.mxu1 %v1669_v4 }
  0x62   : > { %1450 = vmatmul.mubr.msk.bf16.vlgmr.msra.gmra.mxu0 %vm322_vm2, %v1836_v28  ;;  %1460 = vmatmul.mubr.msk.bf16.vlgmr.msra.gmra.mxu1 %vm322_vm2, %v825_v59 }
  0x63   : > { %1464 = vmatpush3.bf16.msra.mxu0 %v1589_v60  ;;  %1474 = vmatpush3.bf16.msra.mxu1 %v1590_v61 }
  0x64   : > { %1465 = vmatprep.subr.bf16.mxu0 %v1669_v4  ;;  %1475 = vmatprep.subr.bf16.mxu1 %v1669_v4 }
  0x65   : > { %1469 = vmatprep.mubr.msk.bf16.mxu0 %vm1670_vm1, %v1669_v4  ;;  %1479 = vmatprep.mubr.msk.bf16.mxu1 %vm1670_vm1, %v1669_v4 }
  0x67   : > { %1466 = vmatpush3.bf16.msra.mxu0 %v1591_v0  ;;  %1476 = vmatpush3.bf16.msra.mxu1 %v1592_v1 }
  0x68   : > { %1467 = vmatprep.subr.bf16.mxu0 %v1669_v4  ;;  %1477 = vmatprep.subr.bf16.mxu1 %v1669_v4 }
  0x6b   : > { %1468 = vmatpush3.bf16.msra.mxu0 %v1593_v6  ;;  %1478 = vmatpush3.bf16.msra.mxu1 %v1594_v8 }
  0x6e   : > { %1470 = vmatmul.mubr.msk.bf16.vlgmr.msra.gmra.mxu0 %vm322_vm2, %v905_v9  ;;  %1480 = vmatmul.mubr.msk.bf16.vlgmr.msra.gmra.mxu1 %vm322_vm2, %v978_v10 }
  0xfe   : > { %v360_v11 = vpop.f32.mrf.mxu0  ;;  %v421_v12 = vpop.f32.mrf.mxu1 }
  0xff   : > { %v422_v23 = vadd.f32 %v421_v12, %v360_v11 }
 0x100   : > { %v1391_v13 = vpop.f32.mrf.mxu0  ;;  %v1401_v14 = vpop.f32.mrf.mxu1 }
 0x102   : > { %v363_v15 = vpop.f32.mrf.mxu0  ;;  %v424_v16 = vpop.f32.mrf.mxu1 }
 0x104   : > { %v1392_v17 = vpop.f32.mrf.mxu0  ;;  %v1402_v18 = vpop.f32.mrf.mxu1 }
 0x10a   : > { %v496_v19 = vpop.f32.mrf.mxu0  ;;  %v579_v20 = vpop.f32.mrf.mxu1 }
 0x10b   : > { %v502_v26 = vadd.f32 %v496_v19, %v422_v23 }
 0x10c   : > { %v1411_v21 = vpop.f32.mrf.mxu0  ;;  %v1421_v4 = vpop.f32.mrf.mxu1 }
 0x10d   : > { %v585_v28 = vadd.f32 %v579_v20, %v502_v26 }
 0x10e   : > { %v499_v22 = vpop.f32.mrf.mxu0  ;;  %v582_v24 = vpop.f32.mrf.mxu1 }
 0x110   : > { %v1412_v25 = vpop.f32.mrf.mxu0  ;;  %v1422_v27 = vpop.f32.mrf.mxu1 }
 0x116   : > { %v655_v29 = vpop.f32.mrf.mxu0  ;;  %v748_v32 = vpop.f32.mrf.mxu1 }
 0x117   : > { %v661_v31 = vadd.f32 %v655_v29, %v585_v28 }
 0x118   : > { %v1431_v33 = vpop.f32.mrf.mxu0  ;;  %v1441_v35 = vpop.f32.mrf.mxu1 }
 0x119   : > { %v663_v34 = vadd.f32 %v662_v30, %v661_v31 }
 0x11a   : > { %v658_v36 = vpop.f32.mrf.mxu0  ;;  %v751_v37 = vpop.f32.mrf.mxu1 }
 0x11b   : > { %665 = vst.msk [vmem:[#allocation2] sm:$0xff] %vm664_vm3, %v663_v34 }
 0x11c   : > { %v1432_v38 = vpop.f32.mrf.mxu0  ;;  %v1442_v39 = vpop.f32.mrf.mxu1 }
 0x122   : > { %v809_v40 = vpop.f32.mrf.mxu0  ;;  %v881_v41 = vpop.f32.mrf.mxu1 }
 0x123   : > { %v810_v47 = vadd.f32 %v809_v40, %v748_v32 }
 0x124   : > { %v1451_v42 = vpop.f32.mrf.mxu0  ;;  %v1461_v43 = vpop.f32.mrf.mxu1 }
 0x125   : > { %v887_v49 = vadd.f32 %v881_v41, %v810_v47 }
 0x126   : > { %v812_v44 = vpop.f32.mrf.mxu0  ;;  %v884_v45 = vpop.f32.mrf.mxu1 }
 0x128   : > { %v1452_v46 = vpop.f32.mrf.mxu0  ;;  %v1462_v48 = vpop.f32.mrf.mxu1 }
 0x12e   : > { %v961_v50 = vpop.f32.mrf.mxu0  ;;  %v1034_v52 = vpop.f32.mrf.mxu1 }
 0x12f   : > { %v967_v51 = vadd.f32 %v961_v50, %v887_v49 }
 0x130   : > { %v1471_v54 = vpop.f32.mrf.mxu0  ;;  %v1481_v56 = vpop.f32.mrf.mxu1 }
 0x131   : > { %v1040_v55 = vadd.f32 %v1034_v52, %v967_v51  ;;  %1048 = sbr.rel (%p1334_p1) target bundleno = 326 (0x146), region = 85 }
 0x132   : > { %v964_v57 = vpop.f32.mrf.mxu0  ;;  %v1037_v59 = vpop.f32.mrf.mxu1 }
 0x133   : > { %v1043_v58 = vadd.f32 %v1042_v53, %v1040_v55 }
 0x134   : > { %v1472_v60 = vpop.f32.mrf.mxu0  ;;  %v1482_v61 = vpop.f32.mrf.mxu1 }
 0x135   : > { %1044 = vst.msk [vmem:[#allocation2 + $0x8] sm:$0xff] %vm664_vm3, %v1043_v58 }
 0x136   : > { %v1049_v62 = vld [vmem:[#allocation2] sm:$0xff]  ;;  %vm1073_vm4 = vcmask 125952  }
 0x137   : > { %v1335_v63 = vld [vmem:[%s1958_s2] ss:$0 sm:$0xff] }
 0x138   : > { %v1336_v0 = vld [vmem:[%s1959_s3] ss:$0 sm:$0xff]  ;;  %v1058_v1 = vmul.f32 %v1335_v63, %v1049_v62 }
 0x13a   : > { %v1067_v5 = vadd.f32 %v1336_v0, %v1058_v1 }
 0x13c   : > { %v1050_v2 = vld [vmem:[#allocation2 + $0x8] sm:$0xff]  ;;  %v1069_v7 = vmax.f32 %v1067_v5, 0.0 }
 0x13d   : > { %v1059_v3 = vmul.f32 %v1335_v63, %v1050_v2 }
 0x13e   : > { %v1071_v9 = vpack.c.bf16 %v1069_v7, %v1069_v7 }
 0x13f   : > { %v1068_v6 = vadd.f32 %v1336_v0, %v1059_v3 }
 0x140   : > { %1074 = vst.msk [vmem:[%s1789_s11] sm:$0xf] %vm1073_vm4, %v1071_v9 }
 0x141   : > { %v1070_v8 = vmax.f32 %v1068_v6, 0.0 }
 0x143   : > { %v1072_v10 = vpack.c.bf16 %v1070_v8, %v1070_v8 }
 0x145   : > { %1075 = vst.msk [vmem:[%s1789_s11 + $0x4] sm:$0xf] %vm1073_vm4, %v1072_v10 }
 0x146 PF: > { %1082 = sbr.rel (!%p1766_p9) target bundleno = 334 (0x14e), region = 89  ;;  %s1338_s19 = sshll.u32 (%p1766_p9), %s1654_s20, 2 }
 0x147   : > { %v1101_v11 = vld [vmem:[%s1789_s11] sm:$0xf] (%p1766_p9)  ;;  %s1084_s29 = scalar_lea.vmem (%p1766_p9), %s1960_s4, %s1338_s19 }
 0x148   : > { %1102 = vst [vmem:[%s1084_s29] sm:$0xf] (%p1766_p9), %v1101_v11 }
 0x14c   : > { %v1103_v12 = vld [vmem:[%s1789_s11 + $0x4] sm:$0xf] }
 0x14d   : > { %1104 = vst [vmem:[%s1084_s29 + $0x20] sm:$0xf] %v1103_v12 }
 0x14e PF: > { %s14_s23 = sadd.s32 1, %s1666_s23   ;;  %s1963_s15 = smov %s1638_s16 }
 0x14f   : > { %p11_p2 = scmp.ge.s32.totalorder %s14_s23, 42   ;;  %s1964_s16 = smov %s1771_s9 }
 0x150   : > { %s1965_s17 = smov %s1646_s18  ;;  %s1966_s18 = smov %s1774_s10 }
 0x151   : > { %s1967_s19 = smov %s1658_s21  ;;  %s1968_s20 = smov %s1662_s22 }
 0x152   : > { %s1969_s21 = smov %s1972_s24  ;;  %s1970_s22 = smov %s1976_s25 }
 0x153   :  { %13 = sbr.rel (!%p11_p2) target bundleno = 5 (0x5), region = 168 }

// kernel: routenet_fcn_forward.21
= control target key start
LH: loop header
LB: loop body
LE: loop exit
PB: predicated region body
PF: predicated region fallthrough
CT: control target
= control target key end

     0   :  { %s1309_s0 = inlined_call_operand.vmem [shape: bf16[2,18,18,4], index: 0, kind: input, shape index: {}]   ;;  %s1310_s1 = inlined_call_operand.vmem [shape: bf16[3,3,4,1], index: 1, kind: input, shape index: {}]   ;;  %s1311_s2 = inlined_call_operand.<no memory space> [shape: f32[1,1], index: 2, kind: input, shape index: {}]   ;;  %s1312_s4 = inlined_call_operand.vmem [shape: f32[2,16,16,1], index: 4, kind: output, shape index: {}]   ;;  %s1313_s3 = inlined_call_operand.<no memory space> [shape: f32[1,1], index: 3, kind: input, shape index: {}]  }
   0x1   :  { %v9_v0 = vstv %s1311_s2  ;;  %v11_v1 = vstv %s1313_s3 }
   0x2   :  { %10 = vst [vmem:[#allocation3] sm:$0x1] %v9_v0  ;;  %12 = vst [vmem:[#allocation4] sm:$0x1] %v11_v1 }
   0x3   :  { %s1111_s19 = smov 0   ;;  %s1113_s20 = smov 0  }
   0x4   :  { %s1115_s21 = smov 0   ;;  %s1117_s22 = smov 0  }
   0x5   :  { %s1119_s23 = smov 0   ;;  %s1121_s24 = smov 0  }
   0x6   :  { %s1123_s25 = smov 0   ;;  %s1125_s2 = smov 0  }
   0x7   :  { %s1127_s26 = smov 0  }
   0x8 LB: > { %s27_s3 = sadd.s32 1, %s1067_s25  ;;  %s30_s27 = sadd.s32 1, %s1071_s2  ;;  %s1075_s26 = sphi %s1127_s26, %s18_s26   ;;  %s1071_s2 = sphi %s1125_s2, %s1323_s2   ;;  %s1067_s25 = sphi %s1123_s25, %s1322_s25   ;;  %s1063_s24 = sphi %s1121_s24, %s1321_s24   ;;  %s1059_s23 = sphi %s1119_s23, %s1320_s23   ;;  %s1055_s22 = sphi %s1117_s22, %s1319_s22   ;;  %s1051_s21 = sphi %s1115_s21, %s1318_s21   ;;  %s1047_s20 = sphi %s1113_s20, %s1317_s20   ;;  %s1043_s19 = sphi %s1111_s19, %s1316_s19  }
   0x9   : > { %p28_p0 = scmp.ge.s32.totalorder %s27_s3, 3  ;;  %s832_s28 = sadd.s32 4294967295, %s1075_s26  }
   0xa   : > { %s34_s29 = sadd.s32 %s1067_s25, %s1071_s2  ;;  %p46_p1 = scmp.ne.s32.totalorder %s1055_s22, %s1051_s21 }
   0xb   : > { %s1325_s3 = smov (%p28_p0, %s27_s3), 0  ;;  %s1327_s27 = smov (!%p28_p0, %s30_s27), %s1071_s2 }
   0xc   : > { %p47_p2 = scmp.eq.s32.totalorder %s1075_s26, 0  ;;  %p32_p3 = scmp.ge.s32.totalorder %s1327_s27, 16 }
   0xd   : > { %s39_s30 = sadd.s32 1, %s1055_s22  ;;  %p138_p5 = scmp.ne.s32.totalorder %s1047_s20, %s1043_s19 }
   0xe   : > { %p1168_p4 = por %p47_p2, %p46_p1  ;;  %s1329_s27 = smov (%p32_p3, %s1327_s27), 0 }
   0xf   : > { %s128_s6 = sadd.s32 1, %s1047_s20  ;;  %p139_p6 = scmp.eq.s32.totalorder %s832_s28, 47 }
  0x10   : > { %s35_s7 = sadd.s32 %s1329_s27, %s1325_s3  ;;  %s125_s8 = ssub.s32 %s1071_s2, %s1329_s27 }
  0x11   : > { %s36_s9 = ssub.s32 %s34_s29, %s35_s7  ;;  %p126_p7 = scmp.eq.s32.totalorder %s125_s8, 0 }
  0x12   : > { %p37_p8 = scmp.eq.s32.totalorder %s36_s9, 0  ;;  %p1181_p9 = por %p139_p6, %p138_p5 }
  0x13   : > { %s1186_s11 = scalar_select %p126_p7, %s1047_s20, %s128_s6  }
  0x14   : > { %s1189_s12 = scalar_select %p37_p8, %s1055_s22, %s39_s30  }
  0x15   : > { %p835_p10 = scmp.ge.s32.totalorder %s1075_s26, 48 }
  0x17   : > { %170 = sbr.rel (%p835_p10) target bundleno = 35 (0x23), region = 28 }
  0x1c   : > { %173 = sbr.rel (!%p1168_p4) target bundleno = 35 (0x23), region = 32  ;;  %s175_s13 = sand.u32 (%p1168_p4), 1, %s1055_s22  }
  0x1d   : > { %s922_s14 = smul.u32 (%p1168_p4), 12, %s34_s29 }
  0x1e   : > { %s921_s15 = smul.u32 (%p1168_p4), 24, %s175_s13 }
  0x1f   : > { %s181_s18 = scalar_lea.vmem (%p1168_p4), %s1309_s0, %s922_s14 }
  0x20   : > { %v198_v2 = vld [vmem:[%s181_s18] sm:$0xff] (%p1168_p4)   ;;  %v202_v3 = vld [vmem:[%s181_s18 + $0x8] sm:$0xf] (%p1168_p4)  ;;  %v204_v4 = vld [vmem:[%s181_s18 + $0xd8] sm:$0xff] (%p1168_p4)   ;;  %s177_s28 = scalar_lea.vmem (%p1168_p4), [#allocation5], %s921_s15 }
  0x21   : > { %199 = vst [vmem:[%s177_s28] sm:$0xff] %v198_v2   ;;  %203 = vst [vmem:[%s177_s28 + $0x8] sm:$0xf] %v202_v3  ;;  %v208_v5 = vld [vmem:[%s181_s18 + $0xe0] sm:$0xf] }
  0x22   : > { %205 = vst [vmem:[%s177_s28 + $0xc] sm:$0xff] %v204_v4   ;;  %209 = vst [vmem:[%s177_s28 + $0x14] sm:$0xf] %v208_v5 }
  0x23 PF: > { %p837_p11 = scmp.ge.s32.totalorder %s1075_s26, 1  ;;  %p244_p12 = scmp.lt.s32.totalorder %s1075_s26, 49 }
  0x25   : > { %p245_p13 = pnand %p837_p11, %p244_p12 }
  0x26   : > { %s251_s29 = sand.u32 (!%p245_p13), 1, %s1051_s21   ;;  %s272_s30 = sand.u32 (!%p245_p13), 1, %s1043_s19  }
  0x27   : > { %248 = sbr.rel (%p245_p13) target bundleno = 303 (0x12f), region = 73  ;;  %s838_s6 = sshll.u32 (!%p245_p13), %s272_s30, 5 }
  0x28   : > { %s923_s5 = smul.u32 (!%p245_p13), 24, %s251_s29  ;;  %s1204_s8 = scalar_lea.vmem (!%p245_p13), [#allocation6], %s838_s6 }
  0x29   : > { %p839_p0 = scmp.ne.s32.totalorder (!%p245_p13), %s1059_s23, 0 }
  0x2a   : > { %s1202_s7 = scalar_lea.vmem (!%p245_p13), [#allocation5], %s923_s5 }
  0x2c   : > { %280 = sbr.rel (%p839_p0) target bundleno = 52 (0x34), region = 81 }
  0x31   : > { %vm281_vm0 = vcmask 7168   ;;  %v1077_v6 = vmov 0.0  }
  0x32   : > { %282 = vst.msk [vmem:[#allocation2] sm:$0xff] %vm281_vm0, %v1077_v6  ;;  %283 = vst.msk [vmem:[#allocation2 + $0x8] sm:$0xff] %vm281_vm0, %v1077_v6 }
  0x33   : > { %284 = vst.msk [vmem:[#allocation2 + $0x10] sm:$0xff] %vm281_vm0, %v1077_v6  ;;  %285 = vst.msk [vmem:[#allocation2 + $0x18] sm:$0xff] %vm281_vm0, %v1077_v6 }
  0x34 PF: > { %s871_s19 = smul.u32 6, %s1059_s23  ;;  %v286_v7 = vld [vmem:[%s1202_s7] sm:$0xf]  ;;  %v1078_v8 = vmov 0.0   ;;  %vm322_vm1 = vcmask 1041408   ;;  %vm1079_vm2 = vmmov 0  }
  0x35   : > { %891 = vmatprep.subr.bf16.mxu1 %v1078_v8  ;;  %885 = vmatprep.subr.bf16.mxu0 %v1078_v8  ;;  %v287_v9 = vld [vmem:[%s1202_s7 + $0x4] sm:$0xf]  ;;  %v1001_v11 = vld [vmem:[%s1202_s7 + $0x8] ss:$0 sps:$4 sm:$0x11]   ;;  %vm318_vm3 = vcmask 31744  }
  0x36   : > { %s1215_s13 = scalar_lea.vmem %s1310_s1, %s871_s19  ;;  %893 = vmatprep.mubr.msk.bf16.mxu1 %vm1079_vm2, %v1078_v8  ;;  %v843_v10 = vcombine.low %v286_v7, %v287_v9  ;;  %887 = vmatprep.mubr.msk.bf16.mxu0 %vm1079_vm2, %v1078_v8  ;;  %v413_v16 = vld [vmem:[%s1202_s7] sm:$0xe]  ;;  %v314_v19 = vshll.u32 %v1001_v11, 16  ;;  %v851_v22 = vld [vmem:[%s1202_s7 + $0xc] sm:$0xf]  ;;  %v423_v42 = vrot.slane %v1001_v11, 1 }
  0x37   : > { %v291_v12 = vld [vmem:[%s1215_s13] sm:$0x3]  ;;  %v842_v13 = vld [vmem:[%s1215_s13 + $0x2] sm:$0x3]  ;;  %v852_v23 = vld [vmem:[%s1202_s7 + $0x10] sm:$0xf]  ;;  %v849_v29 = vcombine.low %v413_v16, %v287_v9 }
  0x38   : > { %v370_v14 = vsel %vm322_vm1, %v291_v12, 0  ;;  %v324_v15 = vsel %vm322_vm1, %v842_v13, 0  ;;  %v307_v17 = vshrl.u32 %v843_v10, 16  ;;  %v309_v18 = vshll.u32 %v843_v10, 16  ;;  %v854_v20 = vld [vmem:[%s1215_s13 + $0x2] sm:$0x3] }
  0x39   : > { %892 = vmatpush3.bf16.msra.mxu1 %v370_v14  ;;  %886 = vmatpush3.bf16.msra.mxu0 %v324_v15  ;;  %v511_v21 = vsel %vm322_vm1, %v854_v20, 0  ;;  %v316_v25 = vrot.slane %v314_v19, 1  ;;  %v848_v26 = vld [vmem:[%s1215_s13 + $0x4] sm:$0x3]  ;;  %v855_v27 = vcombine.low %v851_v22, %v852_v23  ;;  %vm305_vm4 = vsmask.f32 7424 }
  0x3a   : > { %897 = vmatprep.subr.bf16.mxu0 %v1078_v8  ;;  %903 = vmatprep.subr.bf16.mxu1 %v1078_v8  ;;  %v311_v24 = vrot.slane %v309_v18, 1  ;;  %v1003_v28 = vld [vmem:[%s1202_s7 + $0x14] ss:$0 sps:$4 sm:$0x11]   ;;  %v429_v33 = vsel %vm322_vm1, %v848_v26, 0  ;;  %v422_v40 = vrot.slane %v849_v29, 1 }
  0x3b   : > { %v496_v31 = vshrl.u32 %v855_v27, 16  ;;  %v498_v32 = vshll.u32 %v855_v27, 16  ;;  %v503_v34 = vshll.u32 %v1003_v28, 16  ;;  %v859_v35 = vld [vmem:[%s1202_s7 + $0xc] sm:$0xe]  ;;  %vm421_vm5 = vcmask 1046528  }
  0x3c   : > { %894 = vmatmul.mubr.msk.bf16.vlgmr.msra.gmra.mxu1 %vm318_vm3, %v843_v10  ;;  %v312_v30 = vor.u32 %v311_v24, %v307_v17  ;;  %v860_v38 = vld [vmem:[%s1215_s13 + $0x4] sm:$0x3]  ;;  %v861_v43 = vcombine.low %v859_v35, %v852_v23  ;;  %v484_v46 = vld [vmem:[%s1215_s13] sm:$0x3]  ;;  %v424_v47 = vsel %vm421_vm5, %v422_v40, %v423_v42  ;;  %v606_v49 = vrot.slane %v1003_v28, 1  ;;  %v658_v17 = vld [vmem:[#allocation2 + $0x10] sm:$0xff] }
  0x3d   : > { %904 = vmatpush3.bf16.msra.mxu1 %v511_v21  ;;  %905 = vmatprep.mubr.msk.bf16.mxu1 %vm1079_vm2, %v1078_v8  ;;  %v500_v37 = vrot.slane %v498_v32, 1  ;;  %v505_v39 = vrot.slane %v503_v34, 1  ;;  %v612_v44 = vsel %vm322_vm1, %v860_v38, 0  ;;  %v557_v50 = vsel %vm322_vm1, %v484_v46, 0  ;;  %v474_v0 = vld [vmem:[#allocation2] sm:$0xff]  ;;  %v659_v24 = vld [vmem:[#allocation2 + $0x18] sm:$0xff] }
  0x3e   : > { %915 = vmatprep.subr.bf16.mxu1 %v1078_v8  ;;  %v317_v36 = vsel %vm305_vm4, %v312_v30, %v316_v25  ;;  %v605_v48 = vrot.slane %v861_v43, 1  ;;  %vm478_vm6 = vcmask 7168   ;;  %p863_p1 = scmp.ne.s32.totalorder %s1059_s23, 2 }
  0x3f   : > { %888 = vmatmul.mubr.msk.bf16.vlgmr.msra.gmra.mxu0 %vm318_vm3, %v317_v36  ;;  %v501_v41 = vor.u32 %v500_v37, %v496_v31 }
  0x40   : > { %898 = vmatpush3.bf16.msra.mxu0 %v429_v33  ;;  %899 = vmatprep.mubr.msk.bf16.mxu0 %vm1079_vm2, %v1078_v8  ;;  %v607_v51 = vsel %vm421_vm5, %v605_v48, %v606_v49 }
  0x41   : > { %909 = vmatprep.subr.bf16.mxu0 %v1078_v8  ;;  %v506_v45 = vsel %vm305_vm4, %v501_v41, %v505_v39 }
  0x44   : > { %906 = vmatmul.mubr.msk.bf16.vlgmr.msra.gmra.mxu1 %vm318_vm3, %v506_v45 }
  0x45   : > { %916 = vmatpush3.bf16.msra.mxu1 %v612_v44  ;;  %917 = vmatprep.mubr.msk.bf16.mxu1 %vm1079_vm2, %v1078_v8 }
  0x47   : > { %900 = vmatmul.mubr.msk.bf16.vlgmr.msra.gmra.mxu0 %vm318_vm3, %v424_v47 }
  0x48   : > { %910 = vmatpush3.bf16.msra.mxu0 %v557_v50  ;;  %911 = vmatprep.mubr.msk.bf16.mxu0 %vm1079_vm2, %v1078_v8  ;;  %v475_v8 = vld [vmem:[#allocation2 + $0x8] sm:$0xff] }
  0x4c   : > { %918 = vmatmul.mubr.msk.bf16.vlgmr.msra.gmra.mxu1 %vm318_vm3, %v607_v51 }
  0x4f   : > { %912 = vmatmul.mubr.msk.bf16.vlgmr.msra.gmra.mxu0 %vm318_vm3, %v855_v27 }
  0xfc   : > { %v406_v52 = vpop.f32.mrf.mxu1 }
  0xfe   : > { %v895_v53 = vpop.f32.mrf.mxu1 }
  0xff   : > { %v360_v54 = vpop.f32.mrf.mxu0 }
 0x100   : > { %v409_v55 = vpop.f32.mrf.mxu1  ;;  %v407_v62 = vadd.f32 %v406_v52, %v360_v54 }
 0x101   : > { %v889_v56 = vpop.f32.mrf.mxu0 }
 0x102   : > { %v896_v57 = vpop.f32.mrf.mxu1 }
 0x103   : > { %v363_v58 = vpop.f32.mrf.mxu0 }
 0x104   : > { %v547_v59 = vpop.f32.mrf.mxu1  ;;  %v410_v5 = vadd.f32 %v409_v55, %v363_v58 }
 0x105   : > { %v890_v60 = vpop.f32.mrf.mxu0 }
 0x106   : > { %v907_v61 = vpop.f32.mrf.mxu1 }
 0x107   : > { %v465_v63 = vpop.f32.mrf.mxu0 }
 0x108   : > { %v550_v1 = vpop.f32.mrf.mxu1  ;;  %v472_v2 = vadd.f32 %v465_v63, %v407_v62 }
 0x109   : > { %v901_v3 = vpop.f32.mrf.mxu0 }
 0x10a   : > { %v908_v4 = vpop.f32.mrf.mxu1  ;;  %v476_v6 = vadd.f32 %v474_v0, %v472_v2 }
 0x10b   : > { %v468_v7 = vpop.f32.mrf.mxu0 }
 0x10c   : > { %v648_v9 = vpop.f32.mrf.mxu1  ;;  %479 = vst.msk [vmem:[#allocation2] sm:$0xff] %vm478_vm6, %v476_v6  ;;  %v473_v10 = vadd.f32 %v468_v7, %v410_v5 }
 0x10d   : > { %v902_v11 = vpop.f32.mrf.mxu0 }
 0x10e   : > { %v919_v12 = vpop.f32.mrf.mxu1  ;;  %v477_v13 = vadd.f32 %v475_v8, %v473_v10 }
 0x10f   : > { %v593_v14 = vpop.f32.mrf.mxu0 }
 0x110   : > { %v651_v15 = vpop.f32.mrf.mxu1  ;;  %480 = vst.msk [vmem:[#allocation2 + $0x8] sm:$0xff] %vm478_vm6, %v477_v13  ;;  %v594_v16 = vadd.f32 %v593_v14, %v547_v59 }
 0x111   : > { %v913_v18 = vpop.f32.mrf.mxu0 }
 0x112   : > { %v920_v19 = vpop.f32.mrf.mxu1  ;;  %v655_v20 = vadd.f32 %v648_v9, %v594_v16 }
 0x113   : > { %v596_v21 = vpop.f32.mrf.mxu0 }
 0x114   : > { %v660_v22 = vadd.f32 %v658_v17, %v655_v20  ;;  %v597_v23 = vadd.f32 %v596_v21, %v550_v1 }
 0x115   : > { %v914_v25 = vpop.f32.mrf.mxu0 }
 0x116   : > { %662 = vst.msk [vmem:[#allocation2 + $0x10] sm:$0xff] %vm478_vm6, %v660_v22  ;;  %v656_v26 = vadd.f32 %v651_v15, %v597_v23  ;;  %667 = sbr.rel (%p863_p1) target bundleno = 295 (0x127), region = 85 }
 0x118   : > { %v661_v27 = vadd.f32 %v659_v24, %v656_v26 }
 0x11a   : > { %663 = vst.msk [vmem:[#allocation2 + $0x18] sm:$0xff] %vm478_vm6, %v661_v27 }
 0x11b   : > { %v668_v28 = vld [vmem:[#allocation2] sm:$0xff]  ;;  %v669_v32 = vld [vmem:[#allocation2 + $0x8] sm:$0xff] }
 0x11c   : > { %v864_v29 = vld [vmem:[#allocation3] ss:$0 sm:$0xff]  ;;  %v865_v30 = vld [vmem:[#allocation4] ss:$0 sm:$0xff] }
 0x11d   : > { %v679_v31 = vmul.f32 %v864_v29, %v668_v28  ;;  %v670_v33 = vld [vmem:[#allocation2 + $0x10] sm:$0xff]  ;;  %v680_v35 = vmul.f32 %v864_v29, %v669_v32 }
 0x11e   : > { %v681_v36 = vmul.f32 %v864_v29, %v670_v33 }
 0x11f   : > { %v690_v38 = vadd.f32 %v865_v30, %v679_v31  ;;  %v691_v39 = vadd.f32 %v865_v30, %v680_v35 }
 0x120   : > { %v692_v40 = vadd.f32 %v865_v30, %v681_v36 }
 0x121   : > { %v671_v34 = vld [vmem:[#allocation2 + $0x18] sm:$0xff]  ;;  %694 = vst.msk [vmem:[%s1204_s8] sm:$0xff] %vm478_vm6, %v690_v38  ;;  %695 = vst.msk [vmem:[%s1204_s8 + $0x8] sm:$0xff] %vm478_vm6, %v691_v39 }
 0x122   : > { %v682_v37 = vmul.f32 %v864_v29, %v671_v34  ;;  %696 = vst.msk [vmem:[%s1204_s8 + $0x10] sm:$0xff] %vm478_vm6, %v692_v40 }
 0x124   : > { %v693_v41 = vadd.f32 %v865_v30, %v682_v37 }
 0x126   : > { %697 = vst.msk [vmem:[%s1204_s8 + $0x18] sm:$0xff] %vm478_vm6, %v693_v41 }
 0x127 PF: > { %704 = sbr.rel (!%p1181_p9) target bundleno = 303 (0x12f), region = 89  ;;  %s872_s23 = sshll.u32 (%p1181_p9), %s1063_s24, 4 }
 0x128   : > { %v742_v42 = vld [vmem:[%s1204_s8] sm:$0xff] (%p1181_p9)  ;;  %v744_v43 = vld [vmem:[%s1204_s8 + $0x8] sm:$0xff] (%p1181_p9)  ;;  %s707_s16 = scalar_lea.vmem (%p1181_p9), %s1312_s4, %s872_s23 }
 0x129   : > { %v746_v44 = vld [vmem:[%s1204_s8 + $0x10] sm:$0xff] (%p1181_p9)  ;;  %743 = vst [vmem:[%s707_s16] sm:$0xff] (%p1181_p9), %v742_v42  ;;  %745 = vst [vmem:[%s707_s16 + $0x8] sm:$0xff] (%p1181_p9), %v744_v43 }
 0x12a   : > { %747 = vst [vmem:[%s707_s16 + $0x100] sm:$0xff] (%p1181_p9), %v746_v44 }
 0x12d   : > { %v748_v45 = vld [vmem:[%s1204_s8 + $0x18] sm:$0xff] }
 0x12e   : > { %749 = vst [vmem:[%s707_s16 + $0x108] sm:$0xff] %v748_v45 }
 0x12f PF: > { %s18_s26 = sadd.s32 1, %s1075_s26   ;;  %s1316_s19 = smov %s1047_s20 }
 0x130   : > { %p15_p2 = scmp.ge.s32.totalorder %s18_s26, 50   ;;  %s1317_s20 = smov %s1186_s11 }
 0x131   : > { %s1318_s21 = smov %s1055_s22  ;;  %s1319_s22 = smov %s1189_s12 }
 0x132   : > { %s1320_s23 = smov %s1067_s25  ;;  %s1321_s24 = smov %s1071_s2 }
 0x133   : > { %s1322_s25 = smov %s1325_s3  ;;  %s1323_s2 = smov %s1329_s27 }
 0x134   :  { %17 = sbr.rel (!%p15_p2) target bundleno = 8 (0x8), region = 163 }

// kernel: routenet_fcn_forward.20
= control target key start
LH: loop header
LB: loop body
LE: loop exit
PB: predicated region body
PF: predicated region fallthrough
CT: control target
= control target key end

     0   :  { %s1550_s15 = smov 0   ;;  %s1552_s16 = smov 0   ;;  %s1784_s0 = inlined_call_operand.vmem [shape: bf16[2,20,20,16], index: 0, kind: input, shape index: {}]   ;;  %s1785_s1 = inlined_call_operand.vmem [shape: bf16[5,5,16,4], index: 1, kind: input, shape index: {}]   ;;  %s1786_s2 = inlined_call_operand.vmem [shape: f32[1,4], index: 2, kind: input, shape index: {}]   ;;  %s1787_s3 = inlined_call_operand.vmem [shape: f32[1,4], index: 3, kind: input, shape index: {}]   ;;  %s1788_s4 = inlined_call_operand.vmem [shape: bf16[2,16,16,4], index: 4, kind: output, shape index: {}]  }
   0x1   :  { %s1554_s17 = smov 0   ;;  %s1556_s18 = smov 0  }
   0x2   :  { %s1558_s19 = smov 0   ;;  %s1560_s20 = smov 0  }
   0x3   :  { %s1562_s21 = smov 0   ;;  %s1564_s22 = smov 0  }
   0x4   :  { %s1566_s23 = smov 0  }
   0x5 LB: > { %s23_s24 = sadd.s32 1, %s1512_s21  ;;  %s26_s25 = sadd.s32 1, %s1516_s22  ;;  %s1520_s23 = sphi %s1566_s23, %s14_s23   ;;  %s1516_s22 = sphi %s1564_s22, %s1798_s22   ;;  %s1512_s21 = sphi %s1562_s21, %s1797_s21   ;;  %s1508_s20 = sphi %s1560_s20, %s1796_s20   ;;  %s1504_s19 = sphi %s1558_s19, %s1795_s19   ;;  %s1500_s18 = sphi %s1556_s18, %s1794_s18   ;;  %s1496_s17 = sphi %s1554_s17, %s1793_s17   ;;  %s1492_s16 = sphi %s1552_s16, %s1792_s16   ;;  %s1488_s15 = sphi %s1550_s15, %s1791_s15  }
   0x6   : > { %p24_p0 = scmp.ge.s32.totalorder %s23_s24, 5  ;;  %s1185_s26 = sadd.s32 4294967295, %s1520_s23  }
   0x7   : > { %s30_s27 = sadd.s32 %s1512_s21, %s1516_s22  ;;  %p42_p1 = scmp.ne.s32.totalorder %s1500_s18, %s1496_s17 }
   0x8   : > { %s1800_s24 = smov (%p24_p0, %s23_s24), 0  ;;  %s1802_s25 = smov (!%p24_p0, %s26_s25), %s1516_s22 }
   0x9   : > { %p43_p2 = scmp.eq.s32.totalorder %s1520_s23, 0  ;;  %p28_p3 = scmp.ge.s32.totalorder %s1802_s25, 16 }
   0xa   : > { %s35_s28 = sadd.s32 1, %s1500_s18  ;;  %p134_p5 = scmp.ne.s32.totalorder %s1492_s16, %s1488_s15 }
   0xb   : > { %p1607_p4 = por %p43_p2, %p42_p1  ;;  %s1804_s25 = smov (%p28_p3, %s1802_s25), 0 }
   0xc   : > { %s124_s30 = sadd.s32 1, %s1492_s16  ;;  %p135_p6 = scmp.eq.s32.totalorder %s1185_s26, 79 }
   0xd   : > { %s31_s5 = sadd.s32 %s1804_s25, %s1800_s24  ;;  %s121_s6 = ssub.s32 %s1516_s22, %s1804_s25 }
   0xe   : > { %s32_s7 = ssub.s32 %s30_s27, %s31_s5  ;;  %p122_p7 = scmp.eq.s32.totalorder %s121_s6, 0 }
   0xf   : > { %p33_p8 = scmp.eq.s32.totalorder %s32_s7, 0  ;;  %p1620_p9 = por %p135_p6, %p134_p5 }
  0x10   : > { %s1625_s9 = scalar_select %p122_p7, %s1492_s16, %s124_s30  }
  0x11   : > { %s1628_s10 = scalar_select %p33_p8, %s1500_s18, %s35_s28  }
  0x12   : > { %p1188_p10 = scmp.ge.s32.totalorder %s1520_s23, 80 }
  0x14   : > { %166 = sbr.rel (%p1188_p10) target bundleno = 32 (0x20), region = 28 }
  0x19   : > { %169 = sbr.rel (!%p1607_p4) target bundleno = 32 (0x20), region = 32  ;;  %s171_s11 = sand.u32 (%p1607_p4), 1, %s1500_s18  }
  0x1a   : > { %s1353_s12 = smul.u32 (%p1607_p4), 12, %s30_s27 }
  0x1b   : > { %s1352_s13 = smul.u32 (%p1607_p4), 24, %s171_s11 }
  0x1c   : > { %s177_s5 = scalar_lea.vmem (%p1607_p4), %s1784_s0, %s1353_s12 }
  0x1d   : > { %v194_v0 = vld [vmem:[%s177_s5] sm:$0xff] (%p1607_p4)   ;;  %v198_v1 = vld [vmem:[%s177_s5 + $0x8] sm:$0xf] (%p1607_p4)  ;;  %v200_v2 = vld [vmem:[%s177_s5 + $0xf0] sm:$0xff] (%p1607_p4)   ;;  %s173_s30 = scalar_lea.vmem (%p1607_p4), [#allocation3], %s1352_s13 }
  0x1e   : > { %195 = vst [vmem:[%s173_s30] sm:$0xff] %v194_v0   ;;  %199 = vst [vmem:[%s173_s30 + $0x8] sm:$0xf] %v198_v1  ;;  %v204_v3 = vld [vmem:[%s177_s5 + $0xf8] sm:$0xf] }
  0x1f   : > { %201 = vst [vmem:[%s173_s30 + $0xc] sm:$0xff] %v200_v2   ;;  %205 = vst [vmem:[%s173_s30 + $0x14] sm:$0xf] %v204_v3 }
  0x20 PF: > { %p1190_p11 = scmp.ge.s32.totalorder %s1520_s23, 1  ;;  %p240_p12 = scmp.lt.s32.totalorder %s1520_s23, 81 }
  0x22   : > { %p241_p13 = pnand %p1190_p11, %p240_p12 }
  0x23   : > { %s247_s27 = sand.u32 (!%p241_p13), 1, %s1496_s17   ;;  %s268_s28 = sand.u32 (!%p241_p13), 1, %s1488_s15  }
  0x24   : > { %244 = sbr.rel (%p241_p13) target bundleno = 338 (0x152), region = 73  ;;  %s1191_s6 = sshll.u32 (!%p241_p13), %s268_s28, 4 }
  0x25   : > { %s1354_s29 = smul.u32 (!%p241_p13), 24, %s247_s27  ;;  %s1643_s11 = scalar_lea.vmem (!%p241_p13), [#allocation4], %s1191_s6 }
  0x26   : > { %p1192_p0 = scmp.ne.s32.totalorder (!%p241_p13), %s1504_s19, 0 }
  0x27   : > { %s1641_s7 = scalar_lea.vmem (!%p241_p13), [#allocation3], %s1354_s29 }
  0x29   : > { %276 = sbr.rel (%p1192_p0) target bundleno = 49 (0x31), region = 81 }
  0x2e   : > { %vm277_vm0 = vcmask 31744   ;;  %v1522_v4 = vmov 0.0  }
  0x2f   : > { %278 = vst.msk [vmem:[#allocation2] sm:$0xff] %vm277_vm0, %v1522_v4  ;;  %279 = vst.msk [vmem:[#allocation2 + $0x8] sm:$0xff] %vm277_vm0, %v1522_v4 }
  0x30   : > { %280 = vst.msk [vmem:[#allocation2 + $0x10] sm:$0xff] %vm277_vm0, %v1522_v4  ;;  %281 = vst.msk [vmem:[#allocation2 + $0x18] sm:$0xff] %vm277_vm0, %v1522_v4 }
  0x31 PF: > { %s282_s17 = sadd.s32 %s1504_s19, %s1508_s20 }
  0x32   : > { %p283_p1 = scmp.lt.s32.totalorder %s282_s17, 0  ;;  %s284_s15 = ssub.s32 0, %s282_s17 }
  0x33   : > { %s1193_s12 = smin.u32 %s284_s15, %s282_s17 }
  0x34   : > { %s286_s13 = sand.u32 1, %s1193_s12  }
  0x35   : > { %s287_s14 = ssub.s32 0, %s286_s13 }
  0x36   : > { %s1806_s14 = smov (!%p283_p1, %s287_s14), %s286_s13 }
  0x37   : > { %p1195_p2 = scmp.lt.s32.totalorder %s1806_s14, 0  ;;  %s293_s26 = sadd.s32 2, %s1806_s14 }
  0x39   : > { %s1808_s26 = smov (!%p1195_p2, %s293_s26), %s1806_s14 }
  0x3a   : > { %p1196_p3 = scmp.ne.s32.totalorder %s1808_s26, 0 }
  0x3b   : > { %s1266_s5 = smul.u32 (!%p1196_p3), 40, %s1504_s19 }
  0x3c   : > { %298 = sbr.rel (%p1196_p3) target bundleno = 311 (0x137), region = 85 }
  0x3d   : > { %s1659_s28 = scalar_lea.vmem (!%p1196_p3), %s1785_s1, %s1266_s5 }
  0x41   : > { %v299_v5 = vld [vmem:[%s1641_s7] sm:$0xf]  ;;  %v1523_v6 = vmov 0.0   ;;  %v1653_v7 = vld [vmem:[%s1641_s7 + $0x4] sm:$0xf]  ;;  %vm1524_vm1 = vmmov 0  }
  0x42   : > { %1292 = vmatprep.subr.bf16.mxu0 %v1523_v6  ;;  %1298 = vmatprep.subr.bf16.mxu1 %v1523_v6  ;;  %v433_v8 = vld [vmem:[%s1641_s7] sm:$0xe]  ;;  %v1201_v9 = vcombine.low %v299_v5, %v1653_v7  ;;  %v1434_v11 = vld [vmem:[%s1641_s7 + $0x8] ss:$0 sps:$4 sm:$0x11]   ;;  %vm339_vm3 = vcmask 130048  }
  0x43   : > { %1300 = vmatprep.mubr.msk.bf16.mxu1 %vm1524_vm1, %v1523_v6  ;;  %1294 = vmatprep.mubr.msk.bf16.mxu0 %vm1524_vm1, %v1523_v6  ;;  %v1210_v10 = vcombine.low %v433_v8, %v1653_v7  ;;  %vm320_vm2 = vsmask.f32 7424  ;;  %v1430_v12 = vld [vmem:[%s1659_s28 + $0x8] sm:$0xff]   ;;  %v1431_v13 = vld [vmem:[%s1659_s28] sm:$0xff]   ;;  %v329_v16 = vshll.u32 %v1434_v11, 16  ;;  %v1436_v20 = vld [vmem:[%s1659_s28 + $0x18] sm:$0xff]  }
  0x44   : > { %v322_v14 = vshrl.u32 %v1201_v9, 16  ;;  %1293 = vmatpush3.bf16.msra.mxu0 %v1430_v12  ;;  %v324_v15 = vshll.u32 %v1201_v9, 16  ;;  %1299 = vmatpush3.bf16.msra.mxu1 %v1431_v13  ;;  %v1437_v22 = vld [vmem:[%s1641_s7 + $0x8] ss:$0 sps:$4 sm:$0x33]   ;;  %vm442_vm4 = vcmask 1046528  }
  0x45   : > { %1304 = vmatprep.subr.bf16.mxu0 %v1523_v6  ;;  %v509_v17 = vshrl.u32 %v1210_v10, 16  ;;  %v331_v19 = vrot.slane %v329_v16, 1  ;;  %1310 = vmatprep.subr.bf16.mxu1 %v1523_v6  ;;  %v512_v21 = vshll.u32 %v1210_v10, 16  ;;  %v1435_v25 = vld [vmem:[%s1659_s28 + $0x10] sm:$0xff]   ;;  %vm507_vm5 = vsmask.f32 6400 }
  0x46   : > { %v326_v18 = vrot.slane %v324_v15, 1  ;;  %v517_v27 = vshrl.u32 %v1437_v22, 16  ;;  %v520_v28 = vshll.u32 %v1437_v22, 16  ;;  %v443_v30 = vrot.slane %v1210_v10, 1  ;;  %v1225_v32 = vld [vmem:[%s1641_s7 + $0xc] sm:$0xf] }
  0x47   : > { %v511_v23 = vrot.slane %v509_v17, 1  ;;  %1301 = vmatmul.mubr.msk.bf16.vlgmr.msra.gmra.mxu1 %vm339_vm3, %v1201_v9  ;;  %v514_v26 = vrot.slane %v512_v21, 2  ;;  %v444_v31 = vrot.slane %v1434_v11, 1  ;;  %v1683_v36 = vld [vmem:[%s1641_s7 + $0x10] sm:$0xf]  ;;  %v1438_v47 = vld [vmem:[%s1659_s28 + $0x20] sm:$0xff]  }
  0x48   : > { %v327_v24 = vor.u32 %v326_v18, %v322_v14  ;;  %1311 = vmatpush3.bf16.msra.mxu1 %v1436_v20  ;;  %1312 = vmatprep.mubr.msk.bf16.mxu1 %vm1524_vm1, %v1523_v6  ;;  %v519_v34 = vrot.slane %v517_v27, 1  ;;  %v522_v35 = vrot.slane %v520_v28, 2  ;;  %v1439_v37 = vld [vmem:[%s1659_s28 + $0x8] sm:$0xff]   ;;  %v1230_v38 = vcombine.low %v1225_v32, %v1683_v36  ;;  %v577_v40 = vld [vmem:[%s1641_s7] sm:$0xc]  ;;  %v1444_v56 = vld [vmem:[%s1659_s28 + $0x10] sm:$0xff]  }
  0x49   : > { %1322 = vmatprep.subr.bf16.mxu1 %v1523_v6  ;;  %v515_v33 = vor.u32 %v514_v26, %v511_v23  ;;  %v1441_v39 = vld [vmem:[%s1641_s7 + $0x14] ss:$0 sps:$4 sm:$0x11]   ;;  %v445_v46 = vsel %vm442_vm4, %v443_v30, %v444_v31  ;;  %v1222_v50 = vcombine.low %v577_v40, %v1653_v7  ;;  %v1236_v52 = vld [vmem:[%s1641_s7 + $0xc] sm:$0xe]  ;;  %v588_v54 = vrot.slane %v1437_v22, 2 }
  0x4a   : > { %v332_v29 = vsel %vm320_vm2, %v327_v24, %v331_v19  ;;  %v523_v41 = vor.u32 %v522_v35, %v519_v34  ;;  %v666_v42 = vshrl.u32 %v1230_v38, 16  ;;  %v668_v43 = vshll.u32 %v1230_v38, 16  ;;  %v1443_v59 = vld [vmem:[%s1659_s28] sm:$0xff]   ;;  %v1448_v60 = vld [vmem:[%s1641_s7 + $0x14] ss:$0 sps:$4 sm:$0x33]  }
  0x4b   : > { %1295 = vmatmul.mubr.msk.bf16.vlgmr.msra.gmra.mxu0 %vm339_vm3, %v332_v29  ;;  %v673_v44 = vshll.u32 %v1441_v39, 16  ;;  %v587_v53 = vrot.slane %v1222_v50, 2  ;;  %vm586_vm6 = vcmask 1045504   ;;  %v1239_v57 = vcombine.low %v1236_v52, %v1683_v36  ;;  %v1248_v63 = vld [vmem:[%s1641_s7 + $0xc] sm:$0xc]  ;;  %v1446_v8 = vld [vmem:[%s1659_s28 + $0x18] sm:$0xff]  }
  0x4c   : > { %1305 = vmatpush3.bf16.msra.mxu0 %v1435_v25  ;;  %1306 = vmatprep.mubr.msk.bf16.mxu0 %vm1524_vm1, %v1523_v6  ;;  %v524_v45 = vsel %vm507_vm5, %v515_v33, %v523_v41  ;;  %v670_v48 = vrot.slane %v668_v43, 1  ;;  %v783_v62 = vrot.slane %v1441_v39, 1  ;;  %v852_v2 = vshrl.u32 %v1448_v60, 16  ;;  %v1447_v5 = vld [vmem:[%s1659_s28 + $0x20] sm:$0xff]   ;;  %v643_v50 = vld [vmem:[#allocation2 + $0x8] sm:$0xff] }
  0x4d   : > { %1316 = vmatprep.subr.bf16.mxu0 %v1523_v6  ;;  %v675_v49 = vrot.slane %v673_v44, 1  ;;  %v589_v58 = vsel %vm586_vm6, %v587_v53, %v588_v54  ;;  %v782_v61 = vrot.slane %v1239_v57, 1  ;;  %v844_v0 = vshrl.u32 %v1239_v57, 16 }
  0x4e   : > { %v671_v51 = vor.u32 %v670_v48, %v666_v42  ;;  %v847_v1 = vshll.u32 %v1239_v57, 16  ;;  %v855_v3 = vshll.u32 %v1448_v60, 16  ;;  %v1251_v7 = vcombine.low %v1248_v63, %v1683_v36  ;;  %v642_v42 = vld [vmem:[#allocation2] sm:$0xff] }
  0x4f   : > { %1313 = vmatmul.mubr.msk.bf16.vlgmr.msra.gmra.mxu1 %vm339_vm3, %v524_v45  ;;  %v784_v4 = vsel %vm442_vm4, %v782_v61, %v783_v62  ;;  %v846_v9 = vrot.slane %v844_v0, 1  ;;  %v854_v11 = vrot.slane %v852_v2, 1  ;;  %v919_v14 = vrot.slane %v1448_v60, 2 }
  0x50   : > { %1323 = vmatpush3.bf16.msra.mxu1 %v1439_v37  ;;  %1324 = vmatprep.mubr.msk.bf16.mxu1 %vm1524_vm1, %v1523_v6  ;;  %v676_v55 = vsel %vm320_vm2, %v671_v51, %v675_v49  ;;  %v849_v10 = vrot.slane %v847_v1, 2  ;;  %v857_v12 = vrot.slane %v855_v3, 2  ;;  %v918_v13 = vrot.slane %v1251_v7, 2  ;;  %v974_v7 = vld [vmem:[#allocation2 + $0x10] sm:$0xff] }
  0x51   : > { %1334 = vmatprep.subr.bf16.mxu1 %v1523_v6  ;;  %vm646_vm7 = vcmask 31744  }
  0x52   : > { %v850_v15 = vor.u32 %v849_v10, %v846_v9  ;;  %v858_v16 = vor.u32 %v857_v12, %v854_v11  ;;  %v920_v17 = vsel %vm586_vm6, %v918_v13, %v919_v14 }
  0x53   : > { %1307 = vmatmul.mubr.msk.bf16.vlgmr.msra.gmra.mxu0 %vm339_vm3, %v445_v46 }
  0x54   : > { %1317 = vmatpush3.bf16.msra.mxu0 %v1438_v47  ;;  %1318 = vmatprep.mubr.msk.bf16.mxu0 %vm1524_vm1, %v1523_v6  ;;  %v859_v18 = vsel %vm507_vm5, %v850_v15, %v858_v16  ;;  %v975_v15 = vld [vmem:[#allocation2 + $0x18] sm:$0xff] }
  0x55   : > { %1328 = vmatprep.subr.bf16.mxu0 %v1523_v6 }
  0x57   : > { %1325 = vmatmul.mubr.msk.bf16.vlgmr.msra.gmra.mxu1 %vm339_vm3, %v676_v55 }
  0x58   : > { %1335 = vmatpush3.bf16.msra.mxu1 %v1444_v56  ;;  %1336 = vmatprep.mubr.msk.bf16.mxu1 %vm1524_vm1, %v1523_v6 }
  0x59   : > { %1346 = vmatprep.subr.bf16.mxu1 %v1523_v6 }
  0x5b   : > { %1319 = vmatmul.mubr.msk.bf16.vlgmr.msra.gmra.mxu0 %vm339_vm3, %v589_v58 }
  0x5c   : > { %1329 = vmatpush3.bf16.msra.mxu0 %v1443_v59  ;;  %1330 = vmatprep.mubr.msk.bf16.mxu0 %vm1524_vm1, %v1523_v6 }
  0x5d   : > { %1340 = vmatprep.subr.bf16.mxu0 %v1523_v6 }
  0x5f   : > { %1337 = vmatmul.mubr.msk.bf16.vlgmr.msra.gmra.mxu1 %vm339_vm3, %v784_v4 }
  0x60   : > { %1347 = vmatpush3.bf16.msra.mxu1 %v1447_v5  ;;  %1348 = vmatprep.mubr.msk.bf16.mxu1 %vm1524_vm1, %v1523_v6 }
  0x63   : > { %1331 = vmatmul.mubr.msk.bf16.vlgmr.msra.gmra.mxu0 %vm339_vm3, %v1230_v38 }
  0x64   : > { %1341 = vmatpush3.bf16.msra.mxu0 %v1446_v8  ;;  %1342 = vmatprep.mubr.msk.bf16.mxu0 %vm1524_vm1, %v1523_v6 }
  0x67   : > { %1349 = vmatmul.mubr.msk.bf16.vlgmr.msra.gmra.mxu1 %vm339_vm3, %v920_v17 }
  0x6b   : > { %1343 = vmatmul.mubr.msk.bf16.vlgmr.msra.gmra.mxu0 %vm339_vm3, %v859_v18 }
 0x107   : > { %v426_v19 = vpop.f32.mrf.mxu1 }
 0x109   : > { %v1302_v20 = vpop.f32.mrf.mxu1 }
 0x10b   : > { %v377_v21 = vpop.f32.mrf.mxu0  ;;  %v429_v22 = vpop.f32.mrf.mxu1 }
 0x10c   : > { %v427_v29 = vadd.f32 %v426_v19, %v377_v21 }
 0x10d   : > { %v1296_v23 = vpop.f32.mrf.mxu0  ;;  %v1303_v24 = vpop.f32.mrf.mxu1 }
 0x10f   : > { %v380_v25 = vpop.f32.mrf.mxu0  ;;  %v568_v26 = vpop.f32.mrf.mxu1 }
 0x110   : > { %v430_v35 = vadd.f32 %v429_v22, %v380_v25 }
 0x111   : > { %v1297_v27 = vpop.f32.mrf.mxu0  ;;  %v1314_v6 = vpop.f32.mrf.mxu1 }
 0x113   : > { %v489_v28 = vpop.f32.mrf.mxu0  ;;  %v571_v30 = vpop.f32.mrf.mxu1 }
 0x114   : > { %v496_v32 = vadd.f32 %v489_v28, %v427_v29 }
 0x115   : > { %v1308_v31 = vpop.f32.mrf.mxu0  ;;  %v1315_v33 = vpop.f32.mrf.mxu1 }
 0x116   : > { %v575_v39 = vadd.f32 %v568_v26, %v496_v32 }
 0x117   : > { %v492_v34 = vpop.f32.mrf.mxu0  ;;  %v720_v36 = vpop.f32.mrf.mxu1 }
 0x118   : > { %v497_v38 = vadd.f32 %v492_v34, %v430_v35 }
 0x119   : > { %v1309_v37 = vpop.f32.mrf.mxu0  ;;  %v1326_v40 = vpop.f32.mrf.mxu1 }
 0x11a   : > { %v576_v47 = vadd.f32 %v571_v30, %v497_v38 }
 0x11b   : > { %v633_v41 = vpop.f32.mrf.mxu0  ;;  %v723_v44 = vpop.f32.mrf.mxu1 }
 0x11c   : > { %v640_v43 = vadd.f32 %v633_v41, %v575_v39 }
 0x11d   : > { %v1320_v45 = vpop.f32.mrf.mxu0  ;;  %v1327_v48 = vpop.f32.mrf.mxu1 }
 0x11e   : > { %v644_v46 = vadd.f32 %v642_v42, %v640_v43 }
 0x11f   : > { %v636_v49 = vpop.f32.mrf.mxu0  ;;  %v828_v52 = vpop.f32.mrf.mxu1 }
 0x120   : > { %647 = vst.msk [vmem:[#allocation2] sm:$0xff] %vm646_vm7, %v644_v46  ;;  %v641_v51 = vadd.f32 %v636_v49, %v576_v47 }
 0x121   : > { %v1321_v53 = vpop.f32.mrf.mxu0  ;;  %v1338_v55 = vpop.f32.mrf.mxu1 }
 0x122   : > { %v645_v54 = vadd.f32 %v643_v50, %v641_v51 }
 0x123   : > { %v769_v56 = vpop.f32.mrf.mxu0  ;;  %v831_v57 = vpop.f32.mrf.mxu1 }
 0x124   : > { %648 = vst.msk [vmem:[#allocation2 + $0x8] sm:$0xff] %vm646_vm7, %v645_v54  ;;  %v770_v59 = vadd.f32 %v769_v56, %v720_v36 }
 0x125   : > { %v1332_v58 = vpop.f32.mrf.mxu0  ;;  %v1339_v60 = vpop.f32.mrf.mxu1 }
 0x126   : > { %v835_v1 = vadd.f32 %v828_v52, %v770_v59 }
 0x127   : > { %v772_v61 = vpop.f32.mrf.mxu0  ;;  %v964_v62 = vpop.f32.mrf.mxu1 }
 0x128   : > { %v773_v0 = vadd.f32 %v772_v61, %v723_v44 }
 0x129   : > { %v1333_v63 = vpop.f32.mrf.mxu0  ;;  %v1350_v2 = vpop.f32.mrf.mxu1 }
 0x12a   : > { %v836_v10 = vadd.f32 %v831_v57, %v773_v0 }
 0x12b   : > { %v903_v3 = vpop.f32.mrf.mxu0  ;;  %v967_v5 = vpop.f32.mrf.mxu1 }
 0x12c   : > { %v910_v4 = vadd.f32 %v903_v3, %v835_v1 }
 0x12d   : > { %v1344_v8 = vpop.f32.mrf.mxu0  ;;  %v1351_v11 = vpop.f32.mrf.mxu1 }
 0x12e   : > { %v971_v9 = vadd.f32 %v964_v62, %v910_v4 }
 0x12f   : > { %v906_v12 = vpop.f32.mrf.mxu0 }
 0x130   : > { %v976_v13 = vadd.f32 %v974_v7, %v971_v9  ;;  %v911_v14 = vadd.f32 %v906_v12, %v836_v10 }
 0x131   : > { %v1345_v16 = vpop.f32.mrf.mxu0 }
 0x132   : > { %978 = vst.msk [vmem:[#allocation2 + $0x10] sm:$0xff] %vm646_vm7, %v976_v13  ;;  %v972_v17 = vadd.f32 %v967_v5, %v911_v14 }
 0x134   : > { %v977_v18 = vadd.f32 %v975_v15, %v972_v17 }
 0x136   : > { %979 = vst.msk [vmem:[#allocation2 + $0x18] sm:$0xff] %vm646_vm7, %v977_v18 }
 0x137 PF: > { %p1254_p4 = scmp.ne.s32.totalorder %s1504_s19, 4 }
 0x139   : > { %983 = sbr.rel (%p1254_p4) target bundleno = 330 (0x14a), region = 89 }
 0x13e   : > { %v984_v19 = vld [vmem:[#allocation2] sm:$0xff]  ;;  %v985_v23 = vld [vmem:[#allocation2 + $0x8] sm:$0xff]  ;;  %v986_v24 = vld [vmem:[#allocation2 + $0x10] sm:$0xff]  ;;  %vm1030_vm8 = vcmask 27648  }
 0x13f   : > { %v1255_v20 = vld [vmem:[%s1786_s2] ss:$0 sm:$0xff]  ;;  %v987_v25 = vld [vmem:[#allocation2 + $0x18] sm:$0xff] }
 0x140   : > { %v1256_v21 = vld [vmem:[%s1787_s3] ss:$0 sm:$0xff]  ;;  %v995_v22 = vmul.f32 %v1255_v20, %v984_v19  ;;  %v996_v26 = vmul.f32 %v1255_v20, %v985_v23  ;;  %v997_v27 = vmul.f32 %v1255_v20, %v986_v24  ;;  %v998_v6 = vmul.f32 %v1255_v20, %v987_v25 }
 0x142   : > { %v1006_v28 = vadd.f32 %v1256_v21, %v995_v22  ;;  %v1007_v29 = vadd.f32 %v1256_v21, %v996_v26  ;;  %v1008_v30 = vadd.f32 %v1256_v21, %v997_v27  ;;  %v1009_v31 = vadd.f32 %v1256_v21, %v998_v6 }
 0x144   : > { %v1010_v32 = vmax.f32 %v1006_v28, 0.0  ;;  %v1011_v33 = vmax.f32 %v1007_v29, 0.0  ;;  %v1012_v34 = vmax.f32 %v1008_v30, 0.0  ;;  %v1013_v35 = vmax.f32 %v1009_v31, 0.0 }
 0x146   : > { %v1267_v36 = vpack.c.bf16 %v1010_v32, %v1010_v32  ;;  %v1268_v37 = vpack.c.bf16 %v1011_v33, %v1011_v33  ;;  %v1269_v38 = vpack.c.bf16 %v1012_v34, %v1012_v34  ;;  %v1270_v39 = vpack.c.bf16 %v1013_v35, %v1013_v35 }
 0x148   : > { %1031 = vst.msk [vmem:[%s1643_s11] sm:$0xf] %vm1030_vm8, %v1267_v36  ;;  %1032 = vst.msk [vmem:[%s1643_s11 + $0x4] sm:$0xf] %vm1030_vm8, %v1268_v37 }
 0x149   : > { %1033 = vst.msk [vmem:[%s1643_s11 + $0x8] sm:$0xf] %vm1030_vm8, %v1269_v38  ;;  %1034 = vst.msk [vmem:[%s1643_s11 + $0xc] sm:$0xf] %vm1030_vm8, %v1270_v39 }
 0x14a PF: > { %1041 = sbr.rel (!%p1620_p9) target bundleno = 338 (0x152), region = 93  ;;  %s1271_s19 = sshll.u32 (%p1620_p9), %s1508_s20, 3 }
 0x14b   : > { %s1044_s13 = scalar_lea.vmem (%p1620_p9), %s1788_s4, %s1271_s19 }
 0x14f   : > { %v1061_v40 = vld [vmem:[%s1643_s11] sm:$0xff]  }
 0x150   : > { %v1065_v41 = vld [vmem:[%s1643_s11 + $0x8] sm:$0xff]   ;;  %1062 = vst [vmem:[%s1044_s13] sm:$0xff] %v1061_v40  }
 0x151   : > { %1066 = vst [vmem:[%s1044_s13 + $0x80] sm:$0xff] %v1065_v41  }
 0x152 PF: > { %s14_s23 = sadd.s32 1, %s1520_s23   ;;  %s1791_s15 = smov %s1492_s16 }
 0x153   : > { %p11_p5 = scmp.ge.s32.totalorder %s14_s23, 82   ;;  %s1792_s16 = smov %s1625_s9 }
 0x154   : > { %s1793_s17 = smov %s1500_s18  ;;  %s1794_s18 = smov %s1628_s10 }
 0x155   : > { %s1795_s19 = smov %s1512_s21  ;;  %s1796_s20 = smov %s1516_s22 }
 0x156   : > { %s1797_s21 = smov %s1800_s24  ;;  %s1798_s22 = smov %s1804_s25 }
 0x157   :  { %13 = sbr.rel (!%p11_p5) target bundleno = 5 (0x5), region = 172 }

</bundles_post_ra>
